<compile_context>
chip_gen: v6e
topology: v6e:2x2x1
jax: 0.10.0
libtpu: 0.0.40
codegen_flags: <defaults>
</compile_context>

<pallas_src>
import functools

import jax
import jax.numpy as jnp
from jax.experimental import pallas as pl
from jax.experimental.pallas import tpu as pltpu


# ----------------------------------------------------------------------------
# Pallas kernels
# ----------------------------------------------------------------------------
def _conv3x3_in_body(xp_ref, w_ref, b_ref, eps):
    """3x3 'valid' conv over a pre-padded tile + bias + InstanceNorm.

    xp_ref: (1, H+2, W+2, Cin) bf16   padded activation (full Cin)
    w_ref : (9, Cin, Ct)       bf16   3x3 taps flattened (tap = 3*dy + dx)
    b_ref : (1, Ct)            f32
    Returns a lane-dense (H*W, Ct) f32 slab, instance-normalized per channel.
    The 9 im2col taps are in-kernel sublane slices (no HBM im2col).
    """
    hp, wp, cin = xp_ref.shape[1], xp_ref.shape[2], xp_ref.shape[3]
    h, w = hp - 2, wp - 2
    ct = w_ref.shape[2]

    acc = jnp.zeros((h * w, ct), jnp.float32)
    for t in range(9):  # static unroll over the 3x3 taps
        dy, dx = divmod(t, 3)
        patch = xp_ref[0, dy:dy + h, dx:dx + w, :].reshape(h * w, cin)
        acc = acc + jnp.dot(patch, w_ref[t], preferred_element_type=jnp.float32)
    acc = acc + b_ref[...]  # (1, Ct) broadcasts over rows

    # InstanceNorm2d(affine=False): per-channel stats over the spatial extent.
    mean = jnp.mean(acc, axis=0, keepdims=True)
    var = jnp.mean(jnp.square(acc), axis=0, keepdims=True) - jnp.square(mean)
    return (acc - mean) * jax.lax.rsqrt(var + eps)


def _conv_in_relu_kernel(xp_ref, w_ref, b_ref, o_ref, *, eps):
    # Stage 1: conv + bias + InstanceNorm + ReLU  -> bf16 activation
    h, w, ct = o_ref.shape[1], o_ref.shape[2], o_ref.shape[3]
    y = _conv3x3_in_body(xp_ref, w_ref, b_ref, eps)
    y = jnp.maximum(y, 0.0)
    o_ref[0] = y.reshape(h, w, ct).astype(o_ref.dtype)


def _conv_in_residual_kernel(xp_ref, res_ref, w_ref, b_ref, o_ref, *, eps):
    # Stage 2: conv + bias + InstanceNorm + residual add  -> f32 output
    h, w, ct = o_ref.shape[1], o_ref.shape[2], o_ref.shape[3]
    y = _conv3x3_in_body(xp_ref, w_ref, b_ref, eps)
    o_ref[0] = (res_ref[0].astype(jnp.float32) + y.reshape(h, w, ct)).astype(
        o_ref.dtype)


# ----------------------------------------------------------------------------
# Wrappers (glue: reflection padding / weight prep stay in plain JAX)
# ----------------------------------------------------------------------------
def _pad_hw(x_nhwc, padding_type):
    if padding_type == "reflect":
        mode = "reflect"       # nn.ReflectionPad2d
    elif padding_type == "replicate":
        mode = "edge"          # nn.ReplicationPad2d
    elif padding_type == "zero":
        mode = "constant"      # padding=1 inside the conv
    else:
        raise NotImplementedError("padding [%s] is not implemented" % padding_type)
    return jnp.pad(x_nhwc, ((0, 0), (1, 1), (1, 1), (0, 0)), mode=mode)


def _cout_tile(cout):
    # Second "parallel" grid axis for megacore; keep tiles lane-dense.
    if cout > 256 and cout % 256 == 0:
        return 256
    return cout


def _conv_in_stage(xp_bf16, w_flat_bf16, b_f32, *, out_dtype, residual=None,
                   eps=1e-5):
    n, hp, wp, cin = xp_bf16.shape
    h, w = hp - 2, wp - 2
    cout = w_flat_bf16.shape[2]
    ct = _cout_tile(cout)
    grid = (n, cout // ct)

    in_specs = [pl.BlockSpec((1, hp, wp, cin), lambda i, j: (i, 0, 0, 0))]
    args = [xp_bf16]
    if residual is not None:
        in_specs.append(pl.BlockSpec((1, h, w, ct), lambda i, j: (i, 0, 0, j)))
        args.append(residual)
    in_specs += [
        pl.BlockSpec((9, cin, ct), lambda i, j: (0, 0, j)),
        pl.BlockSpec((1, ct), lambda i, j: (0, j)),
    ]
    args += [w_flat_bf16, b_f32.reshape(1, cout).astype(jnp.float32)]

    if residual is None:
        kernel = functools.partial(_conv_in_relu_kernel, eps=eps)
    else:
        kernel = functools.partial(_conv_in_residual_kernel, eps=eps)

    out_itemsize = jnp.dtype(out_dtype).itemsize
    flops = 2 * 9 * n * h * w * cin * cout
    bytes_accessed = int(
        xp_bf16.size * 2 + w_flat_bf16.size * 2 + b_f32.size * 4
        + n * h * w * cout * out_itemsize
        + (residual.size * residual.dtype.itemsize if residual is not None else 0))

    return pl.pallas_call(
        kernel,
        out_shape=jax.ShapeDtypeStruct((n, h, w, cout), out_dtype),
        grid=grid,
        in_specs=in_specs,
        out_specs=pl.BlockSpec((1, h, w, ct), lambda i, j: (i, 0, 0, j)),
        compiler_params=pltpu.CompilerParams(
            dimension_semantics=("parallel", "parallel"),
            vmem_limit_bytes=48 * 1024 * 1024,
        ),
        cost_estimate=pl.CostEstimate(
            flops=int(flops), transcendentals=int(n * cout),
            bytes_accessed=bytes_accessed),
    )(*args)


# ----------------------------------------------------------------------------
# ResnetBlock parameters / forward
# ----------------------------------------------------------------------------
def init_resnet_block_params(key, dim):
    k1, k2, k3, k4 = jax.random.split(key, 4)
    std = (2.0 / (9.0 * dim)) ** 0.5
    return {
        "w1": jax.random.normal(k1, (dim, dim, 3, 3), jnp.float32) * std,
        "b1": jax.random.normal(k2, (dim,), jnp.float32) * 0.01,
        "w2": jax.random.normal(k3, (dim, dim, 3, 3), jnp.float32) * std,
        "b2": jax.random.normal(k4, (dim,), jnp.float32) * 0.01,
    }


def _spectral_normalize(w_oihw, n_iters=10):
    # SNConv2d forward == conv with W / sigma_max(W.reshape(Cout, -1)).
    cout = w_oihw.shape[0]
    wm = w_oihw.reshape(cout, -1)
    u = jnp.ones((cout,), jnp.float32) / jnp.sqrt(jnp.float32(cout))
    for _ in range(n_iters):
        v = wm.T @ u
        v = v / (jnp.linalg.norm(v) + 1e-12)
        u = wm @ v
        u = u / (jnp.linalg.norm(u) + 1e-12)
    v = wm.T @ u
    v = v / (jnp.linalg.norm(v) + 1e-12)
    sigma = u @ (wm @ v)
    return w_oihw / sigma


def _flatten_taps(w_oihw):
    # (Cout, Cin, 3, 3) -> (9, Cin, Cout), tap index t = 3*dy + dx.
    cout, cin = w_oihw.shape[0], w_oihw.shape[1]
    return jnp.transpose(w_oihw, (2, 3, 1, 0)).reshape(9, cin, cout)


def resnet_block_forward(x_nchw, params, padding_type="reflect"):
    x = jnp.transpose(x_nchw, (0, 2, 3, 1)).astype(jnp.float32)  # NCHW -> NHWC
    w1 = _spectral_normalize(params["w1"])
    w2 = params["w2"]
    w1f = _flatten_taps(w1).astype(jnp.bfloat16)
    w2f = _flatten_taps(w2).astype(jnp.bfloat16)

    xp1 = _pad_hw(x, padding_type).astype(jnp.bfloat16)
    h1 = _conv_in_stage(xp1, w1f, params["b1"], out_dtype=jnp.bfloat16)
    # (use_dropout=False -> no-op here; see TODO at top of file)
    xp2 = _pad_hw(h1, padding_type)  # already bf16
    out = _conv_in_stage(xp2, w2f, params["b2"], out_dtype=jnp.float32,
                         residual=x)
    return jnp.transpose(out, (0, 3, 1, 2))                     # NHWC -> NCHW


# ----------------------------------------------------------------------------
# Pure-JAX reference (for correctness check only)
# ----------------------------------------------------------------------------
def _instance_norm_ref(y, eps=1e-5):
    mean = jnp.mean(y, axis=(1, 2), keepdims=True)
    var = jnp.mean(jnp.square(y), axis=(1, 2), keepdims=True) - jnp.square(mean)
    return (y - mean) * jax.lax.rsqrt(var + eps)


def _conv_ref(xp_nhwc, w_oihw, b):
    # Mirrors the kernel's compute dtype: bf16 operands, f32 accumulation.
    w_hwio = jnp.transpose(w_oihw.astype(jnp.bfloat16), (2, 3, 1, 0))
    y = jax.lax.conv_general_dilated(
        xp_nhwc.astype(jnp.bfloat16).astype(jnp.float32),
        w_hwio.astype(jnp.float32),
        window_strides=(1, 1), padding="VALID",
        dimension_numbers=("NHWC", "HWIO", "NHWC"),
        precision=jax.lax.Precision.HIGHEST)
    return y + b.astype(jnp.float32)


def resnet_block_ref(x_nchw, params, padding_type="reflect"):
    x = jnp.transpose(x_nchw, (0, 2, 3, 1)).astype(jnp.float32)
    w1 = _spectral_normalize(params["w1"])
    w2 = params["w2"]
    h = _conv_ref(_pad_hw(x, padding_type), w1, params["b1"])
    h = jnp.maximum(_instance_norm_ref(h), 0.0)
    h = h.astype(jnp.bfloat16)  # inter-stage activation is bf16 in the kernel
    h = _conv_ref(_pad_hw(h, padding_type), w2, params["b2"])
    h = _instance_norm_ref(h)
    return jnp.transpose(x + h, (0, 3, 1, 2))


# ----------------------------------------------------------------------------
if __name__ == "__main__":
    key = jax.random.PRNGKey(0)
    kx, kp = jax.random.split(key)

    batch, dim, size = 2, 32, 16
    x = jax.random.normal(kx, (batch, dim, size, size), jnp.float32)
    params = init_resnet_block_params(kp, dim)

    fwd = jax.jit(functools.partial(resnet_block_forward, params=params,
                                    padding_type="reflect"))
    out = jax.block_until_ready(fwd(x))

    assert out.shape == (batch, dim, size, size), out.shape
    assert out.dtype == jnp.float32, out.dtype

    ref = jax.block_until_ready(resnet_block_ref(x, params, "reflect"))
    max_err = float(jnp.max(jnp.abs(out - ref)))
    assert bool(jnp.allclose(out, ref, rtol=2e-2, atol=2e-2)), max_err

    print("KERNEL_OK")
</pallas_src>

<mosaic_0001>
module attributes {stable_mosaic.version = 11 : i64} {
  func.func @_conv_in_residual_kernel(%arg0: i32, %arg1: i32, %arg2: memref<1x18x18x32xbf16, #tpu.memory_space<vmem>>, %arg3: memref<1x16x16x32xf32, #tpu.memory_space<vmem>>, %arg4: memref<9x32x32xbf16, #tpu.memory_space<vmem>>, %arg5: memref<1x32xf32, #tpu.memory_space<vmem>>, %arg6: memref<1x16x16x32xf32, #tpu.memory_space<vmem>>) attributes {dimension_semantics = [#tpu.dimension_semantics<parallel>, #tpu.dimension_semantics<parallel>], iteration_bounds = array<i64: 2, 1>, scalar_prefetch = 0 : i64, scratch_operands = 0 : i64, tpu.core_type = #tpu.core_type<tc>, window_params = [{transform_indices = @transform_0, window_bounds = array<i64: 1, 18, 18, 32>}, {transform_indices = @transform_1, window_bounds = array<i64: 1, 16, 16, 32>}, {transform_indices = @transform_2, window_bounds = array<i64: 9, 32, 32>}, {transform_indices = @transform_3, window_bounds = array<i64: 1, 32>}, {transform_indices = @transform_4, window_bounds = array<i64: 1, 16, 16, 32>}]} {
    %cst = arith.constant 0.000000e+00 : f32
    %0 = vector.broadcast %cst : f32 to vector<256x32xf32>
    %c0 = arith.constant 0 : index
    %c0_0 = arith.constant 0 : index
    %c0_1 = arith.constant 0 : index
    %c0_2 = arith.constant 0 : index
    %1 = vector.load %arg2[%c0, %c0_0, %c0_1, %c0_2] : memref<1x18x18x32xbf16, #tpu.memory_space<vmem>>, vector<1x16x16x32xbf16>
    %2 = vector.shape_cast %1 : vector<1x16x16x32xbf16> to vector<16x16x32xbf16>
    %3 = vector.shape_cast %2 : vector<16x16x32xbf16> to vector<256x32xbf16>
    %c0_3 = arith.constant 0 : index
    %c0_4 = arith.constant 0 : index
    %c0_5 = arith.constant 0 : index
    %4 = vector.load %arg4[%c0_3, %c0_4, %c0_5] : memref<9x32x32xbf16, #tpu.memory_space<vmem>>, vector<1x32x32xbf16>
    %5 = vector.shape_cast %4 : vector<1x32x32xbf16> to vector<32x32xbf16>
    %cst_6 = arith.constant dense<0.000000e+00> : vector<256x32xf32>
    %6 = tpu.matmul %3, %5, %cst_6 {dimension_numbers = #tpu.dot_dimension_numbers<[1], [0], [0], [1], [0, 0, 1, 1], [], []>} : vector<256x32xbf16>, vector<32x32xbf16>, vector<256x32xf32> -> vector<256x32xf32>
    %7 = arith.addf %0, %6 : vector<256x32xf32>
    %c0_7 = arith.constant 0 : index
    %c0_8 = arith.constant 0 : index
    %c1 = arith.constant 1 : index
    %c0_9 = arith.constant 0 : index
    %8 = vector.load %arg2[%c0_7, %c0_8, %c1, %c0_9] : memref<1x18x18x32xbf16, #tpu.memory_space<vmem>>, vector<1x16x16x32xbf16>
    %9 = vector.shape_cast %8 : vector<1x16x16x32xbf16> to vector<16x16x32xbf16>
    %10 = vector.shape_cast %9 : vector<16x16x32xbf16> to vector<256x32xbf16>
    %c1_10 = arith.constant 1 : index
    %c0_11 = arith.constant 0 : index
    %c0_12 = arith.constant 0 : index
    %11 = vector.load %arg4[%c1_10, %c0_11, %c0_12] : memref<9x32x32xbf16, #tpu.memory_space<vmem>>, vector<1x32x32xbf16>
    %12 = vector.shape_cast %11 : vector<1x32x32xbf16> to vector<32x32xbf16>
    %cst_13 = arith.constant dense<0.000000e+00> : vector<256x32xf32>
    %13 = tpu.matmul %10, %12, %cst_13 {dimension_numbers = #tpu.dot_dimension_numbers<[1], [0], [0], [1], [0, 0, 1, 1], [], []>} : vector<256x32xbf16>, vector<32x32xbf16>, vector<256x32xf32> -> vector<256x32xf32>
    %14 = arith.addf %7, %13 : vector<256x32xf32>
    %c0_14 = arith.constant 0 : index
    %c0_15 = arith.constant 0 : index
    %c2 = arith.constant 2 : index
    %c0_16 = arith.constant 0 : index
    %15 = vector.load %arg2[%c0_14, %c0_15, %c2, %c0_16] : memref<1x18x18x32xbf16, #tpu.memory_space<vmem>>, vector<1x16x16x32xbf16>
    %16 = vector.shape_cast %15 : vector<1x16x16x32xbf16> to vector<16x16x32xbf16>
    %17 = vector.shape_cast %16 : vector<16x16x32xbf16> to vector<256x32xbf16>
    %c2_17 = arith.constant 2 : index
    %c0_18 = arith.constant 0 : index
    %c0_19 = arith.constant 0 : index
    %18 = vector.load %arg4[%c2_17, %c0_18, %c0_19] : memref<9x32x32xbf16, #tpu.memory_space<vmem>>, vector<1x32x32xbf16>
    %19 = vector.shape_cast %18 : vector<1x32x32xbf16> to vector<32x32xbf16>
    %cst_20 = arith.constant dense<0.000000e+00> : vector<256x32xf32>
    %20 = tpu.matmul %17, %19, %cst_20 {dimension_numbers = #tpu.dot_dimension_numbers<[1], [0], [0], [1], [0, 0, 1, 1], [], []>} : vector<256x32xbf16>, vector<32x32xbf16>, vector<256x32xf32> -> vector<256x32xf32>
    %21 = arith.addf %14, %20 : vector<256x32xf32>
    %c0_21 = arith.constant 0 : index
    %c1_22 = arith.constant 1 : index
    %c0_23 = arith.constant 0 : index
    %c0_24 = arith.constant 0 : index
    %22 = vector.load %arg2[%c0_21, %c1_22, %c0_23, %c0_24] : memref<1x18x18x32xbf16, #tpu.memory_space<vmem>>, vector<1x16x16x32xbf16>
    %23 = vector.shape_cast %22 : vector<1x16x16x32xbf16> to vector<16x16x32xbf16>
    %24 = vector.shape_cast %23 : vector<16x16x32xbf16> to vector<256x32xbf16>
    %c3 = arith.constant 3 : index
    %c0_25 = arith.constant 0 : index
    %c0_26 = arith.constant 0 : index
    %25 = vector.load %arg4[%c3, %c0_25, %c0_26] : memref<9x32x32xbf16, #tpu.memory_space<vmem>>, vector<1x32x32xbf16>
    %26 = vector.shape_cast %25 : vector<1x32x32xbf16> to vector<32x32xbf16>
    %cst_27 = arith.constant dense<0.000000e+00> : vector<256x32xf32>
    %27 = tpu.matmul %24, %26, %cst_27 {dimension_numbers = #tpu.dot_dimension_numbers<[1], [0], [0], [1], [0, 0, 1, 1], [], []>} : vector<256x32xbf16>, vector<32x32xbf16>, vector<256x32xf32> -> vector<256x32xf32>
    %28 = arith.addf %21, %27 : vector<256x32xf32>
    %c0_28 = arith.constant 0 : index
    %c1_29 = arith.constant 1 : index
    %c1_30 = arith.constant 1 : index
    %c0_31 = arith.constant 0 : index
    %29 = vector.load %arg2[%c0_28, %c1_29, %c1_30, %c0_31] : memref<1x18x18x32xbf16, #tpu.memory_space<vmem>>, vector<1x16x16x32xbf16>
    %30 = vector.shape_cast %29 : vector<1x16x16x32xbf16> to vector<16x16x32xbf16>
    %31 = vector.shape_cast %30 : vector<16x16x32xbf16> to vector<256x32xbf16>
    %c4 = arith.constant 4 : index
    %c0_32 = arith.constant 0 : index
    %c0_33 = arith.constant 0 : index
    %32 = vector.load %arg4[%c4, %c0_32, %c0_33] : memref<9x32x32xbf16, #tpu.memory_space<vmem>>, vector<1x32x32xbf16>
    %33 = vector.shape_cast %32 : vector<1x32x32xbf16> to vector<32x32xbf16>
    %cst_34 = arith.constant dense<0.000000e+00> : vector<256x32xf32>
    %34 = tpu.matmul %31, %33, %cst_34 {dimension_numbers = #tpu.dot_dimension_numbers<[1], [0], [0], [1], [0, 0, 1, 1], [], []>} : vector<256x32xbf16>, vector<32x32xbf16>, vector<256x32xf32> -> vector<256x32xf32>
    %35 = arith.addf %28, %34 : vector<256x32xf32>
    %c0_35 = arith.constant 0 : index
    %c1_36 = arith.constant 1 : index
    %c2_37 = arith.constant 2 : index
    %c0_38 = arith.constant 0 : index
    %36 = vector.load %arg2[%c0_35, %c1_36, %c2_37, %c0_38] : memref<1x18x18x32xbf16, #tpu.memory_space<vmem>>, vector<1x16x16x32xbf16>
    %37 = vector.shape_cast %36 : vector<1x16x16x32xbf16> to vector<16x16x32xbf16>
    %38 = vector.shape_cast %37 : vector<16x16x32xbf16> to vector<256x32xbf16>
    %c5 = arith.constant 5 : index
    %c0_39 = arith.constant 0 : index
    %c0_40 = arith.constant 0 : index
    %39 = vector.load %arg4[%c5, %c0_39, %c0_40] : memref<9x32x32xbf16, #tpu.memory_space<vmem>>, vector<1x32x32xbf16>
    %40 = vector.shape_cast %39 : vector<1x32x32xbf16> to vector<32x32xbf16>
    %cst_41 = arith.constant dense<0.000000e+00> : vector<256x32xf32>
    %41 = tpu.matmul %38, %40, %cst_41 {dimension_numbers = #tpu.dot_dimension_numbers<[1], [0], [0], [1], [0, 0, 1, 1], [], []>} : vector<256x32xbf16>, vector<32x32xbf16>, vector<256x32xf32> -> vector<256x32xf32>
    %42 = arith.addf %35, %41 : vector<256x32xf32>
    %c0_42 = arith.constant 0 : index
    %c2_43 = arith.constant 2 : index
    %c0_44 = arith.constant 0 : index
    %c0_45 = arith.constant 0 : index
    %43 = vector.load %arg2[%c0_42, %c2_43, %c0_44, %c0_45] : memref<1x18x18x32xbf16, #tpu.memory_space<vmem>>, vector<1x16x16x32xbf16>
    %44 = vector.shape_cast %43 : vector<1x16x16x32xbf16> to vector<16x16x32xbf16>
    %45 = vector.shape_cast %44 : vector<16x16x32xbf16> to vector<256x32xbf16>
    %c6 = arith.constant 6 : index
    %c0_46 = arith.constant 0 : index
    %c0_47 = arith.constant 0 : index
    %46 = vector.load %arg4[%c6, %c0_46, %c0_47] : memref<9x32x32xbf16, #tpu.memory_space<vmem>>, vector<1x32x32xbf16>
    %47 = vector.shape_cast %46 : vector<1x32x32xbf16> to vector<32x32xbf16>
    %cst_48 = arith.constant dense<0.000000e+00> : vector<256x32xf32>
    %48 = tpu.matmul %45, %47, %cst_48 {dimension_numbers = #tpu.dot_dimension_numbers<[1], [0], [0], [1], [0, 0, 1, 1], [], []>} : vector<256x32xbf16>, vector<32x32xbf16>, vector<256x32xf32> -> vector<256x32xf32>
    %49 = arith.addf %42, %48 : vector<256x32xf32>
    %c0_49 = arith.constant 0 : index
    %c2_50 = arith.constant 2 : index
    %c1_51 = arith.constant 1 : index
    %c0_52 = arith.constant 0 : index
    %50 = vector.load %arg2[%c0_49, %c2_50, %c1_51, %c0_52] : memref<1x18x18x32xbf16, #tpu.memory_space<vmem>>, vector<1x16x16x32xbf16>
    %51 = vector.shape_cast %50 : vector<1x16x16x32xbf16> to vector<16x16x32xbf16>
    %52 = vector.shape_cast %51 : vector<16x16x32xbf16> to vector<256x32xbf16>
    %c7 = arith.constant 7 : index
    %c0_53 = arith.constant 0 : index
    %c0_54 = arith.constant 0 : index
    %53 = vector.load %arg4[%c7, %c0_53, %c0_54] : memref<9x32x32xbf16, #tpu.memory_space<vmem>>, vector<1x32x32xbf16>
    %54 = vector.shape_cast %53 : vector<1x32x32xbf16> to vector<32x32xbf16>
    %cst_55 = arith.constant dense<0.000000e+00> : vector<256x32xf32>
    %55 = tpu.matmul %52, %54, %cst_55 {dimension_numbers = #tpu.dot_dimension_numbers<[1], [0], [0], [1], [0, 0, 1, 1], [], []>} : vector<256x32xbf16>, vector<32x32xbf16>, vector<256x32xf32> -> vector<256x32xf32>
    %56 = arith.addf %49, %55 : vector<256x32xf32>
    %c0_56 = arith.constant 0 : index
    %c2_57 = arith.constant 2 : index
    %c2_58 = arith.constant 2 : index
    %c0_59 = arith.constant 0 : index
    %57 = vector.load %arg2[%c0_56, %c2_57, %c2_58, %c0_59] : memref<1x18x18x32xbf16, #tpu.memory_space<vmem>>, vector<1x16x16x32xbf16>
    %58 = vector.shape_cast %57 : vector<1x16x16x32xbf16> to vector<16x16x32xbf16>
    %59 = vector.shape_cast %58 : vector<16x16x32xbf16> to vector<256x32xbf16>
    %c8 = arith.constant 8 : index
    %c0_60 = arith.constant 0 : index
    %c0_61 = arith.constant 0 : index
    %60 = vector.load %arg4[%c8, %c0_60, %c0_61] : memref<9x32x32xbf16, #tpu.memory_space<vmem>>, vector<1x32x32xbf16>
    %61 = vector.shape_cast %60 : vector<1x32x32xbf16> to vector<32x32xbf16>
    %cst_62 = arith.constant dense<0.000000e+00> : vector<256x32xf32>
    %62 = tpu.matmul %59, %61, %cst_62 {dimension_numbers = #tpu.dot_dimension_numbers<[1], [0], [0], [1], [0, 0, 1, 1], [], []>} : vector<256x32xbf16>, vector<32x32xbf16>, vector<256x32xf32> -> vector<256x32xf32>
    %63 = arith.addf %56, %62 : vector<256x32xf32>
    %c0_63 = arith.constant 0 : index
    %c0_64 = arith.constant 0 : index
    %64 = vector.load %arg5[%c0_63, %c0_64] : memref<1x32xf32, #tpu.memory_space<vmem>>, vector<1x32xf32>
    %65 = vector.broadcast %64 : vector<1x32xf32> to vector<256x32xf32>
    %66 = arith.addf %63, %65 : vector<256x32xf32>
    %cst_65 = arith.constant dense<0.000000e+00> : vector<32xf32>
    %67 = vector.multi_reduction <add>, %66, %cst_65 [0] : vector<256x32xf32> to vector<32xf32>
    %68 = vector.shape_cast %67 : vector<32xf32> to vector<1x32xf32>
    %cst_66 = arith.constant 2.560000e+02 : f32
    %69 = vector.broadcast %cst_66 : f32 to vector<1x32xf32>
    %70 = arith.divf %68, %69 : vector<1x32xf32>
    %71 = arith.mulf %66, %66 : vector<256x32xf32>
    %cst_67 = arith.constant dense<0.000000e+00> : vector<32xf32>
    %72 = vector.multi_reduction <add>, %71, %cst_67 [0] : vector<256x32xf32> to vector<32xf32>
    %73 = vector.shape_cast %72 : vector<32xf32> to vector<1x32xf32>
    %cst_68 = arith.constant 2.560000e+02 : f32
    %74 = vector.broadcast %cst_68 : f32 to vector<1x32xf32>
    %75 = arith.divf %73, %74 : vector<1x32xf32>
    %76 = arith.mulf %70, %70 : vector<1x32xf32>
    %77 = arith.subf %75, %76 : vector<1x32xf32>
    %78 = vector.broadcast %70 : vector<1x32xf32> to vector<256x32xf32>
    %79 = arith.subf %66, %78 : vector<256x32xf32>
    %cst_69 = arith.constant 9.99999974E-6 : f32
    %80 = vector.broadcast %cst_69 : f32 to vector<1x32xf32>
    %81 = arith.addf %77, %80 : vector<1x32xf32>
    %82 = math.rsqrt %81 : vector<1x32xf32>
    %83 = vector.broadcast %82 : vector<1x32xf32> to vector<256x32xf32>
    %84 = arith.mulf %79, %83 : vector<256x32xf32>
    %c0_70 = arith.constant 0 : index
    %c0_71 = arith.constant 0 : index
    %c0_72 = arith.constant 0 : index
    %c0_73 = arith.constant 0 : index
    %85 = vector.load %arg3[%c0_70, %c0_71, %c0_72, %c0_73] : memref<1x16x16x32xf32, #tpu.memory_space<vmem>>, vector<1x16x16x32xf32>
    %86 = vector.shape_cast %85 : vector<1x16x16x32xf32> to vector<16x16x32xf32>
    %87 = vector.shape_cast %84 : vector<256x32xf32> to vector<16x16x32xf32>
    %88 = arith.addf %86, %87 : vector<16x16x32xf32>
    %c0_74 = arith.constant 0 : index
    %c0_75 = arith.constant 0 : index
    %c0_76 = arith.constant 0 : index
    %c0_77 = arith.constant 0 : index
    %89 = vector.load %arg6[%c0_74, %c0_75, %c0_76, %c0_77] : memref<1x16x16x32xf32, #tpu.memory_space<vmem>>, vector<1x16x16x32xf32>
    %90 = vector.shape_cast %89 : vector<1x16x16x32xf32> to vector<16x16x32xf32>
    %91 = vector.shape_cast %88 : vector<16x16x32xf32> to vector<1x16x16x32xf32>
    tpu.vector_store %arg6[%c0_74, %c0_75, %c0_76, %c0_77], %91 {strides = array<i32>} : memref<1x16x16x32xf32, #tpu.memory_space<vmem>>, vector<1x16x16x32xf32>,
    return
  }
  func.func @transform_0(%arg0: i32, %arg1: i32) -> (i32, i32, i32, i32) {
    %c0_i32 = arith.constant 0 : i32
    %c0_i32_0 = arith.constant 0 : i32
    %c0_i32_1 = arith.constant 0 : i32
    %c0_i32_2 = arith.constant 0 : i32
    return %arg0, %c0_i32, %c0_i32_0, %c0_i32_1 : i32, i32, i32, i32
  }
  func.func @transform_1(%arg0: i32, %arg1: i32) -> (i32, i32, i32, i32) {
    %c0_i32 = arith.constant 0 : i32
    %c0_i32_0 = arith.constant 0 : i32
    %c0_i32_1 = arith.constant 0 : i32
    return %arg0, %c0_i32, %c0_i32_0, %arg1 : i32, i32, i32, i32
  }
  func.func @transform_2(%arg0: i32, %arg1: i32) -> (i32, i32, i32) {
    %c0_i32 = arith.constant 0 : i32
    %c0_i32_0 = arith.constant 0 : i32
    %c0_i32_1 = arith.constant 0 : i32
    return %c0_i32, %c0_i32_0, %arg1 : i32, i32, i32
  }
  func.func @transform_3(%arg0: i32, %arg1: i32) -> (i32, i32) {
    %c0_i32 = arith.constant 0 : i32
    %c0_i32_0 = arith.constant 0 : i32
    return %c0_i32, %arg1 : i32, i32
  }
  func.func @transform_4(%arg0: i32, %arg1: i32) -> (i32, i32, i32, i32) {
    %c0_i32 = arith.constant 0 : i32
    %c0_i32_0 = arith.constant 0 : i32
    %c0_i32_1 = arith.constant 0 : i32
    return %arg0, %c0_i32, %c0_i32_0, %arg1 : i32, i32, i32, i32
  }
}

module attributes {stable_mosaic.version = 11 : i64} {
  func.func @_conv_in_relu_kernel(%arg0: i32, %arg1: i32, %arg2: memref<1x18x18x32xbf16, #tpu.memory_space<vmem>>, %arg3: memref<9x32x32xbf16, #tpu.memory_space<vmem>>, %arg4: memref<1x32xf32, #tpu.memory_space<vmem>>, %arg5: memref<1x16x16x32xbf16, #tpu.memory_space<vmem>>) attributes {dimension_semantics = [#tpu.dimension_semantics<parallel>, #tpu.dimension_semantics<parallel>], iteration_bounds = array<i64: 2, 1>, scalar_prefetch = 0 : i64, scratch_operands = 0 : i64, tpu.core_type = #tpu.core_type<tc>, window_params = [{transform_indices = @transform_0, window_bounds = array<i64: 1, 18, 18, 32>}, {transform_indices = @transform_1, window_bounds = array<i64: 9, 32, 32>}, {transform_indices = @transform_2, window_bounds = array<i64: 1, 32>}, {transform_indices = @transform_3, window_bounds = array<i64: 1, 16, 16, 32>}]} {
    %cst = arith.constant 0.000000e+00 : f32
    %0 = vector.broadcast %cst : f32 to vector<256x32xf32>
    %c0 = arith.constant 0 : index
    %c0_0 = arith.constant 0 : index
    %c0_1 = arith.constant 0 : index
    %c0_2 = arith.constant 0 : index
    %1 = vector.load %arg2[%c0, %c0_0, %c0_1, %c0_2] : memref<1x18x18x32xbf16, #tpu.memory_space<vmem>>, vector<1x16x16x32xbf16>
    %2 = vector.shape_cast %1 : vector<1x16x16x32xbf16> to vector<16x16x32xbf16>
    %3 = vector.shape_cast %2 : vector<16x16x32xbf16> to vector<256x32xbf16>
    %c0_3 = arith.constant 0 : index
    %c0_4 = arith.constant 0 : index
    %c0_5 = arith.constant 0 : index
    %4 = vector.load %arg3[%c0_3, %c0_4, %c0_5] : memref<9x32x32xbf16, #tpu.memory_space<vmem>>, vector<1x32x32xbf16>
    %5 = vector.shape_cast %4 : vector<1x32x32xbf16> to vector<32x32xbf16>
    %cst_6 = arith.constant dense<0.000000e+00> : vector<256x32xf32>
    %6 = tpu.matmul %3, %5, %cst_6 {dimension_numbers = #tpu.dot_dimension_numbers<[1], [0], [0], [1], [0, 0, 1, 1], [], []>} : vector<256x32xbf16>, vector<32x32xbf16>, vector<256x32xf32> -> vector<256x32xf32>
    %7 = arith.addf %0, %6 : vector<256x32xf32>
    %c0_7 = arith.constant 0 : index
    %c0_8 = arith.constant 0 : index
    %c1 = arith.constant 1 : index
    %c0_9 = arith.constant 0 : index
    %8 = vector.load %arg2[%c0_7, %c0_8, %c1, %c0_9] : memref<1x18x18x32xbf16, #tpu.memory_space<vmem>>, vector<1x16x16x32xbf16>
    %9 = vector.shape_cast %8 : vector<1x16x16x32xbf16> to vector<16x16x32xbf16>
    %10 = vector.shape_cast %9 : vector<16x16x32xbf16> to vector<256x32xbf16>
    %c1_10 = arith.constant 1 : index
    %c0_11 = arith.constant 0 : index
    %c0_12 = arith.constant 0 : index
    %11 = vector.load %arg3[%c1_10, %c0_11, %c0_12] : memref<9x32x32xbf16, #tpu.memory_space<vmem>>, vector<1x32x32xbf16>
    %12 = vector.shape_cast %11 : vector<1x32x32xbf16> to vector<32x32xbf16>
    %cst_13 = arith.constant dense<0.000000e+00> : vector<256x32xf32>
    %13 = tpu.matmul %10, %12, %cst_13 {dimension_numbers = #tpu.dot_dimension_numbers<[1], [0], [0], [1], [0, 0, 1, 1], [], []>} : vector<256x32xbf16>, vector<32x32xbf16>, vector<256x32xf32> -> vector<256x32xf32>
    %14 = arith.addf %7, %13 : vector<256x32xf32>
    %c0_14 = arith.constant 0 : index
    %c0_15 = arith.constant 0 : index
    %c2 = arith.constant 2 : index
    %c0_16 = arith.constant 0 : index
    %15 = vector.load %arg2[%c0_14, %c0_15, %c2, %c0_16] : memref<1x18x18x32xbf16, #tpu.memory_space<vmem>>, vector<1x16x16x32xbf16>
    %16 = vector.shape_cast %15 : vector<1x16x16x32xbf16> to vector<16x16x32xbf16>
    %17 = vector.shape_cast %16 : vector<16x16x32xbf16> to vector<256x32xbf16>
    %c2_17 = arith.constant 2 : index
    %c0_18 = arith.constant 0 : index
    %c0_19 = arith.constant 0 : index
    %18 = vector.load %arg3[%c2_17, %c0_18, %c0_19] : memref<9x32x32xbf16, #tpu.memory_space<vmem>>, vector<1x32x32xbf16>
    %19 = vector.shape_cast %18 : vector<1x32x32xbf16> to vector<32x32xbf16>
    %cst_20 = arith.constant dense<0.000000e+00> : vector<256x32xf32>
    %20 = tpu.matmul %17, %19, %cst_20 {dimension_numbers = #tpu.dot_dimension_numbers<[1], [0], [0], [1], [0, 0, 1, 1], [], []>} : vector<256x32xbf16>, vector<32x32xbf16>, vector<256x32xf32> -> vector<256x32xf32>
    %21 = arith.addf %14, %20 : vector<256x32xf32>
    %c0_21 = arith.constant 0 : index
    %c1_22 = arith.constant 1 : index
    %c0_23 = arith.constant 0 : index
    %c0_24 = arith.constant 0 : index
    %22 = vector.load %arg2[%c0_21, %c1_22, %c0_23, %c0_24] : memref<1x18x18x32xbf16, #tpu.memory_space<vmem>>, vector<1x16x16x32xbf16>
    %23 = vector.shape_cast %22 : vector<1x16x16x32xbf16> to vector<16x16x32xbf16>
    %24 = vector.shape_cast %23 : vector<16x16x32xbf16> to vector<256x32xbf16>
    %c3 = arith.constant 3 : index
    %c0_25 = arith.constant 0 : index
    %c0_26 = arith.constant 0 : index
    %25 = vector.load %arg3[%c3, %c0_25, %c0_26] : memref<9x32x32xbf16, #tpu.memory_space<vmem>>, vector<1x32x32xbf16>
    %26 = vector.shape_cast %25 : vector<1x32x32xbf16> to vector<32x32xbf16>
    %cst_27 = arith.constant dense<0.000000e+00> : vector<256x32xf32>
    %27 = tpu.matmul %24, %26, %cst_27 {dimension_numbers = #tpu.dot_dimension_numbers<[1], [0], [0], [1], [0, 0, 1, 1], [], []>} : vector<256x32xbf16>, vector<32x32xbf16>, vector<256x32xf32> -> vector<256x32xf32>
    %28 = arith.addf %21, %27 : vector<256x32xf32>
    %c0_28 = arith.constant 0 : index
    %c1_29 = arith.constant 1 : index
    %c1_30 = arith.constant 1 : index
    %c0_31 = arith.constant 0 : index
    %29 = vector.load %arg2[%c0_28, %c1_29, %c1_30, %c0_31] : memref<1x18x18x32xbf16, #tpu.memory_space<vmem>>, vector<1x16x16x32xbf16>
    %30 = vector.shape_cast %29 : vector<1x16x16x32xbf16> to vector<16x16x32xbf16>
    %31 = vector.shape_cast %30 : vector<16x16x32xbf16> to vector<256x32xbf16>
    %c4 = arith.constant 4 : index
    %c0_32 = arith.constant 0 : index
    %c0_33 = arith.constant 0 : index
    %32 = vector.load %arg3[%c4, %c0_32, %c0_33] : memref<9x32x32xbf16, #tpu.memory_space<vmem>>, vector<1x32x32xbf16>
    %33 = vector.shape_cast %32 : vector<1x32x32xbf16> to vector<32x32xbf16>
    %cst_34 = arith.constant dense<0.000000e+00> : vector<256x32xf32>
    %34 = tpu.matmul %31, %33, %cst_34 {dimension_numbers = #tpu.dot_dimension_numbers<[1], [0], [0], [1], [0, 0, 1, 1], [], []>} : vector<256x32xbf16>, vector<32x32xbf16>, vector<256x32xf32> -> vector<256x32xf32>
    %35 = arith.addf %28, %34 : vector<256x32xf32>
    %c0_35 = arith.constant 0 : index
    %c1_36 = arith.constant 1 : index
    %c2_37 = arith.constant 2 : index
    %c0_38 = arith.constant 0 : index
    %36 = vector.load %arg2[%c0_35, %c1_36, %c2_37, %c0_38] : memref<1x18x18x32xbf16, #tpu.memory_space<vmem>>, vector<1x16x16x32xbf16>
    %37 = vector.shape_cast %36 : vector<1x16x16x32xbf16> to vector<16x16x32xbf16>
    %38 = vector.shape_cast %37 : vector<16x16x32xbf16> to vector<256x32xbf16>
    %c5 = arith.constant 5 : index
    %c0_39 = arith.constant 0 : index
    %c0_40 = arith.constant 0 : index
    %39 = vector.load %arg3[%c5, %c0_39, %c0_40] : memref<9x32x32xbf16, #tpu.memory_space<vmem>>, vector<1x32x32xbf16>
    %40 = vector.shape_cast %39 : vector<1x32x32xbf16> to vector<32x32xbf16>
    %cst_41 = arith.constant dense<0.000000e+00> : vector<256x32xf32>
    %41 = tpu.matmul %38, %40, %cst_41 {dimension_numbers = #tpu.dot_dimension_numbers<[1], [0], [0], [1], [0, 0, 1, 1], [], []>} : vector<256x32xbf16>, vector<32x32xbf16>, vector<256x32xf32> -> vector<256x32xf32>
    %42 = arith.addf %35, %41 : vector<256x32xf32>
    %c0_42 = arith.constant 0 : index
    %c2_43 = arith.constant 2 : index
    %c0_44 = arith.constant 0 : index
    %c0_45 = arith.constant 0 : index
    %43 = vector.load %arg2[%c0_42, %c2_43, %c0_44, %c0_45] : memref<1x18x18x32xbf16, #tpu.memory_space<vmem>>, vector<1x16x16x32xbf16>
    %44 = vector.shape_cast %43 : vector<1x16x16x32xbf16> to vector<16x16x32xbf16>
    %45 = vector.shape_cast %44 : vector<16x16x32xbf16> to vector<256x32xbf16>
    %c6 = arith.constant 6 : index
    %c0_46 = arith.constant 0 : index
    %c0_47 = arith.constant 0 : index
    %46 = vector.load %arg3[%c6, %c0_46, %c0_47] : memref<9x32x32xbf16, #tpu.memory_space<vmem>>, vector<1x32x32xbf16>
    %47 = vector.shape_cast %46 : vector<1x32x32xbf16> to vector<32x32xbf16>
    %cst_48 = arith.constant dense<0.000000e+00> : vector<256x32xf32>
    %48 = tpu.matmul %45, %47, %cst_48 {dimension_numbers = #tpu.dot_dimension_numbers<[1], [0], [0], [1], [0, 0, 1, 1], [], []>} : vector<256x32xbf16>, vector<32x32xbf16>, vector<256x32xf32> -> vector<256x32xf32>
    %49 = arith.addf %42, %48 : vector<256x32xf32>
    %c0_49 = arith.constant 0 : index
    %c2_50 = arith.constant 2 : index
    %c1_51 = arith.constant 1 : index
    %c0_52 = arith.constant 0 : index
    %50 = vector.load %arg2[%c0_49, %c2_50, %c1_51, %c0_52] : memref<1x18x18x32xbf16, #tpu.memory_space<vmem>>, vector<1x16x16x32xbf16>
    %51 = vector.shape_cast %50 : vector<1x16x16x32xbf16> to vector<16x16x32xbf16>
    %52 = vector.shape_cast %51 : vector<16x16x32xbf16> to vector<256x32xbf16>
    %c7 = arith.constant 7 : index
    %c0_53 = arith.constant 0 : index
    %c0_54 = arith.constant 0 : index
    %53 = vector.load %arg3[%c7, %c0_53, %c0_54] : memref<9x32x32xbf16, #tpu.memory_space<vmem>>, vector<1x32x32xbf16>
    %54 = vector.shape_cast %53 : vector<1x32x32xbf16> to vector<32x32xbf16>
    %cst_55 = arith.constant dense<0.000000e+00> : vector<256x32xf32>
    %55 = tpu.matmul %52, %54, %cst_55 {dimension_numbers = #tpu.dot_dimension_numbers<[1], [0], [0], [1], [0, 0, 1, 1], [], []>} : vector<256x32xbf16>, vector<32x32xbf16>, vector<256x32xf32> -> vector<256x32xf32>
    %56 = arith.addf %49, %55 : vector<256x32xf32>
    %c0_56 = arith.constant 0 : index
    %c2_57 = arith.constant 2 : index
    %c2_58 = arith.constant 2 : index
    %c0_59 = arith.constant 0 : index
    %57 = vector.load %arg2[%c0_56, %c2_57, %c2_58, %c0_59] : memref<1x18x18x32xbf16, #tpu.memory_space<vmem>>, vector<1x16x16x32xbf16>
    %58 = vector.shape_cast %57 : vector<1x16x16x32xbf16> to vector<16x16x32xbf16>
    %59 = vector.shape_cast %58 : vector<16x16x32xbf16> to vector<256x32xbf16>
    %c8 = arith.constant 8 : index
    %c0_60 = arith.constant 0 : index
    %c0_61 = arith.constant 0 : index
    %60 = vector.load %arg3[%c8, %c0_60, %c0_61] : memref<9x32x32xbf16, #tpu.memory_space<vmem>>, vector<1x32x32xbf16>
    %61 = vector.shape_cast %60 : vector<1x32x32xbf16> to vector<32x32xbf16>
    %cst_62 = arith.constant dense<0.000000e+00> : vector<256x32xf32>
    %62 = tpu.matmul %59, %61, %cst_62 {dimension_numbers = #tpu.dot_dimension_numbers<[1], [0], [0], [1], [0, 0, 1, 1], [], []>} : vector<256x32xbf16>, vector<32x32xbf16>, vector<256x32xf32> -> vector<256x32xf32>
    %63 = arith.addf %56, %62 : vector<256x32xf32>
    %c0_63 = arith.constant 0 : index
    %c0_64 = arith.constant 0 : index
    %64 = vector.load %arg4[%c0_63, %c0_64] : memref<1x32xf32, #tpu.memory_space<vmem>>, vector<1x32xf32>
    %65 = vector.broadcast %64 : vector<1x32xf32> to vector<256x32xf32>
    %66 = arith.addf %63, %65 : vector<256x32xf32>
    %cst_65 = arith.constant dense<0.000000e+00> : vector<32xf32>
    %67 = vector.multi_reduction <add>, %66, %cst_65 [0] : vector<256x32xf32> to vector<32xf32>
    %68 = vector.shape_cast %67 : vector<32xf32> to vector<1x32xf32>
    %cst_66 = arith.constant 2.560000e+02 : f32
    %69 = vector.broadcast %cst_66 : f32 to vector<1x32xf32>
    %70 = arith.divf %68, %69 : vector<1x32xf32>
    %71 = arith.mulf %66, %66 : vector<256x32xf32>
    %cst_67 = arith.constant dense<0.000000e+00> : vector<32xf32>
    %72 = vector.multi_reduction <add>, %71, %cst_67 [0] : vector<256x32xf32> to vector<32xf32>
    %73 = vector.shape_cast %72 : vector<32xf32> to vector<1x32xf32>
    %cst_68 = arith.constant 2.560000e+02 : f32
    %74 = vector.broadcast %cst_68 : f32 to vector<1x32xf32>
    %75 = arith.divf %73, %74 : vector<1x32xf32>
    %76 = arith.mulf %70, %70 : vector<1x32xf32>
    %77 = arith.subf %75, %76 : vector<1x32xf32>
    %78 = vector.broadcast %70 : vector<1x32xf32> to vector<256x32xf32>
    %79 = arith.subf %66, %78 : vector<256x32xf32>
    %cst_69 = arith.constant 9.99999974E-6 : f32
    %80 = vector.broadcast %cst_69 : f32 to vector<1x32xf32>
    %81 = arith.addf %77, %80 : vector<1x32xf32>
    %82 = math.rsqrt %81 : vector<1x32xf32>
    %83 = vector.broadcast %82 : vector<1x32xf32> to vector<256x32xf32>
    %84 = arith.mulf %79, %83 : vector<256x32xf32>
    %cst_70 = arith.constant 0.000000e+00 : f32
    %85 = vector.broadcast %cst_70 : f32 to vector<256x32xf32>
    %86 = arith.maximumf %84, %85 : vector<256x32xf32>
    %87 = vector.shape_cast %86 : vector<256x32xf32> to vector<16x16x32xf32>
    %88 = arith.truncf %87 : vector<16x16x32xf32> to vector<16x16x32xbf16>
    %c0_71 = arith.constant 0 : index
    %c0_72 = arith.constant 0 : index
    %c0_73 = arith.constant 0 : index
    %c0_74 = arith.constant 0 : index
    %89 = vector.load %arg5[%c0_71, %c0_72, %c0_73, %c0_74] : memref<1x16x16x32xbf16, #tpu.memory_space<vmem>>, vector<1x16x16x32xbf16>
    %90 = vector.shape_cast %89 : vector<1x16x16x32xbf16> to vector<16x16x32xbf16>
    %91 = vector.shape_cast %88 : vector<16x16x32xbf16> to vector<1x16x16x32xbf16>
    tpu.vector_store %arg5[%c0_71, %c0_72, %c0_73, %c0_74], %91 {strides = array<i32>} : memref<1x16x16x32xbf16, #tpu.memory_space<vmem>>, vector<1x16x16x32xbf16>,
    return
  }
  func.func @transform_0(%arg0: i32, %arg1: i32) -> (i32, i32, i32, i32) {
    %c0_i32 = arith.constant 0 : i32
    %c0_i32_0 = arith.constant 0 : i32
    %c0_i32_1 = arith.constant 0 : i32
    %c0_i32_2 = arith.constant 0 : i32
    return %arg0, %c0_i32, %c0_i32_0, %c0_i32_1 : i32, i32, i32, i32
  }
  func.func @transform_1(%arg0: i32, %arg1: i32) -> (i32, i32, i32) {
    %c0_i32 = arith.constant 0 : i32
    %c0_i32_0 = arith.constant 0 : i32
    %c0_i32_1 = arith.constant 0 : i32
    return %c0_i32, %c0_i32_0, %arg1 : i32, i32, i32
  }
  func.func @transform_2(%arg0: i32, %arg1: i32) -> (i32, i32) {
    %c0_i32 = arith.constant 0 : i32
    %c0_i32_0 = arith.constant 0 : i32
    return %c0_i32, %arg1 : i32, i32
  }
  func.func @transform_3(%arg0: i32, %arg1: i32) -> (i32, i32, i32, i32) {
    %c0_i32 = arith.constant 0 : i32
    %c0_i32_0 = arith.constant 0 : i32
    %c0_i32_1 = arith.constant 0 : i32
    return %arg0, %c0_i32, %c0_i32_0, %arg1 : i32, i32, i32, i32
  }
}

</mosaic_0001>

<bundles_post_ra>
// kernel: resnet_block_forward.3
= control target key start
LH: loop header
LB: loop body
LE: loop exit
PB: predicated region body
PF: predicated region fallthrough
CT: control target
= control target key end

     0   :  { %9 = vsyncpa [#allocation3], 0  ;;  %s9904_s0 = inlined_call_operand.vmem [shape: bf16[2,18,18,32], index: 0, kind: input, shape index: {}]   ;;  %s9905_s1 = inlined_call_operand.vmem [shape: f32[2,16,16,32], index: 1, kind: input, shape index: {}]   ;;  %s9906_s2 = inlined_call_operand.vmem [shape: bf16[9,32,32], index: 2, kind: input, shape index: {}]   ;;  %s9907_s3 = inlined_call_operand.vmem [shape: f32[1,32], index: 3, kind: input, shape index: {}]   ;;  %s9908_s4 = inlined_call_operand.hbm [shape: f32[2,16,16,32], index: 4, kind: output, shape index: {}]  }
   0x1   :  { %11 = vsyncpa [#allocation3 + $0x1], 0  ;;  %s6770_s15 = smov 0   ;;  %s6772_s16 = smov 0  }
   0x2   :  { %s6774_s17 = smov 0   ;;  %s6776_s18 = smov 0  }
   0x3   :  { %s6778_s19 = smov 0   ;;  %s6780_s20 = smov 0  }
   0x4 LB: > { %s5447_s21 = sadd.s32 4294967295, %s6740_s20   ;;  %s5448_s22 = sadd.s32 4294967294, %s6740_s20   ;;  %s6740_s20 = sphi %s6780_s20, %s17_s20   ;;  %s6736_s19 = sphi %s6778_s19, %s10099_s19   ;;  %s6732_s18 = sphi %s6776_s18, %s10098_s18   ;;  %s6728_s17 = sphi %s6774_s17, %s10097_s17   ;;  %s6724_s16 = sphi %s6772_s16, %s10096_s16   ;;  %s6720_s15 = sphi %s6770_s15, %s10095_s15  }
   0x5   : > { %s29_s23 = sadd.s32 1, %s6736_s19  ;;  %s144_s24 = sadd.s32 1, %s6728_s17 }
   0x6   : > { %p31_p0 = scmp.ge.s32.totalorder %s29_s23, 2  ;;  %p154_p1 = scmp.ne.s32.totalorder %s6728_s17, %s6724_s16 }
   0x7   : > { %p155_p2 = scmp.eq.s32.totalorder %s5447_s21, 1  ;;  %p160_p3 = scmp.ne.s32.totalorder %s6724_s16, %s6720_s15 }
   0x8   : > { %s10101_s23 = smov (%p31_p0, %s29_s23), 0  ;;  %p161_p5 = scmp.eq.s32.totalorder %s5448_s22, 1 }
   0x9   : > { %p6810_p4 = por %p155_p2, %p154_p1  ;;  %s139_s26 = ssub.s32 %s6736_s19, %s10101_s23 }
   0xa   : > { %p5453_p6 = scmp.ge.s32.totalorder %s6740_s20, 1  ;;  %p142_p7 = scmp.eq.s32.totalorder %s139_s26, 0 }
   0xb   : > { %p6817_p8 = por %p161_p5, %p160_p3  ;;  %p211_p9 = scmp.lt.s32.totalorder %s6740_s20, 3 }
   0xc   : > { %s6823_s28 = scalar_select %p142_p7, %s6728_s17, %s144_s24  }
   0xd   : > { %p212_p10 = pnand %p5453_p6, %p211_p9 }
   0xf   : > { %215 = sbr.rel (%p212_p10) target bundleno = 643 (0x283), region = 36 }
  0x14   : > { %v6592_v0 = vld [vmem:[%s9906_s2 + $0x18] sm:$0xff]   ;;  %p252_p11 = scmp.lt.s32.totalorder %s6732_s18, 1  ;;  %v6593_v1 = vld [vmem:[%s9906_s2 + $0x10] sm:$0xff]   ;;  %v6838_v2 = vld [vmem:[%s9906_s2 + $0x8] sm:$0xff]   ;;  %vm325_vm0 = vsmask.f32 3328 }
  0x15   : > { %6530 = vmatprep.subr.bf16.mxu1 %v6592_v0  ;;  %6206 = vmatprep.subr.bf16.mxu0 %v6592_v0  ;;  %v6844_v3 = vld [vmem:[%s9906_s2 + $0x28] sm:$0xff]   ;;  %vm326_vm1 = vsmask.f32 7440  ;;  %vm777_vm2 = vcmask 261120   ;;  %vm1336_vm4 = vcmask 1042432   ;;  %vm1337_vm5 = vcmask 1046532  }
  0x16   : > { %s6833_s7 = scalar_select %p252_p11, %s6732_s18, 1  ;;  %6532 = vmatpush3.bf16.msra.mxu1 %v6592_v0  ;;  %6207 = vmatpush3.bf16.msra.mxu0 %v6592_v0  ;;  %vm6889_vm3 = vmor %vm325_vm0, %vm326_vm1 }
  0x17   : > { %6531 = vmatprep.subr.bf16.mxu1 %v6593_v1  ;;  %6208 = vmatprep.subr.bf16.mxu0 %v6593_v1  ;;  %vm7175_vm6 = vmor %vm1336_vm4, %vm1337_vm5  ;;  %s249_s26 = sand.u32 1, %s6724_s16   ;;  %s6043_s8 = sshll.u32 %s6732_s18, 12 }
  0x18   : > { %s6534_s10 = smul.u32 216, %s6833_s7  ;;  %s6042_s24 = sshll.u32 %s6833_s7, 8 }
  0x19   : > { %s9645_s5 = scalar_lea.vmem %s9905_s1, %s6042_s24  ;;  %s9655_s6 = sshll.u32 %s249_s26, 8 }
  0x1a   : > { %s6849_s21 = scalar_lea.vmem %s9904_s0, %s6534_s10  ;;  %6533 = vmatpush3.bf16.msra.mxu1 %v6593_v1  ;;  %6209 = vmatpush3.bf16.msra.mxu0 %v6593_v1  ;;  %s9681_s7 = scalar_lea.vmem [#allocation2], %s9655_s6 }
  0x1b   : > { %v6852_v4 = vld [vmem:[%s6849_s21] sm:$0xf]  ;;  %v6855_v5 = vld [vmem:[%s6849_s21 + $0x4] sm:$0xf]  ;;  %v6858_v6 = vld [vmem:[%s6849_s21 + $0x8] sm:$0x1]  ;;  %6242 = vmatprep.subr.bf16.mxu1 %v6838_v2  ;;  %6278 = vmatprep.subr.bf16.mxu0 %v6844_v3  ;;  %s9823_s12 = scalar_lea.hbm %s9908_s4, %s6043_s8 }
  0x1c   : > { %v329_v7 = vshrl.u32 %v6852_v4, 16  ;;  %v332_v8 = vshll.u32 %v6852_v4, 16  ;;  %v338_v9 = vshll.u32 %v6855_v5, 16  ;;  %v342_v10 = vshrl.u32 %v6855_v5, 16  ;;  %v6865_v11 = vld [vmem:[%s6849_s21 + $0x60] sm:$0xf] }
  0x1d   : > { %v348_v12 = vshll.u32 %v6858_v6, 16  ;;  %v6871_v13 = vld [vmem:[%s6849_s21 + $0x64] sm:$0xf]  ;;  %v6874_v14 = vld [vmem:[%s6849_s21 + $0x68] sm:$0x1]  ;;  %v521_v20 = vshrl.u32 %v6865_v11, 16 }
  0x1e   : > { %v331_v15 = vrot.slane %v329_v7, 4  ;;  %v334_v16 = vrot.slane %v332_v8, 5  ;;  %v340_v17 = vrot.slane %v338_v9, 5  ;;  %v344_v18 = vrot.slane %v342_v10, 4  ;;  %v6882_v27 = vld [vmem:[%s6849_s21 + $0xc] sm:$0xf] }
  0x1f   : > { %v350_v19 = vrot.slane %v348_v12, 5  ;;  %v524_v21 = vshll.u32 %v6865_v11, 16  ;;  %v530_v22 = vshll.u32 %v6871_v13, 16  ;;  %v534_v25 = vshrl.u32 %v6871_v13, 16  ;;  %v6885_v28 = vld [vmem:[%s6849_s21 + $0x10] sm:$0xf] }
  0x20   : > { %v335_v23 = vor.u32 %v334_v16, %v331_v15  ;;  %v345_v24 = vor.u32 %v344_v18, %v340_v17  ;;  %v540_v26 = vshll.u32 %v6874_v14, 16  ;;  %v523_v31 = vrot.slane %v521_v20, 4  ;;  %v6895_v39 = vld [vmem:[%s6849_s21 + $0x14] sm:$0x1]  ;;  %v6906_v51 = vld [vmem:[%s6849_s21 + $0x6c] sm:$0xf] }
  0x21   : > { %v526_v32 = vrot.slane %v524_v21, 5  ;;  %v532_v33 = vrot.slane %v530_v22, 5  ;;  %v536_v36 = vrot.slane %v534_v25, 4  ;;  %v353_v40 = vshrl.u32 %v6882_v27, 16  ;;  %v6910_v56 = vld [vmem:[%s6849_s21 + $0x70] sm:$0xf] }
  0x22   : > { %v336_v34 = vrot.slane %v335_v23, 4  ;;  %v346_v35 = vrot.slane %v345_v24, 4  ;;  %v542_v37 = vrot.slane %v540_v26, 5  ;;  %v356_v41 = vshll.u32 %v6882_v27, 16  ;;  %v6918_v61 = vld [vmem:[%s6849_s21 + $0x74] sm:$0x1] }
  0x23   : > { %v527_v38 = vor.u32 %v526_v32, %v523_v31  ;;  %v362_v42 = vshll.u32 %v6885_v28, 16  ;;  %v537_v45 = vor.u32 %v536_v36, %v532_v33  ;;  %v366_v46 = vshrl.u32 %v6885_v28, 16  ;;  %v6924_v7 = vld [vmem:[%s6849_s21 + $0x18] sm:$0xf]  ;;  %v6937_v23 = vld [vmem:[%s6849_s21 + $0x20] sm:$0x1] }
  0x24   : > { %v341_v43 = vsel %vm6889_vm3, %v336_v34, %v340_v17  ;;  %v351_v44 = vsel %vm6889_vm3, %v346_v35, %v350_v19  ;;  %v355_v49 = vrot.slane %v353_v40, 4  ;;  %v358_v50 = vrot.slane %v356_v41, 5  ;;  %v6931_v19 = vld [vmem:[%s6849_s21 + $0x1c] sm:$0xf]  ;;  %v7111_v30 = vld [vmem:[%s6849_s21 + $0xac] sm:$0xf] }
  0x25   : > { %v5462_v47 = vcombine.low %v341_v43, %v351_v44  ;;  %v528_v48 = vrot.slane %v527_v38, 4  ;;  %v538_v52 = vrot.slane %v537_v45, 4  ;;  %v364_v53 = vrot.slane %v362_v42, 5  ;;  %v6597_v38 = vld [vmem:[%s9906_s2 + $0x20] sm:$0xff]   ;;  %v6951_v44 = vld [vmem:[%s6849_s21 + $0x7c] sm:$0xf] }
  0x26   : > { %v368_v54 = vrot.slane %v366_v46, 4  ;;  %v372_v55 = vshll.u32 %v6895_v39, 16  ;;  %v359_v58 = vor.u32 %v358_v50, %v355_v49  ;;  %v545_v1 = vshrl.u32 %v6906_v51, 16  ;;  %9941 = vst [vmem:[#allocation5_spill] sm:$0xff] %v6951_v44  ;;  %9949 = vst [vmem:[#allocation13_spill] sm:$0xff] %v7111_v30  ;;  %s5330_s9 = sshll.u32 %s9681_s7, 4  ;;  %s9827_s9 = int_to_ptr.vmem [resolvable:$true] %s5330_s9 }
  0x27   : > { %6210 = vmatprep.mubr.msk.bf16.mxu0 %vm777_vm2, %v5462_v47  ;;  %v533_v57 = vsel %vm6889_vm3, %v528_v48, %v532_v33  ;;  %v543_v62 = vsel %vm6889_vm3, %v538_v52, %v542_v37  ;;  %v548_v10 = vshll.u32 %v6906_v51, 16  ;;  %v554_v12 = vshll.u32 %v6910_v56, 16  ;;  %v293_v33 = vld [vmem:[%s6849_s21 + $0x78] sm:$0xf]  ;;  %s9859_s18 = scalar_lea.sflag [#allocation3], %s249_s26  ;;  %s6664_s13 = scalar_lea.vmem %s9827_s9, 4096 }
  0x28   : > { %v369_v63 = vor.u32 %v368_v54, %v364_v53  ;;  %v374_v0 = vrot.slane %v372_v55, 5  ;;  %v5470_v8 = vcombine.low %v533_v57, %v543_v62  ;;  %v360_v9 = vrot.slane %v359_v58, 4  ;;  %v6956_v54 = vld [vmem:[%s6849_s21 + $0x80] sm:$0x1]  ;;  %p6665_p12 = scmp.ne.s32.totalorder %s9827_s9, %s6664_s13  ;;  %s6742_s14 = smov [#allocation2]  }
  0x29   : > { %v547_v16 = vrot.slane %v545_v1, 4  ;;  %v558_v17 = vshrl.u32 %v6910_v56, 16  ;;  %v564_v18 = vshll.u32 %v6918_v61, 16  ;;  %v550_v21 = vrot.slane %v548_v10, 5  ;;  %9942 = vst [vmem:[#allocation6_spill] sm:$0xff] %v6956_v54 }
  0x2a   : > { %v370_v15 = vrot.slane %v369_v63, 4  ;;  %6226 = vmatprep.mubr.msk.bf16.mxu1 %vm777_vm2, %v5470_v8  ;;  %v365_v20 = vsel %vm6889_vm3, %v360_v9, %v364_v53  ;;  %v556_v22 = vrot.slane %v554_v12, 5  ;;  %v377_v24 = vshrl.u32 %v6924_v7, 16  ;;  %v6962_v63 = vld [vmem:[%s6849_s21 + $0x24] sm:$0xf]  ;;  %p6666_p13 = pnand %p6665_p12, %p6810_p4 }
  0x2b   : > { %v560_v26 = vrot.slane %v558_v17, 4  ;;  %v566_v31 = vrot.slane %v564_v18, 5  ;;  %v380_v32 = vshll.u32 %v6924_v7, 16  ;;  %v551_v35 = vor.u32 %v550_v21, %v547_v16  ;;  %v6973_v10 = vld [vmem:[%s6849_s21 + $0x28] sm:$0xf]  ;;  %v6596_v18 = vld [vmem:[%s9906_s2] sm:$0xff]  }
  0x2c   : > { %v375_v25 = vsel %vm6889_vm3, %v370_v15, %v374_v0  ;;  %v379_v36 = vrot.slane %v377_v24, 4  ;;  %v386_v37 = vshll.u32 %v6931_v19, 16  ;;  %v390_v42 = vshrl.u32 %v6931_v19, 16  ;;  %v6982_v24 = vld [vmem:[%s6849_s21 + $0x2c] sm:$0x1]  ;;  %p6667_p0 = pneg %p6666_p13 }
  0x2d   : > { %v5463_v34 = vcombine.low %v365_v20, %v375_v25  ;;  %v561_v40 = vor.u32 %v560_v26, %v556_v22  ;;  %v382_v41 = vrot.slane %v380_v32, 5  ;;  %v396_v43 = vshll.u32 %v6937_v23, 16 }
  0x2e   : > { %v552_v45 = vrot.slane %v551_v35, 4  ;;  %v388_v46 = vrot.slane %v386_v37, 5  ;;  %v569_v47 = vshrl.u32 %v293_v33, 16  ;;  %v572_v48 = vshll.u32 %v293_v33, 16 }
  0x2f   : > { %6211 = vmatmul.mubr.msk.bf16.vlgmr.msra.gmra.mxu0 %vm777_vm2, %v5463_v34  ;;  %v562_v49 = vrot.slane %v561_v40, 4  ;;  %v383_v50 = vor.u32 %v382_v41, %v379_v36  ;;  %v392_v52 = vrot.slane %v390_v42, 4  ;;  %v398_v53 = vrot.slane %v396_v43, 5  ;;  %v6989_v34 = vld [vmem:[%s6849_s21 + $0x84] sm:$0xf] }
  0x30   : > { %6279 = vmatpush3.bf16.msra.mxu0 %v6844_v3  ;;  %v557_v55 = vsel %vm6889_vm3, %v552_v45, %v556_v22  ;;  %v571_v57 = vrot.slane %v569_v47, 4  ;;  %v574_v58 = vrot.slane %v572_v48, 5  ;;  %v578_v62 = vshll.u32 %v6951_v44, 16  ;;  %v6967_v3 = vld [vmem:[%s9906_s2 + $0x48] sm:$0xff]  }
  0x31   : > { %6280 = vmatprep.subr.bf16.mxu0 %v6597_v38  ;;  %v567_v0 = vsel %vm6889_vm3, %v562_v49, %v566_v31  ;;  %v384_v1 = vrot.slane %v383_v50, 4  ;;  %v393_v8 = vor.u32 %v392_v52, %v388_v46  ;;  %v582_v9 = vshrl.u32 %v6951_v44, 16  ;;  %v6997_v40 = vld [vmem:[%s6849_s21 + $0x88] sm:$0xf]  ;;  %v7008_v49 = vld [vmem:[%s6849_s21 + $0x8c] sm:$0x1] }
  0x32   : > { %v5471_v12 = vcombine.low %v557_v55, %v567_v0  ;;  %v575_v15 = vor.u32 %v574_v58, %v571_v57  ;;  %v580_v16 = vrot.slane %v578_v62, 5  ;;  %v588_v17 = vshll.u32 %v6956_v54, 16  ;;  %v7016_v58 = vld [vmem:[%s6849_s21 + $0x30] sm:$0xf]  ;;  %v7140_v44 = vld [vmem:[%s6849_s21 + $0x5c] sm:$0x1] }
  0x33   : > { %v389_v20 = vsel %vm6889_vm3, %v384_v1, %v388_v46  ;;  %v394_v21 = vrot.slane %v393_v8, 4  ;;  %v584_v22 = vrot.slane %v582_v9, 4  ;;  %v401_v25 = vshrl.u32 %v6962_v63, 16  ;;  %v7021_v9 = vld [vmem:[%s6849_s21 + $0x34] sm:$0xf] }
  0x34   : > { %6281 = vmatpush3.bf16.msra.mxu0 %v6597_v38  ;;  %6227 = vmatmul.mubr.msk.bf16.vlgmr.msra.gmra.mxu1 %vm777_vm2, %v5471_v12  ;;  %v576_v26 = vrot.slane %v575_v15, 4  ;;  %v590_v31 = vrot.slane %v588_v17, 5  ;;  %v404_v32 = vshll.u32 %v6962_v63, 16  ;;  %v410_v33 = vshll.u32 %v6973_v10, 16 }
  0x35   : > { %6350 = vmatprep.subr.bf16.mxu0 %v6967_v3  ;;  %6243 = vmatpush3.bf16.msra.mxu1 %v6838_v2  ;;  %v399_v35 = vsel %vm6889_vm3, %v394_v21, %v398_v53  ;;  %v585_v36 = vor.u32 %v584_v22, %v580_v16  ;;  %v403_v37 = vrot.slane %v401_v25, 4  ;;  %v414_v38 = vshrl.u32 %v6973_v10, 16  ;;  %v7004_v2 = vld [vmem:[%s9906_s2 + $0x38] sm:$0xff]  }
  0x36   : > { %v5464_v41 = vcombine.low %v389_v20, %v399_v35  ;;  %v581_v42 = vsel %vm6889_vm3, %v576_v26, %v580_v16  ;;  %v406_v43 = vrot.slane %v404_v32, 5  ;;  %v412_v45 = vrot.slane %v410_v33, 5  ;;  %6244 = vmatprep.subr.bf16.mxu1 %v6596_v18  ;;  %v7026_v25 = vld [vmem:[%s6849_s21 + $0x38] sm:$0x1]  ;;  %v7035_v35 = vld [vmem:[%s6849_s21 + $0x90] sm:$0xf] }
  0x37   : > { %v586_v46 = vrot.slane %v585_v36, 4  ;;  %v416_v47 = vrot.slane %v414_v38, 4  ;;  %v420_v48 = vshll.u32 %v6982_v24, 16  ;;  %v593_v50 = vshrl.u32 %v6989_v34, 16  ;;  %9943 = vst [vmem:[#allocation7_spill] sm:$0xff] %v7035_v35 }
  0x38   : > { %6214 = vmatprep.mubr.msk.bf16.mxu0 %vm777_vm2, %v5464_v41  ;;  %v407_v52 = vor.u32 %v406_v43, %v403_v37  ;;  %v596_v53 = vshll.u32 %v6989_v34, 16  ;;  %v602_v55 = vshll.u32 %v6997_v40, 16  ;;  %v606_v57 = vshrl.u32 %v6997_v40, 16  ;;  %v7038_v36 = vld [vmem:[%s6849_s21 + $0x94] sm:$0xf] }
  0x39   : > { %v591_v62 = vsel %vm6889_vm3, %v586_v46, %v590_v31  ;;  %v417_v0 = vor.u32 %v416_v47, %v412_v45  ;;  %v422_v1 = vrot.slane %v420_v48, 5  ;;  %v595_v8 = vrot.slane %v593_v50, 4  ;;  %6245 = vmatpush3.bf16.msra.mxu1 %v6596_v18  ;;  %v7043_v48 = vld [vmem:[%s6849_s21 + $0x98] sm:$0x1] }
  0x3a   : > { %v5472_v12 = vcombine.low %v581_v42, %v591_v62  ;;  %v408_v15 = vrot.slane %v407_v52, 4  ;;  %v598_v16 = vrot.slane %v596_v53, 5  ;;  %v604_v17 = vrot.slane %v602_v55, 5  ;;  %6314 = vmatprep.subr.bf16.mxu1 %v7004_v2  ;;  %9944 = vst [vmem:[#allocation8_spill] sm:$0xff] %v7043_v48 }
  0x3b   : > { %v418_v20 = vrot.slane %v417_v0, 4  ;;  %v608_v21 = vrot.slane %v606_v57, 4  ;;  %v612_v22 = vshll.u32 %v7008_v49, 16  ;;  %v425_v26 = vshrl.u32 %v7016_v58, 16 }
  0x3c   : > { %6230 = vmatprep.mubr.msk.bf16.mxu1 %vm777_vm2, %v5472_v12  ;;  %v413_v18 = vsel %vm6889_vm3, %v408_v15, %v412_v45  ;;  %v599_v31 = vor.u32 %v598_v16, %v595_v8  ;;  %v428_v32 = vshll.u32 %v7016_v58, 16  ;;  %v434_v33 = vshll.u32 %v7021_v9, 16  ;;  %v7054_v8 = vld [vmem:[%s6849_s21 + $0x3c] sm:$0xf] }
  0x3d   : > { %v423_v37 = vsel %vm6889_vm3, %v418_v20, %v422_v1  ;;  %v609_v38 = vor.u32 %v608_v21, %v604_v17  ;;  %v614_v41 = vrot.slane %v612_v22, 5  ;;  %v427_v42 = vrot.slane %v425_v26, 4  ;;  %v7059_v21 = vld [vmem:[%s6849_s21 + $0x40] sm:$0xf] }
  0x3e   : > { %v5465_v43 = vcombine.low %v413_v18, %v423_v37  ;;  %v600_v46 = vrot.slane %v599_v31, 4  ;;  %v430_v47 = vrot.slane %v428_v32, 5  ;;  %v436_v45 = vrot.slane %v434_v33, 5 }
  0x3f   : > { %v610_v50 = vrot.slane %v609_v38, 4  ;;  %v438_v52 = vshrl.u32 %v7021_v9, 16  ;;  %v444_v53 = vshll.u32 %v7026_v25, 16  ;;  %v617_v55 = vshrl.u32 %v7035_v35, 16 }
  0x40   : > { %6215 = vmatmul.mubr.msk.bf16.gmra.mxu0 %vm777_vm2, %v5465_v43  ;;  %v605_v57 = vsel %vm6889_vm3, %v600_v46, %v604_v17  ;;  %v431_v62 = vor.u32 %v430_v47, %v427_v42  ;;  %v620_v0 = vshll.u32 %v7035_v35, 16  ;;  %v626_v1 = vshll.u32 %v7038_v36, 16  ;;  %v7068_v42 = vld [vmem:[%s6849_s21 + $0x44] sm:$0x1]  ;;  %v7073_v47 = vld [vmem:[%s6849_s21 + $0x9c] sm:$0xf] }
  0x41   : > { %v615_v12 = vsel %vm6889_vm3, %v610_v50, %v614_v41  ;;  %v440_v15 = vrot.slane %v438_v52, 4  ;;  %v446_v16 = vrot.slane %v444_v53, 5  ;;  %v619_v20 = vrot.slane %v617_v55, 4  ;;  %9945 = vst [vmem:[#allocation9_spill] sm:$0xff] %v7073_v47  ;;  %v1289_v35 = vld [vmem:[%s6849_s21 + $0xc] sm:$0xe] }
  0x42   : > { %v5473_v22 = vcombine.low %v605_v57, %v615_v12  ;;  %v432_v26 = vrot.slane %v431_v62, 4  ;;  %v622_v17 = vrot.slane %v620_v0, 5  ;;  %v628_v18 = vrot.slane %v626_v1, 5  ;;  %v7076_v57 = vld [vmem:[%s6849_s21 + $0xa0] sm:$0xf] }
  0x43   : > { %v441_v31 = vor.u32 %v440_v15, %v436_v45  ;;  %v630_v32 = vshrl.u32 %v7038_v36, 16  ;;  %v636_v33 = vshll.u32 %v7043_v48, 16  ;;  %v449_v37 = vshrl.u32 %v7054_v8, 16  ;;  %9946 = vst [vmem:[#allocation10_spill] sm:$0xff] %v7076_v57  ;;  %v7080_v12 = vld [vmem:[%s6849_s21 + $0xa4] sm:$0x1] }
  0x44   : > { %6231 = vmatmul.mubr.msk.bf16.gmra.mxu1 %vm777_vm2, %v5473_v22  ;;  %v437_v38 = vsel %vm6889_vm3, %v432_v26, %v436_v45  ;;  %v623_v41 = vor.u32 %v622_v17, %v619_v20  ;;  %v452_v43 = vshll.u32 %v7054_v8, 16  ;;  %v458_v46 = vshll.u32 %v7059_v21, 16  ;;  %9947 = vst [vmem:[#allocation11_spill] sm:$0xff] %v7080_v12  ;;  %v7087_v17 = vld [vmem:[%s6849_s21 + $0x48] sm:$0xf] }
  0x45   : > { %v442_v50 = vrot.slane %v441_v31, 4  ;;  %v632_v52 = vrot.slane %v630_v32, 4  ;;  %v638_v53 = vrot.slane %v636_v33, 5  ;;  %v451_v55 = vrot.slane %v449_v37, 4 }
  0x46   : > { %v624_v62 = vrot.slane %v623_v41, 4  ;;  %v454_v0 = vrot.slane %v452_v43, 5  ;;  %v460_v1 = vrot.slane %v458_v46, 5  ;;  %v462_v45 = vshrl.u32 %v7059_v21, 16 }
  0x47   : > { %v447_v15 = vsel %vm6889_vm3, %v442_v50, %v446_v16  ;;  %v633_v20 = vor.u32 %v632_v52, %v628_v18  ;;  %v468_v22 = vshll.u32 %v7068_v42, 16  ;;  %v641_v26 = vshrl.u32 %v7073_v47, 16 }
  0x48   : > { %v5466_v31 = vcombine.low %v437_v38, %v447_v15  ;;  %v629_v32 = vsel %vm6889_vm3, %v624_v62, %v628_v18  ;;  %v455_v33 = vor.u32 %v454_v0, %v451_v55  ;;  %v464_v37 = vrot.slane %v462_v45, 4  ;;  %v7099_v0 = vld [vmem:[%s6849_s21 + $0x4c] sm:$0xf] }
  0x49   : > { %v634_v41 = vrot.slane %v633_v20, 4  ;;  %v470_v43 = vrot.slane %v468_v22, 5  ;;  %v643_v46 = vrot.slane %v641_v26, 4  ;;  %v644_v16 = vshll.u32 %v7073_v47, 16 }
  0x4a   : > { %6218 = vmatprep.mubr.msk.bf16.mxu0 %vm777_vm2, %v5466_v31  ;;  %v456_v50 = vrot.slane %v455_v33, 4  ;;  %v465_v52 = vor.u32 %v464_v37, %v460_v1  ;;  %v650_v60 = vshll.u32 %v7076_v57, 16  ;;  %v654_v38 = vshrl.u32 %v7076_v57, 16  ;;  %v7105_v31 = vld [vmem:[%s6849_s21 + $0x50] sm:$0x1] }
  0x4b   : > { %v639_v18 = vsel %vm6889_vm3, %v634_v41, %v638_v53  ;;  %v646_v55 = vrot.slane %v644_v16, 5  ;;  %v660_v62 = vshll.u32 %v7080_v12, 16  ;;  %v473_v45 = vshrl.u32 %v7087_v17, 16  ;;  %v7108_v33 = vld [vmem:[%s6849_s21 + $0xa8] sm:$0xf] }
  0x4c   : > { %v5474_v15 = vcombine.low %v629_v32, %v639_v18  ;;  %v461_v20 = vsel %vm6889_vm3, %v456_v50, %v460_v1  ;;  %v466_v22 = vrot.slane %v465_v52, 4  ;;  %v652_v26 = vrot.slane %v650_v60, 5  ;;  %9948 = vst [vmem:[#allocation12_spill] sm:$0xff] %v7108_v33 }
  0x4d   : > { %v647_v37 = vor.u32 %v646_v55, %v643_v46  ;;  %v656_v53 = vrot.slane %v654_v38, 4  ;;  %v662_v41 = vrot.slane %v660_v62, 5  ;;  %v475_v16 = vrot.slane %v473_v45, 4  ;;  %v7121_v55 = vld [vmem:[%s6849_s21 + $0xb0] sm:$0x1] }
  0x4e   : > { %6234 = vmatprep.mubr.msk.bf16.mxu1 %vm777_vm2, %v5474_v15  ;;  %v471_v32 = vsel %vm6889_vm3, %v466_v22, %v470_v43  ;;  %v476_v1 = vshll.u32 %v7087_v17, 16  ;;  %v482_v60 = vshll.u32 %v7099_v0, 16  ;;  %v486_v50 = vshrl.u32 %v7099_v0, 16  ;;  %9950 = vst [vmem:[#allocation14_spill] sm:$0xff] %v7121_v55  ;;  %v7125_v43 = vld [vmem:[%s6849_s21 + $0x54] sm:$0xf] }
  0x4f   : > { %v5467_v52 = vcombine.low %v461_v20, %v471_v32  ;;  %v648_v46 = vrot.slane %v647_v37, 4  ;;  %v657_v38 = vor.u32 %v656_v53, %v652_v26  ;;  %v492_v18 = vshll.u32 %v7105_v31, 16  ;;  %v7132_v53 = vld [vmem:[%s6849_s21 + $0x58] sm:$0xf] }
  0x50   : > { %v478_v62 = vrot.slane %v476_v1, 5  ;;  %v484_v45 = vrot.slane %v482_v60, 5  ;;  %v488_v15 = vrot.slane %v486_v50, 4  ;;  %v665_v59 = vshrl.u32 %v7108_v33, 16 }
  0x51   : > { %6219 = vmatmul.mubr.msk.bf16.gmra.mxu0 %vm777_vm2, %v5467_v52  ;;  %v653_v22 = vsel %vm6889_vm3, %v648_v46, %v652_v26  ;;  %v658_v54 = vrot.slane %v657_v38, 4  ;;  %v494_v20 = vrot.slane %v492_v18, 5  ;;  %v668_v37 = vshll.u32 %v7108_v33, 16 }
  0x52   : > { %v479_v32 = vor.u32 %v478_v62, %v475_v16  ;;  %v489_v12 = vor.u32 %v488_v15, %v484_v45  ;;  %v667_v1 = vrot.slane %v665_v59, 4  ;;  %v674_v60 = vshll.u32 %v7111_v30, 16 }
  0x53   : > { %v663_v50 = vsel %vm6889_vm3, %v658_v54, %v662_v41  ;;  %v670_v52 = vrot.slane %v668_v37, 5  ;;  %v678_v26 = vshrl.u32 %v7111_v30, 16  ;;  %v684_v46 = vshll.u32 %v7121_v55, 16  ;;  %v7151_v37 = vld [vmem:[%s6849_s21 + $0xb4] sm:$0xf] }
  0x54   : > { %v5475_v38 = vcombine.low %v653_v22, %v663_v50  ;;  %v480_v18 = vrot.slane %v479_v32, 4  ;;  %v490_v16 = vrot.slane %v489_v12, 4  ;;  %v676_v62 = vrot.slane %v674_v60, 5  ;;  %9951 = vst [vmem:[#allocation15_spill] sm:$0xff] %v7151_v37  ;;  %v7154_v32 = vld [vmem:[%s6849_s21 + $0xb8] sm:$0xf] }
  0x55   : > { %v671_v15 = vor.u32 %v670_v52, %v667_v1  ;;  %v680_v59 = vrot.slane %v678_v26, 4  ;;  %v686_v33 = vrot.slane %v684_v46, 5  ;;  %v497_v47 = vshrl.u32 %v7125_v43, 16 }
  0x56   : > { %6235 = vmatmul.mubr.msk.bf16.gmra.mxu1 %vm777_vm2, %v5475_v38  ;;  %v485_v54 = vsel %vm6889_vm3, %v480_v18, %v484_v45  ;;  %v495_v41 = vsel %vm6889_vm3, %v490_v16, %v494_v20  ;;  %v500_v22 = vshll.u32 %v7125_v43, 16  ;;  %v506_v12 = vshll.u32 %v7132_v53, 16  ;;  %v7159_v20 = vld [vmem:[%s6849_s21 + $0xbc] sm:$0x1] }
  0x57   : > { %v5468_v1 = vcombine.low %v485_v54, %v495_v41  ;;  %v672_v60 = vrot.slane %v671_v15, 4  ;;  %v681_v50 = vor.u32 %v680_v59, %v676_v62  ;;  %v499_v52 = vrot.slane %v497_v47, 4 }
  0x58   : > { %v502_v26 = vrot.slane %v500_v22, 5  ;;  %v508_v46 = vrot.slane %v506_v12, 5  ;;  %v510_v45 = vshrl.u32 %v7132_v53, 16  ;;  %v516_v38 = vshll.u32 %v7140_v44, 16  ;;  %v1288_v12 = vld [vmem:[%s6849_s21] sm:$0xe] }
  0x59   : > { %6222 = vmatprep.mubr.msk.bf16.mxu0 %vm777_vm2, %v5468_v1  ;;  %v677_v18 = vsel %vm6889_vm3, %v672_v60, %v676_v62  ;;  %v682_v16 = vrot.slane %v681_v50, 4  ;;  %v689_v15 = vshrl.u32 %v7151_v37, 16  ;;  %v692_v59 = vshll.u32 %v7151_v37, 16 }
  0x5a   : > { %v503_v47 = vor.u32 %v502_v26, %v499_v52  ;;  %v512_v54 = vrot.slane %v510_v45, 4  ;;  %v518_v41 = vrot.slane %v516_v38, 5  ;;  %v698_v22 = vshll.u32 %v7154_v32, 16 }
  0x5b   : > { %v687_v55 = vsel %vm6889_vm3, %v682_v16, %v686_v33  ;;  %v691_v30 = vrot.slane %v689_v15, 4  ;;  %v694_v1 = vrot.slane %v692_v59, 5  ;;  %v702_v57 = vshrl.u32 %v7154_v32, 16 }
  0x5c   : > { %v5476_v62 = vcombine.low %v677_v18, %v687_v55  ;;  %v504_v60 = vrot.slane %v503_v47, 4  ;;  %v513_v50 = vor.u32 %v512_v54, %v508_v46  ;;  %v700_v48 = vrot.slane %v698_v22, 5  ;;  %v1290_v47 = vld [vmem:[%s6849_s21 + $0x18] sm:$0xe] }
  0x5d   : > { %v695_v37 = vor.u32 %v694_v1, %v691_v30  ;;  %v704_v52 = vrot.slane %v702_v57, 4  ;;  %v708_v26 = vshll.u32 %v7159_v20, 16  ;;  %v5530_v33 = vrot.slane %v1288_v12, 9 }
  0x5e   : > { %6238 = vmatprep.mubr.msk.bf16.mxu1 %vm777_vm2, %v5476_v62  ;;  %v509_v55 = vsel %vm6889_vm3, %v504_v60, %v508_v46  ;;  %v514_v38 = vrot.slane %v513_v50, 4  ;;  %v1341_v18 = vrot.slane %v6855_v5, 5  ;;  %v5497_v30 = vcombine.low %v6882_v27, %v6885_v28 }
  0x5f   : > { %v696_v57 = vrot.slane %v695_v37, 4  ;;  %v705_v16 = vor.u32 %v704_v52, %v700_v48  ;;  %v710_v15 = vrot.slane %v708_v26, 5  ;;  %v5531_v59 = vrot.slane %v1289_v35, 9  ;;  %v1291_v26 = vld [vmem:[%s6849_s21 + $0x24] sm:$0xe] }
  0x60   : > { %v519_v54 = vsel %vm6889_vm3, %v514_v38, %v518_v41  ;;  %v1342_v22 = vsel %vm7175_vm6, %v5530_v33, %v1341_v18  ;;  %v1343_v12 = vrot.slane %v1341_v18, 4  ;;  %v9954_v46 = vrot.slane %v6885_v28, 5 }
  0x61   : > { %v5469_v62 = vcombine.low %v509_v55, %v519_v54  ;;  %v701_v60 = vsel %vm6889_vm3, %v696_v57, %v700_v48  ;;  %v706_v37 = vrot.slane %v705_v16, 4  ;;  %v9955_v50 = vrot.slane %v6858_v6, 5 }
  0x62   : > { %v1350_v1 = vrot.slane %v9954_v46, 4  ;;  %v5498_v41 = vcombine.low %v6924_v7, %v6931_v19  ;;  %v5532_v52 = vrot.slane %v1290_v47, 9  ;;  %v5496_v55 = vcombine.low %v6852_v4, %v6855_v5  ;;  %v1292_v47 = vld [vmem:[%s6849_s21 + $0x30] sm:$0xe] }
  0x63   : > { %v1345_v35 = vsel %vm7175_vm6, %v1343_v12, %v9955_v50  ;;  %6223 = vmatmul.mubr.msk.bf16.gmra.mxu0 %vm777_vm2, %v5469_v62  ;;  %v711_v33 = vsel %vm6889_vm3, %v706_v37, %v710_v15  ;;  %v1355_v6 = vrot.slane %v6931_v19, 5  ;;  %v9956_v18 = vmov %v9954_v46 }
  0x64   : > { %v5550_v48 = vcombine.low %v1342_v22, %v1345_v35  ;;  %v5477_v38 = vcombine.low %v701_v60, %v711_v33  ;;  %v1349_v7 = vsel %vm7175_vm6, %v5531_v59, %v9956_v18  ;;  %v9957_v57 = vrot.slane %v6895_v39, 5  ;;  %v1293_v22 = vld [vmem:[%s6849_s21 + $0x3c] sm:$0xe] }
  0x65   : > { %v1358_v15 = vrot.slane %v6937_v23, 5  ;;  %v1356_v4 = vsel %vm7175_vm6, %v5532_v52, %v1355_v6  ;;  %v1357_v5 = vrot.slane %v1355_v6, 4  ;;  %v5533_v19 = vrot.slane %v1291_v26, 9  ;;  %v6611_v26 = vld [vmem:[%s9906_s2 + $0x40] sm:$0xff]   ;;  %v1295_v6 = vld [vmem:[%s6849_s21 + $0x54] sm:$0xe] }
  0x66   : > { %v1352_v16 = vsel %vm7175_vm6, %v1350_v1, %v9957_v57  ;;  %6282 = vmatprep.mubr.msk.bf16.mxu0 %vm777_vm2, %v5550_v48  ;;  %v1362_v54 = vrot.slane %v6973_v10, 5  ;;  %6239 = vmatmul.mubr.msk.bf16.gmra.mxu1 %vm777_vm2, %v5477_v38  ;;  %v1365_v39 = vrot.slane %v6982_v24, 5  ;;  %v1369_v59 = vrot.slane %v7021_v9, 5  ;;  %v1294_v1 = vld [vmem:[%s6849_s21 + $0x48] sm:$0xe] }
  0x67   : > { %6246 = vmatprep.mubr.msk.bf16.mxu1 %vm777_vm2, %v5496_v55  ;;  %v5551_v23 = vcombine.low %v1349_v7, %v1352_v16  ;;  %v1359_v12 = vsel %vm7175_vm6, %v1357_v5, %v1358_v15  ;;  %v5534_v60 = vrot.slane %v1292_v47, 9  ;;  %v1372_v37 = vrot.slane %v7026_v25, 5  ;;  %v1296_v16 = vld [vmem:[%s6849_s21 + $0x60] sm:$0xe]  ;;  %v6609_v15 = vld [vmem:[%s9906_s2 + $0x30] sm:$0xff]  }
  0x68   : > { %v1364_v46 = vrot.slane %v1362_v54, 4  ;;  %v5552_v62 = vcombine.low %v1356_v4, %v1359_v12  ;;  %v1363_v50 = vsel %vm7175_vm6, %v5533_v19, %v1362_v54  ;;  %v1371_v24 = vrot.slane %v1369_v59, 4 }
  0x69   : > { %v5535_v35 = vrot.slane %v1293_v22, 9  ;;  %v1376_v52 = vrot.slane %v7059_v21, 5  ;;  %v1379_v55 = vrot.slane %v7068_v42, 5  ;;  %v5536_v48 = vrot.slane %v1294_v1, 9  ;;  %v1299_v1 = vld [vmem:[%s6849_s21 + $0x84] sm:$0xe] }
  0x6a   : > { %v1366_v33 = vsel %vm7175_vm6, %v1364_v46, %v1365_v39  ;;  %v1383_v25 = vrot.slane %v7099_v0, 5  ;;  %v1386_v18 = vrot.slane %v7105_v31, 5  ;;  %v5499_v7 = vcombine.low %v6962_v63, %v6973_v10  ;;  %v7263_v63 = vld [vmem:[%s9906_s2 + $0x68] sm:$0xff]  }
  0x6b   : > { %6283 = vmatmul.mubr.msk.bf16.vlgmr.msra.gmra.mxu0 %vm777_vm2, %v5551_v23  ;;  %v1378_v38 = vrot.slane %v1376_v52, 4  ;;  %v1370_v57 = vsel %vm7175_vm6, %v5534_v60, %v1369_v59  ;;  %v5553_v47 = vcombine.low %v1363_v50, %v1366_v33  ;;  %v1373_v31 = vsel %vm7175_vm6, %v1371_v24, %v1372_v37  ;;  %v7304_v46 = vld [vmem:[%s6849_s21 + $0x6c] sm:$0xe]  ;;  %v7321_v24 = vld [vmem:[%s6849_s21 + $0x78] sm:$0xe] }
  0x6c   : > { %6351 = vmatpush3.bf16.msra.mxu0 %v6967_v3  ;;  %6286 = vmatprep.mubr.msk.bf16.mxu0 %vm777_vm2, %v5552_v62  ;;  %v1385_v42 = vrot.slane %v1383_v25, 4  ;;  %v7257_v3 = vsel %vm7175_vm6, %v5535_v35, %v1376_v52  ;;  %v1390_v4 = vrot.slane %v7132_v53, 5  ;;  %v7275_v5 = vsel %vm7175_vm6, %v5536_v48, %v1383_v25  ;;  %v7397_v33 = vld [vmem:[%s6849_s21 + $0x10] sm:$0xf] }
  0x6d   : > { %6352 = vmatprep.subr.bf16.mxu0 %v6611_v26  ;;  %v7271_v10 = vsel %vm7175_vm6, %v1378_v38, %v1379_v55  ;;  %v5537_v19 = vrot.slane %v1295_v6, 9  ;;  %v1393_v54 = vrot.slane %v7140_v44, 5  ;;  %v1397_v39 = vrot.slane %v6871_v13, 5  ;;  %v1300_v55 = vld [vmem:[%s6849_s21 + $0x90] sm:$0xe] }
  0x6e   : > { %6247 = vmatmul.mubr.msk.bf16.vlgmr.msra.gmra.mxu1 %vm777_vm2, %v5497_v30  ;;  %v7282_v27 = vsel %vm7175_vm6, %v1385_v42, %v1386_v18  ;;  %v1392_v28 = vrot.slane %v1390_v4, 4  ;;  %v5538_v30 = vrot.slane %v1296_v16, 9  ;;  %v1400_v59 = vrot.slane %v6874_v14, 5  ;;  %v1301_v18 = vld [vmem:[%s6849_s21 + $0x9c] sm:$0xe] }
  0x6f   : > { %6315 = vmatpush3.bf16.msra.mxu1 %v7004_v2  ;;  %6250 = vmatprep.mubr.msk.bf16.mxu1 %vm777_vm2, %v5498_v41  ;;  %v5500_v22 = vcombine.low %v7016_v58, %v7021_v9  ;;  %v5554_v44 = vcombine.low %v1370_v57, %v1373_v31  ;;  %v5501_v2 = vcombine.low %v7054_v8, %v7059_v21  ;;  %v7293_v41 = vld [vmem:[%s9906_s2 + $0x58] sm:$0xff]   ;;  %v1399_v52 = vrot.slane %v1397_v39, 4  ;;  %v7424_v8 = vld [vmem:[%s6849_s21 + $0x14] sm:$0x1] }
  0x70   : > { %6316 = vmatprep.subr.bf16.mxu1 %v6609_v15  ;;  %6353 = vmatpush3.bf16.msra.mxu0 %v6611_v26  ;;  %v5555_v23 = vcombine.low %v7257_v3, %v7271_v10  ;;  %v5502_v12 = vcombine.low %v7087_v17, %v7099_v0  ;;  %v5503_v58 = vcombine.low %v7125_v43, %v7132_v53  ;;  %v1404_v26 = vrot.slane %v6910_v56, 5  ;;  %v5658_v21 = vld [vmem:[%s6849_s21 + $0x1c] sm:$0xf] }
  0x71   : > { %v5504_v9 = vcombine.low %v6865_v11, %v6871_v13  ;;  %6422 = vmatprep.subr.bf16.mxu0 %v7263_v63  ;;  %v5556_v62 = vcombine.low %v7275_v5, %v7282_v27  ;;  %v7312_v60 = vsel %vm7175_vm6, %v5537_v19, %v1390_v4  ;;  %v7316_v37 = vsel %vm7175_vm6, %v1392_v28, %v1393_v54  ;;  %v9959_v5 = vld [vmem:[#allocation8_spill] sm:$0xff]  ;;  %v9960_v19 = vld [vmem:[#allocation10_spill] sm:$0xff]  ;;  %v9961_v54 = vld [vmem:[#allocation9_spill] sm:$0xff] }
  0x72   : > { %v5505_v50 = vcombine.low %v6906_v51, %v6910_v56  ;;  %v7326_v35 = vsel %vm7175_vm6, %v5538_v30, %v1397_v39  ;;  %v5539_v48 = vrot.slane %v7304_v46, 9  ;;  %v5541_v25 = vrot.slane %v1299_v1, 9  ;;  %v1302_v30 = vld [vmem:[%s6849_s21 + $0xa8] sm:$0xe]  ;;  %v5654_v27 = vld [vmem:[%s6849_s21 + $0xc] sm:$0xf] }
  0x73   : > { %6287 = vmatmul.mubr.msk.bf16.gmra.mxu0 %vm777_vm2, %v5553_v47  ;;  %6317 = vmatpush3.bf16.msra.mxu1 %v6609_v15  ;;  %v1418_v6 = vrot.slane %v6997_v40, 5  ;;  %v1421_v38 = vrot.slane %v7008_v49, 5  ;;  %v5557_v57 = vcombine.low %v7312_v60, %v7316_v37  ;;  %v1407_v42 = vrot.slane %v6918_v61, 5  ;;  %v9958_v15 = vld [vmem:[#allocation7_spill] sm:$0xff]  ;;  %v5657_v1 = vld [vmem:[%s6849_s21 + $0x18] sm:$0xf] }
  0x74   : > { %6290 = vmatprep.mubr.msk.bf16.mxu0 %vm777_vm2, %v5554_v44  ;;  %6386 = vmatprep.subr.bf16.mxu1 %v7293_v41  ;;  %v5540_v16 = vrot.slane %v7321_v24, 9  ;;  %v5542_v3 = vrot.slane %v1300_v55, 9  ;;  %v1425_v4 = vrot.slane %v7038_v36, 5  ;;  %v1406_v10 = vrot.slane %v1404_v26, 4  ;;  %v9963_v55 = vld [vmem:[#allocation11_spill] sm:$0xff] }
  0x75   : > { %v7347_v31 = vsel %vm7175_vm6, %v5541_v25, %v1418_v6  ;;  %v1420_v49 = vrot.slane %v1418_v6, 4  ;;  %v1428_v61 = vrot.slane %v9959_v5, 5  ;;  %v5543_v28 = vrot.slane %v1301_v18, 9  ;;  %v9964_v6 = vld [vmem:[#allocation13_spill] sm:$0xff]  ;;  %v9965_v18 = vld [vmem:[#allocation12_spill] sm:$0xff] }
  0x76   : > { %6251 = vmatmul.mubr.msk.bf16.gmra.mxu1 %vm777_vm2, %v5499_v7  ;;  %v9962_v7 = vld [vmem:[#allocation5_spill] sm:$0xff]  ;;  %v7362_v46 = vsel %vm7175_vm6, %v5542_v3, %v1425_v4  ;;  %v1432_v24 = vrot.slane %v9960_v19, 5  ;;  %v1435_v25 = vrot.slane %v9963_v55, 5  ;;  %v1439_v3 = vrot.slane %v9964_v6, 5 }
  0x77   : > { %6254 = vmatprep.mubr.msk.bf16.mxu1 %vm777_vm2, %v5500_v22  ;;  %v1411_v39 = vrot.slane %v9962_v7, 5  ;;  %v7358_v44 = vsel %vm7175_vm6, %v1420_v49, %v1421_v38  ;;  %v1427_v22 = vrot.slane %v1425_v4, 4  ;;  %v5544_v49 = vrot.slane %v1302_v30, 9  ;;  %v9966_v7 = vld [vmem:[#allocation14_spill] sm:$0xff] }
  0x78   : > { %v1442_v4 = vrot.slane %v9966_v7, 5  ;;  %v7382_v5 = vsel %vm7175_vm6, %v5543_v28, %v1432_v24  ;;  %v1434_v47 = vrot.slane %v1432_v24, 4  ;;  %v1401_v30 = vsel %vm7175_vm6, %v1399_v52, %v1400_v59 }
  0x79   : > { %v7372_v38 = vsel %vm7175_vm6, %v1427_v22, %v1428_v61  ;;  %v9967_v61 = vld [vmem:[#allocation15_spill] sm:$0xff]  ;;  %v7394_v28 = vsel %vm7175_vm6, %v5544_v49, %v1439_v3  ;;  %v1441_v24 = vrot.slane %v1439_v3, 4  ;;  %v1413_v22 = vrot.slane %v1411_v39, 4 }
  0x7a   : > { %v2177_v14 = vshrl.u32 %v5654_v27, 16  ;;  %v2180_v55 = vshll.u32 %v5654_v27, 16  ;;  %v7410_v59 = vsel %vm7175_vm6, %v5539_v48, %v1404_v26  ;;  %v7414_v52 = vsel %vm7175_vm6, %v1406_v10, %v1407_v42 }
  0x7b   : > { %6291 = vmatmul.mubr.msk.bf16.gmra.mxu0 %vm777_vm2, %v5555_v23  ;;  %v9968_v23 = vld [vmem:[#allocation6_spill] sm:$0xff]  ;;  %v7420_v27 = vsel %vm7175_vm6, %v1441_v24, %v1442_v4  ;;  %v2186_v42 = vshll.u32 %v7397_v33, 16  ;;  %v5558_v10 = vcombine.low %v7326_v35, %v1401_v30  ;;  %v1446_v49 = vrot.slane %v7154_v32, 5  ;;  %v5660_v24 = vld [vmem:[%s6849_s21 + $0x24] sm:$0xf] }
  0x7c   : > { %6294 = vmatprep.mubr.msk.bf16.mxu0 %vm777_vm2, %v5556_v62  ;;  %v1414_v7 = vrot.slane %v9968_v23, 5  ;;  %v7401_v62 = vsel %vm7175_vm6, %v1434_v47, %v1435_v25  ;;  %v1303_v25 = vld [vmem:[%s6849_s21 + $0xb4] sm:$0xe]  ;;  %v2179_v26 = vrot.slane %v2177_v14, 4  ;;  %v2182_v48 = vrot.slane %v2180_v55, 5 }
  0x7d   : > { %v2190_v3 = vshrl.u32 %v7397_v33, 16  ;;  %v2201_v4 = vshrl.u32 %v5657_v1, 16  ;;  %v5559_v17 = vcombine.low %v7410_v59, %v7414_v52  ;;  %v1412_v0 = vsel %vm7175_vm6, %v5540_v16, %v1411_v39  ;;  %v5659_v55 = vld [vmem:[%s6849_s21 + $0x20] sm:$0x1]  ;;  %v7448_v47 = vld [vmem:[%s6849_s21 + $0x28] sm:$0xf] }
  0x7e   : > { %6255 = vmatmul.mubr.msk.bf16.gmra.mxu1 %vm777_vm2, %v5501_v2  ;;  %v2204_v23 = vshll.u32 %v5657_v1, 16  ;;  %v5545_v14 = vrot.slane %v1303_v25, 9  ;;  %v7445_v2 = vrot.slane %v2186_v42, 5  ;;  %v2210_v30 = vshll.u32 %v5658_v21, 16 }
  0x7f   : > { %6258 = vmatprep.mubr.msk.bf16.mxu1 %vm777_vm2, %v5502_v12  ;;  %v1415_v12 = vsel %vm7175_vm6, %v1413_v22, %v1414_v7  ;;  %v2192_v35 = vrot.slane %v2190_v3, 4  ;;  %v1449_v16 = vrot.slane %v7159_v20, 5  ;;  %v2183_v39 = vor.u32 %v2182_v48, %v2179_v26 }
  0x80   : > { %v2196_v1 = vshll.u32 %v7424_v8, 16  ;;  %v2214_v22 = vshrl.u32 %v5658_v21, 16  ;;  %v1448_v7 = vrot.slane %v1446_v49, 4  ;;  %v2203_v59 = vrot.slane %v2201_v4, 4  ;;  %v7466_v21 = vld [vmem:[%s6849_s21 + $0x2c] sm:$0x1] }
  0x81   : > { %v2225_v52 = vshrl.u32 %v5660_v24, 16  ;;  %v2228_v25 = vshll.u32 %v5660_v24, 16  ;;  %v2206_v42 = vrot.slane %v2204_v23, 5  ;;  %v7457_v3 = vrot.slane %v2210_v30, 5 }
  0x82   : > { %v2216_v60 = vrot.slane %v2214_v22, 4  ;;  %v2220_v37 = vshll.u32 %v5659_v55, 16  ;;  %v2193_v20 = vor.u32 %v2192_v35, %v7445_v2  ;;  %v5560_v4 = vcombine.low %v1412_v0, %v1415_v12  ;;  %v5666_v0 = vld [vmem:[%s6849_s21 + $0x3c] sm:$0xf] }
  0x83   : > { %6295 = vmatmul.mubr.msk.bf16.gmra.mxu0 %vm777_vm2, %v5557_v57  ;;  %v5663_v57 = vld [vmem:[%s6849_s21 + $0x30] sm:$0xf]  ;;  %v2227_v26 = vrot.slane %v2225_v52, 4  ;;  %v2230_v48 = vrot.slane %v2228_v25, 5  ;;  %v7473_v55 = vrot.slane %v2183_v39, 4  ;;  %v7475_v43 = vrot.slane %v2196_v1, 5 }
  0x84   : > { %6298 = vmatprep.mubr.msk.bf16.mxu0 %vm777_vm2, %v5558_v10  ;;  %v2234_v10 = vshll.u32 %v7448_v47, 16  ;;  %v2238_v53 = vshrl.u32 %v7448_v47, 16  ;;  %v7483_v23 = vsel %vm7175_vm6, %v5545_v14, %v1446_v49  ;;  %v7487_v11 = vsel %vm7175_vm6, %v1448_v7, %v1449_v16  ;;  %v7495_v14 = vld [vmem:[%s6849_s21 + $0x40] sm:$0xf]  ;;  %v6660_v16 = vld [vmem:[%s6849_s21 + $0x78] sm:$0xf] }
  0x85   : > { %v2207_v12 = vor.u32 %v2206_v42, %v2203_v59  ;;  %v2217_v24 = vor.u32 %v2216_v60, %v7457_v3  ;;  %v2231_v35 = vor.u32 %v2230_v48, %v2227_v26  ;;  %v2194_v39 = vrot.slane %v2193_v20, 4  ;;  %v6661_v7 = vld [vmem:[%s6849_s21 + $0x7c] sm:$0xf] }
  0x86   : > { %6259 = vmatmul.mubr.msk.bf16.gmra.mxu1 %vm777_vm2, %v5503_v58  ;;  %v7479_v58 = vld [vmem:[%s6849_s21 + $0x34] sm:$0xf]  ;;  %v7489_v13 = vrot.slane %v2234_v10, 5  ;;  %v2240_v30 = vrot.slane %v2238_v53, 4  ;;  %v2222_v1 = vrot.slane %v2220_v37, 5  ;;  %v2244_v22 = vshll.u32 %v7466_v21, 16 }
  0x87   : > { %6262 = vmatprep.mubr.msk.bf16.mxu1 %vm777_vm2, %v5504_v9  ;;  %v2249_v9 = vshrl.u32 %v5663_v57, 16  ;;  %v2252_v49 = vshll.u32 %v5663_v57, 16  ;;  %v5506_v52 = vcombine.low %v6660_v16, %v6661_v7  ;;  %v2258_v25 = vshll.u32 %v7479_v58, 16  ;;  %v7511_v10 = vld [vmem:[%s6849_s21 + $0x38] sm:$0x1] }
  0x88   : > { %v2241_v59 = vor.u32 %v2240_v30, %v7489_v13  ;;  %v2262_v42 = vshrl.u32 %v7479_v58, 16  ;;  %v5565_v60 = vcombine.low %v7483_v23, %v7487_v11  ;;  %v2208_v20 = vrot.slane %v2207_v12, 4  ;;  %v5669_v30 = vld [vmem:[%s6849_s21 + $0x48] sm:$0xf] }
  0x89   : > { %v2251_v37 = vrot.slane %v2249_v9, 4  ;;  %v2254_v57 = vrot.slane %v2252_v49, 5  ;;  %v2218_v26 = vrot.slane %v2217_v24, 4  ;;  %v2232_v48 = vrot.slane %v2231_v35, 4 }
  0x8a   : > { %v2273_v53 = vshrl.u32 %v5666_v0, 16  ;;  %v2264_v16 = vrot.slane %v2262_v42, 4  ;;  %v2242_v9 = vrot.slane %v2241_v59, 4  ;;  %v2246_v12 = vrot.slane %v2244_v22, 5  ;;  %v7537_v59 = vld [vmem:[%s6849_s21 + $0x4c] sm:$0xf] }
  0x8b   : > { %6299 = vmatmul.mubr.msk.bf16.gmra.mxu0 %vm777_vm2, %v5559_v17  ;;  %v2189_v17 = vsel %vm6889_vm3, %v7473_v55, %v7445_v2  ;;  %v2276_v2 = vshll.u32 %v5666_v0, 16  ;;  %v2282_v55 = vshll.u32 %v7495_v14, 16  ;;  %v2286_v35 = vshrl.u32 %v7495_v14, 16 }
  0x8c   : > { %6302 = vmatprep.mubr.msk.bf16.mxu0 %vm777_vm2, %v5560_v4  ;;  %v7518_v4 = vrot.slane %v2258_v25, 5  ;;  %v2275_v24 = vrot.slane %v2273_v53, 4  ;;  %v2199_v51 = vsel %vm6889_vm3, %v2194_v39, %v7475_v43  ;;  %v2255_v56 = vor.u32 %v2254_v57, %v2251_v37  ;;  %v5672_v57 = vld [vmem:[%s6849_s21 + $0x54] sm:$0xf] }
  0x8d   : > { %v2278_v49 = vrot.slane %v2276_v2, 5  ;;  %v7529_v7 = vrot.slane %v2282_v55, 5  ;;  %v2213_v0 = vsel %vm6889_vm3, %v2208_v20, %v7457_v3  ;;  %v2223_v22 = vsel %vm6889_vm3, %v2218_v26, %v2222_v1  ;;  %v5675_v2 = vld [vmem:[%s6849_s21 + $0x60] sm:$0xf] }
  0x8e   : > { %6263 = vmatmul.mubr.msk.bf16.gmra.mxu1 %vm777_vm2, %v5505_v50  ;;  %v7527_v50 = vld [vmem:[%s6849_s21 + $0x44] sm:$0x1]  ;;  %v2297_v25 = vshrl.u32 %v5669_v30, 16  ;;  %v2237_v43 = vsel %vm6889_vm3, %v2232_v48, %v7489_v13  ;;  %v2265_v39 = vor.u32 %v2264_v16, %v7518_v4  ;;  %v2268_v42 = vshll.u32 %v7511_v10, 16  ;;  %v7554_v48 = vld [vmem:[%s6849_s21 + $0x58] sm:$0xf] }
  0x8f   : > { %6266 = vmatprep.mubr.msk.bf16.mxu1 %vm777_vm2, %v5506_v52  ;;  %v2288_v52 = vrot.slane %v2286_v35, 4  ;;  %v2300_v37 = vshll.u32 %v5669_v30, 16  ;;  %v9969_v3 = vcombine.low %v7347_v31, %v7358_v44  ;;  %v2247_v1 = vsel %vm6889_vm3, %v2242_v9, %v2246_v12  ;;  %v7567_v12 = vld [vmem:[%s6849_s21 + $0x50] sm:$0x1] }
  0x90   : > { %v2279_v20 = vor.u32 %v2278_v49, %v2275_v24  ;;  %v2292_v26 = vshll.u32 %v7527_v50, 16  ;;  %v9970_v53 = vcombine.low %v7362_v46, %v7372_v38  ;;  %v2256_v30 = vrot.slane %v2255_v56, 4  ;;  %v7571_v49 = vld [vmem:[%s6849_s21 + $0x64] sm:$0xf] }
  0x91   : > { %v2289_v13 = vor.u32 %v2288_v52, %v7529_v7  ;;  %v2299_v31 = vrot.slane %v2297_v25, 4  ;;  %v2302_v44 = vrot.slane %v2300_v37, 5  ;;  %v2306_v16 = vshll.u32 %v7537_v59, 16 }
  0x92   : > { %v7562_v55 = vcombine.low %v2189_v17, %v2199_v51  ;;  %v7564_v9 = vcombine.low %v2213_v0, %v2223_v22  ;;  %v2310_v24 = vshrl.u32 %v7537_v59, 16  ;;  %v2321_v35 = vshrl.u32 %v5672_v57, 16 }
  0x93   : > { %6303 = vmatmul.mubr.msk.bf16.gmra.mxu0 %vm777_vm2, %v9969_v3  ;;  %v9971_v46 = vcombine.low %v6989_v34, %v6997_v40  ;;  %v7577_v38 = vcombine.low %v2237_v43, %v2247_v1  ;;  %v2266_v17 = vrot.slane %v2265_v39, 4  ;;  %v2270_v51 = vrot.slane %v2268_v42, 5  ;;  %v5678_v42 = vld [vmem:[%s6849_s21 + $0x6c] sm:$0xf] }
  0x94   : > { %6306 = vmatprep.mubr.msk.bf16.mxu0 %vm777_vm2, %v9970_v53  ;;  %v2324_v56 = vshll.u32 %v5672_v57, 16  ;;  %v9972_v0 = vcombine.low %v9958_v15, %v7038_v36  ;;  %v2280_v22 = vrot.slane %v2279_v20, 4  ;;  %v2290_v52 = vrot.slane %v2289_v13, 4  ;;  %v7591_v57 = vld [vmem:[%s6849_s21 + $0x5c] sm:$0x1] }
  0x95   : > { %v2294_v25 = vrot.slane %v2292_v26, 5  ;;  %v2330_v37 = vshll.u32 %v7554_v48, 16  ;;  %v2261_v34 = vsel %vm6889_vm3, %v2256_v30, %v7518_v4  ;;  %v2303_v40 = vor.u32 %v2302_v44, %v2299_v31 }
  0x96   : > { %6267 = vmatmul.mubr.msk.bf16.gmra.mxu1 %vm777_vm2, %v9971_v46  ;;  %v7587_v43 = vrot.slane %v2306_v16, 5  ;;  %v2312_v39 = vrot.slane %v2310_v24, 4  ;;  %v2323_v36 = vrot.slane %v2321_v35, 4  ;;  %v2326_v15 = vrot.slane %v2324_v56, 5  ;;  %v7610_v24 = vld [vmem:[%s6849_s21 + $0x70] sm:$0xf] }
  0x97   : > { %6270 = vmatprep.mubr.msk.bf16.mxu1 %vm777_vm2, %v9972_v0  ;;  %v2334_v3 = vshrl.u32 %v7554_v48, 16  ;;  %v2345_v1 = vshrl.u32 %v5675_v2, 16  ;;  %v2271_v20 = vsel %vm6889_vm3, %v2266_v17, %v2270_v51  ;;  %v2316_v13 = vshll.u32 %v7567_v12, 16  ;;  %v7620_v35 = vld [vmem:[%s6849_s21 + $0x68] sm:$0x1] }
  0x98   : > { %v2348_v4 = vshll.u32 %v5675_v2, 16  ;;  %v2354_v26 = vshll.u32 %v7571_v49, 16  ;;  %v9973_v53 = vcombine.low %v7382_v5, %v7401_v62  ;;  %v2285_v30 = vsel %vm6889_vm3, %v2280_v22, %v7529_v7  ;;  %v5681_v22 = vld [vmem:[%s6849_s21 + $0x78] sm:$0xf] }
  0x99   : > { %v2295_v31 = vsel %vm6889_vm3, %v2290_v52, %v2294_v25  ;;  %v7607_v44 = vrot.slane %v2330_v37, 5  ;;  %v2336_v16 = vrot.slane %v2334_v3, 4  ;;  %v9974_v2 = vcombine.low %v7394_v28, %v7420_v27 }
  0x9a   : > { %v7616_v5 = vrot.slane %v2303_v40, 4  ;;  %v2313_v62 = vor.u32 %v2312_v39, %v7587_v43  ;;  %v2347_v7 = vrot.slane %v2345_v1, 4  ;;  %v2358_v46 = vshrl.u32 %v7571_v49, 16 }
  0x9b   : > { %6307 = vmatmul.mubr.msk.bf16.gmra.mxu0 %vm777_vm2, %v9973_v53  ;;  %v7623_v17 = vcombine.low %v2261_v34, %v2271_v20  ;;  %v2327_v51 = vor.u32 %v2326_v15, %v2323_v36  ;;  %v2350_v56 = vrot.slane %v2348_v4, 5  ;;  %v2369_v0 = vshrl.u32 %v5678_v42, 16  ;;  %v7636_v34 = vld [vmem:[%s6849_s21 + $0x74] sm:$0x1]  ;;  %v7646_v15 = vld [vmem:[%s6849_s21 + $0x7c] sm:$0xf] }
  0x9c   : > { %6310 = vmatprep.mubr.msk.bf16.mxu0 %vm777_vm2, %v9974_v2  ;;  %v9975_v28 = vcombine.low %v9961_v54, %v9960_v19  ;;  %v7630_v27 = vrot.slane %v2316_v13, 5  ;;  %v2340_v52 = vshll.u32 %v7591_v57, 16  ;;  %v7633_v25 = vrot.slane %v2354_v26, 5 }
  0x9d   : > { %v2360_v37 = vrot.slane %v2358_v46, 4  ;;  %v9976_v40 = vcombine.low %v9965_v18, %v9964_v6  ;;  %v7642_v39 = vcombine.low %v2285_v30, %v2295_v31  ;;  %v2337_v19 = vor.u32 %v2336_v16, %v7607_v44 }
  0x9e   : > { %6271 = vmatmul.mubr.msk.bf16.gmra.mxu1 %vm777_vm2, %v9975_v28  ;;  %v2371_v54 = vrot.slane %v2369_v0, 4  ;;  %v2372_v36 = vshll.u32 %v5678_v42, 16  ;;  %v2309_v3 = vsel %vm6889_vm3, %v7616_v5, %v7587_v43  ;;  %v2314_v1 = vrot.slane %v2313_v62, 4  ;;  %v5684_v42 = vld [vmem:[%s6849_s21 + $0x84] sm:$0xf]  ;;  %v6618_v43 = vld [vmem:[%s6849_s21 + $0xc] sm:$0xff]  }
  0x9f   : > { %6274 = vmatprep.mubr.msk.bf16.mxu1 %vm777_vm2, %v9976_v40  ;;  %v2378_v20 = vshll.u32 %v7610_v24, 16  ;;  %v2382_v6 = vshrl.u32 %v7610_v24, 16  ;;  %v2328_v18 = vrot.slane %v2327_v51, 4  ;;  %v2351_v13 = vor.u32 %v2350_v56, %v2347_v7  ;;  %v7671_v51 = vld [vmem:[%s6849_s21 + $0x80] sm:$0x1] }
  0xa0   : > { %v2364_v4 = vshll.u32 %v7620_v35, 16  ;;  %v2374_v26 = vrot.slane %v2372_v36, 5  ;;  %v2342_v53 = vrot.slane %v2340_v52, 5  ;;  %v2361_v30 = vor.u32 %v2360_v37, %v7633_v25 }
  0xa1   : > { %v7657_v31 = vrot.slane %v2378_v20, 5  ;;  %v2393_v16 = vshrl.u32 %v5681_v22, 16  ;;  %v2338_v2 = vrot.slane %v2337_v19, 4  ;;  %v2384_v62 = vrot.slane %v2382_v6, 4  ;;  %v7698_v20 = vld [vmem:[%s6849_s21 + $0x94] sm:$0xf] }
  0xa2   : > { %v2375_v5 = vor.u32 %v2374_v26, %v2371_v54  ;;  %v2388_v7 = vshll.u32 %v7636_v34, 16  ;;  %v2319_v46 = vsel %vm6889_vm3, %v2314_v1, %v7630_v27  ;;  %v2396_v56 = vshll.u32 %v5681_v22, 16  ;;  %v5687_v54 = vld [vmem:[%s6849_s21 + $0x90] sm:$0xf]  ;;  %9979 = vst [vmem:[#allocation8_spill] sm:$0xff] %v7698_v20  ;;  %v6620_v6 = vld [vmem:[%s6849_s21 + $0x18] sm:$0xff]  }
  0xa3   : > { %6311 = vmatmul.mubr.msk.bf16.gmra.mxu0 %vm777_vm2, %v5565_v60  ;;  %v2402_v23 = vshll.u32 %v7646_v15, 16  ;;  %v2406_v11 = vshrl.u32 %v7646_v15, 16  ;;  %v7676_v60 = vld [vmem:[%s6849_s21 + $0x88] sm:$0xf]  ;;  %v2333_v0 = vsel %vm6889_vm3, %v2328_v18, %v7607_v44  ;;  %v2366_v28 = vrot.slane %v2364_v4, 5 }
  0xa4   : > { %6354 = vmatprep.mubr.msk.bf16.mxu0 %vm777_vm2, %v7562_v55  ;;  %9977 = vst [vmem:[#allocation7_spill] sm:$0xff] %v7676_v60  ;;  %v2352_v55 = vrot.slane %v2351_v13, 4  ;;  %v2385_v52 = vor.u32 %v2384_v62, %v7657_v31  ;;  %v9978_v27 = vcombine.low %v9967_v61, %v7154_v32  ;;  %v2362_v22 = vrot.slane %v2361_v30, 4  ;;  %v6631_v32 = vld [vmem:[%s9906_s2 + $0x60] sm:$0xff]   ;;  %v6629_v62 = vld [vmem:[%s9906_s2 + $0x50] sm:$0xff]  }
  0xa5   : > { %v2395_v37 = vrot.slane %v2393_v16, 4  ;;  %v2398_v40 = vrot.slane %v2396_v56, 5  ;;  %v2417_v19 = vshrl.u32 %v5684_v42, 16  ;;  %v2343_v44 = vsel %vm6889_vm3, %v2338_v2, %v2342_v53  ;;  %v6622_v2 = vld [vmem:[%s6849_s21 + $0x24] sm:$0xff]  }
  0xa6   : > { %6275 = vmatmul.mubr.msk.bf16.gmra.mxu1 %vm777_vm2, %v9978_v27  ;;  %v7690_v36 = vrot.slane %v2375_v5, 4  ;;  %v7692_v1 = vrot.slane %v2388_v7, 5  ;;  %v2420_v61 = vshll.u32 %v5684_v42, 16  ;;  %v7701_v18 = vrot.slane %v2402_v23, 5 }
  0xa7   : > { %6318 = vmatprep.mubr.msk.bf16.mxu1 %vm777_vm2, %v6618_v43  ;;  %v2408_v13 = vrot.slane %v2406_v11, 4  ;;  %v2419_v4 = vrot.slane %v2417_v19, 4  ;;  %v2426_v26 = vshll.u32 %v7676_v60, 16  ;;  %v2386_v53 = vrot.slane %v2385_v52, 4  ;;  %v7724_v52 = vld [vmem:[%s6849_s21 + $0x8c] sm:$0x1] }
  0xa8   : > { %v2412_v30 = vshll.u32 %v7671_v51, 16  ;;  %v2422_v16 = vrot.slane %v2420_v61, 5  ;;  %v2430_v43 = vshrl.u32 %v7676_v60, 16  ;;  %v2357_v42 = vsel %vm6889_vm3, %v2352_v55, %v7633_v25  ;;  %9980 = vst [vmem:[#allocation10_spill] sm:$0xff] %v7724_v52  ;;  %v7854_v60 = vld [vmem:[%s6849_s21 + $0xc8] sm:$0x1] }
  0xa9   : > { %v2367_v5 = vsel %vm6889_vm3, %v2362_v22, %v2366_v28  ;;  %v2399_v7 = vor.u32 %v2398_v40, %v2395_v37  ;;  %v7715_v56 = vrot.slane %v2426_v26, 5  ;;  %v7719_v23 = vcombine.low %v2309_v3, %v2319_v46  ;;  %v5690_v28 = vld [vmem:[%s6849_s21 + $0x9c] sm:$0xf]  ;;  %v7749_v40 = vld [vmem:[%s9906_s2 + $0x88] sm:$0xff]  }
  0xaa   : > { %v7721_v11 = vcombine.low %v2333_v0, %v2343_v44  ;;  %v2432_v25 = vrot.slane %v2430_v43, 4  ;;  %v2441_v55 = vshrl.u32 %v5687_v54, 16  ;;  %v2409_v27 = vor.u32 %v2408_v13, %v7701_v18  ;;  %9982 = vst [vmem:[#allocation5_spill] sm:$0xff] %v7749_v40 }
  0xab   : > { %6355 = vmatmul.mubr.msk.bf16.vlgmr.msra.gmra.mxu0 %vm777_vm2, %v7564_v9  ;;  %v2423_v22 = vor.u32 %v2422_v16, %v2419_v4  ;;  %v2444_v37 = vshll.u32 %v5687_v54, 16  ;;  %v2450_v9 = vshll.u32 %v7698_v20, 16  ;;  %v7732_v3 = vcombine.low %v2357_v42, %v2367_v5  ;;  %v5693_v16 = vld [vmem:[%s6849_s21 + $0xa8] sm:$0xf] }
  0xac   : > { %6423 = vmatpush3.bf16.msra.mxu0 %v7263_v63  ;;  %6358 = vmatprep.mubr.msk.bf16.mxu0 %vm777_vm2, %v7577_v38  ;;  %v2381_v46 = vsel %vm6889_vm3, %v7690_v36, %v7657_v31  ;;  %v2391_v63 = vsel %vm6889_vm3, %v2386_v53, %v7692_v1  ;;  %v7741_v0 = vrot.slane %v2412_v30, 5  ;;  %v7744_v38 = vld [vmem:[%s6849_s21 + $0xa0] sm:$0xf]  ;;  %v7752_v19 = vrot.slane %v2399_v7, 4  ;;  %v7760_v36 = vld [vmem:[%s9906_s2 + $0x78] sm:$0xff]  }
  0xad   : > { %6424 = vmatprep.subr.bf16.mxu0 %v6631_v32  ;;  %9981 = vst [vmem:[#allocation9_spill] sm:$0xff] %v7744_v38  ;;  %v2433_v31 = vor.u32 %v2432_v25, %v7715_v56  ;;  %v2436_v54 = vshll.u32 %v7724_v52, 16  ;;  %v2454_v44 = vshrl.u32 %v7698_v20, 16  ;;  %9983 = vst [vmem:[#allocation11_spill] sm:$0xff] %v7760_v36  ;;  %v7765_v1 = vld [vmem:[%s6849_s21 + $0x98] sm:$0x1] }
  0xae   : > { %6319 = vmatmul.mubr.msk.bf16.vlgmr.msra.gmra.mxu1 %vm777_vm2, %v6620_v6  ;;  %9984 = vst [vmem:[#allocation13_spill] sm:$0xff] %v7765_v1  ;;  %v2443_v61 = vrot.slane %v2441_v55, 4  ;;  %v2446_v6 = vrot.slane %v2444_v37, 5  ;;  %v2465_v13 = vshrl.u32 %v5690_v28, 16  ;;  %v2468_v4 = vshll.u32 %v5690_v28, 16  ;;  %v6623_v25 = vld [vmem:[%s6849_s21 + $0x30] sm:$0xff]  }
  0xaf   : > { %6387 = vmatpush3.bf16.msra.mxu1 %v7293_v41  ;;  %6322 = vmatprep.mubr.msk.bf16.mxu1 %vm777_vm2, %v6622_v2  ;;  %v7767_v26 = vrot.slane %v2409_v27, 4  ;;  %v7769_v53 = vrot.slane %v2423_v22, 4  ;;  %v7771_v30 = vrot.slane %v2450_v9, 5  ;;  %v2474_v41 = vshll.u32 %v7744_v38, 16  ;;  %v7777_v7 = vld [vmem:[%s6849_s21 + $0xac] sm:$0xf] }
  0xb0   : > { %6388 = vmatprep.subr.bf16.mxu1 %v6629_v62  ;;  %6425 = vmatpush3.bf16.msra.mxu0 %v6631_v32  ;;  %v2456_v43 = vrot.slane %v2454_v44, 4  ;;  %v2467_v2 = vrot.slane %v2465_v13, 4  ;;  %v2470_v42 = vrot.slane %v2468_v4, 5  ;;  %v2478_v5 = vshrl.u32 %v7744_v38, 16  ;;  %9985 = vst [vmem:[#allocation12_spill] sm:$0xff] %v7777_v7  ;;  %v6624_v22 = vld [vmem:[%s6849_s21 + $0x3c] sm:$0xff]  }
  0xb1   : > { %6494 = vmatprep.subr.bf16.mxu0 %v7749_v40  ;;  %v7781_v32 = vcombine.low %v2381_v46, %v2391_v63  ;;  %v7783_v55 = vrot.slane %v2433_v31, 4  ;;  %v7785_v28 = vrot.slane %v2436_v54, 5  ;;  %v2460_v27 = vshll.u32 %v7765_v1, 16  ;;  %v7792_v9 = vld [vmem:[%s6849_s21 + $0xa4] sm:$0x1] }
  0xb2   : > { %v2447_v37 = vor.u32 %v2446_v6, %v2443_v61  ;;  %9986 = vst [vmem:[#allocation14_spill] sm:$0xff] %v7792_v9  ;;  %v7794_v44 = vrot.slane %v2474_v41, 5  ;;  %v2480_v46 = vrot.slane %v2478_v5, 4  ;;  %v2489_v63 = vshrl.u32 %v5693_v16, 16  ;;  %v7814_v13 = vld [vmem:[%s6849_s21 + $0xb0] sm:$0x1] }
  0xb3   : > { %6359 = vmatmul.mubr.msk.bf16.gmra.mxu0 %vm777_vm2, %v7623_v17  ;;  %6389 = vmatpush3.bf16.msra.mxu1 %v6629_v62  ;;  %v2492_v62 = vshll.u32 %v5693_v16, 16  ;;  %v2498_v54 = vshll.u32 %v7777_v7, 16  ;;  %v2457_v61 = vor.u32 %v2456_v43, %v7771_v30  ;;  %v2471_v6 = vor.u32 %v2470_v42, %v2467_v2  ;;  %9987 = vst [vmem:[#allocation15_spill] sm:$0xff] %v7814_v13  ;;  %v5696_v41 = vld [vmem:[%s6849_s21 + $0xb4] sm:$0xf] }
  0xb4   : > { %6362 = vmatprep.mubr.msk.bf16.mxu0 %vm777_vm2, %v7642_v39  ;;  %6458 = vmatprep.subr.bf16.mxu1 %v7760_v36  ;;  %v2491_v4 = vrot.slane %v2489_v63, 4  ;;  %v2484_v16 = vshll.u32 %v7792_v9, 16  ;;  %v2502_v17 = vshrl.u32 %v7777_v7, 16  ;;  %v7823_v36 = vld [vmem:[%s6849_s21 + $0xb8] sm:$0xf]  ;;  %v2439_v43 = vsel %vm6889_vm3, %v7783_v55, %v7785_v28 }
  0xb5   : > { %v2494_v5 = vrot.slane %v2492_v62, 5  ;;  %v7819_v31 = vrot.slane %v2498_v54, 5  ;;  %9988 = vst [vmem:[#allocation6_spill] sm:$0xff] %v7823_v36  ;;  %v7830_v2 = vrot.slane %v2447_v37, 4  ;;  %v7832_v42 = vrot.slane %v2460_v27, 5  ;;  %v6625_v27 = vld [vmem:[%s6849_s21 + $0x48] sm:$0xff]  }
  0xb6   : > { %6323 = vmatmul.mubr.msk.bf16.gmra.mxu1 %vm777_vm2, %v6623_v25  ;;  %v2481_v25 = vor.u32 %v2480_v46, %v7794_v44  ;;  %v2504_v63 = vrot.slane %v2502_v17, 4  ;;  %v2508_v62 = vshll.u32 %v7814_v13, 16  ;;  %v7837_v54 = vld [vmem:[%s6849_s21 + $0xbc] sm:$0x1]  ;;  %v2513_v39 = vshrl.u32 %v5696_v41, 16 }
  0xb7   : > { %6326 = vmatprep.mubr.msk.bf16.mxu1 %vm777_vm2, %v6624_v22  ;;  %v2516_v22 = vshll.u32 %v5696_v41, 16  ;;  %v2458_v40 = vrot.slane %v2457_v61, 4  ;;  %v2495_v7 = vor.u32 %v2494_v5, %v2491_v4  ;;  %v2522_v9 = vshll.u32 %v7823_v36, 16  ;;  %v5699_v28 = vld [vmem:[%s6849_s21 + $0xc0] sm:$0xf]  ;;  %v6626_v41 = vld [vmem:[%s6849_s21 + $0x54] sm:$0xff]  }
  0xb8   : > { %v2526_v55 = vshrl.u32 %v7823_v36, 16  ;;  %v2472_v37 = vrot.slane %v2471_v6, 4  ;;  %v2486_v38 = vrot.slane %v2484_v16, 5  ;;  %v2505_v46 = vor.u32 %v2504_v63, %v7819_v31  ;;  %v7845_v13 = vld [vmem:[%s6849_s21 + $0xc4] sm:$0xf] }
  0xb9   : > { %v2515_v17 = vrot.slane %v2513_v39, 4  ;;  %v2518_v61 = vrot.slane %v2516_v22, 5  ;;  %v2524_v4 = vrot.slane %v2522_v9, 5  ;;  %v2532_v1 = vshll.u32 %v7837_v54, 16 }
  0xba   : > { %v2528_v5 = vrot.slane %v2526_v55, 4  ;;  %v2482_v6 = vrot.slane %v2481_v25, 4  ;;  %v2510_v16 = vrot.slane %v2508_v62, 5  ;;  %v2537_v36 = vshrl.u32 %v5699_v28, 16 }
  0xbb   : > { %6363 = vmatmul.mubr.msk.bf16.gmra.mxu0 %vm777_vm2, %v7719_v23  ;;  %v2540_v63 = vshll.u32 %v5699_v28, 16  ;;  %v2496_v39 = vrot.slane %v2495_v7, 4  ;;  %v2519_v20 = vor.u32 %v2518_v61, %v2515_v17  ;;  %v2546_v23 = vshll.u32 %v7845_v13, 16  ;;  %v6627_v61 = vld [vmem:[%s6849_s21 + $0x60] sm:$0xff]  }
  0xbc   : > { %6366 = vmatprep.mubr.msk.bf16.mxu0 %vm777_vm2, %v7721_v11  ;;  %v2529_v52 = vor.u32 %v2528_v5, %v2524_v4  ;;  %v2506_v9 = vrot.slane %v2505_v46, 4  ;;  %v2539_v22 = vrot.slane %v2537_v36, 4  ;;  %v2550_v11 = vshrl.u32 %v7845_v13, 16 }
  0xbd   : > { %v2542_v55 = vrot.slane %v2540_v63, 5  ;;  %v2520_v25 = vrot.slane %v2519_v20, 4  ;;  %v2534_v7 = vrot.slane %v2532_v1, 5  ;;  %v7860_v28 = vrot.slane %v2546_v23, 5 }
  0xbe   : > { %6327 = vmatmul.mubr.msk.bf16.gmra.mxu1 %vm777_vm2, %v6625_v27  ;;  %v2530_v62 = vrot.slane %v2529_v52, 4  ;;  %v9989_v27 = vsel %vm6889_vm3, %v7767_v26, %v7741_v0  ;;  %v9990_v36 = vsel %vm6889_vm3, %v7752_v19, %v7701_v18  ;;  %v2556_v20 = vshll.u32 %v7854_v60, 16  ;;  %v5742_v26 = vld [vmem:[%s6849_s21 + $0x24] sm:$0xe] }
  0xbf   : > { %6330 = vmatprep.mubr.msk.bf16.mxu1 %vm777_vm2, %v6626_v41  ;;  %v5715_v46 = vcombine.low %v9990_v36, %v9989_v27  ;;  %v2543_v17 = vor.u32 %v2542_v55, %v2539_v22  ;;  %v2552_v41 = vrot.slane %v2550_v11, 4  ;;  %v9991_v52 = vsel %vm6889_vm3, %v7769_v53, %v7715_v56 }
  0xc0   : > { %v5716_v1 = vcombine.low %v9991_v52, %v2439_v43  ;;  %v2453_v0 = vsel %vm6889_vm3, %v7830_v2, %v7771_v30  ;;  %v2463_v18 = vsel %vm6889_vm3, %v2458_v40, %v7832_v42  ;;  %v2477_v19 = vsel %vm6889_vm3, %v2472_v37, %v7794_v44  ;;  %v7899_v2 = vld [vmem:[%s6849_s21 + $0xc] sm:$0xe]  ;;  %v5743_v37 = vld [vmem:[%s6849_s21 + $0x30] sm:$0xe] }
  0xc1   : > { %v2487_v56 = vsel %vm6889_vm3, %v2482_v6, %v2486_v38  ;;  %v2501_v53 = vsel %vm6889_vm3, %v2496_v39, %v7819_v31  ;;  %v2511_v30 = vsel %vm6889_vm3, %v2506_v9, %v2510_v16  ;;  %v2553_v43 = vor.u32 %v2552_v41, %v7860_v28  ;;  %v6628_v40 = vld [vmem:[%s6849_s21 + $0x6c] sm:$0xff]   ;;  %v5744_v9 = vld [vmem:[%s6849_s21 + $0x3c] sm:$0xe] }
  0xc2   : > { %v2525_v44 = vsel %vm6889_vm3, %v2520_v25, %v2524_v4  ;;  %v2535_v38 = vsel %vm6889_vm3, %v2530_v62, %v2534_v7  ;;  %v7908_v42 = vrot.slane %v2543_v17, 4  ;;  %v2932_v31 = vrot.slane %v7397_v33, 5  ;;  %v5745_v25 = vld [vmem:[%s6849_s21 + $0x48] sm:$0xe]  ;;  %v6637_v33 = vld [vmem:[%s6849_s21 + $0xc0] sm:$0xff]  }
  0xc3   : > { %6367 = vmatmul.mubr.msk.bf16.gmra.mxu0 %vm777_vm2, %v7732_v3  ;;  %v7914_v5 = vcombine.low %v2453_v0, %v2463_v18  ;;  %v7916_v3 = vrot.slane %v2553_v43, 4  ;;  %v7918_v6 = vrot.slane %v2556_v20, 5  ;;  %v5758_v16 = vrot.slane %v5742_v26, 9  ;;  %v5746_v20 = vld [vmem:[%s6849_s21 + $0x54] sm:$0xe]  ;;  %v6630_v26 = vld [vmem:[%s6849_s21 + $0x78] sm:$0xff]  }
  0xc4   : > { %6370 = vmatprep.mubr.msk.bf16.mxu0 %vm777_vm2, %v7781_v32  ;;  %v7920_v4 = vcombine.low %v2477_v19, %v2487_v56  ;;  %v7922_v63 = vcombine.low %v2501_v53, %v2511_v30  ;;  %v5756_v39 = vrot.slane %v7899_v2, 9  ;;  %v2946_v23 = vrot.slane %v7448_v47, 5  ;;  %v5747_v53 = vld [vmem:[%s6849_s21 + $0x60] sm:$0xe] }
  0xc5   : > { %v7928_v32 = vcombine.low %v2525_v44, %v2535_v38  ;;  %v2935_v22 = vrot.slane %v7424_v8, 5  ;;  %v2949_v55 = vrot.slane %v7466_v21, 5  ;;  %v5759_v11 = vrot.slane %v5743_v37, 9  ;;  %v5748_v37 = vld [vmem:[%s6849_s21 + $0x6c] sm:$0xe] }
  0xc6   : > { %6331 = vmatmul.mubr.msk.bf16.gmra.mxu1 %vm777_vm2, %v6627_v61  ;;  %v2549_v47 = vsel %vm6889_vm3, %v7908_v42, %v7860_v28  ;;  %v7940_v62 = vrot.slane %v2932_v31, 4  ;;  %v7944_v7 = vsel %vm7175_vm6, %v5758_v16, %v2946_v23  ;;  %v2948_v21 = vrot.slane %v2946_v23, 4  ;;  %v6638_v42 = vld [vmem:[%s6849_s21 + $0x18] sm:$0xff]  }
  0xc7   : > { %6334 = vmatprep.mubr.msk.bf16.mxu1 %vm777_vm2, %v6628_v40  ;;  %v2559_v27 = vsel %vm6889_vm3, %v7916_v3, %v7918_v6  ;;  %v2953_v36 = vrot.slane %v7479_v58, 5  ;;  %v2956_v17 = vrot.slane %v7511_v10, 5  ;;  %v5760_v41 = vrot.slane %v5744_v9, 9  ;;  %v5749_v9 = vld [vmem:[%s6849_s21 + $0x78] sm:$0xe] }
  0xc8   : > { %v7955_v52 = vsel %vm7175_vm6, %v2948_v21, %v2949_v55  ;;  %v2960_v0 = vrot.slane %v7495_v14, 5  ;;  %v2963_v18 = vrot.slane %v7527_v50, 5  ;;  %v5761_v19 = vrot.slane %v5745_v25, 9  ;;  %v6632_v14 = vld [vmem:[%s6849_s21 + $0x84] sm:$0xff]   ;;  %v5741_v6 = vld [vmem:[%s6849_s21 + $0x18] sm:$0xe] }
  0xc9   : > { %v5778_v61 = vcombine.low %v7944_v7, %v7955_v52  ;;  %v7964_v58 = vsel %vm7175_vm6, %v5759_v11, %v2953_v36  ;;  %v2955_v10 = vrot.slane %v2953_v36, 4  ;;  %v2967_v56 = vrot.slane %v7537_v59, 5 }
  0xca   : > { %v7972_v50 = vsel %vm7175_vm6, %v5760_v41, %v2960_v0  ;;  %v2962_v30 = vrot.slane %v2960_v0, 4  ;;  %v2970_v43 = vrot.slane %v7567_v12, 5  ;;  %v5762_v40 = vrot.slane %v5746_v20, 9  ;;  %v5750_v41 = vld [vmem:[%s6849_s21 + $0x84] sm:$0xe] }
  0xcb   : > { %6371 = vmatmul.mubr.msk.bf16.gmra.mxu0 %vm777_vm2, %v5715_v46  ;;  %v7978_v44 = vsel %vm7175_vm6, %v2955_v10, %v2956_v17  ;;  %v7982_v59 = vsel %vm7175_vm6, %v5761_v19, %v2967_v56  ;;  %v2969_v46 = vrot.slane %v2967_v56, 4  ;;  %v2974_v38 = vrot.slane %v7554_v48, 5  ;;  %v5751_v56 = vld [vmem:[%s6849_s21 + $0x90] sm:$0xe] }
  0xcc   : > { %6374 = vmatprep.mubr.msk.bf16.mxu0 %vm777_vm2, %v5716_v1  ;;  %v5779_v16 = vcombine.low %v7964_v58, %v7978_v44  ;;  %v7990_v12 = vsel %vm7175_vm6, %v2962_v30, %v2963_v18  ;;  %v2977_v1 = vrot.slane %v7591_v57, 5  ;;  %v5763_v23 = vrot.slane %v5747_v53, 9  ;;  %v6633_v53 = vld [vmem:[%s6849_s21 + $0x90] sm:$0xff]  }
  0xcd   : > { %v5780_v55 = vcombine.low %v7972_v50, %v7990_v12  ;;  %v7999_v48 = vsel %vm7175_vm6, %v2969_v46, %v2970_v43  ;;  %v8003_v11 = vsel %vm7175_vm6, %v5762_v40, %v2974_v38  ;;  %v2976_v25 = vrot.slane %v2974_v38, 4  ;;  %v6634_v43 = vld [vmem:[%s6849_s21 + $0x9c] sm:$0xff]   ;;  %v9992_v38 = vld [vmem:[#allocation7_spill] sm:$0xff] }
  0xce   : > { %6335 = vmatmul.mubr.msk.bf16.gmra.mxu1 %vm777_vm2, %v6630_v26  ;;  %v5781_v57 = vcombine.low %v7982_v59, %v7999_v48  ;;  %v2981_v21 = vrot.slane %v7571_v49, 5  ;;  %v2984_v36 = vrot.slane %v7620_v35, 5  ;;  %v5764_v17 = vrot.slane %v5748_v37, 9  ;;  %v6647_v59 = vld [vmem:[%s6849_s21 + $0x6c] sm:$0xff]   ;;  %v6648_v48 = vld [vmem:[%s6849_s21 + $0x78] sm:$0xff]  }
  0xcf   : > { %6338 = vmatprep.mubr.msk.bf16.mxu1 %vm777_vm2, %v6632_v14  ;;  %v8013_v20 = vsel %vm7175_vm6, %v2976_v25, %v2977_v1  ;;  %v2988_v0 = vrot.slane %v7610_v24, 5  ;;  %v2991_v18 = vrot.slane %v7636_v34, 5  ;;  %v5765_v19 = vrot.slane %v5749_v9, 9  ;;  %v5752_v1 = vld [vmem:[%s6849_s21 + $0x9c] sm:$0xe] }
  0xd0   : > { %v8021_v49 = vsel %vm7175_vm6, %v5763_v23, %v2981_v21  ;;  %v2983_v35 = vrot.slane %v2981_v21, 4  ;;  %v2995_v10 = vrot.slane %v7646_v15, 5  ;;  %v2998_v34 = vrot.slane %v7671_v51, 5  ;;  %v9993_v23 = vld [vmem:[#allocation10_spill] sm:$0xff] }
  0xd1   : > { %v8028_v14 = vsel %vm7175_vm6, %v5764_v17, %v2988_v0  ;;  %v2990_v24 = vrot.slane %v2988_v0, 4  ;;  %v5766_v30 = vrot.slane %v5750_v41, 9  ;;  %v3002_v37 = vrot.slane %v9992_v38, 5  ;;  %v5753_v21 = vld [vmem:[%s6849_s21 + $0xa8] sm:$0xe] }
  0xd2   : > { %v8036_v40 = vsel %vm7175_vm6, %v2983_v35, %v2984_v36  ;;  %v8040_v15 = vsel %vm7175_vm6, %v5765_v19, %v2995_v10  ;;  %v2997_v46 = vrot.slane %v2995_v10, 4  ;;  %v3005_v9 = vrot.slane %v9993_v23, 5  ;;  %v9995_v35 = vld [vmem:[#allocation13_spill] sm:$0xff]  ;;  %v9997_v38 = vld [vmem:[#allocation14_spill] sm:$0xff] }
  0xd3   : > { %6375 = vmatmul.mubr.msk.bf16.gmra.mxu0 %vm777_vm2, %v7914_v5  ;;  %v8050_v5 = vsel %vm7175_vm6, %v2990_v24, %v2991_v18  ;;  %v5767_v25 = vrot.slane %v5751_v56, 9  ;;  %v3004_v41 = vrot.slane %v3002_v37, 4  ;;  %v9994_v18 = vld [vmem:[#allocation8_spill] sm:$0xff]  ;;  %v3012_v10 = vrot.slane %v9995_v35, 5  ;;  %v5754_v24 = vld [vmem:[%s6849_s21 + $0xb4] sm:$0xe] }
  0xd4   : > { %6378 = vmatprep.mubr.msk.bf16.mxu0 %vm777_vm2, %v7920_v4  ;;  %v8058_v17 = vsel %vm7175_vm6, %v2997_v46, %v2998_v34  ;;  %v8062_v4 = vsel %vm7175_vm6, %v5766_v30, %v3002_v37  ;;  %v3009_v19 = vrot.slane %v9994_v18, 5  ;;  %v5768_v56 = vrot.slane %v5752_v1, 9  ;;  %v9996_v30 = vld [vmem:[#allocation9_spill] sm:$0xff]  ;;  %v9998_v35 = vld [vmem:[#allocation12_spill] sm:$0xff]  ;;  %v6635_v36 = vld [vmem:[%s6849_s21 + $0xa8] sm:$0xff]  }
  0xd5   : > { %v8073_v34 = vsel %vm7175_vm6, %v3004_v41, %v3005_v9  ;;  %v3016_v46 = vrot.slane %v9996_v30, 5  ;;  %v5769_v37 = vrot.slane %v5753_v21, 9  ;;  %v5755_v0 = vld [vmem:[%s6849_s21 + $0xc0] sm:$0xe]  ;;  %v9999_v30 = vld [vmem:[#allocation15_spill] sm:$0xff]  ;;  %v5770_v21 = vrot.slane %v5754_v24, 9 }
  0xd6   : > { %6339 = vmatmul.mubr.msk.bf16.gmra.mxu1 %vm777_vm2, %v6633_v53  ;;  %v3019_v53 = vrot.slane %v9997_v38, 5  ;;  %v8081_v1 = vsel %vm7175_vm6, %v5767_v25, %v3009_v19  ;;  %v3011_v18 = vrot.slane %v3009_v19, 4  ;;  %v3026_v38 = vrot.slane %v9999_v30, 5 }
  0xd7   : > { %6342 = vmatprep.mubr.msk.bf16.mxu1 %vm777_vm2, %v6634_v43  ;;  %v3023_v43 = vrot.slane %v9998_v35, 5  ;;  %v8087_v9 = vsel %vm7175_vm6, %v5768_v56, %v3016_v46  ;;  %v3018_v41 = vrot.slane %v3016_v46, 4  ;;  %v10000_v35 = vld [vmem:[#allocation6_spill] sm:$0xff]  ;;  %v6636_v56 = vld [vmem:[%s6849_s21 + $0xb4] sm:$0xff]   ;;  %v2933_v3 = vsel %vm7175_vm6, %v5756_v39, %v2932_v31 }
  0xd8   : > { %v8093_v23 = vsel %vm7175_vm6, %v3011_v18, %v3012_v10  ;;  %v3030_v51 = vrot.slane %v10000_v35, 5  ;;  %v3033_v10 = vrot.slane %v7837_v54, 5  ;;  %v5771_v18 = vrot.slane %v5755_v0, 9  ;;  %v6642_v35 = vld [vmem:[%s6849_s21 + $0x30] sm:$0xff]  }
  0xd9   : > { %v8097_v25 = vsel %vm7175_vm6, %v5769_v37, %v3023_v43  ;;  %v3025_v19 = vrot.slane %v3023_v43, 4  ;;  %v8107_v46 = vsel %vm7175_vm6, %v3018_v41, %v3019_v53  ;;  %v3037_v0 = vrot.slane %v7845_v13, 5  ;;  %v6662_v41 = vld [vmem:[%s6849_s21 + $0x1c] sm:$0xf] }
  0xda   : > { %v8120_v43 = vsel %vm7175_vm6, %v5770_v21, %v3030_v51  ;;  %v3032_v53 = vrot.slane %v3030_v51, 4  ;;  %v2939_v30 = vrot.slane %v6662_v41, 5  ;;  %v2936_v28 = vsel %vm7175_vm6, %v7940_v62, %v2935_v22  ;;  %v6663_v22 = vld [vmem:[%s6849_s21 + $0x20] sm:$0x1] }
  0xdb   : > { %6379 = vmatmul.mubr.msk.bf16.gmra.mxu0 %vm777_vm2, %v7922_v63  ;;  %v8116_v63 = vsel %vm7175_vm6, %v3025_v19, %v3026_v38  ;;  %v8147_v51 = vsel %vm7175_vm6, %v5771_v18, %v3037_v0  ;;  %v5776_v8 = vcombine.low %v2933_v3, %v2936_v28  ;;  %v5757_v31 = vrot.slane %v5741_v6, 9  ;;  %v6640_v19 = vld [vmem:[%s6849_s21 + $0x24] sm:$0xff]   ;;  %v8185_v18 = vld [vmem:[%s6849_s21 + $0x1c] sm:$0xf] }
  0xdc   : > { %6382 = vmatprep.mubr.msk.bf16.mxu0 %vm777_vm2, %v7928_v32  ;;  %v3040_v32 = vrot.slane %v7854_v60, 5  ;;  %v8130_v38 = vsel %vm7175_vm6, %v3032_v53, %v3033_v10  ;;  %v5721_v60 = vcombine.low %v2549_v47, %v2559_v27  ;;  %v2941_v39 = vrot.slane %v2939_v30, 4  ;;  %v5880_v10 = vld [vmem:[%s6849_s21 + $0x18] sm:$0xf]  ;;  %v10001_v41 = vld [vmem:[#allocation5_spill] sm:$0xff] }
  0xdd   : > { %v2942_v62 = vrot.slane %v6663_v22, 5  ;;  %v2940_v27 = vsel %vm7175_vm6, %v5757_v31, %v2939_v30  ;;  %v6649_v30 = vld [vmem:[%s9906_s2 + $0x70] sm:$0xff]   ;;  %v3777_v3 = vshll.u32 %v8185_v18, 16  ;;  %v3781_v28 = vshrl.u32 %v8185_v18, 16  ;;  %v6644_v22 = vld [vmem:[%s6849_s21 + $0x48] sm:$0xff]  }
  0xde   : > { %6343 = vmatmul.mubr.msk.bf16.gmra.mxu1 %vm777_vm2, %v6635_v36  ;;  %v3039_v36 = vrot.slane %v3037_v0, 4  ;;  %v5883_v0 = vld [vmem:[%s6849_s21 + $0x24] sm:$0xf]  ;;  %v10002_v31 = vld [vmem:[#allocation11_spill] sm:$0xff] }
  0xdf   : > { %6346 = vmatprep.mubr.msk.bf16.mxu1 %vm777_vm2, %v6636_v56  ;;  %v2943_v21 = vsel %vm7175_vm6, %v2941_v39, %v2942_v62  ;;  %v6651_v56 = vld [vmem:[%s9906_s2 + $0x80] sm:$0xff]   ;;  %v3795_v6 = vshll.u32 %v5883_v0, 16 }
  0xe0   : > { %v8164_v47 = vsel %vm7175_vm6, %v3039_v36, %v3040_v32  ;;  %v5777_v53 = vcombine.low %v2940_v27, %v2943_v21  ;;  %v8190_v32 = vld [vmem:[%s6849_s21 + $0x28] sm:$0xf]  ;;  %v3771_v36 = vshll.u32 %v5880_v10, 16  ;;  %v6643_v39 = vld [vmem:[%s6849_s21 + $0x3c] sm:$0xff]  }
  0xe1   : > { %v8210_v62 = vld [vmem:[%s6849_s21 + $0x20] sm:$0x1] }
  0xe2   : > { %v3773_v21 = vrot.slane %v3771_v36, 5  ;;  %v8224_v36 = vld [vmem:[%s6849_s21 + $0x34] sm:$0xf] }
  0xe3   : > { %6383 = vmatmul.mubr.msk.bf16.gmra.mxu0 %vm777_vm2, %v5721_v60  ;;  %v3768_v60 = vshrl.u32 %v5880_v10, 16 }
  0xe4   : > { %6426 = vmatprep.mubr.msk.bf16.mxu0 %vm777_vm2, %v6638_v42  ;;  %v3792_v42 = vshrl.u32 %v5883_v0, 16  ;;  %v5886_v0 = vld [vmem:[%s6849_s21 + $0x30] sm:$0xf] }
  0xe5   : > { %v3770_v27 = vrot.slane %v3768_v60, 4  ;;  %v5885_v60 = vld [vmem:[%s6849_s21 + $0x2c] sm:$0x1] }
  0xe6   : > { %6347 = vmatmul.mubr.msk.bf16.gmra.mxu1 %vm777_vm2, %v6637_v33  ;;  %v3801_v33 = vshll.u32 %v8190_v32, 16  ;;  %v3794_v10 = vrot.slane %v3792_v42, 4  ;;  %v5966_v42 = vld [vmem:[%s6849_s21 + $0x18] sm:$0xe]  ;;  %v4533_v12 = vrot.slane %v5885_v60, 5 }
  0xe7   : > { %6390 = vmatprep.mubr.msk.bf16.mxu1 %vm777_vm2, %v5776_v8  ;;  %v3805_v8 = vshrl.u32 %v8190_v32, 16  ;;  %v5982_v44 = vrot.slane %v5966_v42, 9 }
  0xe8   : > { %v8215_v7 = vrot.slane %v3801_v33, 5  ;;  %v3819_v33 = vshll.u32 %v5886_v0, 16 }
  0xe9   : > { %v3807_v52 = vrot.slane %v3805_v8, 4 }
  0xea   : > { %v3821_v13 = vrot.slane %v3819_v33, 5 }
  0xeb   : > { %6427 = vmatmul.mubr.msk.bf16.vlgmr.msra.gmra.mxu0 %vm777_vm2, %v6640_v19  ;;  %v8212_v19 = vrot.slane %v3777_v3, 5  ;;  %v3774_v3 = vor.u32 %v3773_v21, %v3770_v27  ;;  %v3825_v27 = vshll.u32 %v8224_v36, 16  ;;  %v3829_v21 = vshrl.u32 %v8224_v36, 16 }
  0xec   : > { %6495 = vmatpush3.bf16.msra.mxu0 %v10001_v41  ;;  %6430 = vmatprep.mubr.msk.bf16.mxu0 %vm777_vm2, %v6642_v35  ;;  %v3783_v35 = vrot.slane %v3781_v28, 4  ;;  %v4523_v41 = vrot.slane %v8185_v18, 5 }
  0xed   : > { %6496 = vmatprep.subr.bf16.mxu0 %v6651_v56  ;;  %v8254_v42 = vrot.slane %v3825_v27, 5  ;;  %v5889_v27 = vld [vmem:[%s6849_s21 + $0x3c] sm:$0xf] }
  0xee   : > { %6391 = vmatmul.mubr.msk.bf16.vlgmr.msra.gmra.mxu1 %vm777_vm2, %v5777_v53  ;;  %v3797_v53 = vrot.slane %v3795_v6, 5  ;;  %v3784_v28 = vor.u32 %v3783_v35, %v8212_v19  ;;  %v3816_v6 = vshrl.u32 %v5886_v0, 16  ;;  %v3775_v0 = vrot.slane %v3774_v3, 4 }
  0xef   : > { %6459 = vmatpush3.bf16.msra.mxu1 %v10002_v31  ;;  %6394 = vmatprep.mubr.msk.bf16.mxu1 %vm777_vm2, %v5778_v61  ;;  %v8218_v61 = vpop.f32.mrf.mxu0  ;;  %v3808_v31 = vor.u32 %v3807_v52, %v8215_v7 }
  0xf0   : > { %6460 = vmatprep.subr.bf16.mxu1 %v6649_v30  ;;  %6497 = vmatpush3.bf16.msra.mxu0 %v6651_v56  ;;  %v3787_v56 = vshll.u32 %v8210_v62, 16  ;;  %v3798_v8 = vor.u32 %v3797_v53, %v3794_v10  ;;  %v4526_v10 = vrot.slane %v8210_v62, 5  ;;  %v6646_v53 = vld [vmem:[%s6849_s21 + $0x60] sm:$0xff]   ;;  %v3785_v52 = vrot.slane %v3784_v28, 4 }
  0xf1   : > { %v8245_v35 = vpop.f32.mrf.mxu0  ;;  %v3818_v2 = vrot.slane %v3816_v6, 4  ;;  %v3809_v24 = vrot.slane %v3808_v31, 4  ;;  %v3831_v62 = vrot.slane %v3829_v21, 4  ;;  %v8261_v28 = vsel %vm7175_vm6, %v5982_v44, %v4523_v41  ;;  %v8288_v21 = vld [vmem:[%s6849_s21 + $0x40] sm:$0xf] }
  0xf2   : > { %v3789_v58 = vrot.slane %v3787_v56, 5  ;;  %v3799_v54 = vrot.slane %v3798_v8, 4  ;;  %v8252_v56 = vld [vmem:[%s6849_s21 + $0x38] sm:$0x1]  ;;  %v3780_v6 = vsel %vm6889_vm3, %v3775_v0, %v8212_v19  ;;  %v3843_v44 = vshll.u32 %v5889_v27, 16 }
  0xf3   : > { %6431 = vmatmul.mubr.msk.bf16.gmra.mxu0 %vm777_vm2, %v6643_v39  ;;  %6461 = vmatpush3.bf16.msra.mxu1 %v6649_v30  ;;  %v4530_v30 = vrot.slane %v8190_v32, 5  ;;  %v3811_v39 = vshll.u32 %v5885_v60, 16  ;;  %v6645_v32 = vld [vmem:[%s6849_s21 + $0x54] sm:$0xff]   ;;  %v8257_v3 = vpop.f32.mrf.mxu0  ;;  %v5968_v60 = vld [vmem:[%s6849_s21 + $0x30] sm:$0xe]  ;;  %v3822_v31 = vor.u32 %v3821_v13, %v3818_v2  ;;  %v3832_v13 = vor.u32 %v3831_v62, %v8254_v42 }
  0xf4   : > { %6434 = vmatprep.mubr.msk.bf16.mxu0 %vm777_vm2, %v6644_v22  ;;  %v8234_v18 = vpop.f32.mrf.mxu1  ;;  %v5967_v22 = vld [vmem:[%s6849_s21 + $0x24] sm:$0xe]  ;;  %v3790_v33 = vsel %vm6889_vm3, %v3785_v52, %v3789_v58  ;;  %v5984_v2 = vrot.slane %v5968_v60, 9  ;;  %v8324_v0 = vld [vmem:[%s6849_s21 + $0x44] sm:$0x1]  ;;  %v3853_v52 = vshrl.u32 %v8288_v21, 16 }
  0xf5   : > { %10003 = vst [vmem:[#allocation7_spill] sm:$0xff] %v8234_v18  ;;  %v5983_v37 = vrot.slane %v5967_v22, 9  ;;  %v4532_v50 = vrot.slane %v4530_v30, 4  ;;  %v3813_v26 = vrot.slane %v3811_v39, 5  ;;  %v3835_v22 = vshll.u32 %v8252_v56, 16 }
  0xf6   : > { %6395 = vmatmul.mubr.msk.bf16.gmra.mxu1 %vm777_vm2, %v5779_v16  ;;  %v4525_v16 = vrot.slane %v4523_v41, 4  ;;  %v3804_v41 = vsel %vm6889_vm3, %v3799_v54, %v8215_v7  ;;  %v4537_v7 = vrot.slane %v8224_v36, 5  ;;  %v8313_v58 = vrot.slane %v3822_v31, 4 }
  0xf7   : > { %6398 = vmatprep.mubr.msk.bf16.mxu1 %vm777_vm2, %v5780_v55  ;;  %v8249_v55 = vpop.f32.mrf.mxu1  ;;  %v8279_v39 = vsel %vm7175_vm6, %v5983_v37, %v4530_v30  ;;  %v8283_v19 = vsel %vm7175_vm6, %v4532_v50, %v4533_v12  ;;  %v3814_v37 = vsel %vm6889_vm3, %v3809_v24, %v3813_v26  ;;  %v10006_v30 = vcombine.low %v8003_v11, %v8013_v20  ;;  %v5892_v24 = vld [vmem:[%s6849_s21 + $0x48] sm:$0xf]  ;;  %v8317_v20 = vld [vmem:[%s6849_s21 + $0x4c] sm:$0xf] }
  0xf8   : > { %10004 = vst [vmem:[#allocation10_spill] sm:$0xff] %v8249_v55  ;;  %v8272_v8 = vsel %vm7175_vm6, %v4525_v16, %v4526_v10  ;;  %v3840_v36 = vshrl.u32 %v5889_v27, 16  ;;  %v3849_v11 = vshll.u32 %v8288_v21, 16  ;;  %v8319_v16 = vcombine.low %v3804_v41, %v3814_v37 }
  0xf9   : > { %v8294_v54 = vpop.f32.mrf.mxu1  ;;  %v3833_v12 = vrot.slane %v3832_v13, 4  ;;  %v8331_v62 = vsel %vm7175_vm6, %v5984_v2, %v4537_v7  ;;  %v4539_v60 = vrot.slane %v4537_v7, 4  ;;  %v3864_v41 = vshrl.u32 %v5892_v24, 16  ;;  %v8341_v13 = vld [vmem:[%s6849_s21 + $0x58] sm:$0xf] }
  0xfa   : > { %10005 = vst [vmem:[#allocation8_spill] sm:$0xff] %v8294_v54  ;;  %v3873_v27 = vshll.u32 %v8317_v20, 16  ;;  %v3877_v37 = vshrl.u32 %v8317_v20, 16  ;;  %v3842_v2 = vrot.slane %v3840_v36, 4  ;;  %v3845_v7 = vrot.slane %v3843_v44, 5  ;;  %v6650_v54 = vld [vmem:[%s6849_s21 + $0x84] sm:$0xff]  }
  0xfb   : > { %6435 = vmatmul.mubr.msk.bf16.gmra.mxu0 %vm777_vm2, %v6645_v32  ;;  %v8308_v32 = vcombine.low %v3780_v6, %v3790_v33  ;;  %v8327_v50 = vpop.f32.mrf.mxu1  ;;  %v4540_v6 = vrot.slane %v8252_v56, 5  ;;  %v5895_v33 = vld [vmem:[%s6849_s21 + $0x54] sm:$0xf]  ;;  %v3828_v56 = vsel %vm6889_vm3, %v8313_v58, %v8254_v42  ;;  %v4544_v10 = vrot.slane %v8288_v21, 5 }
  0xfc   : > { %6438 = vmatprep.mubr.msk.bf16.mxu0 %vm777_vm2, %v6646_v53  ;;  %v3837_v53 = vrot.slane %v3835_v22, 5  ;;  %10007 = vst [vmem:[#allocation13_spill] sm:$0xff] %v8327_v50  ;;  %v3867_v22 = vshll.u32 %v5892_v24, 16  ;;  %v5969_v24 = vld [vmem:[%s6849_s21 + $0x3c] sm:$0xe]  ;;  %v3888_v26 = vshrl.u32 %v5895_v33, 16  ;;  %v10011_v44 = vcombine.low %v8028_v14, %v8050_v5 }
  0xfd   : > { %v3891_v50 = vshll.u32 %v5895_v33, 16  ;;  %v8361_v42 = vsel %vm7175_vm6, %v4539_v60, %v4540_v6  ;;  %v3859_v58 = vshll.u32 %v8324_v0, 16  ;;  %v3897_v36 = vshll.u32 %v8341_v13, 16  ;;  %v6652_v33 = vld [vmem:[%s6849_s21 + $0x90] sm:$0xff]  }
  0xfe   : > { %6399 = vmatmul.mubr.msk.bf16.gmra.mxu1 %vm777_vm2, %v5781_v57  ;;  %v8306_v57 = vpop.f32.mrf.mxu0  ;;  %v3901_v21 = vshrl.u32 %v8341_v13, 16  ;;  %v8375_v60 = vrot.slane %v3873_v27, 5  ;;  %v3879_v6 = vrot.slane %v3877_v37, 4  ;;  %v5985_v18 = vrot.slane %v5969_v24, 9  ;;  %v8399_v24 = vld [vmem:[%s6849_s21 + $0x5c] sm:$0x1] }
  0xff   : > { %6402 = vmatprep.mubr.msk.bf16.mxu1 %vm777_vm2, %v10006_v30  ;;  %v8348_v30 = vrot.slane %v3849_v11, 5  ;;  %v3866_v11 = vrot.slane %v3864_v41, 4  ;;  %v4547_v14 = vrot.slane %v8324_v0, 5  ;;  %v5898_v41 = vld [vmem:[%s6849_s21 + $0x60] sm:$0xf] }
 0x100   : > { %v8336_v31 = vpop.f32.mrf.mxu0  ;;  %v3915_v27 = vshll.u32 %v5898_v41, 16 }
 0x101   : > { %10008 = vst [vmem:[#allocation9_spill] sm:$0xff] %v8336_v31  ;;  %v3893_v31 = vrot.slane %v3891_v50, 5  ;;  %v3880_v50 = vor.u32 %v3879_v6, %v8375_v60  ;;  %v8415_v6 = vld [vmem:[%s6849_s21 + $0x64] sm:$0xf] }
 0x103   : > { %6439 = vmatmul.mubr.msk.bf16.gmra.mxu0 %vm777_vm2, %v6647_v59  ;;  %v3855_v59 = vrot.slane %v3853_v52, 4  ;;  %v3869_v52 = vrot.slane %v3867_v22, 5 }
 0x104   : > { %6442 = vmatprep.mubr.msk.bf16.mxu0 %vm777_vm2, %v6648_v48  ;;  %v10009_v48 = vcombine.low %v8021_v49, %v8036_v40  ;;  %v8357_v55 = vpop.f32.mrf.mxu1  ;;  %v8370_v49 = vpop.f32.mrf.mxu0  ;;  %v8373_v40 = vld [vmem:[%s6849_s21 + $0x50] sm:$0x1] }
 0x105   : > { %10010 = vst [vmem:[#allocation14_spill] sm:$0xff] %v8357_v55  ;;  %10012 = vst [vmem:[#allocation12_spill] sm:$0xff] %v8370_v49  ;;  %v3846_v55 = vor.u32 %v3845_v7, %v3842_v2  ;;  %v3856_v5 = vor.u32 %v3855_v59, %v8348_v30  ;;  %v3890_v49 = vrot.slane %v3888_v26, 4  ;;  %v3883_v37 = vshll.u32 %v8373_v40, 16  ;;  %v5970_v7 = vld [vmem:[%s6849_s21 + $0x48] sm:$0xe] }
 0x106   : > { %6403 = vmatmul.mubr.msk.bf16.gmra.mxu1 %vm777_vm2, %v10009_v48  ;;  %v3838_v48 = vsel %vm6889_vm3, %v3833_v12, %v3837_v53  ;;  %v8383_v22 = vpop.f32.mrf.mxu1  ;;  %v8388_v53 = vrot.slane %v3897_v36, 5  ;;  %v3903_v12 = vrot.slane %v3901_v21, 4  ;;  %v8391_v0 = vpop.f32.mrf.mxu0  ;;  %v3870_v26 = vor.u32 %v3869_v52, %v3866_v11 }
 0x107   : > { %6406 = vmatprep.mubr.msk.bf16.mxu1 %vm777_vm2, %v10011_v44  ;;  %v4546_v44 = vrot.slane %v4544_v10, 4  ;;  %10013 = vst [vmem:[#allocation15_spill] sm:$0xff] %v8383_v22  ;;  %v8393_v2 = vcombine.low %v3828_v56, %v3838_v48  ;;  %v4551_v59 = vrot.slane %v8317_v20, 5  ;;  %v8402_v36 = vrot.slane %v3846_v55, 4 }
 0x108   : > { %v8404_v21 = vrot.slane %v3859_v58, 5  ;;  %v3857_v56 = vrot.slane %v3856_v5, 4  ;;  %v8408_v11 = vsel %vm7175_vm6, %v5985_v18, %v4544_v10  ;;  %v3894_v52 = vor.u32 %v3893_v31, %v3890_v49  ;;  %v8421_v58 = vpop.f32.mrf.mxu1  ;;  %v6653_v31 = vld [vmem:[%s6849_s21 + $0x9c] sm:$0xff]   ;;  %v8430_v49 = vpop.f32.mrf.mxu0  ;;  %v6654_v5 = vld [vmem:[%s6849_s21 + $0xa8] sm:$0xff]  }
 0x109   : > { %v8412_v20 = vsel %vm7175_vm6, %v4546_v44, %v4547_v14  ;;  %v10014_v55 = vcombine.low %v8040_v15, %v8058_v17  ;;  %10015 = vst [vmem:[#allocation6_spill] sm:$0xff] %v8421_v58  ;;  %v5986_v48 = vrot.slane %v5970_v7, 9  ;;  %v3904_v18 = vor.u32 %v3903_v12, %v8388_v53  ;;  %10017 = vst [vmem:[#allocation5_spill] sm:$0xff] %v8430_v49 }
 0x10a   : > { %v3907_v10 = vshll.u32 %v8399_v24, 16  ;;  %v10016_v14 = vcombine.low %v8062_v4, %v8073_v34  ;;  %v3871_v15 = vrot.slane %v3870_v26, 4  ;;  %v3881_v17 = vrot.slane %v3880_v50, 4  ;;  %v8445_v50 = vpop.f32.mrf.mxu1 }
 0x10b   : > { %6443 = vmatmul.mubr.msk.bf16.gmra.mxu0 %vm777_vm2, %v6650_v54  ;;  %v3912_v54 = vshrl.u32 %v5898_v41, 16  ;;  %v4553_v44 = vrot.slane %v4551_v59, 4  ;;  %v4554_v41 = vrot.slane %v8373_v40, 5  ;;  %v3917_v12 = vrot.slane %v3915_v27, 5  ;;  %10018 = vst [vmem:[#allocation11_spill] sm:$0xff] %v8445_v50 }
 0x10c   : > { %6446 = vmatprep.mubr.msk.bf16.mxu0 %vm777_vm2, %v6652_v33  ;;  %v3885_v33 = vrot.slane %v3883_v37, 5  ;;  %v5971_v37 = vld [vmem:[%s6849_s21 + $0x54] sm:$0xe]  ;;  %v3925_v58 = vshrl.u32 %v8415_v6, 16  ;;  %v3852_v4 = vsel %vm6889_vm3, %v8402_v36, %v8348_v30  ;;  %v3862_v34 = vsel %vm6889_vm3, %v3857_v56, %v8404_v21  ;;  %v5901_v36 = vld [vmem:[%s6849_s21 + $0x6c] sm:$0xf] }
 0x10d   : > { %v3914_v7 = vrot.slane %v3912_v54, 4  ;;  %v3895_v26 = vrot.slane %v3894_v52, 4  ;;  %v4558_v40 = vrot.slane %v8341_v13, 5  ;;  %v8451_v54 = vsel %vm7175_vm6, %v5986_v48, %v4551_v59  ;;  %v8467_v48 = vld [vmem:[%s6849_s21 + $0x68] sm:$0x1] }
 0x10e   : > { %6407 = vmatmul.mubr.msk.bf16.gmra.mxu1 %vm777_vm2, %v10014_v55  ;;  %v3921_v55 = vshll.u32 %v8415_v6, 16  ;;  %v3909_v30 = vrot.slane %v3907_v10, 5  ;;  %v3876_v13 = vsel %vm6889_vm3, %v3871_v15, %v8375_v60  ;;  %v3886_v56 = vsel %vm6889_vm3, %v3881_v17, %v3885_v33  ;;  %v8475_v15 = vld [vmem:[%s6849_s21 + $0x70] sm:$0xf] }
 0x10f   : > { %6410 = vmatprep.mubr.msk.bf16.mxu1 %vm777_vm2, %v10016_v14  ;;  %v3905_v14 = vrot.slane %v3904_v18, 4  ;;  %v8464_v52 = vsel %vm7175_vm6, %v4553_v44, %v4554_v41  ;;  %v5987_v59 = vrot.slane %v5971_v37, 9  ;;  %v5972_v18 = vld [vmem:[%s6849_s21 + $0x60] sm:$0xe]  ;;  %v4561_v10 = vrot.slane %v8399_v24, 5 }
 0x110   : > { %v8472_v27 = vrot.slane %v3921_v55, 5  ;;  %v3927_v60 = vrot.slane %v3925_v58, 4  ;;  %v3900_v33 = vsel %vm6889_vm3, %v3895_v26, %v8388_v53  ;;  %v4560_v17 = vrot.slane %v4558_v40, 4 }
 0x111   : > { %v8455_v21 = vpop.f32.mrf.mxu0  ;;  %v3936_v44 = vshrl.u32 %v5901_v36, 16  ;;  %v3939_v41 = vshll.u32 %v5901_v36, 16  ;;  %v3910_v58 = vsel %vm6889_vm3, %v3905_v14, %v3909_v30  ;;  %v3931_v37 = vshll.u32 %v8467_v48, 16  ;;  %v6656_v36 = vld [vmem:[%s6849_s21 + $0xc0] sm:$0xff]  }
 0x112   : > { %10019 = vst [vmem:[#allocation16_spill] sm:$0xff] %v8455_v21  ;;  %v4565_v53 = vrot.slane %v8415_v6, 5  ;;  %v8497_v55 = vcombine.low %v3852_v4, %v3862_v34  ;;  %v8499_v26 = vcombine.low %v3876_v13, %v3886_v56  ;;  %v3945_v14 = vshll.u32 %v8475_v15, 16  ;;  %v5904_v34 = vld [vmem:[%s6849_s21 + $0x78] sm:$0xf] }
 0x113   : > { %6447 = vmatmul.mubr.msk.bf16.gmra.mxu0 %vm777_vm2, %v6653_v31  ;;  %v3918_v31 = vor.u32 %v3917_v12, %v3914_v7  ;;  %v5988_v7 = vrot.slane %v5972_v18, 9  ;;  %v10022_v12 = vcombine.low %v8087_v9, %v8107_v46  ;;  %v3949_v30 = vshrl.u32 %v8475_v15, 16  ;;  %v8521_v18 = vld [vmem:[%s6849_s21 + $0x74] sm:$0x1]  ;;  %v8524_v6 = vld [vmem:[%s6849_s21 + $0x7c] sm:$0xf] }
 0x114   : > { %6450 = vmatprep.mubr.msk.bf16.mxu0 %vm777_vm2, %v6654_v5  ;;  %v10020_v5 = vcombine.low %v8081_v1, %v8093_v23  ;;  %v6655_v23 = vld [vmem:[%s6849_s21 + $0xb4] sm:$0xff]   ;;  %v8495_v1 = vpop.f32.mrf.mxu0  ;;  %v8508_v9 = vsel %vm7175_vm6, %v5987_v59, %v4558_v40  ;;  %v3928_v4 = vor.u32 %v3927_v60, %v8472_v27  ;;  %v8514_v13 = vcombine.low %v3900_v33, %v3910_v58  ;;  %v5907_v33 = vld [vmem:[%s6849_s21 + $0x84] sm:$0xf] }
 0x115   : > { %10023 = vst [vmem:[#allocation18_spill] sm:$0xff] %v8495_v1  ;;  %v8510_v46 = vrot.slane %v3918_v31, 4  ;;  %v8518_v56 = vsel %vm7175_vm6, %v4560_v17, %v4561_v10  ;;  %v8528_v59 = vrot.slane %v3931_v37, 5  ;;  %v8532_v31 = vsel %vm7175_vm6, %v5988_v7, %v4565_v53  ;;  %v5973_v7 = vld [vmem:[%s6849_s21 + $0x6c] sm:$0xe] }
 0x116   : > { %6411 = vmatmul.mubr.msk.bf16.gmra.mxu1 %vm777_vm2, %v10020_v5  ;;  %v8484_v24 = vpop.f32.mrf.mxu1  ;;  %10024 = vst [vmem:[#allocation19_spill] sm:$0xff] %v8514_v13  ;;  %v3938_v5 = vrot.slane %v3936_v44, 4  ;;  %v4567_v60 = vrot.slane %v4565_v53, 4  ;;  %v4568_v10 = vrot.slane %v8467_v48, 5  ;;  %v8537_v17 = vpop.f32.mrf.mxu0  ;;  %v8539_v44 = vrot.slane %v3945_v14, 5 }
 0x117   : > { %10021 = vst [vmem:[#allocation17_spill] sm:$0xff] %v8484_v24  ;;  %6414 = vmatprep.mubr.msk.bf16.mxu1 %vm777_vm2, %v10022_v12  ;;  %v3941_v12 = vrot.slane %v3939_v41, 5  ;;  %10026 = vst [vmem:[#allocation21_spill] sm:$0xff] %v8537_v17  ;;  %v3951_v41 = vrot.slane %v3949_v30, 4  ;;  %v3960_v58 = vshrl.u32 %v5904_v34, 16  ;;  %v8549_v48 = vrot.slane %v3928_v4, 4 }
 0x118   : > { %v8526_v40 = vpop.f32.mrf.mxu1  ;;  %v8542_v24 = vld [vmem:[%s6849_s21 + $0x88] sm:$0xf]  ;;  %v3969_v53 = vshll.u32 %v8524_v6, 16  ;;  %v4572_v30 = vrot.slane %v8475_v15, 5  ;;  %v3987_v50 = vshll.u32 %v5907_v33, 16  ;;  %v8563_v4 = vsel %vm7175_vm6, %v4567_v60, %v4568_v10 }
 0x119   : > { %10025 = vst [vmem:[#allocation20_spill] sm:$0xff] %v8526_v40  ;;  %v3963_v40 = vshll.u32 %v5904_v34, 16  ;;  %v3942_v14 = vor.u32 %v3941_v12, %v3938_v5  ;;  %v3984_v34 = vshrl.u32 %v5907_v33, 16  ;;  %v3955_v22 = vshll.u32 %v8521_v18, 16  ;;  %v8568_v12 = vpop.f32.mrf.mxu0  ;;  %v5906_v60 = vld [vmem:[%s6849_s21 + $0x80] sm:$0x1] }
 0x11a   : > { %v8559_v37 = vpop.f32.mrf.mxu1  ;;  %v3993_v5 = vshll.u32 %v8542_v24, 16  ;;  %v3997_v15 = vshrl.u32 %v8542_v24, 16  ;;  %10029 = vst [vmem:[#allocation23_spill] sm:$0xff] %v8568_v12  ;;  %v3952_v33 = vor.u32 %v3951_v41, %v8539_v44  ;;  %v3962_v10 = vrot.slane %v3960_v58, 4  ;;  %v5974_v13 = vld [vmem:[%s6849_s21 + $0x78] sm:$0xe] }
 0x11b   : > { %6451 = vmatmul.mubr.msk.bf16.gmra.mxu0 %vm777_vm2, %v6655_v23  ;;  %v3973_v23 = vshrl.u32 %v8524_v6, 16  ;;  %10028 = vst [vmem:[#allocation22_spill] sm:$0xff] %v8559_v37  ;;  %v3965_v37 = vrot.slane %v3963_v40, 5  ;;  %v4575_v17 = vrot.slane %v8521_v18, 5  ;;  %v8578_v1 = vrot.slane %v3969_v53, 5 }
 0x11c   : > { %6454 = vmatprep.mubr.msk.bf16.mxu0 %vm777_vm2, %v6656_v36  ;;  %v10027_v36 = vcombine.low %v8097_v25, %v8116_v63  ;;  %v10030_v25 = vcombine.low %v8120_v43, %v8130_v38  ;;  %v6657_v63 = vld [vmem:[%s6849_s21 + $0xcc] sm:$0xff]   ;;  %v4579_v12 = vrot.slane %v8524_v6, 5  ;;  %v8582_v49 = vrot.slane %v3942_v14, 4  ;;  %v8584_v41 = vpop.f32.mrf.mxu1 }
 0x11d   : > { %v3975_v21 = vrot.slane %v3973_v23, 4  ;;  %v4574_v43 = vrot.slane %v4572_v30, 4  ;;  %v3986_v38 = vrot.slane %v3984_v34, 4  ;;  %10031 = vst [vmem:[#allocation24_spill] sm:$0xff] %v8584_v41  ;;  %v3934_v40 = vsel %vm6889_vm3, %v8549_v48, %v8528_v59  ;;  %v8593_v58 = vld [vmem:[%s6849_s21 + $0x8c] sm:$0x1] }
 0x11e   : > { %6415 = vmatmul.mubr.msk.bf16.gmra.mxu1 %vm777_vm2, %v10027_v36  ;;  %v5989_v36 = vrot.slane %v5973_v7, 9  ;;  %v8590_v18 = vrot.slane %v3955_v22, 5  ;;  %v8595_v7 = vrot.slane %v3993_v5, 5  ;;  %v3999_v6 = vrot.slane %v3997_v15, 4  ;;  %v5910_v41 = vld [vmem:[%s6849_s21 + $0x90] sm:$0xf] }
 0x11f   : > { %6418 = vmatprep.mubr.msk.bf16.mxu1 %vm777_vm2, %v10030_v25  ;;  %v3989_v25 = vrot.slane %v3987_v50, 5  ;;  %v3953_v50 = vrot.slane %v3952_v33, 4  ;;  %v3966_v23 = vor.u32 %v3965_v37, %v3962_v10  ;;  %v3979_v14 = vshll.u32 %v5906_v60, 16 }
 0x120   : > { %v5990_v34 = vrot.slane %v5974_v13, 9  ;;  %v10032_v22 = vcombine.low %v8261_v28, %v8272_v8  ;;  %v8607_v59 = vsel %vm7175_vm6, %v5989_v36, %v4572_v30  ;;  %v3976_v48 = vor.u32 %v3975_v21, %v8578_v1  ;;  %v8622_v30 = vld [vmem:[%s6849_s21 + $0x94] sm:$0xf] }
 0x121   : > { %v4581_v5 = vrot.slane %v4579_v12, 4  ;;  %v4582_v15 = vrot.slane %v5906_v60, 5  ;;  %v3948_v13 = vsel %vm6889_vm3, %v8582_v49, %v8539_v44  ;;  %v8618_v28 = vsel %vm7175_vm6, %v4574_v43, %v4575_v17  ;;  %v5975_v60 = vld [vmem:[%s6849_s21 + $0x84] sm:$0xe] }
 0x122   : > { %v3990_v8 = vor.u32 %v3989_v25, %v3986_v38  ;;  %v4003_v37 = vshll.u32 %v8593_v58, 16  ;;  %v10033_v21 = vcombine.low %v8147_v51, %v8164_v47  ;;  %v4000_v36 = vor.u32 %v3999_v6, %v8595_v7 }
 0x123   : > { %v8597_v53 = vpop.f32.mrf.mxu0  ;;  %6455 = vmatmul.mubr.msk.bf16.gmra.mxu0 %vm777_vm2, %v6657_v63  ;;  %v4586_v49 = vrot.slane %v8542_v24, 5  ;;  %v4008_v44 = vshrl.u32 %v5910_v41, 16  ;;  %v4011_v17 = vshll.u32 %v5910_v41, 16  ;;  %v3958_v43 = vsel %vm6889_vm3, %v3953_v50, %v8590_v18 }
 0x124   : > { %6498 = vmatprep.mubr.msk.bf16.mxu0 %vm777_vm2, %v10032_v22  ;;  %v3967_v38 = vrot.slane %v3966_v23, 4  ;;  %v3981_v51 = vrot.slane %v3979_v14, 5  ;;  %v8642_v47 = vsel %vm7175_vm6, %v5990_v34, %v4579_v12  ;;  %v3977_v24 = vrot.slane %v3976_v48, 4  ;;  %v10068_v29 = vld [vmem:[#allocation24_spill] sm:$0xff] }
 0x125   : > { %v8610_v63 = vpop.f32.mrf.mxu0  ;;  %v8648_v41 = vsel %vm7175_vm6, %v4581_v5, %v4582_v15  ;;  %v4017_v6 = vshll.u32 %v8622_v30, 16  ;;  %v3991_v18 = vrot.slane %v3990_v8, 4  ;;  %v4005_v50 = vrot.slane %v4003_v37, 5 }
 0x126   : > { %v8624_v33 = vpop.f32.mrf.mxu1  ;;  %6419 = vmatmul.mubr.msk.bf16.gmra.mxu1 %vm777_vm2, %v10033_v21  ;;  %v5991_v23 = vrot.slane %v5975_v60, 9  ;;  %v4589_v12 = vrot.slane %v8593_v58, 5  ;;  %v4001_v34 = vrot.slane %v4000_v36, 4  ;;  %v4588_v48 = vrot.slane %v4586_v49, 4 }
 0x127   : > { %v8633_v10 = vpop.f32.mrf.mxu0  ;;  %6462 = vmatprep.mubr.msk.bf16.mxu1 %vm777_vm2, %v8308_v32  ;;  %v4021_v32 = vshrl.u32 %v8622_v30, 16  ;;  %v4010_v21 = vrot.slane %v4008_v44, 4  ;;  %v4013_v5 = vrot.slane %v4011_v17, 5  ;;  %v6007_v8 = vcombine.low %v8508_v9, %v8518_v56 }
 0x128   : > { %v8644_v25 = vpop.f32.mrf.mxu1  ;;  %v10036_v58 = vsel %vm6889_vm3, %v8510_v46, %v8472_v27  ;;  %v10037_v44 = vcombine.low %v8331_v62, %v8361_v42  ;;  %v3972_v27 = vsel %vm6889_vm3, %v3967_v38, %v8578_v1  ;;  %v3982_v46 = vsel %vm6889_vm3, %v3977_v24, %v3981_v51  ;;  %v8703_v38 = vld [vmem:[%s6849_s21 + $0xa0] sm:$0xf]  ;;  %v5916_v62 = vld [vmem:[%s6849_s21 + $0xa8] sm:$0xf] }
 0x129   : > { %10034 = vst [vmem:[#allocation25_spill] sm:$0xff] %v8644_v25  ;;  %v8652_v22 = vpop.f32.mrf.mxu0  ;;  %v10035_v25 = vcombine.low %v8279_v39, %v8283_v19  ;;  %v8668_v37 = vcombine.low %v10036_v58, %v3934_v40  ;;  %v8675_v39 = vld [vmem:[%s6849_s21 + $0x98] sm:$0x1]  ;;  %v8688_v40 = vrot.slane %v4017_v6, 5  ;;  %v4023_v17 = vrot.slane %v4021_v32, 4 }
 0x12a   : > { %v8655_v14 = vpop.f32.mrf.mxu1  ;;  %v8691_v60 = vcombine.low %v3948_v13, %v3958_v43  ;;  %v3996_v42 = vsel %vm6889_vm3, %v3991_v18, %v8595_v7  ;;  %v8700_v1 = vsel %vm7175_vm6, %v5991_v23, %v4586_v49  ;;  %v4006_v13 = vsel %vm6889_vm3, %v4001_v34, %v4005_v50  ;;  %v5976_v18 = vld [vmem:[%s6849_s21 + $0x90] sm:$0xe] }
 0x12b   : > { %v6284_v15 = vpop.f32.mrf.mxu0  ;;  %6499 = vmatmul.mubr.msk.bf16.vlgmr.msra.gmra.mxu0 %vm777_vm2, %v10035_v25  ;;  %v5913_v25 = vld [vmem:[%s6849_s21 + $0x9c] sm:$0xf]  ;;  %v8711_v43 = vsel %vm7175_vm6, %v4588_v48, %v4589_v12  ;;  %v4014_v24 = vor.u32 %v4013_v5, %v4010_v21  ;;  %v4027_v7 = vshll.u32 %v8675_v39, 16  ;;  %v8717_v32 = vcombine.low %v3972_v27, %v3982_v46 }
 0x12c   : > { %v8677_v19 = vpop.f32.mrf.mxu1  ;;  %6502 = vmatprep.mubr.msk.bf16.mxu0 %vm777_vm2, %v10037_v44  ;;  %v4035_v23 = vshll.u32 %v5913_v25, 16  ;;  %v4024_v34 = vor.u32 %v4023_v17, %v8688_v40  ;;  %v4593_v12 = vrot.slane %v8622_v30, 5  ;;  %v4041_v48 = vshll.u32 %v8703_v38, 16 }
 0x12d   : > { %v1598_v58 = vpop.f32.mrf.mxu0  ;;  %v4045_v21 = vshrl.u32 %v8703_v38, 16  ;;  %v8727_v44 = vcombine.low %v3996_v42, %v4006_v13  ;;  %v4029_v17 = vrot.slane %v4027_v7, 5  ;;  %v5992_v30 = vrot.slane %v5976_v18, 9 }
 0x12e   : > { %v6248_v51 = vpop.f32.mrf.mxu1  ;;  %6463 = vmatmul.mubr.msk.bf16.vlgmr.msra.gmra.mxu1 %vm777_vm2, %v8319_v16  ;;  %v4032_v16 = vshrl.u32 %v5913_v25, 16  ;;  %v8731_v25 = vrot.slane %v4014_v24, 4  ;;  %v10038_v42 = vcombine.low %v8408_v11, %v8412_v20  ;;  %v8743_v24 = vld [vmem:[%s6849_s21 + $0xac] sm:$0xf]  ;;  %v4595_v18 = vrot.slane %v4593_v12, 4 }
 0x12f   : > { %v1170_v6 = vadd.f32 %v6248_v51, %v8218_v61  ;;  %v6285_v49 = vpop.f32.mrf.mxu0  ;;  %6466 = vmatprep.mubr.msk.bf16.mxu1 %vm777_vm2, %v8393_v2  ;;  %v4596_v51 = vrot.slane %v8675_v39, 5  ;;  %v10039_v39 = vcombine.low %v8451_v54, %v8464_v52  ;;  %v8765_v52 = vsel %vm7175_vm6, %v5992_v30, %v4593_v12 }
 0x130   : > { %v1161_v50 = vpop.f32.mrf.mxu1  ;;  %v4034_v13 = vrot.slane %v4032_v16, 4  ;;  %v8755_v16 = vld [vmem:[%s6849_s21 + $0xa4] sm:$0x1]  ;;  %v4020_v54 = vsel %vm6889_vm3, %v8731_v25, %v8688_v40  ;;  %v4600_v40 = vrot.slane %v8703_v38, 5 }
 0x131   : > { %v8724_v61 = vadd.f32 %v6284_v15, %v1170_v6  ;;  %v1162_v5 = vadd.f32 %v1161_v50, %v8245_v35  ;;  %v1601_v2 = vpop.f32.mrf.mxu0  ;;  %v4037_v6 = vrot.slane %v4035_v23, 5  ;;  %v8749_v50 = vrot.slane %v4041_v48, 5 }
 0x132   : > { %v6249_v46 = vpop.f32.mrf.mxu1  ;;  %v4056_v23 = vshrl.u32 %v5916_v62, 16  ;;  %v8780_v30 = vsel %vm7175_vm6, %v4595_v18, %v4596_v51 }
 0x133   : > { %v8735_v36 = vadd.f32 %v1598_v58, %v1162_v5  ;;  %v1173_v35 = vadd.f32 %v6249_v46, %v8257_v3  ;;  %v6288_v15 = vpop.f32.mrf.mxu0  ;;  %6503 = vmatmul.mubr.msk.bf16.gmra.mxu0 %vm777_vm2, %v10038_v42  ;;  %v4025_v58 = vrot.slane %v4024_v34, 4  ;;  %v4047_v3 = vrot.slane %v4045_v21, 4 }
 0x134   : > { %v1164_v7 = vpop.f32.mrf.mxu1  ;;  %6506 = vmatprep.mubr.msk.bf16.mxu0 %vm777_vm2, %v10039_v39  ;;  %v4059_v46 = vshll.u32 %v5916_v62, 16  ;;  %v10040_v62 = vld [vmem:[#allocation9_spill] sm:$0xff]  ;;  %v4058_v38 = vrot.slane %v4056_v23, 4 }
 0x135   : > { %v8751_v5 = vadd.f32 %v6285_v49, %v1173_v35  ;;  %v1165_v11 = vadd.f32 %v1164_v7, %v8306_v57  ;;  %v1614_v20 = vpop.f32.mrf.mxu0  ;;  %v4065_v57 = vshll.u32 %v8743_v24, 16  ;;  %v4069_v49 = vshrl.u32 %v8743_v24, 16  ;;  %v5977_v35 = vld [vmem:[%s6849_s21 + $0x9c] sm:$0xe] }
 0x136   : > { %v6252_v42 = vpop.f32.mrf.mxu1  ;;  %6467 = vmatmul.mubr.msk.bf16.gmra.mxu1 %vm777_vm2, %v8497_v55  ;;  %v4038_v55 = vor.u32 %v4037_v6, %v4034_v13  ;;  %v4030_v12 = vsel %vm6889_vm3, %v4025_v58, %v4029_v17  ;;  %v4051_v7 = vshll.u32 %v8755_v16, 16  ;;  %v4061_v6 = vrot.slane %v4059_v46, 5 }
 0x137   : > { %v8769_v34 = vadd.f32 %v1601_v2, %v1165_v11  ;;  %v1186_v48 = vadd.f32 %v6252_v42, %v10040_v62  ;;  %v6289_v21 = vpop.f32.mrf.mxu0  ;;  %6470 = vmatprep.mubr.msk.bf16.mxu1 %vm777_vm2, %v8499_v26  ;;  %v4048_v2 = vor.u32 %v4047_v3, %v8749_v50  ;;  %v10041_v11 = vld [vmem:[#allocation12_spill] sm:$0xff]  ;;  %v5993_v62 = vrot.slane %v5977_v35, 9 }
 0x138   : > { %v1177_v25 = vpop.f32.mrf.mxu1  ;;  %v4603_v17 = vrot.slane %v8755_v16, 5  ;;  %v8788_v58 = vrot.slane %v4065_v57, 5  ;;  %v4071_v51 = vrot.slane %v4069_v49, 4  ;;  %v8797_v23 = vrot.slane %v4038_v55, 4  ;;  %v5978_v16 = vld [vmem:[%s6849_s21 + $0xa8] sm:$0xe] }
 0x139   : > { %v8784_v39 = vadd.f32 %v6288_v15, %v1186_v48  ;;  %v1178_v26 = vadd.f32 %v1177_v25, %v10041_v11  ;;  %v1617_v13 = vpop.f32.mrf.mxu0  ;;  %v4602_v46 = vrot.slane %v4600_v40, 4  ;;  %v8800_v48 = vld [vmem:[%s6849_s21 + $0xb0] sm:$0x1]  ;;  %v8811_v56 = vrot.slane %v4048_v2, 4  ;;  %v10043_v55 = vld [vmem:[#allocation5_spill] sm:$0xff] }
 0x13a   : > { %v6253_v42 = vpop.f32.mrf.mxu1  ;;  %v4062_v11 = vor.u32 %v4061_v6, %v4058_v38  ;;  %v4072_v2 = vor.u32 %v4071_v51, %v8788_v58  ;;  %v10045_v38 = vld [vmem:[#allocation16_spill] sm:$0xff] }
 0x13b   : > { %v8790_v18 = vadd.f32 %v1614_v20, %v1178_v26  ;;  %v1189_v3 = vadd.f32 %v6253_v42, %v8391_v0  ;;  %v6292_v15 = vpop.f32.mrf.mxu0  ;;  %6507 = vmatmul.mubr.msk.bf16.gmra.mxu0 %vm777_vm2, %v6007_v8  ;;  %v10042_v20 = vcombine.low %v8532_v31, %v8563_v4  ;;  %v8807_v0 = vcombine.low %v4020_v54, %v4030_v12  ;;  %v5919_v31 = vld [vmem:[%s6849_s21 + $0xb4] sm:$0xf] }
 0x13c   : > { %v1180_v57 = vpop.f32.mrf.mxu1  ;;  %v8813_v8 = vrot.slane %v4051_v7, 5  ;;  %v4607_v26 = vrot.slane %v8743_v24, 5  ;;  %v10044_v54 = vld [vmem:[#allocation19_spill] sm:$0xff]  ;;  %v8824_v12 = vsel %vm7175_vm6, %v5993_v62, %v4600_v40  ;;  %v5994_v7 = vrot.slane %v5978_v16, 9  ;;  %v8847_v16 = vld [vmem:[%s6849_s21 + $0xb8] sm:$0xf] }
 0x13d   : > { %6510 = vmatprep.mubr.msk.bf16.mxu0 %vm777_vm2, %v10042_v20  ;;  %v8815_v49 = vadd.f32 %v6289_v21, %v1189_v3  ;;  %v1181_v35 = vadd.f32 %v1180_v57, %v10043_v55  ;;  %v1630_v25 = vpop.f32.mrf.mxu0  ;;  %v4075_v21 = vshll.u32 %v8800_v48, 16  ;;  %v4044_v40 = vsel %vm6889_vm3, %v8797_v23, %v8749_v50  ;;  %v10046_v50 = vld [vmem:[#allocation18_spill] sm:$0xff] }
 0x13e   : > { %v6256_v4 = vpop.f32.mrf.mxu1  ;;  %6471 = vmatmul.mubr.msk.bf16.gmra.mxu1 %vm777_vm2, %v10044_v54  ;;  %v8839_v62 = vsel %vm7175_vm6, %v4602_v46, %v4603_v17  ;;  %v4610_v3 = vrot.slane %v8800_v48, 5  ;;  %v4083_v57 = vshll.u32 %v5919_v31, 16  ;;  %v4063_v17 = vrot.slane %v4062_v11, 4 }
 0x13f   : > { %v8828_v42 = vadd.f32 %v1617_v13, %v1181_v35  ;;  %v1202_v6 = vadd.f32 %v6256_v4, %v10045_v38  ;;  %v6293_v24 = vpop.f32.mrf.mxu0  ;;  %6474 = vmatprep.mubr.msk.bf16.mxu1 %vm777_vm2, %v8668_v37  ;;  %v4054_v13 = vsel %vm6889_vm3, %v8811_v56, %v8813_v8  ;;  %v4080_v37 = vshrl.u32 %v5919_v31, 16  ;;  %v5922_v35 = vld [vmem:[%s6849_s21 + $0xc0] sm:$0xf] }
 0x140   : > { %v1193_v51 = vpop.f32.mrf.mxu1  ;;  %v4609_v46 = vrot.slane %v4607_v26, 4  ;;  %v4073_v8 = vrot.slane %v4072_v2, 4  ;;  %v4077_v48 = vrot.slane %v4075_v21, 5  ;;  %v8857_v54 = vsel %vm7175_vm6, %v5994_v7, %v4607_v26  ;;  %v8872_v21 = vld [vmem:[%s6849_s21 + $0xc4] sm:$0xf] }
 0x141   : > { %v8849_v20 = vadd.f32 %v6292_v15, %v1202_v6  ;;  %v1194_v23 = vadd.f32 %v1193_v51, %v10046_v50  ;;  %v1633_v55 = vpop.f32.mrf.mxu0  ;;  %v10047_v15 = vld [vmem:[#allocation21_spill] sm:$0xff]  ;;  %v10048_v11 = vcombine.low %v8607_v59, %v8618_v28  ;;  %v8867_v51 = vld [vmem:[%s6849_s21 + $0xbc] sm:$0x1]  ;;  %v4089_v50 = vshll.u32 %v8847_v16, 16 }
 0x142   : > { %v6257_v4 = vpop.f32.mrf.mxu1  ;;  %v4093_v2 = vshrl.u32 %v8847_v16, 16  ;;  %v4082_v7 = vrot.slane %v4080_v37, 4  ;;  %v4104_v59 = vshrl.u32 %v5922_v35, 16  ;;  %v4107_v28 = vshll.u32 %v5922_v35, 16  ;;  %v5979_v37 = vld [vmem:[%s6849_s21 + $0xb4] sm:$0xe] }
 0x143   : > { %v8859_v31 = vadd.f32 %v1630_v25, %v1194_v23  ;;  %v1205_v38 = vadd.f32 %v6257_v4, %v10047_v15  ;;  %v6296_v6 = vpop.f32.mrf.mxu0  ;;  %6511 = vmatmul.mubr.msk.bf16.gmra.mxu0 %vm777_vm2, %v10048_v11  ;;  %v10049_v25 = vcombine.low %v8642_v47, %v8648_v41  ;;  %v4085_v23 = vrot.slane %v4083_v57, 5  ;;  %v10050_v15 = vld [vmem:[#allocation23_spill] sm:$0xff] }
 0x144   : > { %v1196_v26 = vpop.f32.mrf.mxu1  ;;  %v4068_v9 = vsel %vm6889_vm3, %v4063_v17, %v8788_v58  ;;  %v8886_v27 = vsel %vm7175_vm6, %v4609_v46, %v4610_v3  ;;  %v4078_v41 = vsel %vm6889_vm3, %v4073_v8, %v4077_v48  ;;  %v4113_v57 = vshll.u32 %v8872_v21, 16 }
 0x145   : > { %6514 = vmatprep.mubr.msk.bf16.mxu0 %vm777_vm2, %v10049_v25  ;;  %v8878_v4 = vadd.f32 %v6293_v24, %v1205_v38  ;;  %v1197_v11 = vadd.f32 %v1196_v26, %v10050_v15  ;;  %v1646_v56 = vpop.f32.mrf.mxu0  ;;  %v4099_v24 = vshll.u32 %v8867_v51, 16  ;;  %v4117_v35 = vshrl.u32 %v8872_v21, 16 }
 0x146   : > { %v6260_v47 = vpop.f32.mrf.mxu1  ;;  %6475 = vmatmul.mubr.msk.bf16.gmra.mxu1 %vm777_vm2, %v8691_v60  ;;  %v8901_v17 = vrot.slane %v4089_v50, 5  ;;  %v4095_v60 = vrot.slane %v4093_v2, 4  ;;  %v4086_v8 = vor.u32 %v4085_v23, %v4082_v7  ;;  %v4614_v48 = vrot.slane %v8847_v16, 5 }
 0x147   : > { %v8896_v38 = vadd.f32 %v1633_v55, %v1197_v11  ;;  %v1218_v58 = vadd.f32 %v6260_v47, %v8597_v53  ;;  %v6297_v3 = vpop.f32.mrf.mxu0  ;;  %6478 = vmatprep.mubr.msk.bf16.mxu1 %vm777_vm2, %v8717_v32  ;;  %v4106_v26 = vrot.slane %v4104_v59, 4  ;;  %v4109_v25 = vrot.slane %v4107_v28, 5 }
 0x148   : > { %v1209_v46 = vpop.f32.mrf.mxu1  ;;  %v8907_v11 = vcombine.low %v4044_v40, %v4054_v13  ;;  %v5995_v47 = vrot.slane %v5979_v37, 9  ;;  %v8909_v50 = vcombine.low %v4068_v9, %v4078_v41  ;;  %v6014_v2 = vcombine.low %v8857_v54, %v8886_v27  ;;  %v5924_v27 = vld [vmem:[%s6849_s21 + $0xc8] sm:$0x1]  ;;  %v5925_v54 = vld [vmem:[%s6849_s21 + $0xcc] sm:$0xf] }
 0x149   : > { %v8904_v15 = vadd.f32 %v6296_v6, %v1218_v58  ;;  %v1210_v55 = vadd.f32 %v1209_v46, %v8610_v63  ;;  %v1649_v53 = vpop.f32.mrf.mxu0  ;;  %v8913_v7 = vrot.slane %v4113_v57, 5  ;;  %v4119_v16 = vrot.slane %v4117_v35, 4  ;;  %v8935_v41 = vld [vmem:[%s6849_s21 + $0xd0] sm:$0xf] }
 0x14a   : > { %v6261_v32 = vpop.f32.mrf.mxu1  ;;  %v10052_v40 = vcombine.low %v8700_v1, %v8711_v43  ;;  %v8922_v9 = vrot.slane %v4099_v24, 5  ;;  %v4617_v13 = vrot.slane %v8867_v51, 5  ;;  %v4096_v28 = vor.u32 %v4095_v60, %v8901_v17 }
 0x14b   : > { %v8915_v6 = vadd.f32 %v1646_v56, %v1210_v55  ;;  %v1221_v23 = vadd.f32 %v6261_v32, %v8633_v10  ;;  %v6300_v63 = vpop.f32.mrf.mxu0  ;;  %v10053_v56 = vcombine.low %v8765_v52, %v8780_v30  ;;  %v8931_v10 = vrot.slane %v4086_v8, 4  ;;  %v5980_v52 = vld [vmem:[%s6849_s21 + $0xc0] sm:$0xe] }
 0x14c   : > { %6515 = vmatmul.mubr.msk.bf16.gmra.mxu0 %vm777_vm2, %v10052_v40  ;;  %v1212_v59 = vpop.f32.mrf.mxu1  ;;  %v4616_v1 = vrot.slane %v4614_v48, 4  ;;  %v4110_v43 = vor.u32 %v4109_v25, %v4106_v26  ;;  %v8942_v57 = vsel %vm7175_vm6, %v5995_v47, %v4614_v48  ;;  %v4621_v30 = vrot.slane %v8872_v21, 5 }
 0x14d   : > { %10051 = vst [vmem:[#allocation9_spill] sm:$0xff] %v8915_v6  ;;  %6518 = vmatprep.mubr.msk.bf16.mxu0 %vm777_vm2, %v10053_v56  ;;  %v8937_v24 = vadd.f32 %v6297_v3, %v1221_v23  ;;  %v1213_v51 = vadd.f32 %v1212_v59, %v8652_v22  ;;  %v1662_v37 = vpop.f32.mrf.mxu0  ;;  %v4120_v58 = vor.u32 %v4119_v16, %v8913_v7  ;;  %v4123_v60 = vshll.u32 %v5924_v27, 16  ;;  %v10056_v22 = vld [vmem:[#allocation7_spill] sm:$0xff] }
 0x14e   : > { %v6264_v35 = vpop.f32.mrf.mxu1  ;;  %6479 = vmatmul.mubr.msk.bf16.gmra.mxu1 %vm777_vm2, %v8727_v44  ;;  %v4128_v46 = vshrl.u32 %v5925_v54, 16  ;;  %v4131_v3 = vshll.u32 %v5925_v54, 16  ;;  %v4137_v48 = vshll.u32 %v8935_v41, 16  ;;  %v4141_v21 = vshrl.u32 %v8935_v41, 16 }
 0x14f   : > { %10054 = vst [vmem:[#allocation12_spill] sm:$0xff] %v8937_v24  ;;  %v8949_v8 = vadd.f32 %v1649_v53, %v1213_v51  ;;  %v1234_v26 = vadd.f32 %v6264_v35, %v10056_v22  ;;  %v6301_v25 = vpop.f32.mrf.mxu0  ;;  %6482 = vmatprep.mubr.msk.bf16.mxu1 %vm777_vm2, %v8807_v0  ;;  %v4097_v47 = vrot.slane %v4096_v28, 4  ;;  %v4618_v44 = vsel %vm7175_vm6, %v4616_v1, %v4617_v13  ;;  %v10057_v53 = vld [vmem:[#allocation10_spill] sm:$0xff]  ;;  %v10058_v28 = vld [vmem:[#allocation8_spill] sm:$0xff] }
 0x150   : > { %v1225_v55 = vpop.f32.mrf.mxu1  ;;  %v4111_v32 = vrot.slane %v4110_v43, 4  ;;  %v5996_v16 = vrot.slane %v5980_v52, 9  ;;  %v4623_v59 = vrot.slane %v4621_v30, 4  ;;  %v4624_v56 = vrot.slane %v5924_v27, 5 }
 0x151   : > { %10055 = vst [vmem:[#allocation5_spill] sm:$0xff] %v8949_v8  ;;  %v8958_v23 = vadd.f32 %v6300_v63, %v1234_v26  ;;  %v1226_v40 = vadd.f32 %v1225_v55, %v10057_v53  ;;  %v1665_v54 = vpop.f32.mrf.mxu0  ;;  %v4121_v51 = vrot.slane %v4120_v58, 4  ;;  %v4125_v35 = vrot.slane %v4123_v60, 5  ;;  %v5927_v58 = vld [vmem:[%s6849_s21 + $0xd4] sm:$0x1]  ;;  %v10060_v60 = vld [vmem:[#allocation13_spill] sm:$0xff] }
 0x152   : > { %v6265_v0 = vpop.f32.mrf.mxu1  ;;  %v4130_v22 = vrot.slane %v4128_v46, 4  ;;  %v4133_v8 = vrot.slane %v4131_v3, 5  ;;  %v10059_v63 = vcombine.low %v8824_v12, %v8839_v62  ;;  %v8968_v1 = vrot.slane %v4137_v48, 5  ;;  %v5981_v48 = vld [vmem:[%s6849_s21 + $0xcc] sm:$0xe]  ;;  %s6668_s21 = sshll.u32 %s6742_s14, 4  ;;  %s6669_s21 = int_to_ptr.vmem [resolvable:$false] %s6668_s21 }
 0x153   : > { %v8961_v24 = vadd.f32 %v1662_v37, %v1226_v40  ;;  %v1237_v6 = vadd.f32 %v6265_v0, %v10058_v28  ;;  %v6304_v13 = vpop.f32.mrf.mxu0  ;;  %v4143_v27 = vrot.slane %v4141_v21, 4  ;;  %v4092_v37 = vsel %vm6889_vm3, %v8931_v10, %v8901_v17  ;;  %v10062_v40 = vld [vmem:[#allocation15_spill] sm:$0xff]  ;;  %s6670_s22 = scalar_lea.vmem %s6669_s21, 8192  ;;  %p6671_p1 = scmp.lt.s32.totalorder %s9827_s9, %s6669_s21 }
 0x154   : > { %6519 = vmatmul.mubr.msk.bf16.gmra.mxu0 %vm777_vm2, %v10059_v63  ;;  %v1228_v43 = vpop.f32.mrf.mxu1  ;;  %v4102_v52 = vsel %vm6889_vm3, %v4097_v47, %v8922_v9  ;;  %v4628_v12 = vrot.slane %v8935_v41, 5  ;;  %v4625_v26 = vsel %vm7175_vm6, %v4623_v59, %v4624_v56  ;;  %v6015_v9 = vcombine.low %v8942_v57, %v4618_v44  ;;  %p6672_p2 = scmp.lt.s32.totalorder %s6670_s22, %s6664_s13 }
 0x155   : > { %6522 = vmatprep.mubr.msk.bf16.mxu0 %vm777_vm2, %v6014_v2  ;;  %v8980_v62 = vadd.f32 %v6301_v25, %v1237_v6  ;;  %v1229_v46 = vadd.f32 %v1228_v43, %v10060_v60  ;;  %v1678_v3 = vpop.f32.mrf.mxu0  ;;  %v4622_v2 = vsel %vm7175_vm6, %v5996_v16, %v4621_v30  ;;  %v4116_v6 = vsel %vm6889_vm3, %v4111_v32, %v8913_v7  ;;  %v10061_v30 = vld [vmem:[#allocation14_spill] sm:$0xff] }
 0x156   : > { %v6268_v17 = vpop.f32.mrf.mxu1  ;;  %6483 = vmatmul.mubr.msk.bf16.gmra.mxu1 %vm777_vm2, %v8907_v11  ;;  %v4126_v10 = vsel %vm6889_vm3, %v4121_v51, %v4125_v35  ;;  %v4134_v41 = vor.u32 %v4133_v8, %v4130_v22  ;;  %v4144_v11 = vor.u32 %v4143_v27, %v8968_v1  ;;  %v4147_v47 = vshll.u32 %v5927_v58, 16  ;;  %p6673_p3 = por %p6672_p2, %p6671_p1 }
 0x157   : > { %v8996_v25 = vadd.f32 %v1665_v54, %v1229_v46  ;;  %v1250_v21 = vadd.f32 %v6268_v17, %v10061_v30  ;;  %v6305_v55 = vpop.f32.mrf.mxu0  ;;  %6486 = vmatprep.mubr.msk.bf16.mxu1 %vm777_vm2, %v8909_v50  ;;  %v6016_v44 = vcombine.low %v4622_v2, %v4625_v26  ;;  %v5997_v16 = vrot.slane %v5981_v48, 9  ;;  %v10063_v50 = vld [vmem:[#allocation6_spill] sm:$0xff]  ;;  %v10065_v48 = vld [vmem:[#allocation17_spill] sm:$0xff] }
 0x158   : > { %v1241_v57 = vpop.f32.mrf.mxu1  ;;  %v4630_v53 = vrot.slane %v4628_v12, 4  ;;  %v4631_v7 = vrot.slane %v5927_v58, 5  ;;  %v5945_v56 = vcombine.low %v4092_v37, %v4102_v52  ;;  %v5946_v0 = vcombine.low %v4116_v6, %v4126_v10  ;;  %v10064_v58 = vld [vmem:[#allocation11_spill] sm:$0xff]  ;;  %p6674_p5 = pnand %p6673_p3, %p6667_p0 }
 0x159   : > { %v9002_v32 = vadd.f32 %v6304_v13, %v1250_v21  ;;  %v1242_v8 = vadd.f32 %v1241_v57, %v10062_v40  ;;  %v1681_v54 = vpop.f32.mrf.mxu0  ;;  %v4135_v51 = vrot.slane %v4134_v41, 4  ;;  %v4145_v63 = vrot.slane %v4144_v11, 4  ;;  %v10066_v41 = vld [vmem:[#allocation20_spill] sm:$0xff] }
 0x15a   : > { %v6269_v59 = vpop.f32.mrf.mxu1  ;;  %v4149_v27 = vrot.slane %v4147_v47, 5  ;;  %v4629_v13 = vsel %vm7175_vm6, %v5997_v16, %v4628_v12  ;;  %v4632_v37 = vsel %vm7175_vm6, %v4630_v53, %v4631_v7  ;;  %v10067_v47 = vld [vmem:[#allocation22_spill] sm:$0xff] }
 0x15b   : > { %v9005_v35 = vadd.f32 %v1678_v3, %v1242_v8  ;;  %v1253_v22 = vadd.f32 %v6269_v59, %v10063_v50  ;;  %v6308_v28 = vpop.f32.mrf.mxu0  ;;  %v4140_v2 = vsel %vm6889_vm3, %v4135_v51, %v8968_v1  ;;  %v10069_v50 = vld [vmem:[#allocation25_spill] sm:$0xff] }
 0x15c   : > { %6523 = vmatmul.mubr.msk.bf16.gmra.mxu0 %vm777_vm2, %v6015_v9  ;;  %v1244_v43 = vpop.f32.mrf.mxu1  ;;  %v4150_v45 = vsel %vm6889_vm3, %v4145_v63, %v4149_v27  ;;  %v6017_v9 = vcombine.low %v4629_v13, %v4632_v37 }
 0x15d   : > { %6526 = vmatprep.mubr.msk.bf16.mxu0 %vm777_vm2, %v6016_v44  ;;  %v9014_v52 = vadd.f32 %v6305_v55, %v1253_v22  ;;  %v1245_v60 = vadd.f32 %v1244_v43, %v10064_v58  ;;  %v1694_v46 = vpop.f32.mrf.mxu0  ;;  %v5947_v11 = vcombine.low %v4140_v2, %v4150_v45 }
 0x15e   : > { %v6272_v3 = vpop.f32.mrf.mxu1  ;;  %6487 = vmatmul.mubr.msk.bf16.gmra.mxu1 %vm777_vm2, %v5945_v56 }
 0x15f   : > { %v9021_v26 = vadd.f32 %v1681_v54, %v1245_v60  ;;  %v1266_v17 = vadd.f32 %v6272_v3, %v10065_v48  ;;  %v6309_v12 = vpop.f32.mrf.mxu0  ;;  %6490 = vmatprep.mubr.msk.bf16.mxu1 %vm777_vm2, %v5946_v0 }
 0x160   : > { %v1257_v6 = vpop.f32.mrf.mxu1 }
 0x161   : > { %v9027_v10 = vadd.f32 %v6308_v28, %v1266_v17  ;;  %v1258_v30 = vadd.f32 %v1257_v6, %v10066_v41  ;;  %v1697_v21 = vpop.f32.mrf.mxu0 }
 0x162   : > { %v6273_v55 = vpop.f32.mrf.mxu1 }
 0x163   : > { %v9030_v1 = vadd.f32 %v1694_v46, %v1258_v30  ;;  %v1269_v57 = vadd.f32 %v6273_v55, %v10067_v47  ;;  %v6312_v44 = vpop.f32.mrf.mxu0 }
 0x164   : > { %6527 = vmatmul.mubr.msk.bf16.gmra.mxu0 %vm777_vm2, %v6017_v9  ;;  %v1260_v16 = vpop.f32.mrf.mxu1 }
 0x165   : > { %v9034_v53 = vadd.f32 %v6309_v12, %v1269_v57  ;;  %v1261_v7 = vadd.f32 %v1260_v16, %v10068_v29  ;;  %v1710_v40 = vpop.f32.mrf.mxu0 }
 0x166   : > { %v6276_v8 = vpop.f32.mrf.mxu1  ;;  %6491 = vmatmul.mubr.msk.bf16.gmra.mxu1 %vm777_vm2, %v5947_v11 }
 0x167   : > { %v9038_v54 = vadd.f32 %v1697_v21, %v1261_v7  ;;  %v1282_v59 = vadd.f32 %v6276_v8, %v8624_v33  ;;  %v6313_v56 = vpop.f32.mrf.mxu0 }
 0x168   : > { %v1273_v0 = vpop.f32.mrf.mxu1 }
 0x169   : > { %v9041_v51 = vadd.f32 %v6312_v44, %v1282_v59  ;;  %v1274_v22 = vadd.f32 %v1273_v0, %v10069_v50  ;;  %v1713_v28 = vpop.f32.mrf.mxu0 }
 0x16a   : > { %v6277_v63 = vpop.f32.mrf.mxu1 }
 0x16b   : > { %v9044_v27 = vadd.f32 %v1710_v40, %v1274_v22  ;;  %v1285_v43 = vadd.f32 %v6277_v63, %v8655_v14  ;;  %v6356_v13 = vpop.f32.mrf.mxu0 }
 0x16c   : > { %v1276_v37 = vpop.f32.mrf.mxu1 }
 0x16d   : > { %v9047_v58 = vadd.f32 %v6313_v56, %v1285_v43  ;;  %v1277_v60 = vadd.f32 %v1276_v37, %v8677_v19  ;;  %v2707_v46 = vpop.f32.mrf.mxu0 }
 0x16e   : > { %v6320_v33 = vpop.f32.mrf.mxu1 }
 0x16f   : > { %v9050_v3 = vadd.f32 %v1713_v28, %v1277_v60  ;;  %v2098_v2 = vadd.f32 %v6320_v33, %v8724_v61  ;;  %v6357_v48 = vpop.f32.mrf.mxu0 }
 0x170   : > { %v1969_v17 = vpop.f32.mrf.mxu1 }
 0x171   : > { %v9053_v12 = vadd.f32 %v6356_v13, %v2098_v2  ;;  %v2096_v45 = vadd.f32 %v1969_v17, %v8735_v36  ;;  %v2710_v9 = vpop.f32.mrf.mxu0 }
 0x172   : > { %v6321_v14 = vpop.f32.mrf.mxu1 }
 0x173   : > { %v9056_v6 = vadd.f32 %v2707_v46, %v2096_v45  ;;  %v2099_v41 = vadd.f32 %v6321_v14, %v8751_v5  ;;  %v6360_v30 = vpop.f32.mrf.mxu0 }
 0x174   : > { %v1972_v19 = vpop.f32.mrf.mxu1 }
 0x175   : > { %v9059_v21 = vadd.f32 %v6357_v48, %v2099_v41  ;;  %v2097_v55 = vadd.f32 %v1972_v19, %v8769_v34  ;;  %v2723_v11 = vpop.f32.mrf.mxu0 }
 0x176   : > { %v6324_v61 = vpop.f32.mrf.mxu1 }
 0x177   : > { %v9062_v47 = vadd.f32 %v2710_v9, %v2097_v55  ;;  %v2102_v57 = vadd.f32 %v6324_v61, %v8784_v39  ;;  %v6361_v44 = vpop.f32.mrf.mxu0  ;;  %v10071_v61 = vld [vmem:[#allocation12_spill] sm:$0xff] }
 0x178   : > { %v1985_v36 = vpop.f32.mrf.mxu1 }
 0x179   : > { %v9065_v16 = vadd.f32 %v6360_v30, %v2102_v57  ;;  %v2100_v29 = vadd.f32 %v1985_v36, %v8790_v18  ;;  %v2726_v7 = vpop.f32.mrf.mxu0  ;;  %v10070_v30 = vld [vmem:[#allocation9_spill] sm:$0xff] }
 0x17a   : > { %v6325_v5 = vpop.f32.mrf.mxu1 }
 0x17b   : > { %v9068_v40 = vadd.f32 %v2723_v11, %v2100_v29  ;;  %v2103_v8 = vadd.f32 %v6325_v5, %v8815_v49  ;;  %v6364_v59 = vpop.f32.mrf.mxu0  ;;  %v10072_v29 = vld [vmem:[#allocation5_spill] sm:$0xff] }
 0x17c   : > { %v1988_v34 = vpop.f32.mrf.mxu1 }
 0x17d   : > { %v9071_v56 = vadd.f32 %v6361_v44, %v2103_v8  ;;  %v2101_v0 = vadd.f32 %v1988_v34, %v8828_v42  ;;  %v2739_v50 = vpop.f32.mrf.mxu0 }
 0x17e   : > { %v6328_v39 = vpop.f32.mrf.mxu1 }
 0x17f   : > { %v9074_v22 = vadd.f32 %v2726_v7, %v2101_v0  ;;  %v2106_v28 = vadd.f32 %v6328_v39, %v8849_v20  ;;  %v6365_v63 = vpop.f32.mrf.mxu0 }
 0x180   : > { %v2001_v18 = vpop.f32.mrf.mxu1 }
 0x181   : > { %v9077_v43 = vadd.f32 %v6364_v59, %v2106_v28  ;;  %v2104_v13 = vadd.f32 %v2001_v18, %v8859_v31  ;;  %v2742_v37 = vpop.f32.mrf.mxu0 }
 0x182   : > { %v6329_v49 = vpop.f32.mrf.mxu1 }
 0x183   : > { %v9080_v60 = vadd.f32 %v2739_v50, %v2104_v13  ;;  %v2107_v46 = vadd.f32 %v6329_v49, %v8878_v4  ;;  %v6368_v33 = vpop.f32.mrf.mxu0 }
 0x184   : > { %v2004_v42 = vpop.f32.mrf.mxu1 }
 0x185   : > { %v9083_v2 = vadd.f32 %v6365_v63, %v2107_v46  ;;  %v2105_v48 = vadd.f32 %v2004_v42, %v8896_v38  ;;  %v2755_v17 = vpop.f32.mrf.mxu0 }
 0x186   : > { %v6332_v20 = vpop.f32.mrf.mxu1 }
 0x187   : > { %v9086_v45 = vadd.f32 %v2742_v37, %v2105_v48  ;;  %v2110_v9 = vadd.f32 %v6332_v20, %v8904_v15  ;;  %v6369_v14 = vpop.f32.mrf.mxu0 }
 0x188   : > { %v2017_v31 = vpop.f32.mrf.mxu1 }
 0x189   : > { %v9089_v41 = vadd.f32 %v6368_v33, %v2110_v9  ;;  %v2108_v19 = vadd.f32 %v2017_v31, %v10070_v30  ;;  %v2758_v55 = vpop.f32.mrf.mxu0 }
 0x18a   : > { %v6333_v4 = vpop.f32.mrf.mxu1 }
 0x18b   : > { %v9092_v11 = vadd.f32 %v2755_v17, %v2108_v19  ;;  %v2111_v57 = vadd.f32 %v6333_v4, %v10071_v61  ;;  %v6372_v44 = vpop.f32.mrf.mxu0 }
 0x18c   : > { %v2020_v38 = vpop.f32.mrf.mxu1 }
 0x18d   : > { %v9095_v36 = vadd.f32 %v6369_v14, %v2111_v57  ;;  %v2109_v7 = vadd.f32 %v2020_v38, %v10072_v29  ;;  %v2771_v5 = vpop.f32.mrf.mxu0 }
 0x18e   : > { %v6336_v15 = vpop.f32.mrf.mxu1 }
 0x18f   : > { %v9098_v8 = vadd.f32 %v2758_v55, %v2109_v7  ;;  %v2114_v59 = vadd.f32 %v6336_v15, %v8958_v23  ;;  %v6373_v34 = vpop.f32.mrf.mxu0 }
 0x190   : > { %v2033_v0 = vpop.f32.mrf.mxu1 }
 0x191   : > { %v9101_v50 = vadd.f32 %v6372_v44, %v2114_v59  ;;  %v2112_v39 = vadd.f32 %v2033_v0, %v8961_v24  ;;  %v2774_v28 = vpop.f32.mrf.mxu0 }
 0x192   : > { %v6337_v63 = vpop.f32.mrf.mxu1 }
 0x193   : > { %v9104_v18 = vadd.f32 %v2771_v5, %v2112_v39  ;;  %v2115_v13 = vadd.f32 %v6337_v63, %v8980_v62  ;;  %v6376_v37 = vpop.f32.mrf.mxu0 }
 0x194   : > { %v2036_v49 = vpop.f32.mrf.mxu1 }
 0x195   : > { %v9107_v46 = vadd.f32 %v6373_v34, %v2115_v13  ;;  %v2113_v33 = vadd.f32 %v2036_v49, %v8996_v25  ;;  %v2787_v42 = vpop.f32.mrf.mxu0 }
 0x196   : > { %v6340_v23 = vpop.f32.mrf.mxu1 }
 0x197   : > { %v9110_v48 = vadd.f32 %v2774_v28, %v2113_v33  ;;  %v2118_v17 = vadd.f32 %v6340_v23, %v9002_v32  ;;  %v6377_v20 = vpop.f32.mrf.mxu0 }
 0x198   : > { %v2049_v24 = vpop.f32.mrf.mxu1 }
 0x199   : > { %v9113_v9 = vadd.f32 %v6376_v37, %v2118_v17  ;;  %v2116_v14 = vadd.f32 %v2049_v24, %v9005_v35  ;;  %v2790_v31 = vpop.f32.mrf.mxu0 }
 0x19a   : > { %v6341_v62 = vpop.f32.mrf.mxu1 }
 0x19b   : > { %v9116_v30 = vadd.f32 %v2787_v42, %v2116_v14  ;;  %v2119_v19 = vadd.f32 %v6341_v62, %v9014_v52  ;;  %v6380_v55 = vpop.f32.mrf.mxu0 }
 0x19c   : > { %v2052_v25 = vpop.f32.mrf.mxu1 }
 0x19d   : > { %v9119_v4 = vadd.f32 %v6377_v20, %v2119_v19  ;;  %v2117_v61 = vadd.f32 %v2052_v25, %v9021_v26  ;;  %v2803_v57 = vpop.f32.mrf.mxu0 }
 0x19e   : > { %v6344_v32 = vpop.f32.mrf.mxu1 }
 0x19f   : > { %v9122_v44 = vadd.f32 %v2790_v31, %v2117_v61  ;;  %v2122_v38 = vadd.f32 %v6344_v32, %v9027_v10  ;;  %v6381_v29 = vpop.f32.mrf.mxu0 }
 0x1a0   : > { %v2065_v35 = vpop.f32.mrf.mxu1 }
 0x1a1   : > { %v9125_v7 = vadd.f32 %v6380_v55, %v2122_v38  ;;  %v2120_v5 = vadd.f32 %v2065_v35, %v9030_v1  ;;  %v2806_v15 = vpop.f32.mrf.mxu0 }
 0x1a2   : > { %v6345_v52 = vpop.f32.mrf.mxu1 }
 0x1a3   : > { %v9128_v59 = vadd.f32 %v2803_v57, %v2120_v5  ;;  %v2123_v34 = vadd.f32 %v6345_v52, %v9034_v53  ;;  %v6384_v0 = vpop.f32.mrf.mxu0 }
 0x1a4   : > { %v2068_v26 = vpop.f32.mrf.mxu1 }
 0x1a5   : > { %v9131_v39 = vadd.f32 %v6381_v29, %v2123_v34  ;;  %v2121_v28 = vadd.f32 %v2068_v26, %v9038_v54  ;;  %v2819_v63 = vpop.f32.mrf.mxu0 }
 0x1a6   : > { %v6348_v10 = vpop.f32.mrf.mxu1 }
 0x1a7   : > { %v9134_v13 = vadd.f32 %v2806_v15, %v2121_v28  ;;  %v2126_v37 = vadd.f32 %v6348_v10, %v9041_v51  ;;  %v6385_v49 = vpop.f32.mrf.mxu0 }
 0x1a8   : > { %v2081_v1 = vpop.f32.mrf.mxu1 }
 0x1a9   : > { %v9137_v33 = vadd.f32 %v6384_v0, %v2126_v37  ;;  %v2124_v42 = vadd.f32 %v2081_v1, %v9044_v27  ;;  %v2822_v23 = vpop.f32.mrf.mxu0 }
 0x1aa   : > { %v6349_v53 = vpop.f32.mrf.mxu1 }
 0x1ab   : > { %v9140_v17 = vadd.f32 %v2819_v63, %v2124_v42  ;;  %v2127_v20 = vadd.f32 %v6349_v53, %v9047_v58  ;;  %v6428_v24 = vpop.f32.mrf.mxu0 }
 0x1ac   : > { %v2084_v54 = vpop.f32.mrf.mxu1 }
 0x1ad   : > { %v9143_v14 = vadd.f32 %v6385_v49, %v2127_v20  ;;  %v2125_v31 = vadd.f32 %v2084_v54, %v9050_v3  ;;  %v3560_v62 = vpop.f32.mrf.mxu0 }
 0x1ae   : > { %v6392_v51 = vpop.f32.mrf.mxu1 }
 0x1af   : > { %v9146_v19 = vadd.f32 %v2822_v23, %v2125_v31  ;;  %v3318_v55 = vadd.f32 %v6392_v51, %v9053_v12  ;;  %v6429_v25 = vpop.f32.mrf.mxu0 }
 0x1b0   : > { %v3189_v27 = vpop.f32.mrf.mxu1 }
 0x1b1   : > { %v9149_v61 = vadd.f32 %v6428_v24, %v3318_v55  ;;  %v3316_v57 = vadd.f32 %v3189_v27, %v9056_v6  ;;  %v9152_v32 = vpop.f32.mrf.mxu0 }
 0x1b2   : > { %v6393_v58 = vpop.f32.mrf.mxu1 }
 0x1b3   : > { %v9154_v38 = vadd.f32 %v3560_v62, %v3316_v57  ;;  %v3319_v29 = vadd.f32 %v6393_v58, %v9059_v21  ;;  %v6432_v3 = vpop.f32.mrf.mxu0 }
 0x1b4   : > { %v9157_v35 = vpop.f32.mrf.mxu1 }
 0x1b5   : > { %v9159_v5 = vadd.f32 %v6429_v25, %v3319_v29  ;;  %v9161_v15 = vpop.f32.mrf.mxu0 }
 0x1b6   : > { %v6396_v12 = vpop.f32.mrf.mxu1 }
 0x1b7   : > { %v3322_v52 = vadd.f32 %v6396_v12, %v9065_v16  ;;  %v6433_v34 = vpop.f32.mrf.mxu0 }
 0x1b8   : > { %v9164_v0 = vpop.f32.mrf.mxu1 }
 0x1b9   : > { %v9166_v6 = vadd.f32 %v6432_v3, %v3322_v52  ;;  %v9168_v26 = vpop.f32.mrf.mxu0 }
 0x1ba   : > { %v6397_v28 = vpop.f32.mrf.mxu1 }
 0x1bb   : > { %v3323_v21 = vadd.f32 %v6397_v28, %v9071_v56  ;;  %v6436_v63 = vpop.f32.mrf.mxu0 }
 0x1bc   : > { %v9171_v10 = vpop.f32.mrf.mxu1 }
 0x1bd   : > { %v9173_v37 = vadd.f32 %v6433_v34, %v3323_v21  ;;  %v9175_v49 = vpop.f32.mrf.mxu0 }
 0x1be   : > { %v6400_v1 = vpop.f32.mrf.mxu1 }
 0x1bf   : > { %v3326_v16 = vadd.f32 %v6400_v1, %v9077_v43  ;;  %v6437_v42 = vpop.f32.mrf.mxu0 }
 0x1c0   : > { %v9178_v23 = vpop.f32.mrf.mxu1 }
 0x1c1   : > { %v9180_v53 = vadd.f32 %v6436_v63, %v3326_v16  ;;  %v9182_v20 = vpop.f32.mrf.mxu0 }
 0x1c2   : > { %v6401_v24 = vpop.f32.mrf.mxu1 }
 0x1c3   : > { %10073 = vst [vmem:[#allocation19_spill] sm:$0xff] %v9180_v53  ;;  %v3327_v56 = vadd.f32 %v6401_v24, %v9083_v2  ;;  %v6440_v54 = vpop.f32.mrf.mxu0 }
 0x1c4   : > { %v9185_v31 = vpop.f32.mrf.mxu1 }
 0x1c5   : > { %v9187_v62 = vadd.f32 %v6437_v42, %v3327_v56  ;;  %v9189_v51 = vpop.f32.mrf.mxu0 }
 0x1c6   : > { %v6404_v55 = vpop.f32.mrf.mxu1 }
 0x1c7   : > { %10074 = vst [vmem:[#allocation16_spill] sm:$0xff] %v9187_v62  ;;  %v3330_v43 = vadd.f32 %v6404_v55, %v9089_v41  ;;  %v6441_v25 = vpop.f32.mrf.mxu0 }
 0x1c8   : > { %v9192_v27 = vpop.f32.mrf.mxu1 }
 0x1c9   : > { %v9194_v57 = vadd.f32 %v6440_v54, %v3330_v43  ;;  %v9196_v58 = vpop.f32.mrf.mxu0 }
 0x1ca   : > { %v6405_v29 = vpop.f32.mrf.mxu1 }
 0x1cb   : > { %10075 = vst [vmem:[#allocation18_spill] sm:$0xff] %v9194_v57  ;;  %v3331_v2 = vadd.f32 %v6405_v29, %v9095_v36  ;;  %v6444_v3 = vpop.f32.mrf.mxu0 }
 0x1cc   : > { %v9199_v12 = vpop.f32.mrf.mxu1 }
 0x1cd   : > { %v9201_v52 = vadd.f32 %v6441_v25, %v3331_v2  ;;  %v9203_v34 = vpop.f32.mrf.mxu0 }
 0x1ce   : > { %v6408_v28 = vpop.f32.mrf.mxu1 }
 0x1cf   : > { %10076 = vst [vmem:[#allocation21_spill] sm:$0xff] %v9201_v52  ;;  %v3334_v41 = vadd.f32 %v6408_v28, %v9101_v50  ;;  %v6445_v21 = vpop.f32.mrf.mxu0 }
 0x1d0   : > { %v3253_v63 = vpop.f32.mrf.mxu1 }
 0x1d1   : > { %v9206_v1 = vadd.f32 %v6444_v3, %v3334_v41  ;;  %v9208_v16 = vpop.f32.mrf.mxu0 }
 0x1d2   : > { %v6409_v42 = vpop.f32.mrf.mxu1 }
 0x1d3   : > { %10077 = vst [vmem:[#allocation23_spill] sm:$0xff] %v9206_v1  ;;  %v3335_v24 = vadd.f32 %v6409_v42, %v9107_v46  ;;  %v6448_v36 = vpop.f32.mrf.mxu0 }
 0x1d4   : > { %v3256_v56 = vpop.f32.mrf.mxu1 }
 0x1d5   : > { %v9211_v54 = vadd.f32 %v6445_v21, %v3335_v24  ;;  %v9213_v55 = vpop.f32.mrf.mxu0 }
 0x1d6   : > { %v6412_v43 = vpop.f32.mrf.mxu1 }
 0x1d7   : > { %10078 = vst [vmem:[#allocation7_spill] sm:$0xff] %v9211_v54  ;;  %v3338_v25 = vadd.f32 %v6412_v43, %v9113_v9  ;;  %v6449_v29 = vpop.f32.mrf.mxu0 }
 0x1d8   : > { %v3269_v50 = vpop.f32.mrf.mxu1 }
 0x1d9   : > { %v9216_v2 = vadd.f32 %v6448_v36, %v3338_v25  ;;  %v9218_v3 = vpop.f32.mrf.mxu0 }
 0x1da   : > { %v6413_v28 = vpop.f32.mrf.mxu1 }
 0x1db   : > { %10079 = vst [vmem:[#allocation10_spill] sm:$0xff] %v9216_v2  ;;  %v3339_v41 = vadd.f32 %v6413_v28, %v9119_v4  ;;  %v6452_v1 = vpop.f32.mrf.mxu0 }
 0x1dc   : > { %v3272_v46 = vpop.f32.mrf.mxu1 }
 0x1dd   : > { %v9221_v42 = vadd.f32 %v6449_v29, %v3339_v41  ;;  %v9223_v21 = vpop.f32.mrf.mxu0 }
 0x1de   : > { %v6416_v24 = vpop.f32.mrf.mxu1 }
 0x1df   : > { %10080 = vst [vmem:[#allocation8_spill] sm:$0xff] %v9221_v42  ;;  %v3342_v54 = vadd.f32 %v6416_v24, %v9125_v7  ;;  %v6453_v52 = vpop.f32.mrf.mxu0 }
 0x1e0   : > { %v3285_v9 = vpop.f32.mrf.mxu1 }
 0x1e1   : > { %v9226_v43 = vadd.f32 %v6452_v1, %v3342_v54  ;;  %v9228_v36 = vpop.f32.mrf.mxu0 }
 0x1e2   : > { %v6417_v25 = vpop.f32.mrf.mxu1 }
 0x1e3   : > { %10081 = vst [vmem:[#allocation13_spill] sm:$0xff] %v9226_v43  ;;  %v3343_v2 = vadd.f32 %v6417_v25, %v9131_v39  ;;  %v6456_v57 = vpop.f32.mrf.mxu0 }
 0x1e4   : > { %v3288_v4 = vpop.f32.mrf.mxu1 }
 0x1e5   : > { %v9231_v28 = vadd.f32 %v6453_v52, %v3343_v2  ;;  %v9233_v29 = vpop.f32.mrf.mxu0  ;;  %v3317_v52 = vadd.f32 %v9157_v35, %v9062_v47 }
 0x1e6   : > { %v6420_v41 = vpop.f32.mrf.mxu1 }
 0x1e7   : > { %v3346_v42 = vadd.f32 %v6420_v41, %v9137_v33  ;;  %v6457_v62 = vpop.f32.mrf.mxu0  ;;  %v3320_v33 = vadd.f32 %v9164_v0, %v9068_v40  ;;  %v3688_v35 = vadd.f32 %v9152_v32, %v3317_v52  ;;  %v3332_v0 = vadd.f32 %v3253_v63, %v9104_v18  ;;  %v9275_v18 = vld [vmem:[%s9907_s3] ss:$0 sm:$0xff] }
 0x1e8   : > { %v3301_v7 = vpop.f32.mrf.mxu1 }
 0x1e9   : > { %v9236_v24 = vadd.f32 %v6456_v57, %v3346_v42  ;;  %v9238_v1 = vpop.f32.mrf.mxu0  ;;  %v3691_v40 = vadd.f32 %v9161_v15, %v3320_v33 }
 0x1ea   : > { %v6421_v54 = vpop.f32.mrf.mxu1 }
 0x1eb   : > { %10082 = vst [vmem:[#allocation14_spill] sm:$0xff] %v9236_v24  ;;  %v3347_v43 = vadd.f32 %v6421_v54, %v9143_v14  ;;  %v6500_v53 = vpop.f32.mrf.mxu0  ;;  %v3321_v24 = vadd.f32 %v9171_v10, %v9074_v22  ;;  %v3324_v14 = vadd.f32 %v9178_v23, %v9080_v60  ;;  %v3325_v54 = vadd.f32 %v9185_v31, %v9086_v45 }
 0x1ec   : > { %v3304_v39 = vpop.f32.mrf.mxu1  ;;  %v3329_v22 = vadd.f32 %v9199_v12, %v9098_v8  ;;  %v3333_v10 = vadd.f32 %v3256_v56, %v9110_v48  ;;  %v3336_v8 = vadd.f32 %v3269_v50, %v9116_v30 }
 0x1ed   : > { %v9243_v2 = vadd.f32 %v6457_v62, %v3347_v43  ;;  %v4780_v25 = vpop.f32.mrf.mxu0  ;;  %v9266_v15 = vadd.f32 %v9175_v49, %v3324_v14 }
 0x1ee   : > { %v6464_v41 = vpop.f32.mrf.mxu1  ;;  %v9288_v50 = vadd.f32 %v9196_v58, %v3329_v22 }
 0x1ef   : > { %v4427_v57 = vadd.f32 %v6464_v41, %v9149_v61  ;;  %v6501_v42 = vpop.f32.mrf.mxu0  ;;  %v3328_v61 = vadd.f32 %v9192_v27, %v9092_v11  ;;  %v9269_v11 = vadd.f32 %v9182_v20, %v3325_v54  ;;  %v3344_v20 = vadd.f32 %v3301_v7, %v9140_v17 }
 0x1f0   : > { %v4298_v47 = vpop.f32.mrf.mxu1  ;;  %v9300_v17 = vadd.f32 %v9213_v55, %v3336_v8  ;;  %v9324_v41 = vadd.f32 %v3304_v39, %v9146_v19 }
 0x1f1   : > { %v4425_v62 = vadd.f32 %v4298_v47, %v9154_v38  ;;  %v4783_v43 = vpop.f32.mrf.mxu0  ;;  %v4909_v45 = vadd.f32 %v6500_v53, %v4427_v57  ;;  %v3692_v38 = vadd.f32 %v9168_v26, %v3321_v24  ;;  %v3337_v53 = vadd.f32 %v3272_v46, %v9122_v44 }
 0x1f2   : > { %v6465_v60 = vpop.f32.mrf.mxu1  ;;  %v3341_v26 = vadd.f32 %v3288_v4, %v9134_v13  ;;  %v9281_v12 = vadd.f32 %v9189_v51, %v3328_v61  ;;  %v9291_v44 = vadd.f32 %v9203_v34, %v3332_v0  ;;  %v9316_v55 = vadd.f32 %v9233_v29, %v3344_v20 }
 0x1f3   : > { %v4907_v23 = vadd.f32 %v4780_v25, %v4425_v62  ;;  %v4428_v32 = vadd.f32 %v6465_v60, %v9159_v5  ;;  %v6504_v31 = vpop.f32.mrf.mxu0  ;;  %v3340_v5 = vadd.f32 %v3285_v9, %v9128_v59  ;;  %v9294_v59 = vadd.f32 %v9208_v16, %v3333_v10 }
 0x1f4   : > { %v4301_v48 = vpop.f32.mrf.mxu1  ;;  %v9297_v13 = vadd.f32 %v9275_v18, %v4909_v45  ;;  %v9307_v34 = vadd.f32 %v9218_v3, %v3337_v53  ;;  %v9313_v7 = vadd.f32 %v9228_v36, %v3341_v26  ;;  %v10083_v53 = vld [vmem:[#allocation19_spill] sm:$0xff] }
 0x1f5   : > { %v4910_v27 = vadd.f32 %v6501_v42, %v4428_v32  ;;  %v4796_v49 = vpop.f32.mrf.mxu0  ;;  %v9285_v30 = vadd.f32 %v9275_v18, %v4907_v23  ;;  %v4426_v63 = vadd.f32 %v4301_v48, %v3688_v35  ;;  %v9310_v16 = vadd.f32 %v9223_v21, %v3340_v5 }
 0x1f6   : > { %v6468_v56 = vpop.f32.mrf.mxu1  ;;  %v5051_v21 = vmul.f32 %v9297_v13, %v9297_v13 }
 0x1f7   : > { %v6505_v51 = vpop.f32.mrf.mxu0  ;;  %v9303_v46 = vadd.f32 %v9275_v18, %v4910_v27  ;;  %v4908_v9 = vadd.f32 %v4783_v43, %v4426_v63  ;;  %v4431_v58 = vadd.f32 %v6468_v56, %v9166_v6  ;;  %v5049_v25 = vmul.f32 %v9285_v30, %v9285_v30 }
 0x1f8   : > { %v4314_v4 = vpop.f32.mrf.mxu1  ;;  %v4978_v29 = vsel %vm777_vm2, %v9285_v30, 0.0  ;;  %v5084_v10 = vsel %vm777_vm2, %v5051_v21, 0.0 }
 0x1f9   : > { %v4429_v24 = vadd.f32 %v4314_v4, %v3691_v40  ;;  %v4799_v52 = vpop.f32.mrf.mxu0  ;;  %v9321_v6 = vadd.f32 %v9275_v18, %v4908_v9  ;;  %v4913_v33 = vadd.f32 %v6504_v31, %v4431_v58  ;;  %v5052_v14 = vmul.f32 %v9303_v46, %v9303_v46 }
 0x1fa   : > { %v6469_v3 = vpop.f32.mrf.mxu1  ;;  %v4981_v40 = vsel %vm777_vm2, %v9297_v13, 0.0  ;;  %v5081_v61 = vsel %vm777_vm2, %v5049_v25, 0.0  ;;  %v4983_v45 = vsel %vm777_vm2, %v9303_v46, 0.0 }
 0x1fb   : > { %v4911_v36 = vadd.f32 %v4796_v49, %v4429_v24  ;;  %v4432_v57 = vadd.f32 %v6469_v3, %v9173_v37  ;;  %v6508_v42 = vpop.f32.mrf.mxu0  ;;  %v4979_v54 = vsel %vm777_vm2, %v9321_v6, 0.0  ;;  %v5050_v19 = vmul.f32 %v9321_v6, %v9321_v6  ;;  %v10084_v3 = vld [vmem:[#allocation16_spill] sm:$0xff] }
 0x1fc   : > { %v4317_v39 = vpop.f32.mrf.mxu1  ;;  %v4980_v47 = vadd.f32 %v4979_v54, %v4978_v29  ;;  %v9345_v0 = vadd.f32 %v9275_v18, %v4913_v33  ;;  %v5086_v27 = vsel %vm777_vm2, %v5052_v14, 0.0 }
 0x1fd   : > { %v9338_v35 = vadd.f32 %v9275_v18, %v4911_v36  ;;  %v4914_v62 = vadd.f32 %v6505_v51, %v4432_v57  ;;  %v4430_v37 = vadd.f32 %v4317_v39, %v3692_v38  ;;  %v4812_v43 = vpop.f32.mrf.mxu0  ;;  %v5082_v22 = vsel %vm777_vm2, %v5050_v19, 0.0 }
 0x1fe   : > { %v6472_v60 = vpop.f32.mrf.mxu1  ;;  %v4982_v23 = vadd.f32 %v4981_v40, %v4980_v47  ;;  %v5083_v32 = vadd.f32 %v5082_v22, %v5081_v61  ;;  %v5055_v51 = vmul.f32 %v9345_v0, %v9345_v0 }
 0x1ff   : > { %v6509_v31 = vpop.f32.mrf.mxu0  ;;  %v5053_v38 = vmul.f32 %v9338_v35, %v9338_v35  ;;  %v9353_v8 = vadd.f32 %v9275_v18, %v4914_v62  ;;  %v4912_v48 = vadd.f32 %v4799_v52, %v4430_v37  ;;  %v4435_v5 = vadd.f32 %v6472_v60, %v10083_v53  ;;  %v10085_v53 = vld [vmem:[#allocation18_spill] sm:$0xff] }
 0x200   : > { %v4330_v26 = vpop.f32.mrf.mxu1  ;;  %v5085_v49 = vadd.f32 %v5084_v10, %v5083_v32  ;;  %v4984_v20 = vadd.f32 %v4983_v45, %v4982_v23  ;;  %v4985_v9 = vsel %vm777_vm2, %v9338_v35, 0.0  ;;  %v4989_v37 = vsel %vm777_vm2, %v9345_v0, 0.0 }
 0x201   : > { %v4433_v63 = vadd.f32 %v4330_v26, %v9266_v15  ;;  %v4815_v56 = vpop.f32.mrf.mxu0  ;;  %v9363_v58 = vadd.f32 %v9275_v18, %v4912_v48  ;;  %v4917_v4 = vadd.f32 %v6508_v42, %v4435_v5  ;;  %v5088_v15 = vsel %vm777_vm2, %v5053_v38, 0.0 }
 0x202   : > { %v6473_v24 = vpop.f32.mrf.mxu1  ;;  %v4986_v52 = vadd.f32 %v4985_v9, %v4984_v20  ;;  %v5087_v25 = vadd.f32 %v5086_v27, %v5085_v49  ;;  %v5056_v57 = vmul.f32 %v9353_v8, %v9353_v8  ;;  %v5092_v60 = vsel %vm777_vm2, %v5055_v51, 0.0 }
 0x203   : > { %v4915_v33 = vadd.f32 %v4812_v43, %v4433_v63  ;;  %v4436_v21 = vadd.f32 %v6473_v24, %v10084_v3  ;;  %v6512_v36 = vpop.f32.mrf.mxu0  ;;  %v4987_v29 = vsel %vm777_vm2, %v9363_v58, 0.0  ;;  %v5054_v14 = vmul.f32 %v9363_v58, %v9363_v58  ;;  %v10086_v3 = vld [vmem:[#allocation21_spill] sm:$0xff] }
 0x204   : > { %v4333_v54 = vpop.f32.mrf.mxu1  ;;  %v5089_v42 = vadd.f32 %v5088_v15, %v5087_v25  ;;  %v4988_v19 = vadd.f32 %v4987_v29, %v4986_v52  ;;  %v9380_v40 = vadd.f32 %v9275_v18, %v4917_v4  ;;  %v4991_v10 = vsel %vm777_vm2, %v9353_v8, 0.0 }
 0x205   : > { %v9374_v39 = vadd.f32 %v9275_v18, %v4915_v33  ;;  %v4918_v47 = vadd.f32 %v6509_v31, %v4436_v21  ;;  %v4828_v62 = vpop.f32.mrf.mxu0  ;;  %v5090_v43 = vsel %vm777_vm2, %v5054_v14, 0.0  ;;  %v4434_v61 = vadd.f32 %v4333_v54, %v9269_v11 }
 0x206   : > { %v6476_v22 = vpop.f32.mrf.mxu1  ;;  %v4990_v45 = vadd.f32 %v4989_v37, %v4988_v19  ;;  %v5091_v23 = vadd.f32 %v5090_v43, %v5089_v42  ;;  %v5094_v11 = vsel %vm777_vm2, %v5056_v57, 0.0  ;;  %v5059_v51 = vmul.f32 %v9380_v40, %v9380_v40 }
 0x207   : > { %v6513_v32 = vpop.f32.mrf.mxu0  ;;  %v5057_v31 = vmul.f32 %v9374_v39, %v9374_v39  ;;  %v9389_v38 = vadd.f32 %v9275_v18, %v4918_v47  ;;  %v4916_v48 = vadd.f32 %v4815_v56, %v4434_v61  ;;  %v4439_v5 = vadd.f32 %v6476_v22, %v10085_v53 }
 0x208   : > { %v4346_v26 = vpop.f32.mrf.mxu1  ;;  %v5093_v27 = vadd.f32 %v5092_v60, %v5091_v23  ;;  %v4992_v49 = vadd.f32 %v4991_v10, %v4990_v45  ;;  %v4993_v9 = vsel %vm777_vm2, %v9374_v39, 0.0  ;;  %v4997_v37 = vsel %vm777_vm2, %v9380_v40, 0.0 }
 0x209   : > { %v4437_v20 = vadd.f32 %v4346_v26, %v9281_v12  ;;  %v4831_v63 = vpop.f32.mrf.mxu0  ;;  %v9399_v4 = vadd.f32 %v9275_v18, %v4916_v48  ;;  %v4921_v56 = vadd.f32 %v6512_v36, %v4439_v5  ;;  %v5096_v12 = vsel %vm777_vm2, %v5057_v31, 0.0  ;;  %v10087_v26 = vld [vmem:[#allocation23_spill] sm:$0xff] }
 0x20a   : > { %v6477_v24 = vpop.f32.mrf.mxu1  ;;  %v4994_v52 = vadd.f32 %v4993_v9, %v4992_v49  ;;  %v5095_v25 = vadd.f32 %v5094_v11, %v5093_v27  ;;  %v5060_v57 = vmul.f32 %v9389_v38, %v9389_v38  ;;  %v5100_v10 = vsel %vm777_vm2, %v5059_v51, 0.0 }
 0x20b   : > { %v4919_v33 = vadd.f32 %v4828_v62, %v4437_v20  ;;  %v4440_v21 = vadd.f32 %v6477_v24, %v10086_v3  ;;  %v4995_v29 = vsel %vm777_vm2, %v9399_v4, 0.0  ;;  %v5058_v14 = vmul.f32 %v9399_v4, %v9399_v4 }
 0x20c   : > { %v6516_v15 = vpop.f32.mrf.mxu0  ;;  %v4349_v54 = vpop.f32.mrf.mxu1  ;;  %v5097_v36 = vadd.f32 %v5096_v12, %v5095_v25  ;;  %v4996_v42 = vadd.f32 %v4995_v29, %v4994_v52  ;;  %v9416_v61 = vadd.f32 %v9275_v18, %v4921_v56  ;;  %v4999_v45 = vsel %vm777_vm2, %v9389_v38, 0.0  ;;  %v10088_v12 = vld [vmem:[#allocation7_spill] sm:$0xff] }
 0x20d   : > { %v9410_v19 = vadd.f32 %v9275_v18, %v4919_v33  ;;  %v4922_v47 = vadd.f32 %v6513_v32, %v4440_v21  ;;  %v5098_v43 = vsel %vm777_vm2, %v5058_v14, 0.0  ;;  %v4438_v22 = vadd.f32 %v4349_v54, %v9288_v50 }
 0x20e   : > { %v4844_v62 = vpop.f32.mrf.mxu0  ;;  %v6480_v60 = vpop.f32.mrf.mxu1  ;;  %v4998_v23 = vadd.f32 %v4997_v37, %v4996_v42  ;;  %v5099_v31 = vadd.f32 %v5098_v43, %v5097_v36  ;;  %v5102_v50 = vsel %vm777_vm2, %v5060_v57, 0.0  ;;  %v5063_v56 = vmul.f32 %v9416_v61, %v9416_v61 }
 0x20f   : > { %v5061_v48 = vmul.f32 %v9410_v19, %v9410_v19  ;;  %v9425_v53 = vadd.f32 %v9275_v18, %v4922_v47  ;;  %v4920_v5 = vadd.f32 %v4831_v63, %v4438_v22  ;;  %v4443_v11 = vadd.f32 %v6480_v60, %v10087_v26 }
 0x210   : > { %v6517_v32 = vpop.f32.mrf.mxu0  ;;  %v4362_v27 = vpop.f32.mrf.mxu1  ;;  %v5101_v49 = vadd.f32 %v5100_v10, %v5099_v31  ;;  %v5000_v20 = vadd.f32 %v4999_v45, %v4998_v23  ;;  %v5001_v24 = vsel %vm777_vm2, %v9410_v19, 0.0  ;;  %v5005_v22 = vsel %vm777_vm2, %v9416_v61, 0.0 }
 0x211   : > { %v4441_v51 = vadd.f32 %v4362_v27, %v9291_v44  ;;  %v9435_v52 = vadd.f32 %v9275_v18, %v4920_v5  ;;  %v4925_v63 = vadd.f32 %v6516_v15, %v4443_v11  ;;  %v5104_v44 = vsel %vm777_vm2, %v5061_v48, 0.0 }
 0x212   : > { %v4847_v9 = vpop.f32.mrf.mxu0  ;;  %v6481_v25 = vpop.f32.mrf.mxu1  ;;  %v5002_v33 = vadd.f32 %v5001_v24, %v5000_v20  ;;  %v5103_v3 = vadd.f32 %v5102_v50, %v5101_v49  ;;  %v5064_v14 = vmul.f32 %v9425_v53, %v9425_v53  ;;  %v5108_v31 = vsel %vm777_vm2, %v5063_v56, 0.0  ;;  %v10089_v49 = vld [vmem:[#allocation10_spill] sm:$0xff] }
 0x213   : > { %v4923_v21 = vadd.f32 %v4844_v62, %v4441_v51  ;;  %v4444_v57 = vadd.f32 %v6481_v25, %v10088_v12  ;;  %v5003_v54 = vsel %vm777_vm2, %v9435_v52, 0.0  ;;  %v5062_v36 = vmul.f32 %v9435_v52, %v9435_v52 }
 0x214   : > { %v6520_v29 = vpop.f32.mrf.mxu0  ;;  %v4365_v42 = vpop.f32.mrf.mxu1  ;;  %v5105_v15 = vadd.f32 %v5104_v44, %v5103_v3  ;;  %v5004_v47 = vadd.f32 %v5003_v54, %v5002_v33  ;;  %v9452_v10 = vadd.f32 %v9275_v18, %v4925_v63  ;;  %v5007_v48 = vsel %vm777_vm2, %v9425_v53, 0.0 }
 0x215   : > { %v9446_v37 = vadd.f32 %v9275_v18, %v4923_v21  ;;  %v4926_v62 = vadd.f32 %v6517_v32, %v4444_v57  ;;  %v5106_v60 = vsel %vm777_vm2, %v5062_v36, 0.0  ;;  %v4442_v45 = vadd.f32 %v4365_v42, %v9294_v59 }
 0x216   : > { %v4860_v43 = vpop.f32.mrf.mxu0  ;;  %v6484_v23 = vpop.f32.mrf.mxu1  ;;  %v5006_v5 = vadd.f32 %v5005_v22, %v5004_v47  ;;  %v5107_v26 = vadd.f32 %v5106_v60, %v5105_v15  ;;  %v5110_v59 = vsel %vm777_vm2, %v5064_v14, 0.0  ;;  %v5067_v33 = vmul.f32 %v9452_v10, %v9452_v10  ;;  %v10090_v14 = vld [vmem:[#allocation8_spill] sm:$0xff] }
 0x217   : > { %v5065_v11 = vmul.f32 %v9446_v37, %v9446_v37  ;;  %v9461_v27 = vadd.f32 %v9275_v18, %v4926_v62  ;;  %v4924_v50 = vadd.f32 %v4847_v9, %v4442_v45  ;;  %v4447_v20 = vadd.f32 %v6484_v23, %v10089_v49 }
 0x218   : > { %v6521_v32 = vpop.f32.mrf.mxu0  ;;  %v4378_v51 = vpop.f32.mrf.mxu1  ;;  %v5109_v24 = vadd.f32 %v5108_v31, %v5107_v26  ;;  %v5008_v56 = vadd.f32 %v5007_v48, %v5006_v5  ;;  %v5009_v3 = vsel %vm777_vm2, %v9446_v37, 0.0  ;;  %v5013_v31 = vsel %vm777_vm2, %v9452_v10, 0.0 }
 0x219   : > { %v4445_v63 = vadd.f32 %v4378_v51, %v9300_v17  ;;  %v9471_v21 = vadd.f32 %v9275_v18, %v4924_v50  ;;  %v4929_v9 = vadd.f32 %v6520_v29, %v4447_v20  ;;  %v5112_v17 = vsel %vm777_vm2, %v5065_v11, 0.0 }
 0x21a   : > { %v4863_v25 = vpop.f32.mrf.mxu0  ;;  %v6485_v12 = vpop.f32.mrf.mxu1  ;;  %v5010_v57 = vadd.f32 %v5009_v3, %v5008_v56  ;;  %v5111_v44 = vadd.f32 %v5110_v59, %v5109_v24  ;;  %v5068_v15 = vmul.f32 %v9461_v27, %v9461_v27  ;;  %v5116_v50 = vsel %vm777_vm2, %v5067_v33, 0.0 }
 0x21b   : > { %v4927_v54 = vadd.f32 %v4860_v43, %v4445_v63  ;;  %v4448_v36 = vadd.f32 %v6485_v12, %v10090_v14  ;;  %v5011_v47 = vsel %vm777_vm2, %v9471_v21, 0.0  ;;  %v5066_v62 = vmul.f32 %v9471_v21, %v9471_v21  ;;  %v10091_v63 = vld [vmem:[#allocation13_spill] sm:$0xff] }
 0x21c   : > { %v6524_v42 = vpop.f32.mrf.mxu0  ;;  %v4381_v22 = vpop.f32.mrf.mxu1  ;;  %v5113_v29 = vadd.f32 %v5112_v17, %v5111_v44  ;;  %v5012_v60 = vadd.f32 %v5011_v47, %v5010_v57  ;;  %v9488_v5 = vadd.f32 %v9275_v18, %v4929_v9  ;;  %v5015_v49 = vsel %vm777_vm2, %v9461_v27, 0.0 }
 0x21d   : > { %v9482_v45 = vadd.f32 %v9275_v18, %v4927_v54  ;;  %v4930_v43 = vadd.f32 %v6521_v32, %v4448_v36  ;;  %v5114_v48 = vsel %vm777_vm2, %v5066_v62, 0.0  ;;  %v4446_v26 = vadd.f32 %v4381_v22, %v9307_v34 }
 0x21e   : > { %v4876_v23 = vpop.f32.mrf.mxu0  ;;  %v6488_v11 = vpop.f32.mrf.mxu1  ;;  %v5014_v20 = vadd.f32 %v5013_v31, %v5012_v60  ;;  %v5115_v51 = vadd.f32 %v5114_v48, %v5113_v29  ;;  %v5118_v59 = vsel %vm777_vm2, %v5068_v15, 0.0  ;;  %v5071_v54 = vmul.f32 %v9488_v5, %v9488_v5 }
 0x21f   : > { %v5069_v24 = vmul.f32 %v9482_v45, %v9482_v45  ;;  %v4928_v56 = vadd.f32 %v4863_v25, %v4446_v26  ;;  %v4451_v3 = vadd.f32 %v6488_v11, %v10091_v63  ;;  %v9499_v57 = vadd.f32 %v9275_v18, %v4930_v43 }
 0x220   : > { %v6525_v32 = vpop.f32.mrf.mxu0  ;;  %v4394_v9 = vpop.f32.mrf.mxu1  ;;  %v5117_v12 = vadd.f32 %v5116_v50, %v5115_v51  ;;  %v5016_v34 = vadd.f32 %v5015_v49, %v5014_v20  ;;  %v5017_v14 = vsel %vm777_vm2, %v9482_v45, 0.0 }
 0x221   : > { %v4449_v33 = vadd.f32 %v4394_v9, %v9310_v16  ;;  %v9507_v36 = vadd.f32 %v9275_v18, %v4928_v56  ;;  %v4933_v25 = vadd.f32 %v6524_v42, %v4451_v3  ;;  %v5021_v16 = vsel %vm777_vm2, %v9488_v5, 0.0 }
 0x222   : > { %v4879_v44 = vpop.f32.mrf.mxu0  ;;  %v6489_v17 = vpop.f32.mrf.mxu1  ;;  %v5018_v15 = vadd.f32 %v5017_v14, %v5016_v34  ;;  %v5119_v47 = vadd.f32 %v5118_v59, %v5117_v12  ;;  %v5120_v60 = vsel %vm777_vm2, %v5069_v24, 0.0  ;;  %v5072_v26 = vmul.f32 %v9499_v57, %v9499_v57 }
 0x223   : > { %v4931_v62 = vadd.f32 %v4876_v23, %v4449_v33  ;;  %v4452_v22 = vadd.f32 %v6489_v17, %v9231_v28  ;;  %v5019_v43 = vsel %vm777_vm2, %v9507_v36, 0.0  ;;  %v5070_v31 = vmul.f32 %v9507_v36, %v9507_v36  ;;  %v10092_v33 = vld [vmem:[#allocation14_spill] sm:$0xff] }
 0x224   : > { %v6528_v29 = vpop.f32.mrf.mxu0  ;;  %v4397_v48 = vpop.f32.mrf.mxu1  ;;  %v5121_v42 = vadd.f32 %v5120_v60, %v5119_v47  ;;  %v5020_v23 = vadd.f32 %v5019_v43, %v5018_v15  ;;  %v9524_v50 = vadd.f32 %v9275_v18, %v4933_v25  ;;  %v3716_v59 = vadd.f32 %v9238_v1, %v9324_v41 }
 0x225   : > { %v9520_v28 = vadd.f32 %v9275_v18, %v4931_v62  ;;  %v5122_v11 = vsel %vm777_vm2, %v5070_v31, 0.0  ;;  %v4934_v49 = vadd.f32 %v6525_v32, %v4452_v22  ;;  %v4450_v20 = vadd.f32 %v4397_v48, %v9313_v7 }
 0x226   : > { %v6492_v51 = vpop.f32.mrf.mxu1  ;;  %v5124_v24 = vsel %vm777_vm2, %v5071_v54, 0.0  ;;  %v5022_v56 = vadd.f32 %v5021_v16, %v5020_v23  ;;  %v5123_v63 = vadd.f32 %v5122_v11, %v5121_v42  ;;  %v4892_v3 = vpop.f32.mrf.mxu0  ;;  %v5023_v9 = vsel %vm777_vm2, %v9499_v57, 0.0 }
 0x227   : > { %v5073_v12 = vmul.f32 %v9520_v28, %v9520_v28  ;;  %v4932_v34 = vadd.f32 %v4879_v44, %v4450_v20  ;;  %v4455_v32 = vadd.f32 %v6492_v51, %v10092_v33  ;;  %v5126_v7 = vsel %vm777_vm2, %v5072_v26, 0.0 }
 0x228   : > { %v4410_v14 = vpop.f32.mrf.mxu1  ;;  %v5125_v25 = vadd.f32 %v5124_v24, %v5123_v63  ;;  %v5024_v17 = vadd.f32 %v5023_v9, %v5022_v56  ;;  %v5075_v41 = vmul.f32 %v9524_v50, %v9524_v50  ;;  %v5025_v54 = vsel %vm777_vm2, %v9520_v28, 0.0  ;;  %v6529_v43 = vpop.f32.mrf.mxu0 }
 0x229   : > { %v4453_v1 = vadd.f32 %v4410_v14, %v9316_v55  ;;  %v9542_v15 = vadd.f32 %v9275_v18, %v4934_v49  ;;  %v9545_v44 = vadd.f32 %v9275_v18, %v4932_v34  ;;  %v5128_v55 = vsel %vm777_vm2, %v5073_v12, 0.0 }
 0x22a   : > { %v6493_v47 = vpop.f32.mrf.mxu1  ;;  %v5026_v62 = vadd.f32 %v5025_v54, %v5024_v17  ;;  %v5127_v22 = vadd.f32 %v5126_v7, %v5125_v25  ;;  %v4937_v42 = vadd.f32 %v6528_v29, %v4455_v32  ;;  %v5029_v23 = vsel %vm777_vm2, %v9524_v50, 0.0  ;;  %v4895_v9 = vpop.f32.mrf.mxu0 }
 0x22b   : > { %v4935_v16 = vadd.f32 %v4892_v3, %v4453_v1  ;;  %v4456_v60 = vadd.f32 %v6493_v47, %v9243_v2  ;;  %v5027_v31 = vsel %vm777_vm2, %v9545_v44, 0.0  ;;  %v5074_v48 = vmul.f32 %v9545_v44, %v9545_v44 }
 0x22c   : > { %v4413_v26 = vpop.f32.mrf.mxu1  ;;  %v5129_v11 = vadd.f32 %v5128_v55, %v5127_v22  ;;  %v5028_v49 = vadd.f32 %v5027_v31, %v5026_v62  ;;  %v5076_v2 = vmul.f32 %v9542_v15, %v9542_v15  ;;  %v5132_v63 = vsel %vm777_vm2, %v5075_v41, 0.0 }
 0x22d   : > { %v9556_v20 = vadd.f32 %v9275_v18, %v4935_v16  ;;  %v5130_v51 = vsel %vm777_vm2, %v5074_v48, 0.0  ;;  %v4938_v24 = vadd.f32 %v6529_v43, %v4456_v60  ;;  %v4454_v56 = vadd.f32 %v4413_v26, %v3716_v59 }
 0x22e   : > { %v5030_v3 = vadd.f32 %v5029_v23, %v5028_v49  ;;  %v5131_v29 = vadd.f32 %v5130_v51, %v5129_v11  ;;  %v5031_v12 = vsel %vm777_vm2, %v9542_v15, 0.0  ;;  %v9565_v34 = vadd.f32 %v9275_v18, %v4937_v42 }
 0x22f   : > { %v5077_v33 = vmul.f32 %v9556_v20, %v9556_v20  ;;  %v4936_v32 = vadd.f32 %v4895_v9, %v4454_v56  ;;  %v5134_v25 = vsel %vm777_vm2, %v5076_v2, 0.0  ;;  %v5033_v59 = vsel %vm777_vm2, %v9556_v20, 0.0 }
 0x230   : > { %v5133_v14 = vadd.f32 %v5132_v63, %v5131_v29  ;;  %v5032_v7 = vadd.f32 %v5031_v12, %v5030_v3  ;;  %v9573_v17 = vadd.f32 %v9275_v18, %v4938_v24  ;;  %v5079_v47 = vmul.f32 %v9565_v34, %v9565_v34 }
 0x231   : > { %v9576_v1 = vadd.f32 %v9275_v18, %v4936_v32  ;;  %v5136_v62 = vsel %vm777_vm2, %v5077_v33, 0.0  ;;  %v5037_v55 = vsel %vm777_vm2, %v9565_v34, 0.0 }
 0x232   : > { %v5034_v41 = vadd.f32 %v5033_v59, %v5032_v7  ;;  %v5135_v54 = vadd.f32 %v5134_v25, %v5133_v14  ;;  %v5080_v18 = vmul.f32 %v9573_v17, %v9573_v17  ;;  %v5140_v26 = vsel %vm777_vm2, %v5079_v47, 0.0 }
 0x233   : > { %v5035_v22 = vsel %vm777_vm2, %v9576_v1, 0.0  ;;  %v5078_v16 = vmul.f32 %v9576_v1, %v9576_v1  ;;  %v5039_v23 = vsel %vm777_vm2, %v9573_v17, 0.0 }
 0x234   : > { %v5137_v60 = vadd.f32 %v5136_v62, %v5135_v54  ;;  %v5036_v43 = vadd.f32 %v5035_v22, %v5034_v41  ;;  %v5142_v2 = vsel %vm777_vm2, %v5080_v18, 0.0 }
 0x235   : > { %v5138_v31 = vsel %vm777_vm2, %v5078_v16, 0.0 }
 0x236   : > { %v5038_v48 = vadd.f32 %v5037_v55, %v5036_v43  ;;  %v5139_v42 = vadd.f32 %v5138_v31, %v5137_v60 }
 0x238   : > { %v5040_v11 = vadd.f32 %v5039_v23, %v5038_v48  ;;  %v5141_v49 = vadd.f32 %v5140_v26, %v5139_v42 }
 0x23a   : > { %v5041_v51 = vrot.slane %v5040_v11, 4  ;;  %v5143_v24 = vadd.f32 %v5142_v2, %v5141_v49 }
 0x23c   : > { %v5042_v56 = vadd.f32 %v5041_v51, %v5040_v11  ;;  %v5144_v63 = vrot.slane %v5143_v24, 4 }
 0x23e   : > { %v5043_v3 = vrot.slane %v5042_v56, 2  ;;  %v5145_v29 = vadd.f32 %v5144_v63, %v5143_v24 }
 0x240   : > { %v5044_v9 = vadd.f32 %v5043_v3, %v5042_v56  ;;  %v5146_v12 = vrot.slane %v5145_v29, 2 }
 0x242   : > { %v5045_v33 = vrot.slane %v5044_v9, 1  ;;  %v5147_v32 = vadd.f32 %v5146_v12, %v5145_v29 }
 0x244   : > { %v5046_v14 = vadd.f32 %v5045_v33, %v5044_v9  ;;  %v5148_v7 = vrot.slane %v5147_v32, 1 }
 0x246   : > { %v9594_v25 = vmul.f32 0.00390625, %v5046_v14  ;;  %v5149_v59 = vadd.f32 %v5148_v7, %v5147_v32  ;;  %v5221_v7 = vld [vmem:[%s9645_s5 + $0x10] sm:$0xff] }
 0x248   : > { %v5150_v41 = vmul.f32 0.00390625, %v5149_v59  ;;  %v5151_v54 = vmul.f32 %v9594_v25, %v9594_v25  ;;  %v5182_v47 = vsub.f32 %v9576_v1, %v9594_v25  ;;  %v5162_v22 = vsub.f32 %v9399_v4, %v9594_v25 }
 0x249   : > { %v5165_v60 = vsub.f32 %v9410_v19, %v9594_v25  ;;  %v5166_v43 = vsub.f32 %v9435_v52, %v9594_v25  ;;  %v5167_v55 = vsub.f32 %v9416_v61, %v9594_v25  ;;  %v5168_v18 = vsub.f32 %v9425_v53, %v9594_v25 }
 0x24a   : > { %v5152_v62 = vsub.f32 %v5150_v41, %v5151_v54  ;;  %v5169_v1 = vsub.f32 %v9446_v37, %v9594_v25  ;;  %v5170_v4 = vsub.f32 %v9471_v21, %v9594_v25  ;;  %v5171_v19 = vsub.f32 %v9452_v10, %v9594_v25 }
 0x24b   : > { %v5172_v52 = vsub.f32 %v9461_v27, %v9594_v25  ;;  %v5173_v61 = vsub.f32 %v9482_v45, %v9594_v25  ;;  %v5174_v53 = vsub.f32 %v9507_v36, %v9594_v25  ;;  %v5175_v37 = vsub.f32 %v9488_v5, %v9594_v25  ;;  %v5234_v5 = vld [vmem:[%s9645_s5 + $0x78] sm:$0xff] }
 0x24c   : > { %v5185_v16 = vadd.f32 1e-05, %v5152_v62  ;;  %v5176_v21 = vsub.f32 %v9499_v57, %v9594_v25  ;;  %v5177_v31 = vsub.f32 %v9520_v28, %v9594_v25  ;;  %v5178_v48 = vsub.f32 %v9545_v44, %v9594_v25  ;;  %v5222_v62 = vld [vmem:[%s9645_s5 + $0x18] sm:$0xff] }
 0x24d   : > { %v5179_v27 = vsub.f32 %v9524_v50, %v9594_v25  ;;  %v5180_v45 = vsub.f32 %v9542_v15, %v9594_v25  ;;  %v5181_v36 = vsub.f32 %v9556_v20, %v9594_v25  ;;  %v5183_v42 = vsub.f32 %v9565_v34, %v9594_v25  ;;  %v5237_v50 = vld [vmem:[%s9645_s5 + $0x90] sm:$0xff] }
 0x24e   : > { %6658 = vrsqrt.f32 %v5185_v16  ;;  %v5184_v26 = vsub.f32 %v9573_v17, %v9594_v25  ;;  %v5153_v23 = vsub.f32 %v9285_v30, %v9594_v25  ;;  %v5154_v11 = vsub.f32 %v9321_v6, %v9594_v25  ;;  %v5248_v6 = vld [vmem:[%s9645_s5 + $0xe8] sm:$0xff]  ;;  %v5241_v34 = vld [vmem:[%s9645_s5 + $0xb0] sm:$0xff] }
 0x24f   : > { %v5155_v49 = vsub.f32 %v9297_v13, %v9594_v25  ;;  %v5156_v2 = vsub.f32 %v9303_v46, %v9594_v25  ;;  %v5157_v51 = vsub.f32 %v9338_v35, %v9594_v25  ;;  %v5158_v24 = vsub.f32 %v9363_v58, %v9594_v25  ;;  %v5220_v16 = vld [vmem:[%s9645_s5 + $0x8] sm:$0xff] }
 0x250   : > { %v5159_v30 = vsub.f32 %v9345_v0, %v9594_v25  ;;  %v5160_v13 = vsub.f32 %v9353_v8, %v9594_v25  ;;  %v5161_v63 = vsub.f32 %v9374_v39, %v9594_v25  ;;  %v5163_v46 = vsub.f32 %v9380_v40, %v9594_v25  ;;  %v5240_v17 = vld [vmem:[%s9645_s5 + $0xa8] sm:$0xff] }
 0x251   : > { %v5164_v35 = vsub.f32 %v9389_v38, %v9594_v25  ;;  %v5219_v38 = vld [vmem:[%s9645_s5] sm:$0xff]  ;;  %v5245_v25 = vld [vmem:[%s9645_s5 + $0xd0] sm:$0xff] }
 0x25b   : > { %v6659_v56 = vpop.eup %6658 }
 0x25c   : > { %v5216_v58 = vmul.f32 %v6659_v56, %v5182_v47  ;;  %v5187_v3 = vmul.f32 %v6659_v56, %v5153_v23  ;;  %v5188_v29 = vmul.f32 %v6659_v56, %v5154_v11  ;;  %v5189_v0 = vmul.f32 %v6659_v56, %v5155_v49  ;;  %v5225_v23 = vld [vmem:[%s9645_s5 + $0x30] sm:$0xff]  ;;  %v5223_v11 = vld [vmem:[%s9645_s5 + $0x20] sm:$0xff] }
 0x25d   : > { %v5190_v9 = vmul.f32 %v6659_v56, %v5156_v2  ;;  %v5191_v8 = vmul.f32 %v6659_v56, %v5157_v51  ;;  %v5192_v12 = vmul.f32 %v6659_v56, %v5158_v24  ;;  %v5193_v39 = vmul.f32 %v6659_v56, %v5159_v30  ;;  %v5229_v24 = vld [vmem:[%s9645_s5 + $0x50] sm:$0xff]  ;;  %v5227_v30 = vld [vmem:[%s9645_s5 + $0x40] sm:$0xff] }
 0x25e   : > { %v5280_v33 = vadd.f32 %v5248_v6, %v5216_v58  ;;  %v5194_v32 = vmul.f32 %v6659_v56, %v5160_v13  ;;  %v5195_v14 = vmul.f32 %v6659_v56, %v5161_v63  ;;  %v5196_v40 = vmul.f32 %v6659_v56, %v5162_v22  ;;  %v5233_v63 = vld [vmem:[%s9645_s5 + $0x70] sm:$0xff] }
 0x25f   : > { %v5197_v59 = vmul.f32 %v6659_v56, %v5163_v46  ;;  %v5198_v41 = vmul.f32 %v6659_v56, %v5164_v35  ;;  %v5199_v54 = vmul.f32 %v6659_v56, %v5165_v60  ;;  %v5200_v47 = vmul.f32 %v6659_v56, %v5166_v43  ;;  %v5226_v60 = vld [vmem:[%s9645_s5 + $0x38] sm:$0xff]  ;;  %v5224_v43 = vld [vmem:[%s9645_s5 + $0x28] sm:$0xff] }
 0x260   : > { %5312 = vst.msk [vmem:[%s9681_s7 + $0xe8] sm:$0xff] %vm777_vm2, %v5280_v33  ;;  %v5201_v22 = vmul.f32 %v6659_v56, %v5167_v55  ;;  %v9685_v49 = vmul.f32 %v6659_v56, %v5168_v18  ;;  %v9687_v2 = vmul.f32 %v6659_v56, %v5169_v1  ;;  %v9689_v51 = vmul.f32 %v6659_v56, %v5170_v4  ;;  %v5230_v1 = vld [vmem:[%s9645_s5 + $0x58] sm:$0xff]  ;;  %v5228_v4 = vld [vmem:[%s9645_s5 + $0x48] sm:$0xff] }
 0x261   : > { %v5205_v6 = vmul.f32 %v6659_v56, %v5171_v19  ;;  %v9698_v13 = vmul.f32 %v6659_v56, %v5172_v52  ;;  %v9700_v55 = vmul.f32 %v6659_v56, %v5173_v61  ;;  %v9702_v18 = vmul.f32 %v6659_v56, %v5174_v53  ;;  %v5231_v61 = vld [vmem:[%s9645_s5 + $0x60] sm:$0xff]  ;;  %v5232_v53 = vld [vmem:[%s9645_s5 + $0x68] sm:$0xff] }
 0x262   : > { %v5209_v46 = vmul.f32 %v6659_v56, %v5175_v37  ;;  %v9713_v10 = vmul.f32 %v6659_v56, %v5176_v21  ;;  %v9718_v19 = vmul.f32 %v6659_v56, %v5177_v31  ;;  %v9723_v52 = vmul.f32 %v6659_v56, %v5178_v48  ;;  %v5235_v21 = vld [vmem:[%s9645_s5 + $0x80] sm:$0xff]  ;;  %v5238_v31 = vld [vmem:[%s9645_s5 + $0x98] sm:$0xff] }
 0x263   : > { %v9731_v57 = vmul.f32 %v6659_v56, %v5179_v27  ;;  %v9736_v28 = vmul.f32 %v6659_v56, %v5180_v45  ;;  %v9741_v44 = vmul.f32 %v6659_v56, %v5181_v36  ;;  %v9746_v37 = vmul.f32 %v6659_v56, %v5183_v42  ;;  %v5236_v45 = vld [vmem:[%s9645_s5 + $0x88] sm:$0xff]  ;;  %v5239_v36 = vld [vmem:[%s9645_s5 + $0xa0] sm:$0xff] }
 0x264   : > { %v9754_v15 = vmul.f32 %v6659_v56, %v5184_v26  ;;  %v5251_v48 = vadd.f32 %v5219_v38, %v5187_v3  ;;  %v5252_v20 = vadd.f32 %v5220_v16, %v5188_v29  ;;  %v5253_v27 = vadd.f32 %v5221_v7, %v5189_v0  ;;  %v5243_v0 = vld [vmem:[%s9645_s5 + $0xc0] sm:$0xff]  ;;  %v5250_v38 = vld [vmem:[%s9645_s5 + $0xf8] sm:$0xff] }
 0x265   : > { %10093 = vst [vmem:[#allocation15_spill] sm:$0xff] %v9746_v37  ;;  %v5254_v42 = vadd.f32 %v5222_v62, %v5190_v9  ;;  %v5255_v35 = vadd.f32 %v5223_v11, %v5191_v8  ;;  %v5256_v58 = vadd.f32 %v5224_v43, %v5192_v12  ;;  %v5257_v33 = vadd.f32 %v5225_v23, %v5193_v39  ;;  %v5242_v37 = vld [vmem:[%s9645_s5 + $0xb8] sm:$0xff]  ;;  %v5244_v8 = vld [vmem:[%s9645_s5 + $0xc8] sm:$0xff]  ;;  %v5247_v7 = vld [vmem:[%s9645_s5 + $0xe0] sm:$0xff] }
 0x266   : > { %v5258_v26 = vadd.f32 %v5226_v60, %v5194_v32  ;;  %v5259_v56 = vadd.f32 %v5227_v30, %v5195_v14  ;;  %v5260_v3 = vadd.f32 %v5228_v4, %v5196_v40  ;;  %v5261_v29 = vadd.f32 %v5229_v24, %v5197_v59  ;;  %5283 = vst.msk [vmem:[%s9681_s7] sm:$0xff] %vm777_vm2, %v5251_v48  ;;  %v5246_v9 = vld [vmem:[%s9645_s5 + $0xd8] sm:$0xff]  ;;  %v5249_v40 = vld [vmem:[%s9645_s5 + $0xf0] sm:$0xff] }
 0x267   : > { %5284 = vst.msk [vmem:[%s9681_s7 + $0x8] sm:$0xff] %vm777_vm2, %v5252_v20  ;;  %5285 = vst.msk [vmem:[%s9681_s7 + $0x10] sm:$0xff] %vm777_vm2, %v5253_v27  ;;  %v5262_v12 = vadd.f32 %v5230_v1, %v5198_v41  ;;  %v5263_v39 = vadd.f32 %v5231_v61, %v5199_v54  ;;  %v5264_v32 = vadd.f32 %v5232_v53, %v5200_v47 }
 0x268   : > { %v5265_v14 = vadd.f32 %v5233_v63, %v5201_v22  ;;  %5286 = vst.msk [vmem:[%s9681_s7 + $0x18] sm:$0xff] %vm777_vm2, %v5254_v42  ;;  %5287 = vst.msk [vmem:[%s9681_s7 + $0x20] sm:$0xff] %vm777_vm2, %v5255_v35  ;;  %v5266_v59 = vadd.f32 %v5234_v5, %v9685_v49  ;;  %v5267_v41 = vadd.f32 %v5235_v21, %v9687_v2 }
 0x269   : > { %5288 = vst.msk [vmem:[%s9681_s7 + $0x28] sm:$0xff] %vm777_vm2, %v5256_v58  ;;  %5289 = vst.msk [vmem:[%s9681_s7 + $0x30] sm:$0xff] %vm777_vm2, %v5257_v33  ;;  %v5268_v54 = vadd.f32 %v5236_v45, %v9689_v51  ;;  %v5269_v47 = vadd.f32 %v5237_v50, %v5205_v6  ;;  %v5270_v62 = vadd.f32 %v5238_v31, %v9698_v13 }
 0x26a   : > { %5290 = vst.msk [vmem:[%s9681_s7 + $0x38] sm:$0xff] %vm777_vm2, %v5258_v26  ;;  %5291 = vst.msk [vmem:[%s9681_s7 + $0x40] sm:$0xff] %vm777_vm2, %v5259_v56  ;;  %v5271_v16 = vadd.f32 %v5239_v36, %v9700_v55  ;;  %v5272_v23 = vadd.f32 %v5240_v17, %v9702_v18  ;;  %v5273_v11 = vadd.f32 %v5241_v34, %v5209_v46 }
 0x26b   : > { %5292 = vst.msk [vmem:[%s9681_s7 + $0x48] sm:$0xff] %vm777_vm2, %v5260_v3  ;;  %5293 = vst.msk [vmem:[%s9681_s7 + $0x50] sm:$0xff] %vm777_vm2, %v5261_v29  ;;  %v5274_v22 = vadd.f32 %v5242_v37, %v9713_v10  ;;  %v5275_v49 = vadd.f32 %v5243_v0, %v9718_v19  ;;  %v5276_v2 = vadd.f32 %v5244_v8, %v9723_v52 }
 0x26c   : > { %5294 = vst.msk [vmem:[%s9681_s7 + $0x58] sm:$0xff] %vm777_vm2, %v5262_v12  ;;  %5295 = vst.msk [vmem:[%s9681_s7 + $0x60] sm:$0xff] %vm777_vm2, %v5263_v39  ;;  %v5277_v51 = vadd.f32 %v5245_v25, %v9731_v57  ;;  %v5278_v60 = vadd.f32 %v5246_v9, %v9736_v28  ;;  %v5279_v43 = vadd.f32 %v5247_v7, %v9741_v44  ;;  %v10094_v24 = vld [vmem:[#allocation15_spill] sm:$0xff] }
 0x26d   : > { %5296 = vst.msk [vmem:[%s9681_s7 + $0x68] sm:$0xff] %vm777_vm2, %v5264_v32  ;;  %5297 = vst.msk [vmem:[%s9681_s7 + $0x70] sm:$0xff] %vm777_vm2, %v5265_v14  ;;  %v5281_v30 = vadd.f32 %v5249_v40, %v10094_v24  ;;  %v5282_v6 = vadd.f32 %v5250_v38, %v9754_v15 }
 0x26e   : > { %5298 = vst.msk [vmem:[%s9681_s7 + $0x78] sm:$0xff] %vm777_vm2, %v5266_v59  ;;  %5299 = vst.msk [vmem:[%s9681_s7 + $0x80] sm:$0xff] %vm777_vm2, %v5267_v41 }
 0x26f   : > { %5300 = vst.msk [vmem:[%s9681_s7 + $0x88] sm:$0xff] %vm777_vm2, %v5268_v54  ;;  %5301 = vst.msk [vmem:[%s9681_s7 + $0x90] sm:$0xff] %vm777_vm2, %v5269_v47 }
 0x270   : > { %5302 = vst.msk [vmem:[%s9681_s7 + $0x98] sm:$0xff] %vm777_vm2, %v5270_v62  ;;  %5303 = vst.msk [vmem:[%s9681_s7 + $0xa0] sm:$0xff] %vm777_vm2, %v5271_v16 }
 0x271   : > { %5304 = vst.msk [vmem:[%s9681_s7 + $0xa8] sm:$0xff] %vm777_vm2, %v5272_v23  ;;  %5305 = vst.msk [vmem:[%s9681_s7 + $0xb0] sm:$0xff] %vm777_vm2, %v5273_v11 }
 0x272   : > { %5306 = vst.msk [vmem:[%s9681_s7 + $0xb8] sm:$0xff] %vm777_vm2, %v5274_v22  ;;  %5307 = vst.msk [vmem:[%s9681_s7 + $0xc0] sm:$0xff] %vm777_vm2, %v5275_v49 }
 0x273   : > { %5308 = vst.msk [vmem:[%s9681_s7 + $0xc8] sm:$0xff] %vm777_vm2, %v5276_v2  ;;  %5309 = vst.msk [vmem:[%s9681_s7 + $0xd0] sm:$0xff] %vm777_vm2, %v5277_v51 }
 0x274   : > { %5310 = vst.msk [vmem:[%s9681_s7 + $0xd8] sm:$0xff] %vm777_vm2, %v5278_v60  ;;  %5311 = vst.msk [vmem:[%s9681_s7 + $0xe0] sm:$0xff] %vm777_vm2, %v5279_v43 }
 0x275   : > { %5313 = vst.msk [vmem:[%s9681_s7 + $0xf0] sm:$0xff] %vm777_vm2, %v5281_v30  ;;  %5314 = vst.msk [vmem:[%s9681_s7 + $0xf8] sm:$0xff] %vm777_vm2, %v5282_v6 }
 0x276   : > { %6677 = shalt.err (!%p6674_p5)
}
 0x277   : > { %s6678_s24 = scalar_lea.hbm %s9823_s12, 4096  ;;  %s6682_s30 = scalar_lea.hbm %s9908_s4, 8192 }
 0x278   : > { %p6679_p6 = scmp.ne.s32.totalorder %s9823_s12, %s6678_s24  ;;  %p6683_p10 = scmp.lt.s32.totalorder %s9823_s12, %s9908_s4 }
 0x279   : > { %p6684_p11 = scmp.lt.s32.totalorder %s6682_s30, %s6678_s24 }
 0x27a   : > { %p6680_p7 = pnand %p6679_p6, %p6810_p4 }
 0x27b   : > { %p6685_p12 = por %p6684_p11, %p6683_p10 }
 0x27c   : > { %p6681_p9 = pneg %p6680_p7 }
 0x27e   : > { %p6686_p13 = pnand %p6685_p12, %p6681_p9 }
 0x280   : > { %6689 = shalt.err (!%p6686_p13)
}
 0x281   : > { %s6743_s7 = smov 128   ;;  %s6744_s8 = smov 8  }
 0x282   : > { %6535 = dma.vmem_to_hbm [thread:$0]  (%p6810_p4), %s9827_s9, 4096, %s9823_s12, %s9859_s18, %s6743_s7, %s6743_s7, %s6744_s8  }
 0x283 PF: > { %p6541_p0 = scmp.ge.s32.totalorder %s6740_s20, 2  ;;  %s5345_s10 = sand.u32 1, %s6720_s15  }
 0x284   : > { %s5346_s11 = scalar_lea.sflag [#allocation3], %s5345_s10 }
 0x285   : > { %p6538_p1 = pnand %p6541_p0, %p6817_p8 }
 0x287   : > { %p6539_p2 = pneg %p6538_p1 }
 0x289   : > { %6715 = dma.done.wait (%p6539_p2), %s5346_s11, 4096  }
 0x28a   : > { %6717 = vsyncadd (%p6539_p2), %s5346_s11, 4294963200  ;;  %s17_s20 = sadd.s32 1, %s6740_s20   ;;  %s10095_s15 = smov %s6724_s16 }
 0x28b   : > { %p14_p3 = scmp.ge.s32.totalorder %s17_s20, 4   ;;  %s10096_s16 = smov %s6728_s17 }
 0x28c   : > { %s10097_s17 = smov %s6823_s28  ;;  %s10098_s18 = smov %s6736_s19 }
 0x28d   : > { %s10099_s19 = smov %s10101_s23  ;;  %16 = sbr.rel (!%p14_p3) target bundleno = 4 (0x4), region = 90 }
 0x292   :  { %5351 = vsyncpa [#allocation3], 1 }
 0x293   :  { %5353 = vsyncpa [#allocation3 + $0x1], 1 }

// kernel: resnet_block_forward.2
= control target key start
LH: loop header
LB: loop body
LE: loop exit
PB: predicated region body
PF: predicated region fallthrough
CT: control target
= control target key end

     0   :  { %s6754_s12 = smov 0   ;;  %s6756_s13 = smov 0   ;;  %s9782_s0 = inlined_call_operand.vmem [shape: bf16[2,18,18,32], index: 0, kind: input, shape index: {}]   ;;  %s9783_s1 = inlined_call_operand.vmem [shape: bf16[9,32,32], index: 1, kind: input, shape index: {}]   ;;  %s9784_s2 = inlined_call_operand.vmem [shape: f32[1,32], index: 2, kind: input, shape index: {}]   ;;  %s9785_s3 = inlined_call_operand.vmem [shape: bf16[2,16,16,32], index: 3, kind: output, shape index: {}]  }
   0x1   :  { %s6758_s14 = smov 0  }
   0x2 LB: > { %s25_s15 = sadd.s32 1, %s6728_s13  ;;  %p5473_p0 = scmp.ge.s32.totalorder %s6732_s14, 1  ;;  %s6732_s14 = sphi %s6758_s14, %s13_s14   ;;  %s6728_s13 = sphi %s6756_s13, %s9969_s13   ;;  %s6724_s12 = sphi %s6754_s12, %s9968_s12  }
   0x3   : > { %p27_p1 = scmp.ge.s32.totalorder %s25_s15, 2  ;;  %p168_p2 = scmp.lt.s32.totalorder %s6732_s14, 3 }
   0x5   : > { %s9971_s15 = smov (%p27_p1, %s25_s15), 0  ;;  %p169_p3 = pnand %p5473_p0, %p168_p2 }
   0x7   : > { %172 = sbr.rel (%p169_p3) target bundleno = 632 (0x278), region = 32 }
   0xc   : > { %v6638_v0 = vld [vmem:[%s9783_s1 + $0x18] sm:$0xff]   ;;  %p202_p4 = scmp.lt.s32.totalorder %s6724_s12, 1  ;;  %v6639_v1 = vld [vmem:[%s9783_s1 + $0x10] sm:$0xff]   ;;  %v6783_v2 = vld [vmem:[%s9783_s1 + $0x8] sm:$0xff]   ;;  %vm275_vm0 = vsmask.f32 3328 }
   0xd   : > { %6609 = vmatprep.subr.bf16.mxu1 %v6638_v0  ;;  %6285 = vmatprep.subr.bf16.mxu0 %v6638_v0  ;;  %v6789_v3 = vld [vmem:[%s9783_s1 + $0x28] sm:$0xff]   ;;  %vm276_vm1 = vsmask.f32 7440  ;;  %vm727_vm2 = vcmask 261120   ;;  %vm1286_vm4 = vcmask 1042432   ;;  %vm1287_vm5 = vcmask 1046532  }
   0xe   : > { %s9973_s12 = smov (!%p202_p4, %s6724_s12), 1  ;;  %6611 = vmatpush3.bf16.msra.mxu1 %v6638_v0  ;;  %6286 = vmatpush3.bf16.msra.mxu0 %v6638_v0  ;;  %vm6834_vm3 = vmor %vm275_vm0, %vm276_vm1  ;;  %vm5329_vm7 = vcmask 257024  }
   0xf   : > { %6610 = vmatprep.subr.bf16.mxu1 %v6639_v1  ;;  %6287 = vmatprep.subr.bf16.mxu0 %v6639_v1  ;;  %s6613_s22 = smul.u32 216, %s9973_s12  ;;  %vm7120_vm6 = vmor %vm1286_vm4, %vm1287_vm5  ;;  %s6090_s8 = sshll.u32 %s9973_s12, 7 }
  0x10   : > { %s9703_s10 = scalar_lea.vmem %s9785_s3, %s6090_s8 }
  0x11   : > { %s6794_s27 = scalar_lea.vmem %s9782_s0, %s6613_s22 }
  0x12   : > { %6612 = vmatpush3.bf16.msra.mxu1 %v6639_v1  ;;  %6288 = vmatpush3.bf16.msra.mxu0 %v6639_v1  ;;  %v6797_v4 = vld [vmem:[%s6794_s27] sm:$0xf]  ;;  %v6800_v5 = vld [vmem:[%s6794_s27 + $0x4] sm:$0xf]  ;;  %v6803_v6 = vld [vmem:[%s6794_s27 + $0x8] sm:$0x1] }
  0x13   : > { %v279_v7 = vshrl.u32 %v6797_v4, 16  ;;  %v282_v8 = vshll.u32 %v6797_v4, 16  ;;  %v288_v9 = vshll.u32 %v6800_v5, 16  ;;  %v292_v10 = vshrl.u32 %v6800_v5, 16  ;;  %v6810_v11 = vld [vmem:[%s6794_s27 + $0x60] sm:$0xf]  ;;  %6321 = vmatprep.subr.bf16.mxu1 %v6783_v2  ;;  %6357 = vmatprep.subr.bf16.mxu0 %v6789_v3 }
  0x14   : > { %v298_v12 = vshll.u32 %v6803_v6, 16  ;;  %v6816_v13 = vld [vmem:[%s6794_s27 + $0x64] sm:$0xf]  ;;  %v6819_v14 = vld [vmem:[%s6794_s27 + $0x68] sm:$0x1]  ;;  %v471_v20 = vshrl.u32 %v6810_v11, 16 }
  0x15   : > { %v281_v15 = vrot.slane %v279_v7, 4  ;;  %v284_v16 = vrot.slane %v282_v8, 5  ;;  %v290_v17 = vrot.slane %v288_v9, 5  ;;  %v294_v18 = vrot.slane %v292_v10, 4  ;;  %v6827_v27 = vld [vmem:[%s6794_s27 + $0xc] sm:$0xf] }
  0x16   : > { %v300_v19 = vrot.slane %v298_v12, 5  ;;  %v474_v21 = vshll.u32 %v6810_v11, 16  ;;  %v480_v22 = vshll.u32 %v6816_v13, 16  ;;  %v484_v25 = vshrl.u32 %v6816_v13, 16  ;;  %v6830_v28 = vld [vmem:[%s6794_s27 + $0x10] sm:$0xf] }
  0x17   : > { %v285_v23 = vor.u32 %v284_v16, %v281_v15  ;;  %v295_v24 = vor.u32 %v294_v18, %v290_v17  ;;  %v490_v26 = vshll.u32 %v6819_v14, 16  ;;  %v473_v31 = vrot.slane %v471_v20, 4  ;;  %v6840_v39 = vld [vmem:[%s6794_s27 + $0x14] sm:$0x1]  ;;  %v6851_v51 = vld [vmem:[%s6794_s27 + $0x6c] sm:$0xf] }
  0x18   : > { %v476_v32 = vrot.slane %v474_v21, 5  ;;  %v482_v33 = vrot.slane %v480_v22, 5  ;;  %v486_v36 = vrot.slane %v484_v25, 4  ;;  %v303_v40 = vshrl.u32 %v6827_v27, 16  ;;  %v6855_v56 = vld [vmem:[%s6794_s27 + $0x70] sm:$0xf] }
  0x19   : > { %v286_v34 = vrot.slane %v285_v23, 4  ;;  %v296_v35 = vrot.slane %v295_v24, 4  ;;  %v492_v37 = vrot.slane %v490_v26, 5  ;;  %v306_v41 = vshll.u32 %v6827_v27, 16  ;;  %v6863_v61 = vld [vmem:[%s6794_s27 + $0x74] sm:$0x1] }
  0x1a   : > { %v477_v38 = vor.u32 %v476_v32, %v473_v31  ;;  %v312_v42 = vshll.u32 %v6830_v28, 16  ;;  %v487_v45 = vor.u32 %v486_v36, %v482_v33  ;;  %v316_v46 = vshrl.u32 %v6830_v28, 16  ;;  %v6869_v7 = vld [vmem:[%s6794_s27 + $0x18] sm:$0xf]  ;;  %v6882_v23 = vld [vmem:[%s6794_s27 + $0x20] sm:$0x1] }
  0x1b   : > { %v291_v43 = vsel %vm6834_vm3, %v286_v34, %v290_v17  ;;  %v301_v44 = vsel %vm6834_vm3, %v296_v35, %v300_v19  ;;  %v305_v49 = vrot.slane %v303_v40, 4  ;;  %v308_v50 = vrot.slane %v306_v41, 5  ;;  %v6876_v19 = vld [vmem:[%s6794_s27 + $0x1c] sm:$0xf]  ;;  %v7056_v30 = vld [vmem:[%s6794_s27 + $0xac] sm:$0xf] }
  0x1c   : > { %v5481_v47 = vcombine.low %v291_v43, %v301_v44  ;;  %v478_v48 = vrot.slane %v477_v38, 4  ;;  %v488_v52 = vrot.slane %v487_v45, 4  ;;  %v314_v53 = vrot.slane %v312_v42, 5  ;;  %v6643_v38 = vld [vmem:[%s9783_s1 + $0x20] sm:$0xff]   ;;  %v6896_v44 = vld [vmem:[%s6794_s27 + $0x7c] sm:$0xf] }
  0x1d   : > { %v318_v54 = vrot.slane %v316_v46, 4  ;;  %v322_v55 = vshll.u32 %v6840_v39, 16  ;;  %v309_v58 = vor.u32 %v308_v50, %v305_v49  ;;  %v495_v1 = vshrl.u32 %v6851_v51, 16  ;;  %9816 = vst [vmem:[#allocation2_spill] sm:$0xff] %v6896_v44  ;;  %9824 = vst [vmem:[#allocation10_spill] sm:$0xff] %v7056_v30 }
  0x1e   : > { %6289 = vmatprep.mubr.msk.bf16.mxu0 %vm727_vm2, %v5481_v47  ;;  %v483_v57 = vsel %vm6834_vm3, %v478_v48, %v482_v33  ;;  %v493_v62 = vsel %vm6834_vm3, %v488_v52, %v492_v37  ;;  %v498_v10 = vshll.u32 %v6851_v51, 16  ;;  %v504_v12 = vshll.u32 %v6855_v56, 16  ;;  %v243_v33 = vld [vmem:[%s6794_s27 + $0x78] sm:$0xf] }
  0x1f   : > { %v319_v63 = vor.u32 %v318_v54, %v314_v53  ;;  %v324_v0 = vrot.slane %v322_v55, 5  ;;  %v5489_v8 = vcombine.low %v483_v57, %v493_v62  ;;  %v310_v9 = vrot.slane %v309_v58, 4  ;;  %v6901_v54 = vld [vmem:[%s6794_s27 + $0x80] sm:$0x1] }
  0x20   : > { %v497_v16 = vrot.slane %v495_v1, 4  ;;  %v508_v17 = vshrl.u32 %v6855_v56, 16  ;;  %v514_v18 = vshll.u32 %v6863_v61, 16  ;;  %v500_v21 = vrot.slane %v498_v10, 5  ;;  %9817 = vst [vmem:[#allocation3_spill] sm:$0xff] %v6901_v54 }
  0x21   : > { %v320_v15 = vrot.slane %v319_v63, 4  ;;  %6305 = vmatprep.mubr.msk.bf16.mxu1 %vm727_vm2, %v5489_v8  ;;  %v315_v20 = vsel %vm6834_vm3, %v310_v9, %v314_v53  ;;  %v506_v22 = vrot.slane %v504_v12, 5  ;;  %v327_v24 = vshrl.u32 %v6869_v7, 16  ;;  %v6907_v63 = vld [vmem:[%s6794_s27 + $0x24] sm:$0xf] }
  0x22   : > { %v510_v26 = vrot.slane %v508_v17, 4  ;;  %v516_v31 = vrot.slane %v514_v18, 5  ;;  %v330_v32 = vshll.u32 %v6869_v7, 16  ;;  %v501_v35 = vor.u32 %v500_v21, %v497_v16  ;;  %v6918_v10 = vld [vmem:[%s6794_s27 + $0x28] sm:$0xf]  ;;  %v6642_v18 = vld [vmem:[%s9783_s1] sm:$0xff]  }
  0x23   : > { %v325_v25 = vsel %vm6834_vm3, %v320_v15, %v324_v0  ;;  %v329_v36 = vrot.slane %v327_v24, 4  ;;  %v336_v37 = vshll.u32 %v6876_v19, 16  ;;  %v340_v42 = vshrl.u32 %v6876_v19, 16  ;;  %v6927_v24 = vld [vmem:[%s6794_s27 + $0x2c] sm:$0x1] }
  0x24   : > { %v5482_v34 = vcombine.low %v315_v20, %v325_v25  ;;  %v511_v40 = vor.u32 %v510_v26, %v506_v22  ;;  %v332_v41 = vrot.slane %v330_v32, 5  ;;  %v346_v43 = vshll.u32 %v6882_v23, 16 }
  0x25   : > { %v502_v45 = vrot.slane %v501_v35, 4  ;;  %v338_v46 = vrot.slane %v336_v37, 5  ;;  %v519_v47 = vshrl.u32 %v243_v33, 16  ;;  %v522_v48 = vshll.u32 %v243_v33, 16 }
  0x26   : > { %6290 = vmatmul.mubr.msk.bf16.vlgmr.msra.gmra.mxu0 %vm727_vm2, %v5482_v34  ;;  %v512_v49 = vrot.slane %v511_v40, 4  ;;  %v333_v50 = vor.u32 %v332_v41, %v329_v36  ;;  %v342_v52 = vrot.slane %v340_v42, 4  ;;  %v348_v53 = vrot.slane %v346_v43, 5  ;;  %v6934_v34 = vld [vmem:[%s6794_s27 + $0x84] sm:$0xf] }
  0x27   : > { %6358 = vmatpush3.bf16.msra.mxu0 %v6789_v3  ;;  %v507_v55 = vsel %vm6834_vm3, %v502_v45, %v506_v22  ;;  %v521_v57 = vrot.slane %v519_v47, 4  ;;  %v524_v58 = vrot.slane %v522_v48, 5  ;;  %v528_v62 = vshll.u32 %v6896_v44, 16  ;;  %v6912_v3 = vld [vmem:[%s9783_s1 + $0x48] sm:$0xff]  }
  0x28   : > { %6359 = vmatprep.subr.bf16.mxu0 %v6643_v38  ;;  %v517_v0 = vsel %vm6834_vm3, %v512_v49, %v516_v31  ;;  %v334_v1 = vrot.slane %v333_v50, 4  ;;  %v343_v8 = vor.u32 %v342_v52, %v338_v46  ;;  %v532_v9 = vshrl.u32 %v6896_v44, 16  ;;  %v6942_v40 = vld [vmem:[%s6794_s27 + $0x88] sm:$0xf]  ;;  %v6953_v49 = vld [vmem:[%s6794_s27 + $0x8c] sm:$0x1] }
  0x29   : > { %v5490_v12 = vcombine.low %v507_v55, %v517_v0  ;;  %v525_v15 = vor.u32 %v524_v58, %v521_v57  ;;  %v530_v16 = vrot.slane %v528_v62, 5  ;;  %v538_v17 = vshll.u32 %v6901_v54, 16  ;;  %v6961_v58 = vld [vmem:[%s6794_s27 + $0x30] sm:$0xf]  ;;  %v7085_v44 = vld [vmem:[%s6794_s27 + $0x5c] sm:$0x1] }
  0x2a   : > { %v339_v20 = vsel %vm6834_vm3, %v334_v1, %v338_v46  ;;  %v344_v21 = vrot.slane %v343_v8, 4  ;;  %v534_v22 = vrot.slane %v532_v9, 4  ;;  %v351_v25 = vshrl.u32 %v6907_v63, 16  ;;  %v6966_v9 = vld [vmem:[%s6794_s27 + $0x34] sm:$0xf] }
  0x2b   : > { %6360 = vmatpush3.bf16.msra.mxu0 %v6643_v38  ;;  %6306 = vmatmul.mubr.msk.bf16.vlgmr.msra.gmra.mxu1 %vm727_vm2, %v5490_v12  ;;  %v526_v26 = vrot.slane %v525_v15, 4  ;;  %v540_v31 = vrot.slane %v538_v17, 5  ;;  %v354_v32 = vshll.u32 %v6907_v63, 16  ;;  %v360_v33 = vshll.u32 %v6918_v10, 16 }
  0x2c   : > { %6429 = vmatprep.subr.bf16.mxu0 %v6912_v3  ;;  %6322 = vmatpush3.bf16.msra.mxu1 %v6783_v2  ;;  %v349_v35 = vsel %vm6834_vm3, %v344_v21, %v348_v53  ;;  %v535_v36 = vor.u32 %v534_v22, %v530_v16  ;;  %v353_v37 = vrot.slane %v351_v25, 4  ;;  %v364_v38 = vshrl.u32 %v6918_v10, 16  ;;  %v6949_v2 = vld [vmem:[%s9783_s1 + $0x38] sm:$0xff]  }
  0x2d   : > { %v5483_v41 = vcombine.low %v339_v20, %v349_v35  ;;  %v531_v42 = vsel %vm6834_vm3, %v526_v26, %v530_v16  ;;  %v356_v43 = vrot.slane %v354_v32, 5  ;;  %v362_v45 = vrot.slane %v360_v33, 5  ;;  %6323 = vmatprep.subr.bf16.mxu1 %v6642_v18  ;;  %v6971_v25 = vld [vmem:[%s6794_s27 + $0x38] sm:$0x1]  ;;  %v6980_v35 = vld [vmem:[%s6794_s27 + $0x90] sm:$0xf] }
  0x2e   : > { %v536_v46 = vrot.slane %v535_v36, 4  ;;  %v366_v47 = vrot.slane %v364_v38, 4  ;;  %v370_v48 = vshll.u32 %v6927_v24, 16  ;;  %v543_v50 = vshrl.u32 %v6934_v34, 16  ;;  %9818 = vst [vmem:[#allocation4_spill] sm:$0xff] %v6980_v35 }
  0x2f   : > { %6293 = vmatprep.mubr.msk.bf16.mxu0 %vm727_vm2, %v5483_v41  ;;  %v357_v52 = vor.u32 %v356_v43, %v353_v37  ;;  %v546_v53 = vshll.u32 %v6934_v34, 16  ;;  %v552_v55 = vshll.u32 %v6942_v40, 16  ;;  %v556_v57 = vshrl.u32 %v6942_v40, 16  ;;  %v6983_v36 = vld [vmem:[%s6794_s27 + $0x94] sm:$0xf] }
  0x30   : > { %v541_v62 = vsel %vm6834_vm3, %v536_v46, %v540_v31  ;;  %v367_v0 = vor.u32 %v366_v47, %v362_v45  ;;  %v372_v1 = vrot.slane %v370_v48, 5  ;;  %v545_v8 = vrot.slane %v543_v50, 4  ;;  %6324 = vmatpush3.bf16.msra.mxu1 %v6642_v18  ;;  %v6988_v48 = vld [vmem:[%s6794_s27 + $0x98] sm:$0x1] }
  0x31   : > { %v5491_v12 = vcombine.low %v531_v42, %v541_v62  ;;  %v358_v15 = vrot.slane %v357_v52, 4  ;;  %v548_v16 = vrot.slane %v546_v53, 5  ;;  %v554_v17 = vrot.slane %v552_v55, 5  ;;  %6393 = vmatprep.subr.bf16.mxu1 %v6949_v2  ;;  %9819 = vst [vmem:[#allocation5_spill] sm:$0xff] %v6988_v48 }
  0x32   : > { %v368_v20 = vrot.slane %v367_v0, 4  ;;  %v558_v21 = vrot.slane %v556_v57, 4  ;;  %v562_v22 = vshll.u32 %v6953_v49, 16  ;;  %v375_v26 = vshrl.u32 %v6961_v58, 16 }
  0x33   : > { %6309 = vmatprep.mubr.msk.bf16.mxu1 %vm727_vm2, %v5491_v12  ;;  %v363_v18 = vsel %vm6834_vm3, %v358_v15, %v362_v45  ;;  %v549_v31 = vor.u32 %v548_v16, %v545_v8  ;;  %v378_v32 = vshll.u32 %v6961_v58, 16  ;;  %v384_v33 = vshll.u32 %v6966_v9, 16  ;;  %v6999_v8 = vld [vmem:[%s6794_s27 + $0x3c] sm:$0xf] }
  0x34   : > { %v373_v37 = vsel %vm6834_vm3, %v368_v20, %v372_v1  ;;  %v559_v38 = vor.u32 %v558_v21, %v554_v17  ;;  %v564_v41 = vrot.slane %v562_v22, 5  ;;  %v377_v42 = vrot.slane %v375_v26, 4  ;;  %v7004_v21 = vld [vmem:[%s6794_s27 + $0x40] sm:$0xf] }
  0x35   : > { %v5484_v43 = vcombine.low %v363_v18, %v373_v37  ;;  %v550_v46 = vrot.slane %v549_v31, 4  ;;  %v380_v47 = vrot.slane %v378_v32, 5  ;;  %v386_v45 = vrot.slane %v384_v33, 5 }
  0x36   : > { %v560_v50 = vrot.slane %v559_v38, 4  ;;  %v388_v52 = vshrl.u32 %v6966_v9, 16  ;;  %v394_v53 = vshll.u32 %v6971_v25, 16  ;;  %v567_v55 = vshrl.u32 %v6980_v35, 16 }
  0x37   : > { %6294 = vmatmul.mubr.msk.bf16.gmra.mxu0 %vm727_vm2, %v5484_v43  ;;  %v555_v57 = vsel %vm6834_vm3, %v550_v46, %v554_v17  ;;  %v381_v62 = vor.u32 %v380_v47, %v377_v42  ;;  %v570_v0 = vshll.u32 %v6980_v35, 16  ;;  %v576_v1 = vshll.u32 %v6983_v36, 16  ;;  %v7013_v42 = vld [vmem:[%s6794_s27 + $0x44] sm:$0x1]  ;;  %v7018_v47 = vld [vmem:[%s6794_s27 + $0x9c] sm:$0xf] }
  0x38   : > { %v565_v12 = vsel %vm6834_vm3, %v560_v50, %v564_v41  ;;  %v390_v15 = vrot.slane %v388_v52, 4  ;;  %v396_v16 = vrot.slane %v394_v53, 5  ;;  %v569_v20 = vrot.slane %v567_v55, 4  ;;  %9820 = vst [vmem:[#allocation6_spill] sm:$0xff] %v7018_v47  ;;  %v1239_v35 = vld [vmem:[%s6794_s27 + $0xc] sm:$0xe] }
  0x39   : > { %v5492_v22 = vcombine.low %v555_v57, %v565_v12  ;;  %v382_v26 = vrot.slane %v381_v62, 4  ;;  %v572_v17 = vrot.slane %v570_v0, 5  ;;  %v578_v18 = vrot.slane %v576_v1, 5  ;;  %v7021_v57 = vld [vmem:[%s6794_s27 + $0xa0] sm:$0xf] }
  0x3a   : > { %v391_v31 = vor.u32 %v390_v15, %v386_v45  ;;  %v580_v32 = vshrl.u32 %v6983_v36, 16  ;;  %v586_v33 = vshll.u32 %v6988_v48, 16  ;;  %v399_v37 = vshrl.u32 %v6999_v8, 16  ;;  %9821 = vst [vmem:[#allocation7_spill] sm:$0xff] %v7021_v57  ;;  %v7025_v12 = vld [vmem:[%s6794_s27 + $0xa4] sm:$0x1] }
  0x3b   : > { %6310 = vmatmul.mubr.msk.bf16.gmra.mxu1 %vm727_vm2, %v5492_v22  ;;  %v387_v38 = vsel %vm6834_vm3, %v382_v26, %v386_v45  ;;  %v573_v41 = vor.u32 %v572_v17, %v569_v20  ;;  %v402_v43 = vshll.u32 %v6999_v8, 16  ;;  %v408_v46 = vshll.u32 %v7004_v21, 16  ;;  %9822 = vst [vmem:[#allocation8_spill] sm:$0xff] %v7025_v12  ;;  %v7032_v17 = vld [vmem:[%s6794_s27 + $0x48] sm:$0xf] }
  0x3c   : > { %v392_v50 = vrot.slane %v391_v31, 4  ;;  %v582_v52 = vrot.slane %v580_v32, 4  ;;  %v588_v53 = vrot.slane %v586_v33, 5  ;;  %v401_v55 = vrot.slane %v399_v37, 4 }
  0x3d   : > { %v574_v62 = vrot.slane %v573_v41, 4  ;;  %v404_v0 = vrot.slane %v402_v43, 5  ;;  %v410_v1 = vrot.slane %v408_v46, 5  ;;  %v412_v45 = vshrl.u32 %v7004_v21, 16 }
  0x3e   : > { %v397_v15 = vsel %vm6834_vm3, %v392_v50, %v396_v16  ;;  %v583_v20 = vor.u32 %v582_v52, %v578_v18  ;;  %v418_v22 = vshll.u32 %v7013_v42, 16  ;;  %v591_v26 = vshrl.u32 %v7018_v47, 16 }
  0x3f   : > { %v5485_v31 = vcombine.low %v387_v38, %v397_v15  ;;  %v579_v32 = vsel %vm6834_vm3, %v574_v62, %v578_v18  ;;  %v405_v33 = vor.u32 %v404_v0, %v401_v55  ;;  %v414_v37 = vrot.slane %v412_v45, 4  ;;  %v7044_v0 = vld [vmem:[%s6794_s27 + $0x4c] sm:$0xf] }
  0x40   : > { %v584_v41 = vrot.slane %v583_v20, 4  ;;  %v420_v43 = vrot.slane %v418_v22, 5  ;;  %v593_v46 = vrot.slane %v591_v26, 4  ;;  %v594_v16 = vshll.u32 %v7018_v47, 16 }
  0x41   : > { %6297 = vmatprep.mubr.msk.bf16.mxu0 %vm727_vm2, %v5485_v31  ;;  %v406_v50 = vrot.slane %v405_v33, 4  ;;  %v415_v52 = vor.u32 %v414_v37, %v410_v1  ;;  %v600_v60 = vshll.u32 %v7021_v57, 16  ;;  %v604_v38 = vshrl.u32 %v7021_v57, 16  ;;  %v7050_v31 = vld [vmem:[%s6794_s27 + $0x50] sm:$0x1] }
  0x42   : > { %v589_v18 = vsel %vm6834_vm3, %v584_v41, %v588_v53  ;;  %v596_v55 = vrot.slane %v594_v16, 5  ;;  %v610_v62 = vshll.u32 %v7025_v12, 16  ;;  %v423_v45 = vshrl.u32 %v7032_v17, 16  ;;  %v7053_v33 = vld [vmem:[%s6794_s27 + $0xa8] sm:$0xf] }
  0x43   : > { %v5493_v15 = vcombine.low %v579_v32, %v589_v18  ;;  %v411_v20 = vsel %vm6834_vm3, %v406_v50, %v410_v1  ;;  %v416_v22 = vrot.slane %v415_v52, 4  ;;  %v602_v26 = vrot.slane %v600_v60, 5  ;;  %9823 = vst [vmem:[#allocation9_spill] sm:$0xff] %v7053_v33 }
  0x44   : > { %v597_v37 = vor.u32 %v596_v55, %v593_v46  ;;  %v606_v53 = vrot.slane %v604_v38, 4  ;;  %v612_v41 = vrot.slane %v610_v62, 5  ;;  %v425_v16 = vrot.slane %v423_v45, 4  ;;  %v7066_v55 = vld [vmem:[%s6794_s27 + $0xb0] sm:$0x1] }
  0x45   : > { %6313 = vmatprep.mubr.msk.bf16.mxu1 %vm727_vm2, %v5493_v15  ;;  %v421_v32 = vsel %vm6834_vm3, %v416_v22, %v420_v43  ;;  %v426_v1 = vshll.u32 %v7032_v17, 16  ;;  %v432_v60 = vshll.u32 %v7044_v0, 16  ;;  %v436_v50 = vshrl.u32 %v7044_v0, 16  ;;  %9825 = vst [vmem:[#allocation11_spill] sm:$0xff] %v7066_v55  ;;  %v7070_v43 = vld [vmem:[%s6794_s27 + $0x54] sm:$0xf] }
  0x46   : > { %v5486_v52 = vcombine.low %v411_v20, %v421_v32  ;;  %v598_v46 = vrot.slane %v597_v37, 4  ;;  %v607_v38 = vor.u32 %v606_v53, %v602_v26  ;;  %v442_v18 = vshll.u32 %v7050_v31, 16  ;;  %v7077_v53 = vld [vmem:[%s6794_s27 + $0x58] sm:$0xf] }
  0x47   : > { %v428_v62 = vrot.slane %v426_v1, 5  ;;  %v434_v45 = vrot.slane %v432_v60, 5  ;;  %v438_v15 = vrot.slane %v436_v50, 4  ;;  %v615_v59 = vshrl.u32 %v7053_v33, 16 }
  0x48   : > { %6298 = vmatmul.mubr.msk.bf16.gmra.mxu0 %vm727_vm2, %v5486_v52  ;;  %v603_v22 = vsel %vm6834_vm3, %v598_v46, %v602_v26  ;;  %v608_v54 = vrot.slane %v607_v38, 4  ;;  %v444_v20 = vrot.slane %v442_v18, 5  ;;  %v618_v37 = vshll.u32 %v7053_v33, 16 }
  0x49   : > { %v429_v32 = vor.u32 %v428_v62, %v425_v16  ;;  %v439_v12 = vor.u32 %v438_v15, %v434_v45  ;;  %v617_v1 = vrot.slane %v615_v59, 4  ;;  %v624_v60 = vshll.u32 %v7056_v30, 16 }
  0x4a   : > { %v613_v50 = vsel %vm6834_vm3, %v608_v54, %v612_v41  ;;  %v620_v52 = vrot.slane %v618_v37, 5  ;;  %v628_v26 = vshrl.u32 %v7056_v30, 16  ;;  %v634_v46 = vshll.u32 %v7066_v55, 16  ;;  %v7096_v37 = vld [vmem:[%s6794_s27 + $0xb4] sm:$0xf] }
  0x4b   : > { %v5494_v38 = vcombine.low %v603_v22, %v613_v50  ;;  %v430_v18 = vrot.slane %v429_v32, 4  ;;  %v440_v16 = vrot.slane %v439_v12, 4  ;;  %v626_v62 = vrot.slane %v624_v60, 5  ;;  %9826 = vst [vmem:[#allocation12_spill] sm:$0xff] %v7096_v37  ;;  %v7099_v32 = vld [vmem:[%s6794_s27 + $0xb8] sm:$0xf] }
  0x4c   : > { %v621_v15 = vor.u32 %v620_v52, %v617_v1  ;;  %v630_v59 = vrot.slane %v628_v26, 4  ;;  %v636_v33 = vrot.slane %v634_v46, 5  ;;  %v447_v47 = vshrl.u32 %v7070_v43, 16 }
  0x4d   : > { %6314 = vmatmul.mubr.msk.bf16.gmra.mxu1 %vm727_vm2, %v5494_v38  ;;  %v435_v54 = vsel %vm6834_vm3, %v430_v18, %v434_v45  ;;  %v445_v41 = vsel %vm6834_vm3, %v440_v16, %v444_v20  ;;  %v450_v22 = vshll.u32 %v7070_v43, 16  ;;  %v456_v12 = vshll.u32 %v7077_v53, 16  ;;  %v7104_v20 = vld [vmem:[%s6794_s27 + $0xbc] sm:$0x1] }
  0x4e   : > { %v5487_v1 = vcombine.low %v435_v54, %v445_v41  ;;  %v622_v60 = vrot.slane %v621_v15, 4  ;;  %v631_v50 = vor.u32 %v630_v59, %v626_v62  ;;  %v449_v52 = vrot.slane %v447_v47, 4 }
  0x4f   : > { %v452_v26 = vrot.slane %v450_v22, 5  ;;  %v458_v46 = vrot.slane %v456_v12, 5  ;;  %v460_v45 = vshrl.u32 %v7077_v53, 16  ;;  %v466_v38 = vshll.u32 %v7085_v44, 16  ;;  %v1238_v12 = vld [vmem:[%s6794_s27] sm:$0xe] }
  0x50   : > { %6301 = vmatprep.mubr.msk.bf16.mxu0 %vm727_vm2, %v5487_v1  ;;  %v627_v18 = vsel %vm6834_vm3, %v622_v60, %v626_v62  ;;  %v632_v16 = vrot.slane %v631_v50, 4  ;;  %v639_v15 = vshrl.u32 %v7096_v37, 16  ;;  %v642_v59 = vshll.u32 %v7096_v37, 16 }
  0x51   : > { %v453_v47 = vor.u32 %v452_v26, %v449_v52  ;;  %v462_v54 = vrot.slane %v460_v45, 4  ;;  %v468_v41 = vrot.slane %v466_v38, 5  ;;  %v648_v22 = vshll.u32 %v7099_v32, 16 }
  0x52   : > { %v637_v55 = vsel %vm6834_vm3, %v632_v16, %v636_v33  ;;  %v641_v30 = vrot.slane %v639_v15, 4  ;;  %v644_v1 = vrot.slane %v642_v59, 5  ;;  %v652_v57 = vshrl.u32 %v7099_v32, 16 }
  0x53   : > { %v5495_v62 = vcombine.low %v627_v18, %v637_v55  ;;  %v454_v60 = vrot.slane %v453_v47, 4  ;;  %v463_v50 = vor.u32 %v462_v54, %v458_v46  ;;  %v650_v48 = vrot.slane %v648_v22, 5  ;;  %v1240_v47 = vld [vmem:[%s6794_s27 + $0x18] sm:$0xe] }
  0x54   : > { %v645_v37 = vor.u32 %v644_v1, %v641_v30  ;;  %v654_v52 = vrot.slane %v652_v57, 4  ;;  %v658_v26 = vshll.u32 %v7104_v20, 16  ;;  %v5549_v33 = vrot.slane %v1238_v12, 9 }
  0x55   : > { %6317 = vmatprep.mubr.msk.bf16.mxu1 %vm727_vm2, %v5495_v62  ;;  %v459_v55 = vsel %vm6834_vm3, %v454_v60, %v458_v46  ;;  %v464_v38 = vrot.slane %v463_v50, 4  ;;  %v1291_v18 = vrot.slane %v6800_v5, 5  ;;  %v5516_v30 = vcombine.low %v6827_v27, %v6830_v28 }
  0x56   : > { %v646_v57 = vrot.slane %v645_v37, 4  ;;  %v655_v16 = vor.u32 %v654_v52, %v650_v48  ;;  %v660_v15 = vrot.slane %v658_v26, 5  ;;  %v5550_v59 = vrot.slane %v1239_v35, 9  ;;  %v1241_v26 = vld [vmem:[%s6794_s27 + $0x24] sm:$0xe] }
  0x57   : > { %v469_v54 = vsel %vm6834_vm3, %v464_v38, %v468_v41  ;;  %v1292_v22 = vsel %vm7120_vm6, %v5549_v33, %v1291_v18  ;;  %v1293_v12 = vrot.slane %v1291_v18, 4  ;;  %v9829_v46 = vrot.slane %v6830_v28, 5 }
  0x58   : > { %v5488_v62 = vcombine.low %v459_v55, %v469_v54  ;;  %v651_v60 = vsel %vm6834_vm3, %v646_v57, %v650_v48  ;;  %v656_v37 = vrot.slane %v655_v16, 4  ;;  %v9830_v50 = vrot.slane %v6803_v6, 5 }
  0x59   : > { %v1300_v1 = vrot.slane %v9829_v46, 4  ;;  %v5517_v41 = vcombine.low %v6869_v7, %v6876_v19  ;;  %v5551_v52 = vrot.slane %v1240_v47, 9  ;;  %v5515_v55 = vcombine.low %v6797_v4, %v6800_v5  ;;  %v1242_v47 = vld [vmem:[%s6794_s27 + $0x30] sm:$0xe] }
  0x5a   : > { %v1295_v35 = vsel %vm7120_vm6, %v1293_v12, %v9830_v50  ;;  %6302 = vmatmul.mubr.msk.bf16.gmra.mxu0 %vm727_vm2, %v5488_v62  ;;  %v661_v33 = vsel %vm6834_vm3, %v656_v37, %v660_v15  ;;  %v1305_v6 = vrot.slane %v6876_v19, 5  ;;  %v9831_v18 = vmov %v9829_v46 }
  0x5b   : > { %v5569_v48 = vcombine.low %v1292_v22, %v1295_v35  ;;  %v5496_v38 = vcombine.low %v651_v60, %v661_v33  ;;  %v1299_v7 = vsel %vm7120_vm6, %v5550_v59, %v9831_v18  ;;  %v9832_v57 = vrot.slane %v6840_v39, 5  ;;  %v1243_v22 = vld [vmem:[%s6794_s27 + $0x3c] sm:$0xe] }
  0x5c   : > { %v1308_v15 = vrot.slane %v6882_v23, 5  ;;  %v1306_v4 = vsel %vm7120_vm6, %v5551_v52, %v1305_v6  ;;  %v1307_v5 = vrot.slane %v1305_v6, 4  ;;  %v5552_v19 = vrot.slane %v1241_v26, 9  ;;  %v6657_v26 = vld [vmem:[%s9783_s1 + $0x40] sm:$0xff]   ;;  %v1245_v6 = vld [vmem:[%s6794_s27 + $0x54] sm:$0xe] }
  0x5d   : > { %v1302_v16 = vsel %vm7120_vm6, %v1300_v1, %v9832_v57  ;;  %6361 = vmatprep.mubr.msk.bf16.mxu0 %vm727_vm2, %v5569_v48  ;;  %v1312_v54 = vrot.slane %v6918_v10, 5  ;;  %6318 = vmatmul.mubr.msk.bf16.gmra.mxu1 %vm727_vm2, %v5496_v38  ;;  %v1315_v39 = vrot.slane %v6927_v24, 5  ;;  %v1319_v59 = vrot.slane %v6966_v9, 5  ;;  %v1244_v1 = vld [vmem:[%s6794_s27 + $0x48] sm:$0xe] }
  0x5e   : > { %6325 = vmatprep.mubr.msk.bf16.mxu1 %vm727_vm2, %v5515_v55  ;;  %v5570_v23 = vcombine.low %v1299_v7, %v1302_v16  ;;  %v1309_v12 = vsel %vm7120_vm6, %v1307_v5, %v1308_v15  ;;  %v5553_v60 = vrot.slane %v1242_v47, 9  ;;  %v1322_v37 = vrot.slane %v6971_v25, 5  ;;  %v1246_v16 = vld [vmem:[%s6794_s27 + $0x60] sm:$0xe]  ;;  %v6655_v15 = vld [vmem:[%s9783_s1 + $0x30] sm:$0xff]  }
  0x5f   : > { %v1314_v46 = vrot.slane %v1312_v54, 4  ;;  %v5571_v62 = vcombine.low %v1306_v4, %v1309_v12  ;;  %v1313_v50 = vsel %vm7120_vm6, %v5552_v19, %v1312_v54  ;;  %v1321_v24 = vrot.slane %v1319_v59, 4 }
  0x60   : > { %v5554_v35 = vrot.slane %v1243_v22, 9  ;;  %v1326_v52 = vrot.slane %v7004_v21, 5  ;;  %v1329_v55 = vrot.slane %v7013_v42, 5  ;;  %v5555_v48 = vrot.slane %v1244_v1, 9  ;;  %v1249_v1 = vld [vmem:[%s6794_s27 + $0x84] sm:$0xe] }
  0x61   : > { %v1316_v33 = vsel %vm7120_vm6, %v1314_v46, %v1315_v39  ;;  %v1333_v25 = vrot.slane %v7044_v0, 5  ;;  %v1336_v18 = vrot.slane %v7050_v31, 5  ;;  %v5518_v7 = vcombine.low %v6907_v63, %v6918_v10  ;;  %v7208_v63 = vld [vmem:[%s9783_s1 + $0x68] sm:$0xff]  }
  0x62   : > { %6362 = vmatmul.mubr.msk.bf16.vlgmr.msra.gmra.mxu0 %vm727_vm2, %v5570_v23  ;;  %v1328_v38 = vrot.slane %v1326_v52, 4  ;;  %v1320_v57 = vsel %vm7120_vm6, %v5553_v60, %v1319_v59  ;;  %v5572_v47 = vcombine.low %v1313_v50, %v1316_v33  ;;  %v1323_v31 = vsel %vm7120_vm6, %v1321_v24, %v1322_v37  ;;  %v7249_v46 = vld [vmem:[%s6794_s27 + $0x6c] sm:$0xe]  ;;  %v7266_v24 = vld [vmem:[%s6794_s27 + $0x78] sm:$0xe] }
  0x63   : > { %6430 = vmatpush3.bf16.msra.mxu0 %v6912_v3  ;;  %6365 = vmatprep.mubr.msk.bf16.mxu0 %vm727_vm2, %v5571_v62  ;;  %v1335_v42 = vrot.slane %v1333_v25, 4  ;;  %v7202_v3 = vsel %vm7120_vm6, %v5554_v35, %v1326_v52  ;;  %v1340_v4 = vrot.slane %v7077_v53, 5  ;;  %v7220_v5 = vsel %vm7120_vm6, %v5555_v48, %v1333_v25  ;;  %v7342_v33 = vld [vmem:[%s6794_s27 + $0x10] sm:$0xf] }
  0x64   : > { %6431 = vmatprep.subr.bf16.mxu0 %v6657_v26  ;;  %v7216_v10 = vsel %vm7120_vm6, %v1328_v38, %v1329_v55  ;;  %v5556_v19 = vrot.slane %v1245_v6, 9  ;;  %v1343_v54 = vrot.slane %v7085_v44, 5  ;;  %v1347_v39 = vrot.slane %v6816_v13, 5  ;;  %v1250_v55 = vld [vmem:[%s6794_s27 + $0x90] sm:$0xe] }
  0x65   : > { %6326 = vmatmul.mubr.msk.bf16.vlgmr.msra.gmra.mxu1 %vm727_vm2, %v5516_v30  ;;  %v7227_v27 = vsel %vm7120_vm6, %v1335_v42, %v1336_v18  ;;  %v1342_v28 = vrot.slane %v1340_v4, 4  ;;  %v5557_v30 = vrot.slane %v1246_v16, 9  ;;  %v1350_v59 = vrot.slane %v6819_v14, 5  ;;  %v1251_v18 = vld [vmem:[%s6794_s27 + $0x9c] sm:$0xe] }
  0x66   : > { %6394 = vmatpush3.bf16.msra.mxu1 %v6949_v2  ;;  %6329 = vmatprep.mubr.msk.bf16.mxu1 %vm727_vm2, %v5517_v41  ;;  %v5519_v22 = vcombine.low %v6961_v58, %v6966_v9  ;;  %v5573_v44 = vcombine.low %v1320_v57, %v1323_v31  ;;  %v5520_v2 = vcombine.low %v6999_v8, %v7004_v21  ;;  %v7238_v41 = vld [vmem:[%s9783_s1 + $0x58] sm:$0xff]   ;;  %v1349_v52 = vrot.slane %v1347_v39, 4  ;;  %v7369_v8 = vld [vmem:[%s6794_s27 + $0x14] sm:$0x1] }
  0x67   : > { %6395 = vmatprep.subr.bf16.mxu1 %v6655_v15  ;;  %6432 = vmatpush3.bf16.msra.mxu0 %v6657_v26  ;;  %v5574_v23 = vcombine.low %v7202_v3, %v7216_v10  ;;  %v5521_v12 = vcombine.low %v7032_v17, %v7044_v0  ;;  %v5522_v58 = vcombine.low %v7070_v43, %v7077_v53  ;;  %v1354_v26 = vrot.slane %v6855_v56, 5  ;;  %v5677_v21 = vld [vmem:[%s6794_s27 + $0x1c] sm:$0xf] }
  0x68   : > { %v5523_v9 = vcombine.low %v6810_v11, %v6816_v13  ;;  %6501 = vmatprep.subr.bf16.mxu0 %v7208_v63  ;;  %v5575_v62 = vcombine.low %v7220_v5, %v7227_v27  ;;  %v7257_v60 = vsel %vm7120_vm6, %v5556_v19, %v1340_v4  ;;  %v7261_v37 = vsel %vm7120_vm6, %v1342_v28, %v1343_v54  ;;  %v9834_v5 = vld [vmem:[#allocation5_spill] sm:$0xff]  ;;  %v9835_v19 = vld [vmem:[#allocation7_spill] sm:$0xff]  ;;  %v9836_v54 = vld [vmem:[#allocation6_spill] sm:$0xff] }
  0x69   : > { %v5524_v50 = vcombine.low %v6851_v51, %v6855_v56  ;;  %v7271_v35 = vsel %vm7120_vm6, %v5557_v30, %v1347_v39  ;;  %v5558_v48 = vrot.slane %v7249_v46, 9  ;;  %v5560_v25 = vrot.slane %v1249_v1, 9  ;;  %v1252_v30 = vld [vmem:[%s6794_s27 + $0xa8] sm:$0xe]  ;;  %v5673_v27 = vld [vmem:[%s6794_s27 + $0xc] sm:$0xf] }
  0x6a   : > { %6366 = vmatmul.mubr.msk.bf16.gmra.mxu0 %vm727_vm2, %v5572_v47  ;;  %6396 = vmatpush3.bf16.msra.mxu1 %v6655_v15  ;;  %v1368_v6 = vrot.slane %v6942_v40, 5  ;;  %v1371_v38 = vrot.slane %v6953_v49, 5  ;;  %v5576_v57 = vcombine.low %v7257_v60, %v7261_v37  ;;  %v1357_v42 = vrot.slane %v6863_v61, 5  ;;  %v9833_v15 = vld [vmem:[#allocation4_spill] sm:$0xff]  ;;  %v5676_v1 = vld [vmem:[%s6794_s27 + $0x18] sm:$0xf] }
  0x6b   : > { %6369 = vmatprep.mubr.msk.bf16.mxu0 %vm727_vm2, %v5573_v44  ;;  %6465 = vmatprep.subr.bf16.mxu1 %v7238_v41  ;;  %v5559_v16 = vrot.slane %v7266_v24, 9  ;;  %v5561_v3 = vrot.slane %v1250_v55, 9  ;;  %v1375_v4 = vrot.slane %v6983_v36, 5  ;;  %v1356_v10 = vrot.slane %v1354_v26, 4  ;;  %v9838_v55 = vld [vmem:[#allocation8_spill] sm:$0xff] }
  0x6c   : > { %v7292_v31 = vsel %vm7120_vm6, %v5560_v25, %v1368_v6  ;;  %v1370_v49 = vrot.slane %v1368_v6, 4  ;;  %v1378_v61 = vrot.slane %v9834_v5, 5  ;;  %v5562_v28 = vrot.slane %v1251_v18, 9  ;;  %v9839_v6 = vld [vmem:[#allocation10_spill] sm:$0xff]  ;;  %v9840_v18 = vld [vmem:[#allocation9_spill] sm:$0xff] }
  0x6d   : > { %6330 = vmatmul.mubr.msk.bf16.gmra.mxu1 %vm727_vm2, %v5518_v7  ;;  %v9837_v7 = vld [vmem:[#allocation2_spill] sm:$0xff]  ;;  %v7307_v46 = vsel %vm7120_vm6, %v5561_v3, %v1375_v4  ;;  %v1382_v24 = vrot.slane %v9835_v19, 5  ;;  %v1385_v25 = vrot.slane %v9838_v55, 5  ;;  %v1389_v3 = vrot.slane %v9839_v6, 5 }
  0x6e   : > { %6333 = vmatprep.mubr.msk.bf16.mxu1 %vm727_vm2, %v5519_v22  ;;  %v1361_v39 = vrot.slane %v9837_v7, 5  ;;  %v7303_v44 = vsel %vm7120_vm6, %v1370_v49, %v1371_v38  ;;  %v1377_v22 = vrot.slane %v1375_v4, 4  ;;  %v5563_v49 = vrot.slane %v1252_v30, 9  ;;  %v9841_v7 = vld [vmem:[#allocation11_spill] sm:$0xff] }
  0x6f   : > { %v1392_v4 = vrot.slane %v9841_v7, 5  ;;  %v7327_v5 = vsel %vm7120_vm6, %v5562_v28, %v1382_v24  ;;  %v1384_v47 = vrot.slane %v1382_v24, 4  ;;  %v1351_v30 = vsel %vm7120_vm6, %v1349_v52, %v1350_v59 }
  0x70   : > { %v7317_v38 = vsel %vm7120_vm6, %v1377_v22, %v1378_v61  ;;  %v9842_v61 = vld [vmem:[#allocation12_spill] sm:$0xff]  ;;  %v7339_v28 = vsel %vm7120_vm6, %v5563_v49, %v1389_v3  ;;  %v1391_v24 = vrot.slane %v1389_v3, 4  ;;  %v1363_v22 = vrot.slane %v1361_v39, 4 }
  0x71   : > { %v2127_v14 = vshrl.u32 %v5673_v27, 16  ;;  %v2130_v55 = vshll.u32 %v5673_v27, 16  ;;  %v7355_v59 = vsel %vm7120_vm6, %v5558_v48, %v1354_v26  ;;  %v7359_v52 = vsel %vm7120_vm6, %v1356_v10, %v1357_v42 }
  0x72   : > { %6370 = vmatmul.mubr.msk.bf16.gmra.mxu0 %vm727_vm2, %v5574_v23  ;;  %v9843_v23 = vld [vmem:[#allocation3_spill] sm:$0xff]  ;;  %v7365_v27 = vsel %vm7120_vm6, %v1391_v24, %v1392_v4  ;;  %v2136_v42 = vshll.u32 %v7342_v33, 16  ;;  %v5577_v10 = vcombine.low %v7271_v35, %v1351_v30  ;;  %v1396_v49 = vrot.slane %v7099_v32, 5  ;;  %v5679_v24 = vld [vmem:[%s6794_s27 + $0x24] sm:$0xf] }
  0x73   : > { %6373 = vmatprep.mubr.msk.bf16.mxu0 %vm727_vm2, %v5575_v62  ;;  %v1364_v7 = vrot.slane %v9843_v23, 5  ;;  %v7346_v62 = vsel %vm7120_vm6, %v1384_v47, %v1385_v25  ;;  %v1253_v25 = vld [vmem:[%s6794_s27 + $0xb4] sm:$0xe]  ;;  %v2129_v26 = vrot.slane %v2127_v14, 4  ;;  %v2132_v48 = vrot.slane %v2130_v55, 5 }
  0x74   : > { %v2140_v3 = vshrl.u32 %v7342_v33, 16  ;;  %v2151_v4 = vshrl.u32 %v5676_v1, 16  ;;  %v5578_v17 = vcombine.low %v7355_v59, %v7359_v52  ;;  %v1362_v0 = vsel %vm7120_vm6, %v5559_v16, %v1361_v39  ;;  %v5678_v55 = vld [vmem:[%s6794_s27 + $0x20] sm:$0x1]  ;;  %v7393_v47 = vld [vmem:[%s6794_s27 + $0x28] sm:$0xf] }
  0x75   : > { %6334 = vmatmul.mubr.msk.bf16.gmra.mxu1 %vm727_vm2, %v5520_v2  ;;  %v2154_v23 = vshll.u32 %v5676_v1, 16  ;;  %v5564_v14 = vrot.slane %v1253_v25, 9  ;;  %v7390_v2 = vrot.slane %v2136_v42, 5  ;;  %v2160_v30 = vshll.u32 %v5677_v21, 16 }
  0x76   : > { %6337 = vmatprep.mubr.msk.bf16.mxu1 %vm727_vm2, %v5521_v12  ;;  %v1365_v12 = vsel %vm7120_vm6, %v1363_v22, %v1364_v7  ;;  %v2142_v35 = vrot.slane %v2140_v3, 4  ;;  %v1399_v16 = vrot.slane %v7104_v20, 5  ;;  %v2133_v39 = vor.u32 %v2132_v48, %v2129_v26 }
  0x77   : > { %v2146_v1 = vshll.u32 %v7369_v8, 16  ;;  %v2164_v22 = vshrl.u32 %v5677_v21, 16  ;;  %v1398_v7 = vrot.slane %v1396_v49, 4  ;;  %v2153_v59 = vrot.slane %v2151_v4, 4  ;;  %v7411_v21 = vld [vmem:[%s6794_s27 + $0x2c] sm:$0x1] }
  0x78   : > { %v2175_v52 = vshrl.u32 %v5679_v24, 16  ;;  %v2178_v25 = vshll.u32 %v5679_v24, 16  ;;  %v2156_v42 = vrot.slane %v2154_v23, 5  ;;  %v7402_v3 = vrot.slane %v2160_v30, 5 }
  0x79   : > { %v2166_v60 = vrot.slane %v2164_v22, 4  ;;  %v2170_v37 = vshll.u32 %v5678_v55, 16  ;;  %v2143_v20 = vor.u32 %v2142_v35, %v7390_v2  ;;  %v5579_v4 = vcombine.low %v1362_v0, %v1365_v12  ;;  %v5685_v0 = vld [vmem:[%s6794_s27 + $0x3c] sm:$0xf] }
  0x7a   : > { %6374 = vmatmul.mubr.msk.bf16.gmra.mxu0 %vm727_vm2, %v5576_v57  ;;  %v5682_v57 = vld [vmem:[%s6794_s27 + $0x30] sm:$0xf]  ;;  %v2177_v26 = vrot.slane %v2175_v52, 4  ;;  %v2180_v48 = vrot.slane %v2178_v25, 5  ;;  %v7418_v55 = vrot.slane %v2133_v39, 4  ;;  %v7420_v43 = vrot.slane %v2146_v1, 5 }
  0x7b   : > { %6377 = vmatprep.mubr.msk.bf16.mxu0 %vm727_vm2, %v5577_v10  ;;  %v2184_v10 = vshll.u32 %v7393_v47, 16  ;;  %v2188_v53 = vshrl.u32 %v7393_v47, 16  ;;  %v7428_v23 = vsel %vm7120_vm6, %v5564_v14, %v1396_v49  ;;  %v7432_v11 = vsel %vm7120_vm6, %v1398_v7, %v1399_v16  ;;  %v7440_v14 = vld [vmem:[%s6794_s27 + $0x40] sm:$0xf]  ;;  %v6706_v16 = vld [vmem:[%s6794_s27 + $0x78] sm:$0xf] }
  0x7c   : > { %v2157_v12 = vor.u32 %v2156_v42, %v2153_v59  ;;  %v2167_v24 = vor.u32 %v2166_v60, %v7402_v3  ;;  %v2181_v35 = vor.u32 %v2180_v48, %v2177_v26  ;;  %v2144_v39 = vrot.slane %v2143_v20, 4  ;;  %v6707_v7 = vld [vmem:[%s6794_s27 + $0x7c] sm:$0xf] }
  0x7d   : > { %6338 = vmatmul.mubr.msk.bf16.gmra.mxu1 %vm727_vm2, %v5522_v58  ;;  %v7424_v58 = vld [vmem:[%s6794_s27 + $0x34] sm:$0xf]  ;;  %v7434_v13 = vrot.slane %v2184_v10, 5  ;;  %v2190_v30 = vrot.slane %v2188_v53, 4  ;;  %v2172_v1 = vrot.slane %v2170_v37, 5  ;;  %v2194_v22 = vshll.u32 %v7411_v21, 16 }
  0x7e   : > { %6341 = vmatprep.mubr.msk.bf16.mxu1 %vm727_vm2, %v5523_v9  ;;  %v2199_v9 = vshrl.u32 %v5682_v57, 16  ;;  %v2202_v49 = vshll.u32 %v5682_v57, 16  ;;  %v5525_v52 = vcombine.low %v6706_v16, %v6707_v7  ;;  %v2208_v25 = vshll.u32 %v7424_v58, 16  ;;  %v7456_v10 = vld [vmem:[%s6794_s27 + $0x38] sm:$0x1] }
  0x7f   : > { %v2191_v59 = vor.u32 %v2190_v30, %v7434_v13  ;;  %v2212_v42 = vshrl.u32 %v7424_v58, 16  ;;  %v5584_v60 = vcombine.low %v7428_v23, %v7432_v11  ;;  %v2158_v20 = vrot.slane %v2157_v12, 4  ;;  %v5688_v30 = vld [vmem:[%s6794_s27 + $0x48] sm:$0xf] }
  0x80   : > { %v2201_v37 = vrot.slane %v2199_v9, 4  ;;  %v2204_v57 = vrot.slane %v2202_v49, 5  ;;  %v2168_v26 = vrot.slane %v2167_v24, 4  ;;  %v2182_v48 = vrot.slane %v2181_v35, 4 }
  0x81   : > { %v2223_v53 = vshrl.u32 %v5685_v0, 16  ;;  %v2214_v16 = vrot.slane %v2212_v42, 4  ;;  %v2192_v9 = vrot.slane %v2191_v59, 4  ;;  %v2196_v12 = vrot.slane %v2194_v22, 5  ;;  %v7482_v59 = vld [vmem:[%s6794_s27 + $0x4c] sm:$0xf] }
  0x82   : > { %6378 = vmatmul.mubr.msk.bf16.gmra.mxu0 %vm727_vm2, %v5578_v17  ;;  %v2139_v17 = vsel %vm6834_vm3, %v7418_v55, %v7390_v2  ;;  %v2226_v2 = vshll.u32 %v5685_v0, 16  ;;  %v2232_v55 = vshll.u32 %v7440_v14, 16  ;;  %v2236_v35 = vshrl.u32 %v7440_v14, 16 }
  0x83   : > { %6381 = vmatprep.mubr.msk.bf16.mxu0 %vm727_vm2, %v5579_v4  ;;  %v7463_v4 = vrot.slane %v2208_v25, 5  ;;  %v2225_v24 = vrot.slane %v2223_v53, 4  ;;  %v2149_v51 = vsel %vm6834_vm3, %v2144_v39, %v7420_v43  ;;  %v2205_v56 = vor.u32 %v2204_v57, %v2201_v37  ;;  %v5691_v57 = vld [vmem:[%s6794_s27 + $0x54] sm:$0xf] }
  0x84   : > { %v2228_v49 = vrot.slane %v2226_v2, 5  ;;  %v7474_v7 = vrot.slane %v2232_v55, 5  ;;  %v2163_v0 = vsel %vm6834_vm3, %v2158_v20, %v7402_v3  ;;  %v2173_v22 = vsel %vm6834_vm3, %v2168_v26, %v2172_v1  ;;  %v5694_v2 = vld [vmem:[%s6794_s27 + $0x60] sm:$0xf] }
  0x85   : > { %6342 = vmatmul.mubr.msk.bf16.gmra.mxu1 %vm727_vm2, %v5524_v50  ;;  %v7472_v50 = vld [vmem:[%s6794_s27 + $0x44] sm:$0x1]  ;;  %v2247_v25 = vshrl.u32 %v5688_v30, 16  ;;  %v2187_v43 = vsel %vm6834_vm3, %v2182_v48, %v7434_v13  ;;  %v2215_v39 = vor.u32 %v2214_v16, %v7463_v4  ;;  %v2218_v42 = vshll.u32 %v7456_v10, 16  ;;  %v7499_v48 = vld [vmem:[%s6794_s27 + $0x58] sm:$0xf] }
  0x86   : > { %6345 = vmatprep.mubr.msk.bf16.mxu1 %vm727_vm2, %v5525_v52  ;;  %v2238_v52 = vrot.slane %v2236_v35, 4  ;;  %v2250_v37 = vshll.u32 %v5688_v30, 16  ;;  %v9844_v3 = vcombine.low %v7292_v31, %v7303_v44  ;;  %v2197_v1 = vsel %vm6834_vm3, %v2192_v9, %v2196_v12  ;;  %v7512_v12 = vld [vmem:[%s6794_s27 + $0x50] sm:$0x1] }
  0x87   : > { %v2229_v20 = vor.u32 %v2228_v49, %v2225_v24  ;;  %v2242_v26 = vshll.u32 %v7472_v50, 16  ;;  %v9845_v53 = vcombine.low %v7307_v46, %v7317_v38  ;;  %v2206_v30 = vrot.slane %v2205_v56, 4  ;;  %v7516_v49 = vld [vmem:[%s6794_s27 + $0x64] sm:$0xf] }
  0x88   : > { %v2239_v13 = vor.u32 %v2238_v52, %v7474_v7  ;;  %v2249_v31 = vrot.slane %v2247_v25, 4  ;;  %v2252_v44 = vrot.slane %v2250_v37, 5  ;;  %v2256_v16 = vshll.u32 %v7482_v59, 16 }
  0x89   : > { %v7507_v55 = vcombine.low %v2139_v17, %v2149_v51  ;;  %v7509_v9 = vcombine.low %v2163_v0, %v2173_v22  ;;  %v2260_v24 = vshrl.u32 %v7482_v59, 16  ;;  %v2271_v35 = vshrl.u32 %v5691_v57, 16 }
  0x8a   : > { %6382 = vmatmul.mubr.msk.bf16.gmra.mxu0 %vm727_vm2, %v9844_v3  ;;  %v9846_v46 = vcombine.low %v6934_v34, %v6942_v40  ;;  %v7522_v38 = vcombine.low %v2187_v43, %v2197_v1  ;;  %v2216_v17 = vrot.slane %v2215_v39, 4  ;;  %v2220_v51 = vrot.slane %v2218_v42, 5  ;;  %v5697_v42 = vld [vmem:[%s6794_s27 + $0x6c] sm:$0xf] }
  0x8b   : > { %6385 = vmatprep.mubr.msk.bf16.mxu0 %vm727_vm2, %v9845_v53  ;;  %v2274_v56 = vshll.u32 %v5691_v57, 16  ;;  %v9847_v0 = vcombine.low %v9833_v15, %v6983_v36  ;;  %v2230_v22 = vrot.slane %v2229_v20, 4  ;;  %v2240_v52 = vrot.slane %v2239_v13, 4  ;;  %v7536_v57 = vld [vmem:[%s6794_s27 + $0x5c] sm:$0x1] }
  0x8c   : > { %v2244_v25 = vrot.slane %v2242_v26, 5  ;;  %v2280_v37 = vshll.u32 %v7499_v48, 16  ;;  %v2211_v34 = vsel %vm6834_vm3, %v2206_v30, %v7463_v4  ;;  %v2253_v40 = vor.u32 %v2252_v44, %v2249_v31 }
  0x8d   : > { %6346 = vmatmul.mubr.msk.bf16.gmra.mxu1 %vm727_vm2, %v9846_v46  ;;  %v7532_v43 = vrot.slane %v2256_v16, 5  ;;  %v2262_v39 = vrot.slane %v2260_v24, 4  ;;  %v2273_v36 = vrot.slane %v2271_v35, 4  ;;  %v2276_v15 = vrot.slane %v2274_v56, 5  ;;  %v7555_v24 = vld [vmem:[%s6794_s27 + $0x70] sm:$0xf] }
  0x8e   : > { %6349 = vmatprep.mubr.msk.bf16.mxu1 %vm727_vm2, %v9847_v0  ;;  %v2284_v3 = vshrl.u32 %v7499_v48, 16  ;;  %v2295_v1 = vshrl.u32 %v5694_v2, 16  ;;  %v2221_v20 = vsel %vm6834_vm3, %v2216_v17, %v2220_v51  ;;  %v2266_v13 = vshll.u32 %v7512_v12, 16  ;;  %v7565_v35 = vld [vmem:[%s6794_s27 + $0x68] sm:$0x1] }
  0x8f   : > { %v2298_v4 = vshll.u32 %v5694_v2, 16  ;;  %v2304_v26 = vshll.u32 %v7516_v49, 16  ;;  %v9848_v53 = vcombine.low %v7327_v5, %v7346_v62  ;;  %v2235_v30 = vsel %vm6834_vm3, %v2230_v22, %v7474_v7  ;;  %v5700_v22 = vld [vmem:[%s6794_s27 + $0x78] sm:$0xf] }
  0x90   : > { %v2245_v31 = vsel %vm6834_vm3, %v2240_v52, %v2244_v25  ;;  %v7552_v44 = vrot.slane %v2280_v37, 5  ;;  %v2286_v16 = vrot.slane %v2284_v3, 4  ;;  %v9849_v2 = vcombine.low %v7339_v28, %v7365_v27 }
  0x91   : > { %v7561_v5 = vrot.slane %v2253_v40, 4  ;;  %v2263_v62 = vor.u32 %v2262_v39, %v7532_v43  ;;  %v2297_v7 = vrot.slane %v2295_v1, 4  ;;  %v2308_v46 = vshrl.u32 %v7516_v49, 16 }
  0x92   : > { %6386 = vmatmul.mubr.msk.bf16.gmra.mxu0 %vm727_vm2, %v9848_v53  ;;  %v7568_v17 = vcombine.low %v2211_v34, %v2221_v20  ;;  %v2277_v51 = vor.u32 %v2276_v15, %v2273_v36  ;;  %v2300_v56 = vrot.slane %v2298_v4, 5  ;;  %v2319_v0 = vshrl.u32 %v5697_v42, 16  ;;  %v7581_v34 = vld [vmem:[%s6794_s27 + $0x74] sm:$0x1]  ;;  %v7591_v15 = vld [vmem:[%s6794_s27 + $0x7c] sm:$0xf] }
  0x93   : > { %6389 = vmatprep.mubr.msk.bf16.mxu0 %vm727_vm2, %v9849_v2  ;;  %v9850_v28 = vcombine.low %v9836_v54, %v9835_v19  ;;  %v7575_v27 = vrot.slane %v2266_v13, 5  ;;  %v2290_v52 = vshll.u32 %v7536_v57, 16  ;;  %v7578_v25 = vrot.slane %v2304_v26, 5 }
  0x94   : > { %v2310_v37 = vrot.slane %v2308_v46, 4  ;;  %v9851_v40 = vcombine.low %v9840_v18, %v9839_v6  ;;  %v7587_v39 = vcombine.low %v2235_v30, %v2245_v31  ;;  %v2287_v19 = vor.u32 %v2286_v16, %v7552_v44 }
  0x95   : > { %6350 = vmatmul.mubr.msk.bf16.gmra.mxu1 %vm727_vm2, %v9850_v28  ;;  %v2321_v54 = vrot.slane %v2319_v0, 4  ;;  %v2322_v36 = vshll.u32 %v5697_v42, 16  ;;  %v2259_v3 = vsel %vm6834_vm3, %v7561_v5, %v7532_v43  ;;  %v2264_v1 = vrot.slane %v2263_v62, 4  ;;  %v5703_v42 = vld [vmem:[%s6794_s27 + $0x84] sm:$0xf]  ;;  %v6664_v43 = vld [vmem:[%s6794_s27 + $0xc] sm:$0xff]  }
  0x96   : > { %6353 = vmatprep.mubr.msk.bf16.mxu1 %vm727_vm2, %v9851_v40  ;;  %v2328_v20 = vshll.u32 %v7555_v24, 16  ;;  %v2332_v6 = vshrl.u32 %v7555_v24, 16  ;;  %v2278_v18 = vrot.slane %v2277_v51, 4  ;;  %v2301_v13 = vor.u32 %v2300_v56, %v2297_v7  ;;  %v7616_v51 = vld [vmem:[%s6794_s27 + $0x80] sm:$0x1] }
  0x97   : > { %v2314_v4 = vshll.u32 %v7565_v35, 16  ;;  %v2324_v26 = vrot.slane %v2322_v36, 5  ;;  %v2292_v53 = vrot.slane %v2290_v52, 5  ;;  %v2311_v30 = vor.u32 %v2310_v37, %v7578_v25 }
  0x98   : > { %v7602_v31 = vrot.slane %v2328_v20, 5  ;;  %v2343_v16 = vshrl.u32 %v5700_v22, 16  ;;  %v2288_v2 = vrot.slane %v2287_v19, 4  ;;  %v2334_v62 = vrot.slane %v2332_v6, 4  ;;  %v7643_v20 = vld [vmem:[%s6794_s27 + $0x94] sm:$0xf] }
  0x99   : > { %v2325_v5 = vor.u32 %v2324_v26, %v2321_v54  ;;  %v2338_v7 = vshll.u32 %v7581_v34, 16  ;;  %v2269_v46 = vsel %vm6834_vm3, %v2264_v1, %v7575_v27  ;;  %v2346_v56 = vshll.u32 %v5700_v22, 16  ;;  %v5706_v54 = vld [vmem:[%s6794_s27 + $0x90] sm:$0xf]  ;;  %9854 = vst [vmem:[#allocation5_spill] sm:$0xff] %v7643_v20  ;;  %v6666_v6 = vld [vmem:[%s6794_s27 + $0x18] sm:$0xff]  }
  0x9a   : > { %6390 = vmatmul.mubr.msk.bf16.gmra.mxu0 %vm727_vm2, %v5584_v60  ;;  %v2352_v23 = vshll.u32 %v7591_v15, 16  ;;  %v2356_v11 = vshrl.u32 %v7591_v15, 16  ;;  %v7621_v60 = vld [vmem:[%s6794_s27 + $0x88] sm:$0xf]  ;;  %v2283_v0 = vsel %vm6834_vm3, %v2278_v18, %v7552_v44  ;;  %v2316_v28 = vrot.slane %v2314_v4, 5 }
  0x9b   : > { %6433 = vmatprep.mubr.msk.bf16.mxu0 %vm727_vm2, %v7507_v55  ;;  %9852 = vst [vmem:[#allocation4_spill] sm:$0xff] %v7621_v60  ;;  %v2302_v55 = vrot.slane %v2301_v13, 4  ;;  %v2335_v52 = vor.u32 %v2334_v62, %v7602_v31  ;;  %v9853_v27 = vcombine.low %v9842_v61, %v7099_v32  ;;  %v2312_v22 = vrot.slane %v2311_v30, 4  ;;  %v6677_v32 = vld [vmem:[%s9783_s1 + $0x60] sm:$0xff]   ;;  %v6675_v62 = vld [vmem:[%s9783_s1 + $0x50] sm:$0xff]  }
  0x9c   : > { %v2345_v37 = vrot.slane %v2343_v16, 4  ;;  %v2348_v40 = vrot.slane %v2346_v56, 5  ;;  %v2367_v19 = vshrl.u32 %v5703_v42, 16  ;;  %v2293_v44 = vsel %vm6834_vm3, %v2288_v2, %v2292_v53  ;;  %v6668_v2 = vld [vmem:[%s6794_s27 + $0x24] sm:$0xff]  }
  0x9d   : > { %6354 = vmatmul.mubr.msk.bf16.gmra.mxu1 %vm727_vm2, %v9853_v27  ;;  %v7635_v36 = vrot.slane %v2325_v5, 4  ;;  %v7637_v1 = vrot.slane %v2338_v7, 5  ;;  %v2370_v61 = vshll.u32 %v5703_v42, 16  ;;  %v7646_v18 = vrot.slane %v2352_v23, 5 }
  0x9e   : > { %6397 = vmatprep.mubr.msk.bf16.mxu1 %vm727_vm2, %v6664_v43  ;;  %v2358_v13 = vrot.slane %v2356_v11, 4  ;;  %v2369_v4 = vrot.slane %v2367_v19, 4  ;;  %v2376_v26 = vshll.u32 %v7621_v60, 16  ;;  %v2336_v53 = vrot.slane %v2335_v52, 4  ;;  %v7669_v52 = vld [vmem:[%s6794_s27 + $0x8c] sm:$0x1] }
  0x9f   : > { %v2362_v30 = vshll.u32 %v7616_v51, 16  ;;  %v2372_v16 = vrot.slane %v2370_v61, 5  ;;  %v2380_v43 = vshrl.u32 %v7621_v60, 16  ;;  %v2307_v42 = vsel %vm6834_vm3, %v2302_v55, %v7578_v25  ;;  %9855 = vst [vmem:[#allocation7_spill] sm:$0xff] %v7669_v52  ;;  %v7799_v60 = vld [vmem:[%s6794_s27 + $0xc8] sm:$0x1] }
  0xa0   : > { %v2317_v5 = vsel %vm6834_vm3, %v2312_v22, %v2316_v28  ;;  %v2349_v7 = vor.u32 %v2348_v40, %v2345_v37  ;;  %v7660_v56 = vrot.slane %v2376_v26, 5  ;;  %v7664_v23 = vcombine.low %v2259_v3, %v2269_v46  ;;  %v5709_v28 = vld [vmem:[%s6794_s27 + $0x9c] sm:$0xf]  ;;  %v7694_v40 = vld [vmem:[%s9783_s1 + $0x88] sm:$0xff]  }
  0xa1   : > { %v7666_v11 = vcombine.low %v2283_v0, %v2293_v44  ;;  %v2382_v25 = vrot.slane %v2380_v43, 4  ;;  %v2391_v55 = vshrl.u32 %v5706_v54, 16  ;;  %v2359_v27 = vor.u32 %v2358_v13, %v7646_v18  ;;  %9857 = vst [vmem:[#allocation2_spill] sm:$0xff] %v7694_v40 }
  0xa2   : > { %6434 = vmatmul.mubr.msk.bf16.vlgmr.msra.gmra.mxu0 %vm727_vm2, %v7509_v9  ;;  %v2373_v22 = vor.u32 %v2372_v16, %v2369_v4  ;;  %v2394_v37 = vshll.u32 %v5706_v54, 16  ;;  %v2400_v9 = vshll.u32 %v7643_v20, 16  ;;  %v7677_v3 = vcombine.low %v2307_v42, %v2317_v5  ;;  %v5712_v16 = vld [vmem:[%s6794_s27 + $0xa8] sm:$0xf] }
  0xa3   : > { %6502 = vmatpush3.bf16.msra.mxu0 %v7208_v63  ;;  %6437 = vmatprep.mubr.msk.bf16.mxu0 %vm727_vm2, %v7522_v38  ;;  %v2331_v46 = vsel %vm6834_vm3, %v7635_v36, %v7602_v31  ;;  %v2341_v63 = vsel %vm6834_vm3, %v2336_v53, %v7637_v1  ;;  %v7686_v0 = vrot.slane %v2362_v30, 5  ;;  %v7689_v38 = vld [vmem:[%s6794_s27 + $0xa0] sm:$0xf]  ;;  %v7697_v19 = vrot.slane %v2349_v7, 4  ;;  %v7705_v36 = vld [vmem:[%s9783_s1 + $0x78] sm:$0xff]  }
  0xa4   : > { %6503 = vmatprep.subr.bf16.mxu0 %v6677_v32  ;;  %9856 = vst [vmem:[#allocation6_spill] sm:$0xff] %v7689_v38  ;;  %v2383_v31 = vor.u32 %v2382_v25, %v7660_v56  ;;  %v2386_v54 = vshll.u32 %v7669_v52, 16  ;;  %v2404_v44 = vshrl.u32 %v7643_v20, 16  ;;  %9858 = vst [vmem:[#allocation8_spill] sm:$0xff] %v7705_v36  ;;  %v7710_v1 = vld [vmem:[%s6794_s27 + $0x98] sm:$0x1] }
  0xa5   : > { %6398 = vmatmul.mubr.msk.bf16.vlgmr.msra.gmra.mxu1 %vm727_vm2, %v6666_v6  ;;  %9859 = vst [vmem:[#allocation10_spill] sm:$0xff] %v7710_v1  ;;  %v2393_v61 = vrot.slane %v2391_v55, 4  ;;  %v2396_v6 = vrot.slane %v2394_v37, 5  ;;  %v2415_v13 = vshrl.u32 %v5709_v28, 16  ;;  %v2418_v4 = vshll.u32 %v5709_v28, 16  ;;  %v6669_v25 = vld [vmem:[%s6794_s27 + $0x30] sm:$0xff]  }
  0xa6   : > { %6466 = vmatpush3.bf16.msra.mxu1 %v7238_v41  ;;  %6401 = vmatprep.mubr.msk.bf16.mxu1 %vm727_vm2, %v6668_v2  ;;  %v7712_v26 = vrot.slane %v2359_v27, 4  ;;  %v7714_v53 = vrot.slane %v2373_v22, 4  ;;  %v7716_v30 = vrot.slane %v2400_v9, 5  ;;  %v2424_v41 = vshll.u32 %v7689_v38, 16  ;;  %v7722_v7 = vld [vmem:[%s6794_s27 + $0xac] sm:$0xf] }
  0xa7   : > { %6467 = vmatprep.subr.bf16.mxu1 %v6675_v62  ;;  %6504 = vmatpush3.bf16.msra.mxu0 %v6677_v32  ;;  %v2406_v43 = vrot.slane %v2404_v44, 4  ;;  %v2417_v2 = vrot.slane %v2415_v13, 4  ;;  %v2420_v42 = vrot.slane %v2418_v4, 5  ;;  %v2428_v5 = vshrl.u32 %v7689_v38, 16  ;;  %9860 = vst [vmem:[#allocation9_spill] sm:$0xff] %v7722_v7  ;;  %v6670_v22 = vld [vmem:[%s6794_s27 + $0x3c] sm:$0xff]  }
  0xa8   : > { %6573 = vmatprep.subr.bf16.mxu0 %v7694_v40  ;;  %v7726_v32 = vcombine.low %v2331_v46, %v2341_v63  ;;  %v7728_v55 = vrot.slane %v2383_v31, 4  ;;  %v7730_v28 = vrot.slane %v2386_v54, 5  ;;  %v2410_v27 = vshll.u32 %v7710_v1, 16  ;;  %v7737_v9 = vld [vmem:[%s6794_s27 + $0xa4] sm:$0x1] }
  0xa9   : > { %v2397_v37 = vor.u32 %v2396_v6, %v2393_v61  ;;  %9861 = vst [vmem:[#allocation11_spill] sm:$0xff] %v7737_v9  ;;  %v7739_v44 = vrot.slane %v2424_v41, 5  ;;  %v2430_v46 = vrot.slane %v2428_v5, 4  ;;  %v2439_v63 = vshrl.u32 %v5712_v16, 16  ;;  %v7759_v13 = vld [vmem:[%s6794_s27 + $0xb0] sm:$0x1] }
  0xaa   : > { %6438 = vmatmul.mubr.msk.bf16.gmra.mxu0 %vm727_vm2, %v7568_v17  ;;  %6468 = vmatpush3.bf16.msra.mxu1 %v6675_v62  ;;  %v2442_v62 = vshll.u32 %v5712_v16, 16  ;;  %v2448_v54 = vshll.u32 %v7722_v7, 16  ;;  %v2407_v61 = vor.u32 %v2406_v43, %v7716_v30  ;;  %v2421_v6 = vor.u32 %v2420_v42, %v2417_v2  ;;  %9862 = vst [vmem:[#allocation12_spill] sm:$0xff] %v7759_v13  ;;  %v5715_v41 = vld [vmem:[%s6794_s27 + $0xb4] sm:$0xf] }
  0xab   : > { %6441 = vmatprep.mubr.msk.bf16.mxu0 %vm727_vm2, %v7587_v39  ;;  %6537 = vmatprep.subr.bf16.mxu1 %v7705_v36  ;;  %v2441_v4 = vrot.slane %v2439_v63, 4  ;;  %v2434_v16 = vshll.u32 %v7737_v9, 16  ;;  %v2452_v17 = vshrl.u32 %v7722_v7, 16  ;;  %v7768_v36 = vld [vmem:[%s6794_s27 + $0xb8] sm:$0xf]  ;;  %v2389_v43 = vsel %vm6834_vm3, %v7728_v55, %v7730_v28 }
  0xac   : > { %v2444_v5 = vrot.slane %v2442_v62, 5  ;;  %v7764_v31 = vrot.slane %v2448_v54, 5  ;;  %9863 = vst [vmem:[#allocation3_spill] sm:$0xff] %v7768_v36  ;;  %v7775_v2 = vrot.slane %v2397_v37, 4  ;;  %v7777_v42 = vrot.slane %v2410_v27, 5  ;;  %v6671_v27 = vld [vmem:[%s6794_s27 + $0x48] sm:$0xff]  }
  0xad   : > { %6402 = vmatmul.mubr.msk.bf16.gmra.mxu1 %vm727_vm2, %v6669_v25  ;;  %v2431_v25 = vor.u32 %v2430_v46, %v7739_v44  ;;  %v2454_v63 = vrot.slane %v2452_v17, 4  ;;  %v2458_v62 = vshll.u32 %v7759_v13, 16  ;;  %v7782_v54 = vld [vmem:[%s6794_s27 + $0xbc] sm:$0x1]  ;;  %v2463_v39 = vshrl.u32 %v5715_v41, 16 }
  0xae   : > { %6405 = vmatprep.mubr.msk.bf16.mxu1 %vm727_vm2, %v6670_v22  ;;  %v2466_v22 = vshll.u32 %v5715_v41, 16  ;;  %v2408_v40 = vrot.slane %v2407_v61, 4  ;;  %v2445_v7 = vor.u32 %v2444_v5, %v2441_v4  ;;  %v2472_v9 = vshll.u32 %v7768_v36, 16  ;;  %v5718_v28 = vld [vmem:[%s6794_s27 + $0xc0] sm:$0xf]  ;;  %v6672_v41 = vld [vmem:[%s6794_s27 + $0x54] sm:$0xff]  }
  0xaf   : > { %v2476_v55 = vshrl.u32 %v7768_v36, 16  ;;  %v2422_v37 = vrot.slane %v2421_v6, 4  ;;  %v2436_v38 = vrot.slane %v2434_v16, 5  ;;  %v2455_v46 = vor.u32 %v2454_v63, %v7764_v31  ;;  %v7790_v13 = vld [vmem:[%s6794_s27 + $0xc4] sm:$0xf] }
  0xb0   : > { %v2465_v17 = vrot.slane %v2463_v39, 4  ;;  %v2468_v61 = vrot.slane %v2466_v22, 5  ;;  %v2474_v4 = vrot.slane %v2472_v9, 5  ;;  %v2482_v1 = vshll.u32 %v7782_v54, 16 }
  0xb1   : > { %v2478_v5 = vrot.slane %v2476_v55, 4  ;;  %v2432_v6 = vrot.slane %v2431_v25, 4  ;;  %v2460_v16 = vrot.slane %v2458_v62, 5  ;;  %v2487_v36 = vshrl.u32 %v5718_v28, 16 }
  0xb2   : > { %6442 = vmatmul.mubr.msk.bf16.gmra.mxu0 %vm727_vm2, %v7664_v23  ;;  %v2490_v63 = vshll.u32 %v5718_v28, 16  ;;  %v2446_v39 = vrot.slane %v2445_v7, 4  ;;  %v2469_v20 = vor.u32 %v2468_v61, %v2465_v17  ;;  %v2496_v23 = vshll.u32 %v7790_v13, 16  ;;  %v6673_v61 = vld [vmem:[%s6794_s27 + $0x60] sm:$0xff]  }
  0xb3   : > { %6445 = vmatprep.mubr.msk.bf16.mxu0 %vm727_vm2, %v7666_v11  ;;  %v2479_v52 = vor.u32 %v2478_v5, %v2474_v4  ;;  %v2456_v9 = vrot.slane %v2455_v46, 4  ;;  %v2489_v22 = vrot.slane %v2487_v36, 4  ;;  %v2500_v11 = vshrl.u32 %v7790_v13, 16 }
  0xb4   : > { %v2492_v55 = vrot.slane %v2490_v63, 5  ;;  %v2470_v25 = vrot.slane %v2469_v20, 4  ;;  %v2484_v7 = vrot.slane %v2482_v1, 5  ;;  %v7805_v28 = vrot.slane %v2496_v23, 5 }
  0xb5   : > { %6406 = vmatmul.mubr.msk.bf16.gmra.mxu1 %vm727_vm2, %v6671_v27  ;;  %v2480_v62 = vrot.slane %v2479_v52, 4  ;;  %v9864_v27 = vsel %vm6834_vm3, %v7712_v26, %v7686_v0  ;;  %v9865_v36 = vsel %vm6834_vm3, %v7697_v19, %v7646_v18  ;;  %v2506_v20 = vshll.u32 %v7799_v60, 16  ;;  %v5761_v26 = vld [vmem:[%s6794_s27 + $0x24] sm:$0xe] }
  0xb6   : > { %6409 = vmatprep.mubr.msk.bf16.mxu1 %vm727_vm2, %v6672_v41  ;;  %v5734_v46 = vcombine.low %v9865_v36, %v9864_v27  ;;  %v2493_v17 = vor.u32 %v2492_v55, %v2489_v22  ;;  %v2502_v41 = vrot.slane %v2500_v11, 4  ;;  %v9866_v52 = vsel %vm6834_vm3, %v7714_v53, %v7660_v56 }
  0xb7   : > { %v5735_v1 = vcombine.low %v9866_v52, %v2389_v43  ;;  %v2403_v0 = vsel %vm6834_vm3, %v7775_v2, %v7716_v30  ;;  %v2413_v18 = vsel %vm6834_vm3, %v2408_v40, %v7777_v42  ;;  %v2427_v19 = vsel %vm6834_vm3, %v2422_v37, %v7739_v44  ;;  %v7844_v2 = vld [vmem:[%s6794_s27 + $0xc] sm:$0xe]  ;;  %v5762_v37 = vld [vmem:[%s6794_s27 + $0x30] sm:$0xe] }
  0xb8   : > { %v2437_v56 = vsel %vm6834_vm3, %v2432_v6, %v2436_v38  ;;  %v2451_v53 = vsel %vm6834_vm3, %v2446_v39, %v7764_v31  ;;  %v2461_v30 = vsel %vm6834_vm3, %v2456_v9, %v2460_v16  ;;  %v2503_v43 = vor.u32 %v2502_v41, %v7805_v28  ;;  %v6674_v40 = vld [vmem:[%s6794_s27 + $0x6c] sm:$0xff]   ;;  %v5763_v9 = vld [vmem:[%s6794_s27 + $0x3c] sm:$0xe] }
  0xb9   : > { %v2475_v44 = vsel %vm6834_vm3, %v2470_v25, %v2474_v4  ;;  %v2485_v38 = vsel %vm6834_vm3, %v2480_v62, %v2484_v7  ;;  %v7853_v42 = vrot.slane %v2493_v17, 4  ;;  %v2882_v31 = vrot.slane %v7342_v33, 5  ;;  %v5764_v25 = vld [vmem:[%s6794_s27 + $0x48] sm:$0xe]  ;;  %v6683_v33 = vld [vmem:[%s6794_s27 + $0xc0] sm:$0xff]  }
  0xba   : > { %6446 = vmatmul.mubr.msk.bf16.gmra.mxu0 %vm727_vm2, %v7677_v3  ;;  %v7859_v5 = vcombine.low %v2403_v0, %v2413_v18  ;;  %v7861_v3 = vrot.slane %v2503_v43, 4  ;;  %v7863_v6 = vrot.slane %v2506_v20, 5  ;;  %v5777_v16 = vrot.slane %v5761_v26, 9  ;;  %v5765_v20 = vld [vmem:[%s6794_s27 + $0x54] sm:$0xe]  ;;  %v6676_v26 = vld [vmem:[%s6794_s27 + $0x78] sm:$0xff]  }
  0xbb   : > { %6449 = vmatprep.mubr.msk.bf16.mxu0 %vm727_vm2, %v7726_v32  ;;  %v7865_v4 = vcombine.low %v2427_v19, %v2437_v56  ;;  %v7867_v63 = vcombine.low %v2451_v53, %v2461_v30  ;;  %v5775_v39 = vrot.slane %v7844_v2, 9  ;;  %v2896_v23 = vrot.slane %v7393_v47, 5  ;;  %v5766_v53 = vld [vmem:[%s6794_s27 + $0x60] sm:$0xe] }
  0xbc   : > { %v7873_v32 = vcombine.low %v2475_v44, %v2485_v38  ;;  %v2885_v22 = vrot.slane %v7369_v8, 5  ;;  %v2899_v55 = vrot.slane %v7411_v21, 5  ;;  %v5778_v11 = vrot.slane %v5762_v37, 9  ;;  %v5767_v37 = vld [vmem:[%s6794_s27 + $0x6c] sm:$0xe] }
  0xbd   : > { %6410 = vmatmul.mubr.msk.bf16.gmra.mxu1 %vm727_vm2, %v6673_v61  ;;  %v2499_v47 = vsel %vm6834_vm3, %v7853_v42, %v7805_v28  ;;  %v7885_v62 = vrot.slane %v2882_v31, 4  ;;  %v7889_v7 = vsel %vm7120_vm6, %v5777_v16, %v2896_v23  ;;  %v2898_v21 = vrot.slane %v2896_v23, 4  ;;  %v6684_v42 = vld [vmem:[%s6794_s27 + $0x18] sm:$0xff]  }
  0xbe   : > { %6413 = vmatprep.mubr.msk.bf16.mxu1 %vm727_vm2, %v6674_v40  ;;  %v2509_v27 = vsel %vm6834_vm3, %v7861_v3, %v7863_v6  ;;  %v2903_v36 = vrot.slane %v7424_v58, 5  ;;  %v2906_v17 = vrot.slane %v7456_v10, 5  ;;  %v5779_v41 = vrot.slane %v5763_v9, 9  ;;  %v5768_v9 = vld [vmem:[%s6794_s27 + $0x78] sm:$0xe] }
  0xbf   : > { %v7900_v52 = vsel %vm7120_vm6, %v2898_v21, %v2899_v55  ;;  %v2910_v0 = vrot.slane %v7440_v14, 5  ;;  %v2913_v18 = vrot.slane %v7472_v50, 5  ;;  %v5780_v19 = vrot.slane %v5764_v25, 9  ;;  %v6678_v14 = vld [vmem:[%s6794_s27 + $0x84] sm:$0xff]   ;;  %v5760_v6 = vld [vmem:[%s6794_s27 + $0x18] sm:$0xe] }
  0xc0   : > { %v5797_v61 = vcombine.low %v7889_v7, %v7900_v52  ;;  %v7909_v58 = vsel %vm7120_vm6, %v5778_v11, %v2903_v36  ;;  %v2905_v10 = vrot.slane %v2903_v36, 4  ;;  %v2917_v56 = vrot.slane %v7482_v59, 5 }
  0xc1   : > { %v7917_v50 = vsel %vm7120_vm6, %v5779_v41, %v2910_v0  ;;  %v2912_v30 = vrot.slane %v2910_v0, 4  ;;  %v2920_v43 = vrot.slane %v7512_v12, 5  ;;  %v5781_v40 = vrot.slane %v5765_v20, 9  ;;  %v5769_v41 = vld [vmem:[%s6794_s27 + $0x84] sm:$0xe] }
  0xc2   : > { %6450 = vmatmul.mubr.msk.bf16.gmra.mxu0 %vm727_vm2, %v5734_v46  ;;  %v7923_v44 = vsel %vm7120_vm6, %v2905_v10, %v2906_v17  ;;  %v7927_v59 = vsel %vm7120_vm6, %v5780_v19, %v2917_v56  ;;  %v2919_v46 = vrot.slane %v2917_v56, 4  ;;  %v2924_v38 = vrot.slane %v7499_v48, 5  ;;  %v5770_v56 = vld [vmem:[%s6794_s27 + $0x90] sm:$0xe] }
  0xc3   : > { %6453 = vmatprep.mubr.msk.bf16.mxu0 %vm727_vm2, %v5735_v1  ;;  %v5798_v16 = vcombine.low %v7909_v58, %v7923_v44  ;;  %v7935_v12 = vsel %vm7120_vm6, %v2912_v30, %v2913_v18  ;;  %v2927_v1 = vrot.slane %v7536_v57, 5  ;;  %v5782_v23 = vrot.slane %v5766_v53, 9  ;;  %v6679_v53 = vld [vmem:[%s6794_s27 + $0x90] sm:$0xff]  }
  0xc4   : > { %v5799_v55 = vcombine.low %v7917_v50, %v7935_v12  ;;  %v7944_v48 = vsel %vm7120_vm6, %v2919_v46, %v2920_v43  ;;  %v7948_v11 = vsel %vm7120_vm6, %v5781_v40, %v2924_v38  ;;  %v2926_v25 = vrot.slane %v2924_v38, 4  ;;  %v6680_v43 = vld [vmem:[%s6794_s27 + $0x9c] sm:$0xff]   ;;  %v9867_v38 = vld [vmem:[#allocation4_spill] sm:$0xff] }
  0xc5   : > { %6414 = vmatmul.mubr.msk.bf16.gmra.mxu1 %vm727_vm2, %v6676_v26  ;;  %v5800_v57 = vcombine.low %v7927_v59, %v7944_v48  ;;  %v2931_v21 = vrot.slane %v7516_v49, 5  ;;  %v2934_v36 = vrot.slane %v7565_v35, 5  ;;  %v5783_v17 = vrot.slane %v5767_v37, 9  ;;  %v6693_v59 = vld [vmem:[%s6794_s27 + $0x6c] sm:$0xff]   ;;  %v6694_v48 = vld [vmem:[%s6794_s27 + $0x78] sm:$0xff]  }
  0xc6   : > { %6417 = vmatprep.mubr.msk.bf16.mxu1 %vm727_vm2, %v6678_v14  ;;  %v7958_v20 = vsel %vm7120_vm6, %v2926_v25, %v2927_v1  ;;  %v2938_v0 = vrot.slane %v7555_v24, 5  ;;  %v2941_v18 = vrot.slane %v7581_v34, 5  ;;  %v5784_v19 = vrot.slane %v5768_v9, 9  ;;  %v5771_v1 = vld [vmem:[%s6794_s27 + $0x9c] sm:$0xe] }
  0xc7   : > { %v7966_v49 = vsel %vm7120_vm6, %v5782_v23, %v2931_v21  ;;  %v2933_v35 = vrot.slane %v2931_v21, 4  ;;  %v2945_v10 = vrot.slane %v7591_v15, 5  ;;  %v2948_v34 = vrot.slane %v7616_v51, 5  ;;  %v9868_v23 = vld [vmem:[#allocation7_spill] sm:$0xff] }
  0xc8   : > { %v7973_v14 = vsel %vm7120_vm6, %v5783_v17, %v2938_v0  ;;  %v2940_v24 = vrot.slane %v2938_v0, 4  ;;  %v5785_v30 = vrot.slane %v5769_v41, 9  ;;  %v2952_v37 = vrot.slane %v9867_v38, 5  ;;  %v5772_v21 = vld [vmem:[%s6794_s27 + $0xa8] sm:$0xe] }
  0xc9   : > { %v7981_v40 = vsel %vm7120_vm6, %v2933_v35, %v2934_v36  ;;  %v7985_v15 = vsel %vm7120_vm6, %v5784_v19, %v2945_v10  ;;  %v2947_v46 = vrot.slane %v2945_v10, 4  ;;  %v2955_v9 = vrot.slane %v9868_v23, 5  ;;  %v9870_v35 = vld [vmem:[#allocation10_spill] sm:$0xff]  ;;  %v9872_v38 = vld [vmem:[#allocation11_spill] sm:$0xff] }
  0xca   : > { %6454 = vmatmul.mubr.msk.bf16.gmra.mxu0 %vm727_vm2, %v7859_v5  ;;  %v7995_v5 = vsel %vm7120_vm6, %v2940_v24, %v2941_v18  ;;  %v5786_v25 = vrot.slane %v5770_v56, 9  ;;  %v2954_v41 = vrot.slane %v2952_v37, 4  ;;  %v9869_v18 = vld [vmem:[#allocation5_spill] sm:$0xff]  ;;  %v2962_v10 = vrot.slane %v9870_v35, 5  ;;  %v5773_v24 = vld [vmem:[%s6794_s27 + $0xb4] sm:$0xe] }
  0xcb   : > { %6457 = vmatprep.mubr.msk.bf16.mxu0 %vm727_vm2, %v7865_v4  ;;  %v8003_v17 = vsel %vm7120_vm6, %v2947_v46, %v2948_v34  ;;  %v8007_v4 = vsel %vm7120_vm6, %v5785_v30, %v2952_v37  ;;  %v2959_v19 = vrot.slane %v9869_v18, 5  ;;  %v5787_v56 = vrot.slane %v5771_v1, 9  ;;  %v9871_v30 = vld [vmem:[#allocation6_spill] sm:$0xff]  ;;  %v9873_v35 = vld [vmem:[#allocation9_spill] sm:$0xff]  ;;  %v6681_v36 = vld [vmem:[%s6794_s27 + $0xa8] sm:$0xff]  }
  0xcc   : > { %v8018_v34 = vsel %vm7120_vm6, %v2954_v41, %v2955_v9  ;;  %v2966_v46 = vrot.slane %v9871_v30, 5  ;;  %v5788_v37 = vrot.slane %v5772_v21, 9  ;;  %v5774_v0 = vld [vmem:[%s6794_s27 + $0xc0] sm:$0xe]  ;;  %v9874_v30 = vld [vmem:[#allocation12_spill] sm:$0xff]  ;;  %v5789_v21 = vrot.slane %v5773_v24, 9 }
  0xcd   : > { %6418 = vmatmul.mubr.msk.bf16.gmra.mxu1 %vm727_vm2, %v6679_v53  ;;  %v2969_v53 = vrot.slane %v9872_v38, 5  ;;  %v8026_v1 = vsel %vm7120_vm6, %v5786_v25, %v2959_v19  ;;  %v2961_v18 = vrot.slane %v2959_v19, 4  ;;  %v2976_v38 = vrot.slane %v9874_v30, 5 }
  0xce   : > { %6421 = vmatprep.mubr.msk.bf16.mxu1 %vm727_vm2, %v6680_v43  ;;  %v2973_v43 = vrot.slane %v9873_v35, 5  ;;  %v8032_v9 = vsel %vm7120_vm6, %v5787_v56, %v2966_v46  ;;  %v2968_v41 = vrot.slane %v2966_v46, 4  ;;  %v9875_v35 = vld [vmem:[#allocation3_spill] sm:$0xff]  ;;  %v6682_v56 = vld [vmem:[%s6794_s27 + $0xb4] sm:$0xff]   ;;  %v2883_v3 = vsel %vm7120_vm6, %v5775_v39, %v2882_v31 }
  0xcf   : > { %v8038_v23 = vsel %vm7120_vm6, %v2961_v18, %v2962_v10  ;;  %v2980_v51 = vrot.slane %v9875_v35, 5  ;;  %v2983_v10 = vrot.slane %v7782_v54, 5  ;;  %v5790_v18 = vrot.slane %v5774_v0, 9  ;;  %v6688_v35 = vld [vmem:[%s6794_s27 + $0x30] sm:$0xff]  }
  0xd0   : > { %v8042_v25 = vsel %vm7120_vm6, %v5788_v37, %v2973_v43  ;;  %v2975_v19 = vrot.slane %v2973_v43, 4  ;;  %v8052_v46 = vsel %vm7120_vm6, %v2968_v41, %v2969_v53  ;;  %v2987_v0 = vrot.slane %v7790_v13, 5  ;;  %v6708_v41 = vld [vmem:[%s6794_s27 + $0x1c] sm:$0xf] }
  0xd1   : > { %v8065_v43 = vsel %vm7120_vm6, %v5789_v21, %v2980_v51  ;;  %v2982_v53 = vrot.slane %v2980_v51, 4  ;;  %v2889_v30 = vrot.slane %v6708_v41, 5  ;;  %v2886_v28 = vsel %vm7120_vm6, %v7885_v62, %v2885_v22  ;;  %v6709_v22 = vld [vmem:[%s6794_s27 + $0x20] sm:$0x1] }
  0xd2   : > { %6458 = vmatmul.mubr.msk.bf16.gmra.mxu0 %vm727_vm2, %v7867_v63  ;;  %v8061_v63 = vsel %vm7120_vm6, %v2975_v19, %v2976_v38  ;;  %v8092_v51 = vsel %vm7120_vm6, %v5790_v18, %v2987_v0  ;;  %v5795_v8 = vcombine.low %v2883_v3, %v2886_v28  ;;  %v5776_v31 = vrot.slane %v5760_v6, 9  ;;  %v6686_v19 = vld [vmem:[%s6794_s27 + $0x24] sm:$0xff]   ;;  %v8130_v18 = vld [vmem:[%s6794_s27 + $0x1c] sm:$0xf] }
  0xd3   : > { %6461 = vmatprep.mubr.msk.bf16.mxu0 %vm727_vm2, %v7873_v32  ;;  %v2990_v32 = vrot.slane %v7799_v60, 5  ;;  %v8075_v38 = vsel %vm7120_vm6, %v2982_v53, %v2983_v10  ;;  %v5740_v60 = vcombine.low %v2499_v47, %v2509_v27  ;;  %v2891_v39 = vrot.slane %v2889_v30, 4  ;;  %v5899_v10 = vld [vmem:[%s6794_s27 + $0x18] sm:$0xf]  ;;  %v9876_v41 = vld [vmem:[#allocation2_spill] sm:$0xff] }
  0xd4   : > { %v2892_v62 = vrot.slane %v6709_v22, 5  ;;  %v2890_v27 = vsel %vm7120_vm6, %v5776_v31, %v2889_v30  ;;  %v6695_v30 = vld [vmem:[%s9783_s1 + $0x70] sm:$0xff]   ;;  %v3727_v3 = vshll.u32 %v8130_v18, 16  ;;  %v3731_v28 = vshrl.u32 %v8130_v18, 16  ;;  %v6690_v22 = vld [vmem:[%s6794_s27 + $0x48] sm:$0xff]  }
  0xd5   : > { %6422 = vmatmul.mubr.msk.bf16.gmra.mxu1 %vm727_vm2, %v6681_v36  ;;  %v2989_v36 = vrot.slane %v2987_v0, 4  ;;  %v5902_v0 = vld [vmem:[%s6794_s27 + $0x24] sm:$0xf]  ;;  %v9877_v31 = vld [vmem:[#allocation8_spill] sm:$0xff] }
  0xd6   : > { %6425 = vmatprep.mubr.msk.bf16.mxu1 %vm727_vm2, %v6682_v56  ;;  %v2893_v21 = vsel %vm7120_vm6, %v2891_v39, %v2892_v62  ;;  %v6697_v56 = vld [vmem:[%s9783_s1 + $0x80] sm:$0xff]   ;;  %v3745_v6 = vshll.u32 %v5902_v0, 16 }
  0xd7   : > { %v8109_v47 = vsel %vm7120_vm6, %v2989_v36, %v2990_v32  ;;  %v5796_v53 = vcombine.low %v2890_v27, %v2893_v21  ;;  %v8135_v32 = vld [vmem:[%s6794_s27 + $0x28] sm:$0xf]  ;;  %v3721_v36 = vshll.u32 %v5899_v10, 16  ;;  %v6689_v39 = vld [vmem:[%s6794_s27 + $0x3c] sm:$0xff]  }
  0xd8   : > { %v8155_v62 = vld [vmem:[%s6794_s27 + $0x20] sm:$0x1] }
  0xd9   : > { %v3723_v21 = vrot.slane %v3721_v36, 5  ;;  %v8169_v36 = vld [vmem:[%s6794_s27 + $0x34] sm:$0xf] }
  0xda   : > { %6462 = vmatmul.mubr.msk.bf16.gmra.mxu0 %vm727_vm2, %v5740_v60  ;;  %v3718_v60 = vshrl.u32 %v5899_v10, 16 }
  0xdb   : > { %6505 = vmatprep.mubr.msk.bf16.mxu0 %vm727_vm2, %v6684_v42  ;;  %v3742_v42 = vshrl.u32 %v5902_v0, 16  ;;  %v5905_v0 = vld [vmem:[%s6794_s27 + $0x30] sm:$0xf] }
  0xdc   : > { %v3720_v27 = vrot.slane %v3718_v60, 4  ;;  %v5904_v60 = vld [vmem:[%s6794_s27 + $0x2c] sm:$0x1] }
  0xdd   : > { %6426 = vmatmul.mubr.msk.bf16.gmra.mxu1 %vm727_vm2, %v6683_v33  ;;  %v3751_v33 = vshll.u32 %v8135_v32, 16  ;;  %v3744_v10 = vrot.slane %v3742_v42, 4  ;;  %v5985_v42 = vld [vmem:[%s6794_s27 + $0x18] sm:$0xe]  ;;  %v4483_v12 = vrot.slane %v5904_v60, 5 }
  0xde   : > { %6469 = vmatprep.mubr.msk.bf16.mxu1 %vm727_vm2, %v5795_v8  ;;  %v3755_v8 = vshrl.u32 %v8135_v32, 16  ;;  %v6001_v44 = vrot.slane %v5985_v42, 9 }
  0xdf   : > { %v8160_v7 = vrot.slane %v3751_v33, 5  ;;  %v3769_v33 = vshll.u32 %v5905_v0, 16 }
  0xe0   : > { %v3757_v52 = vrot.slane %v3755_v8, 4 }
  0xe1   : > { %v3771_v13 = vrot.slane %v3769_v33, 5 }
  0xe2   : > { %6506 = vmatmul.mubr.msk.bf16.vlgmr.msra.gmra.mxu0 %vm727_vm2, %v6686_v19  ;;  %v8157_v19 = vrot.slane %v3727_v3, 5  ;;  %v3724_v3 = vor.u32 %v3723_v21, %v3720_v27  ;;  %v3775_v27 = vshll.u32 %v8169_v36, 16  ;;  %v3779_v21 = vshrl.u32 %v8169_v36, 16 }
  0xe3   : > { %6574 = vmatpush3.bf16.msra.mxu0 %v9876_v41  ;;  %6509 = vmatprep.mubr.msk.bf16.mxu0 %vm727_vm2, %v6688_v35  ;;  %v3733_v35 = vrot.slane %v3731_v28, 4  ;;  %v4473_v41 = vrot.slane %v8130_v18, 5 }
  0xe4   : > { %6575 = vmatprep.subr.bf16.mxu0 %v6697_v56  ;;  %v8199_v42 = vrot.slane %v3775_v27, 5  ;;  %v5908_v27 = vld [vmem:[%s6794_s27 + $0x3c] sm:$0xf] }
  0xe5   : > { %6470 = vmatmul.mubr.msk.bf16.vlgmr.msra.gmra.mxu1 %vm727_vm2, %v5796_v53  ;;  %v3747_v53 = vrot.slane %v3745_v6, 5  ;;  %v3734_v28 = vor.u32 %v3733_v35, %v8157_v19  ;;  %v3766_v6 = vshrl.u32 %v5905_v0, 16  ;;  %v3725_v0 = vrot.slane %v3724_v3, 4 }
  0xe6   : > { %6538 = vmatpush3.bf16.msra.mxu1 %v9877_v31  ;;  %6473 = vmatprep.mubr.msk.bf16.mxu1 %vm727_vm2, %v5797_v61  ;;  %v8163_v61 = vpop.f32.mrf.mxu0  ;;  %v3758_v31 = vor.u32 %v3757_v52, %v8160_v7 }
  0xe7   : > { %6539 = vmatprep.subr.bf16.mxu1 %v6695_v30  ;;  %6576 = vmatpush3.bf16.msra.mxu0 %v6697_v56  ;;  %v3737_v56 = vshll.u32 %v8155_v62, 16  ;;  %v3748_v8 = vor.u32 %v3747_v53, %v3744_v10  ;;  %v4476_v10 = vrot.slane %v8155_v62, 5  ;;  %v6692_v53 = vld [vmem:[%s6794_s27 + $0x60] sm:$0xff]   ;;  %v3735_v52 = vrot.slane %v3734_v28, 4 }
  0xe8   : > { %v8190_v35 = vpop.f32.mrf.mxu0  ;;  %v3768_v2 = vrot.slane %v3766_v6, 4  ;;  %v3759_v24 = vrot.slane %v3758_v31, 4  ;;  %v3781_v62 = vrot.slane %v3779_v21, 4  ;;  %v8206_v28 = vsel %vm7120_vm6, %v6001_v44, %v4473_v41  ;;  %v8233_v21 = vld [vmem:[%s6794_s27 + $0x40] sm:$0xf] }
  0xe9   : > { %v3739_v58 = vrot.slane %v3737_v56, 5  ;;  %v3749_v54 = vrot.slane %v3748_v8, 4  ;;  %v8197_v56 = vld [vmem:[%s6794_s27 + $0x38] sm:$0x1]  ;;  %v3730_v6 = vsel %vm6834_vm3, %v3725_v0, %v8157_v19  ;;  %v3793_v44 = vshll.u32 %v5908_v27, 16 }
  0xea   : > { %6510 = vmatmul.mubr.msk.bf16.gmra.mxu0 %vm727_vm2, %v6689_v39  ;;  %6540 = vmatpush3.bf16.msra.mxu1 %v6695_v30  ;;  %v4480_v30 = vrot.slane %v8135_v32, 5  ;;  %v3761_v39 = vshll.u32 %v5904_v60, 16  ;;  %v6691_v32 = vld [vmem:[%s6794_s27 + $0x54] sm:$0xff]   ;;  %v8202_v3 = vpop.f32.mrf.mxu0  ;;  %v5987_v60 = vld [vmem:[%s6794_s27 + $0x30] sm:$0xe]  ;;  %v3772_v31 = vor.u32 %v3771_v13, %v3768_v2  ;;  %v3782_v13 = vor.u32 %v3781_v62, %v8199_v42 }
  0xeb   : > { %6513 = vmatprep.mubr.msk.bf16.mxu0 %vm727_vm2, %v6690_v22  ;;  %v8179_v18 = vpop.f32.mrf.mxu1  ;;  %v5986_v22 = vld [vmem:[%s6794_s27 + $0x24] sm:$0xe]  ;;  %v3740_v33 = vsel %vm6834_vm3, %v3735_v52, %v3739_v58  ;;  %v6003_v2 = vrot.slane %v5987_v60, 9  ;;  %v8269_v0 = vld [vmem:[%s6794_s27 + $0x44] sm:$0x1]  ;;  %v3803_v52 = vshrl.u32 %v8233_v21, 16 }
  0xec   : > { %9878 = vst [vmem:[#allocation4_spill] sm:$0xff] %v8179_v18  ;;  %v6002_v37 = vrot.slane %v5986_v22, 9  ;;  %v4482_v50 = vrot.slane %v4480_v30, 4  ;;  %v3763_v26 = vrot.slane %v3761_v39, 5  ;;  %v3785_v22 = vshll.u32 %v8197_v56, 16 }
  0xed   : > { %6474 = vmatmul.mubr.msk.bf16.gmra.mxu1 %vm727_vm2, %v5798_v16  ;;  %v4475_v16 = vrot.slane %v4473_v41, 4  ;;  %v3754_v41 = vsel %vm6834_vm3, %v3749_v54, %v8160_v7  ;;  %v4487_v7 = vrot.slane %v8169_v36, 5  ;;  %v8258_v58 = vrot.slane %v3772_v31, 4 }
  0xee   : > { %6477 = vmatprep.mubr.msk.bf16.mxu1 %vm727_vm2, %v5799_v55  ;;  %v8194_v55 = vpop.f32.mrf.mxu1  ;;  %v8224_v39 = vsel %vm7120_vm6, %v6002_v37, %v4480_v30  ;;  %v8228_v19 = vsel %vm7120_vm6, %v4482_v50, %v4483_v12  ;;  %v3764_v37 = vsel %vm6834_vm3, %v3759_v24, %v3763_v26  ;;  %v9881_v30 = vcombine.low %v7948_v11, %v7958_v20  ;;  %v5911_v24 = vld [vmem:[%s6794_s27 + $0x48] sm:$0xf]  ;;  %v8262_v20 = vld [vmem:[%s6794_s27 + $0x4c] sm:$0xf] }
  0xef   : > { %9879 = vst [vmem:[#allocation7_spill] sm:$0xff] %v8194_v55  ;;  %v8217_v8 = vsel %vm7120_vm6, %v4475_v16, %v4476_v10  ;;  %v3790_v36 = vshrl.u32 %v5908_v27, 16  ;;  %v3799_v11 = vshll.u32 %v8233_v21, 16  ;;  %v8264_v16 = vcombine.low %v3754_v41, %v3764_v37 }
  0xf0   : > { %v8239_v54 = vpop.f32.mrf.mxu1  ;;  %v3783_v12 = vrot.slane %v3782_v13, 4  ;;  %v8276_v62 = vsel %vm7120_vm6, %v6003_v2, %v4487_v7  ;;  %v4489_v60 = vrot.slane %v4487_v7, 4  ;;  %v3814_v41 = vshrl.u32 %v5911_v24, 16  ;;  %v8286_v13 = vld [vmem:[%s6794_s27 + $0x58] sm:$0xf] }
  0xf1   : > { %9880 = vst [vmem:[#allocation5_spill] sm:$0xff] %v8239_v54  ;;  %v3823_v27 = vshll.u32 %v8262_v20, 16  ;;  %v3827_v37 = vshrl.u32 %v8262_v20, 16  ;;  %v3792_v2 = vrot.slane %v3790_v36, 4  ;;  %v3795_v7 = vrot.slane %v3793_v44, 5  ;;  %v6696_v54 = vld [vmem:[%s6794_s27 + $0x84] sm:$0xff]  }
  0xf2   : > { %6514 = vmatmul.mubr.msk.bf16.gmra.mxu0 %vm727_vm2, %v6691_v32  ;;  %v8253_v32 = vcombine.low %v3730_v6, %v3740_v33  ;;  %v8272_v50 = vpop.f32.mrf.mxu1  ;;  %v4490_v6 = vrot.slane %v8197_v56, 5  ;;  %v5914_v33 = vld [vmem:[%s6794_s27 + $0x54] sm:$0xf]  ;;  %v3778_v56 = vsel %vm6834_vm3, %v8258_v58, %v8199_v42  ;;  %v4494_v10 = vrot.slane %v8233_v21, 5 }
  0xf3   : > { %6517 = vmatprep.mubr.msk.bf16.mxu0 %vm727_vm2, %v6692_v53  ;;  %v3787_v53 = vrot.slane %v3785_v22, 5  ;;  %9882 = vst [vmem:[#allocation10_spill] sm:$0xff] %v8272_v50  ;;  %v3817_v22 = vshll.u32 %v5911_v24, 16  ;;  %v5988_v24 = vld [vmem:[%s6794_s27 + $0x3c] sm:$0xe]  ;;  %v3838_v26 = vshrl.u32 %v5914_v33, 16  ;;  %v9886_v44 = vcombine.low %v7973_v14, %v7995_v5 }
  0xf4   : > { %v3841_v50 = vshll.u32 %v5914_v33, 16  ;;  %v8306_v42 = vsel %vm7120_vm6, %v4489_v60, %v4490_v6  ;;  %v3809_v58 = vshll.u32 %v8269_v0, 16  ;;  %v3847_v36 = vshll.u32 %v8286_v13, 16  ;;  %v6698_v33 = vld [vmem:[%s6794_s27 + $0x90] sm:$0xff]  }
  0xf5   : > { %6478 = vmatmul.mubr.msk.bf16.gmra.mxu1 %vm727_vm2, %v5800_v57  ;;  %v8251_v57 = vpop.f32.mrf.mxu0  ;;  %v3851_v21 = vshrl.u32 %v8286_v13, 16  ;;  %v8320_v60 = vrot.slane %v3823_v27, 5  ;;  %v3829_v6 = vrot.slane %v3827_v37, 4  ;;  %v6004_v18 = vrot.slane %v5988_v24, 9  ;;  %v8344_v24 = vld [vmem:[%s6794_s27 + $0x5c] sm:$0x1] }
  0xf6   : > { %6481 = vmatprep.mubr.msk.bf16.mxu1 %vm727_vm2, %v9881_v30  ;;  %v8293_v30 = vrot.slane %v3799_v11, 5  ;;  %v3816_v11 = vrot.slane %v3814_v41, 4  ;;  %v4497_v14 = vrot.slane %v8269_v0, 5  ;;  %v5917_v41 = vld [vmem:[%s6794_s27 + $0x60] sm:$0xf] }
  0xf7   : > { %v8281_v31 = vpop.f32.mrf.mxu0  ;;  %v3865_v27 = vshll.u32 %v5917_v41, 16 }
  0xf8   : > { %9883 = vst [vmem:[#allocation6_spill] sm:$0xff] %v8281_v31  ;;  %v3843_v31 = vrot.slane %v3841_v50, 5  ;;  %v3830_v50 = vor.u32 %v3829_v6, %v8320_v60  ;;  %v8360_v6 = vld [vmem:[%s6794_s27 + $0x64] sm:$0xf] }
  0xfa   : > { %6518 = vmatmul.mubr.msk.bf16.gmra.mxu0 %vm727_vm2, %v6693_v59  ;;  %v3805_v59 = vrot.slane %v3803_v52, 4  ;;  %v3819_v52 = vrot.slane %v3817_v22, 5 }
  0xfb   : > { %6521 = vmatprep.mubr.msk.bf16.mxu0 %vm727_vm2, %v6694_v48  ;;  %v9884_v48 = vcombine.low %v7966_v49, %v7981_v40  ;;  %v8302_v55 = vpop.f32.mrf.mxu1  ;;  %v8315_v49 = vpop.f32.mrf.mxu0  ;;  %v8318_v40 = vld [vmem:[%s6794_s27 + $0x50] sm:$0x1] }
  0xfc   : > { %9885 = vst [vmem:[#allocation11_spill] sm:$0xff] %v8302_v55  ;;  %9887 = vst [vmem:[#allocation9_spill] sm:$0xff] %v8315_v49  ;;  %v3796_v55 = vor.u32 %v3795_v7, %v3792_v2  ;;  %v3806_v5 = vor.u32 %v3805_v59, %v8293_v30  ;;  %v3840_v49 = vrot.slane %v3838_v26, 4  ;;  %v3833_v37 = vshll.u32 %v8318_v40, 16  ;;  %v5989_v7 = vld [vmem:[%s6794_s27 + $0x48] sm:$0xe] }
  0xfd   : > { %6482 = vmatmul.mubr.msk.bf16.gmra.mxu1 %vm727_vm2, %v9884_v48  ;;  %v3788_v48 = vsel %vm6834_vm3, %v3783_v12, %v3787_v53  ;;  %v8328_v22 = vpop.f32.mrf.mxu1  ;;  %v8333_v53 = vrot.slane %v3847_v36, 5  ;;  %v3853_v12 = vrot.slane %v3851_v21, 4  ;;  %v8336_v0 = vpop.f32.mrf.mxu0  ;;  %v3820_v26 = vor.u32 %v3819_v52, %v3816_v11 }
  0xfe   : > { %6485 = vmatprep.mubr.msk.bf16.mxu1 %vm727_vm2, %v9886_v44  ;;  %v4496_v44 = vrot.slane %v4494_v10, 4  ;;  %9888 = vst [vmem:[#allocation12_spill] sm:$0xff] %v8328_v22  ;;  %v8338_v2 = vcombine.low %v3778_v56, %v3788_v48  ;;  %v4501_v59 = vrot.slane %v8262_v20, 5  ;;  %v8347_v36 = vrot.slane %v3796_v55, 4 }
  0xff   : > { %v8349_v21 = vrot.slane %v3809_v58, 5  ;;  %v3807_v56 = vrot.slane %v3806_v5, 4  ;;  %v8353_v11 = vsel %vm7120_vm6, %v6004_v18, %v4494_v10  ;;  %v3844_v52 = vor.u32 %v3843_v31, %v3840_v49  ;;  %v8366_v58 = vpop.f32.mrf.mxu1  ;;  %v6699_v31 = vld [vmem:[%s6794_s27 + $0x9c] sm:$0xff]   ;;  %v8375_v49 = vpop.f32.mrf.mxu0  ;;  %v6700_v5 = vld [vmem:[%s6794_s27 + $0xa8] sm:$0xff]  }
 0x100   : > { %v8357_v20 = vsel %vm7120_vm6, %v4496_v44, %v4497_v14  ;;  %v9889_v55 = vcombine.low %v7985_v15, %v8003_v17  ;;  %9890 = vst [vmem:[#allocation3_spill] sm:$0xff] %v8366_v58  ;;  %v6005_v48 = vrot.slane %v5989_v7, 9  ;;  %v3854_v18 = vor.u32 %v3853_v12, %v8333_v53  ;;  %9892 = vst [vmem:[#allocation2_spill] sm:$0xff] %v8375_v49 }
 0x101   : > { %v3857_v10 = vshll.u32 %v8344_v24, 16  ;;  %v9891_v14 = vcombine.low %v8007_v4, %v8018_v34  ;;  %v3821_v15 = vrot.slane %v3820_v26, 4  ;;  %v3831_v17 = vrot.slane %v3830_v50, 4  ;;  %v8390_v50 = vpop.f32.mrf.mxu1 }
 0x102   : > { %6522 = vmatmul.mubr.msk.bf16.gmra.mxu0 %vm727_vm2, %v6696_v54  ;;  %v3862_v54 = vshrl.u32 %v5917_v41, 16  ;;  %v4503_v44 = vrot.slane %v4501_v59, 4  ;;  %v4504_v41 = vrot.slane %v8318_v40, 5  ;;  %v3867_v12 = vrot.slane %v3865_v27, 5  ;;  %9893 = vst [vmem:[#allocation8_spill] sm:$0xff] %v8390_v50 }
 0x103   : > { %6525 = vmatprep.mubr.msk.bf16.mxu0 %vm727_vm2, %v6698_v33  ;;  %v3835_v33 = vrot.slane %v3833_v37, 5  ;;  %v5990_v37 = vld [vmem:[%s6794_s27 + $0x54] sm:$0xe]  ;;  %v3875_v58 = vshrl.u32 %v8360_v6, 16  ;;  %v3802_v4 = vsel %vm6834_vm3, %v8347_v36, %v8293_v30  ;;  %v3812_v34 = vsel %vm6834_vm3, %v3807_v56, %v8349_v21  ;;  %v5920_v36 = vld [vmem:[%s6794_s27 + $0x6c] sm:$0xf] }
 0x104   : > { %v3864_v7 = vrot.slane %v3862_v54, 4  ;;  %v3845_v26 = vrot.slane %v3844_v52, 4  ;;  %v4508_v40 = vrot.slane %v8286_v13, 5  ;;  %v8396_v54 = vsel %vm7120_vm6, %v6005_v48, %v4501_v59  ;;  %v8412_v48 = vld [vmem:[%s6794_s27 + $0x68] sm:$0x1] }
 0x105   : > { %6486 = vmatmul.mubr.msk.bf16.gmra.mxu1 %vm727_vm2, %v9889_v55  ;;  %v3871_v55 = vshll.u32 %v8360_v6, 16  ;;  %v3859_v30 = vrot.slane %v3857_v10, 5  ;;  %v3826_v13 = vsel %vm6834_vm3, %v3821_v15, %v8320_v60  ;;  %v3836_v56 = vsel %vm6834_vm3, %v3831_v17, %v3835_v33  ;;  %v8420_v15 = vld [vmem:[%s6794_s27 + $0x70] sm:$0xf] }
 0x106   : > { %6489 = vmatprep.mubr.msk.bf16.mxu1 %vm727_vm2, %v9891_v14  ;;  %v3855_v14 = vrot.slane %v3854_v18, 4  ;;  %v8409_v52 = vsel %vm7120_vm6, %v4503_v44, %v4504_v41  ;;  %v6006_v59 = vrot.slane %v5990_v37, 9  ;;  %v5991_v18 = vld [vmem:[%s6794_s27 + $0x60] sm:$0xe]  ;;  %v4511_v10 = vrot.slane %v8344_v24, 5 }
 0x107   : > { %v8417_v27 = vrot.slane %v3871_v55, 5  ;;  %v3877_v60 = vrot.slane %v3875_v58, 4  ;;  %v3850_v33 = vsel %vm6834_vm3, %v3845_v26, %v8333_v53  ;;  %v4510_v17 = vrot.slane %v4508_v40, 4 }
 0x108   : > { %v8400_v21 = vpop.f32.mrf.mxu0  ;;  %v3886_v44 = vshrl.u32 %v5920_v36, 16  ;;  %v3889_v41 = vshll.u32 %v5920_v36, 16  ;;  %v3860_v58 = vsel %vm6834_vm3, %v3855_v14, %v3859_v30  ;;  %v3881_v37 = vshll.u32 %v8412_v48, 16  ;;  %v6702_v36 = vld [vmem:[%s6794_s27 + $0xc0] sm:$0xff]  }
 0x109   : > { %9894 = vst [vmem:[#allocation13_spill] sm:$0xff] %v8400_v21  ;;  %v4515_v53 = vrot.slane %v8360_v6, 5  ;;  %v8442_v55 = vcombine.low %v3802_v4, %v3812_v34  ;;  %v8444_v26 = vcombine.low %v3826_v13, %v3836_v56  ;;  %v3895_v14 = vshll.u32 %v8420_v15, 16  ;;  %v5923_v34 = vld [vmem:[%s6794_s27 + $0x78] sm:$0xf] }
 0x10a   : > { %6526 = vmatmul.mubr.msk.bf16.gmra.mxu0 %vm727_vm2, %v6699_v31  ;;  %v3868_v31 = vor.u32 %v3867_v12, %v3864_v7  ;;  %v6007_v7 = vrot.slane %v5991_v18, 9  ;;  %v9897_v12 = vcombine.low %v8032_v9, %v8052_v46  ;;  %v3899_v30 = vshrl.u32 %v8420_v15, 16  ;;  %v8466_v18 = vld [vmem:[%s6794_s27 + $0x74] sm:$0x1]  ;;  %v8469_v6 = vld [vmem:[%s6794_s27 + $0x7c] sm:$0xf] }
 0x10b   : > { %6529 = vmatprep.mubr.msk.bf16.mxu0 %vm727_vm2, %v6700_v5  ;;  %v9895_v5 = vcombine.low %v8026_v1, %v8038_v23  ;;  %v6701_v23 = vld [vmem:[%s6794_s27 + $0xb4] sm:$0xff]   ;;  %v8440_v1 = vpop.f32.mrf.mxu0  ;;  %v8453_v9 = vsel %vm7120_vm6, %v6006_v59, %v4508_v40  ;;  %v3878_v4 = vor.u32 %v3877_v60, %v8417_v27  ;;  %v8459_v13 = vcombine.low %v3850_v33, %v3860_v58  ;;  %v5926_v33 = vld [vmem:[%s6794_s27 + $0x84] sm:$0xf] }
 0x10c   : > { %9898 = vst [vmem:[#allocation15_spill] sm:$0xff] %v8440_v1  ;;  %v8455_v46 = vrot.slane %v3868_v31, 4  ;;  %v8463_v56 = vsel %vm7120_vm6, %v4510_v17, %v4511_v10  ;;  %v8473_v59 = vrot.slane %v3881_v37, 5  ;;  %v8477_v31 = vsel %vm7120_vm6, %v6007_v7, %v4515_v53  ;;  %v5992_v7 = vld [vmem:[%s6794_s27 + $0x6c] sm:$0xe] }
 0x10d   : > { %6490 = vmatmul.mubr.msk.bf16.gmra.mxu1 %vm727_vm2, %v9895_v5  ;;  %v8429_v24 = vpop.f32.mrf.mxu1  ;;  %9899 = vst [vmem:[#allocation16_spill] sm:$0xff] %v8459_v13  ;;  %v3888_v5 = vrot.slane %v3886_v44, 4  ;;  %v4517_v60 = vrot.slane %v4515_v53, 4  ;;  %v4518_v10 = vrot.slane %v8412_v48, 5  ;;  %v8482_v17 = vpop.f32.mrf.mxu0  ;;  %v8484_v44 = vrot.slane %v3895_v14, 5 }
 0x10e   : > { %9896 = vst [vmem:[#allocation14_spill] sm:$0xff] %v8429_v24  ;;  %6493 = vmatprep.mubr.msk.bf16.mxu1 %vm727_vm2, %v9897_v12  ;;  %v3891_v12 = vrot.slane %v3889_v41, 5  ;;  %9901 = vst [vmem:[#allocation18_spill] sm:$0xff] %v8482_v17  ;;  %v3901_v41 = vrot.slane %v3899_v30, 4  ;;  %v3910_v58 = vshrl.u32 %v5923_v34, 16  ;;  %v8494_v48 = vrot.slane %v3878_v4, 4 }
 0x10f   : > { %v8471_v40 = vpop.f32.mrf.mxu1  ;;  %v8487_v24 = vld [vmem:[%s6794_s27 + $0x88] sm:$0xf]  ;;  %v3919_v53 = vshll.u32 %v8469_v6, 16  ;;  %v4522_v30 = vrot.slane %v8420_v15, 5  ;;  %v3937_v50 = vshll.u32 %v5926_v33, 16  ;;  %v8508_v4 = vsel %vm7120_vm6, %v4517_v60, %v4518_v10 }
 0x110   : > { %9900 = vst [vmem:[#allocation17_spill] sm:$0xff] %v8471_v40  ;;  %v3913_v40 = vshll.u32 %v5923_v34, 16  ;;  %v3892_v14 = vor.u32 %v3891_v12, %v3888_v5  ;;  %v3934_v34 = vshrl.u32 %v5926_v33, 16  ;;  %v3905_v22 = vshll.u32 %v8466_v18, 16  ;;  %v8513_v12 = vpop.f32.mrf.mxu0  ;;  %v5925_v60 = vld [vmem:[%s6794_s27 + $0x80] sm:$0x1] }
 0x111   : > { %v8504_v37 = vpop.f32.mrf.mxu1  ;;  %v3943_v5 = vshll.u32 %v8487_v24, 16  ;;  %v3947_v15 = vshrl.u32 %v8487_v24, 16  ;;  %9904 = vst [vmem:[#allocation20_spill] sm:$0xff] %v8513_v12  ;;  %v3902_v33 = vor.u32 %v3901_v41, %v8484_v44  ;;  %v3912_v10 = vrot.slane %v3910_v58, 4  ;;  %v5993_v13 = vld [vmem:[%s6794_s27 + $0x78] sm:$0xe] }
 0x112   : > { %6530 = vmatmul.mubr.msk.bf16.gmra.mxu0 %vm727_vm2, %v6701_v23  ;;  %v3923_v23 = vshrl.u32 %v8469_v6, 16  ;;  %9903 = vst [vmem:[#allocation19_spill] sm:$0xff] %v8504_v37  ;;  %v3915_v37 = vrot.slane %v3913_v40, 5  ;;  %v4525_v17 = vrot.slane %v8466_v18, 5  ;;  %v8523_v1 = vrot.slane %v3919_v53, 5 }
 0x113   : > { %6533 = vmatprep.mubr.msk.bf16.mxu0 %vm727_vm2, %v6702_v36  ;;  %v9902_v36 = vcombine.low %v8042_v25, %v8061_v63  ;;  %v9905_v25 = vcombine.low %v8065_v43, %v8075_v38  ;;  %v6703_v63 = vld [vmem:[%s6794_s27 + $0xcc] sm:$0xff]   ;;  %v4529_v12 = vrot.slane %v8469_v6, 5  ;;  %v8527_v49 = vrot.slane %v3892_v14, 4  ;;  %v8529_v41 = vpop.f32.mrf.mxu1 }
 0x114   : > { %v3925_v21 = vrot.slane %v3923_v23, 4  ;;  %v4524_v43 = vrot.slane %v4522_v30, 4  ;;  %v3936_v38 = vrot.slane %v3934_v34, 4  ;;  %9906 = vst [vmem:[#allocation21_spill] sm:$0xff] %v8529_v41  ;;  %v3884_v40 = vsel %vm6834_vm3, %v8494_v48, %v8473_v59  ;;  %v8538_v58 = vld [vmem:[%s6794_s27 + $0x8c] sm:$0x1] }
 0x115   : > { %6494 = vmatmul.mubr.msk.bf16.gmra.mxu1 %vm727_vm2, %v9902_v36  ;;  %v6008_v36 = vrot.slane %v5992_v7, 9  ;;  %v8535_v18 = vrot.slane %v3905_v22, 5  ;;  %v8540_v7 = vrot.slane %v3943_v5, 5  ;;  %v3949_v6 = vrot.slane %v3947_v15, 4  ;;  %v5929_v41 = vld [vmem:[%s6794_s27 + $0x90] sm:$0xf] }
 0x116   : > { %6497 = vmatprep.mubr.msk.bf16.mxu1 %vm727_vm2, %v9905_v25  ;;  %v3939_v25 = vrot.slane %v3937_v50, 5  ;;  %v3903_v50 = vrot.slane %v3902_v33, 4  ;;  %v3916_v23 = vor.u32 %v3915_v37, %v3912_v10  ;;  %v3929_v14 = vshll.u32 %v5925_v60, 16 }
 0x117   : > { %v6009_v34 = vrot.slane %v5993_v13, 9  ;;  %v9907_v22 = vcombine.low %v8206_v28, %v8217_v8  ;;  %v8552_v59 = vsel %vm7120_vm6, %v6008_v36, %v4522_v30  ;;  %v3926_v48 = vor.u32 %v3925_v21, %v8523_v1  ;;  %v8567_v30 = vld [vmem:[%s6794_s27 + $0x94] sm:$0xf] }
 0x118   : > { %v4531_v5 = vrot.slane %v4529_v12, 4  ;;  %v4532_v15 = vrot.slane %v5925_v60, 5  ;;  %v3898_v13 = vsel %vm6834_vm3, %v8527_v49, %v8484_v44  ;;  %v8563_v28 = vsel %vm7120_vm6, %v4524_v43, %v4525_v17  ;;  %v5994_v60 = vld [vmem:[%s6794_s27 + $0x84] sm:$0xe] }
 0x119   : > { %v3940_v8 = vor.u32 %v3939_v25, %v3936_v38  ;;  %v3953_v37 = vshll.u32 %v8538_v58, 16  ;;  %v9908_v21 = vcombine.low %v8092_v51, %v8109_v47  ;;  %v3950_v36 = vor.u32 %v3949_v6, %v8540_v7 }
 0x11a   : > { %v8542_v53 = vpop.f32.mrf.mxu0  ;;  %6534 = vmatmul.mubr.msk.bf16.gmra.mxu0 %vm727_vm2, %v6703_v63  ;;  %v4536_v49 = vrot.slane %v8487_v24, 5  ;;  %v3958_v44 = vshrl.u32 %v5929_v41, 16  ;;  %v3961_v17 = vshll.u32 %v5929_v41, 16  ;;  %v3908_v43 = vsel %vm6834_vm3, %v3903_v50, %v8535_v18 }
 0x11b   : > { %6577 = vmatprep.mubr.msk.bf16.mxu0 %vm727_vm2, %v9907_v22  ;;  %v3917_v38 = vrot.slane %v3916_v23, 4  ;;  %v3931_v51 = vrot.slane %v3929_v14, 5  ;;  %v8587_v47 = vsel %vm7120_vm6, %v6009_v34, %v4529_v12  ;;  %v3927_v24 = vrot.slane %v3926_v48, 4  ;;  %v9943_v29 = vld [vmem:[#allocation21_spill] sm:$0xff] }
 0x11c   : > { %v8555_v63 = vpop.f32.mrf.mxu0  ;;  %v8593_v41 = vsel %vm7120_vm6, %v4531_v5, %v4532_v15  ;;  %v3967_v6 = vshll.u32 %v8567_v30, 16  ;;  %v3941_v18 = vrot.slane %v3940_v8, 4  ;;  %v3955_v50 = vrot.slane %v3953_v37, 5 }
 0x11d   : > { %v8569_v33 = vpop.f32.mrf.mxu1  ;;  %6498 = vmatmul.mubr.msk.bf16.gmra.mxu1 %vm727_vm2, %v9908_v21  ;;  %v6010_v23 = vrot.slane %v5994_v60, 9  ;;  %v4539_v12 = vrot.slane %v8538_v58, 5  ;;  %v3951_v34 = vrot.slane %v3950_v36, 4  ;;  %v4538_v48 = vrot.slane %v4536_v49, 4 }
 0x11e   : > { %v8578_v10 = vpop.f32.mrf.mxu0  ;;  %6541 = vmatprep.mubr.msk.bf16.mxu1 %vm727_vm2, %v8253_v32  ;;  %v3971_v32 = vshrl.u32 %v8567_v30, 16  ;;  %v3960_v21 = vrot.slane %v3958_v44, 4  ;;  %v3963_v5 = vrot.slane %v3961_v17, 5  ;;  %v6026_v8 = vcombine.low %v8453_v9, %v8463_v56 }
 0x11f   : > { %v8589_v25 = vpop.f32.mrf.mxu1  ;;  %v9911_v58 = vsel %vm6834_vm3, %v8455_v46, %v8417_v27  ;;  %v9912_v44 = vcombine.low %v8276_v62, %v8306_v42  ;;  %v3922_v27 = vsel %vm6834_vm3, %v3917_v38, %v8523_v1  ;;  %v3932_v46 = vsel %vm6834_vm3, %v3927_v24, %v3931_v51  ;;  %v8648_v38 = vld [vmem:[%s6794_s27 + $0xa0] sm:$0xf]  ;;  %v5935_v62 = vld [vmem:[%s6794_s27 + $0xa8] sm:$0xf] }
 0x120   : > { %9909 = vst [vmem:[#allocation22_spill] sm:$0xff] %v8589_v25  ;;  %v8597_v22 = vpop.f32.mrf.mxu0  ;;  %v9910_v25 = vcombine.low %v8224_v39, %v8228_v19  ;;  %v8613_v37 = vcombine.low %v9911_v58, %v3884_v40  ;;  %v8620_v39 = vld [vmem:[%s6794_s27 + $0x98] sm:$0x1]  ;;  %v8633_v40 = vrot.slane %v3967_v6, 5  ;;  %v3973_v17 = vrot.slane %v3971_v32, 4 }
 0x121   : > { %v8600_v14 = vpop.f32.mrf.mxu1  ;;  %v8636_v60 = vcombine.low %v3898_v13, %v3908_v43  ;;  %v3946_v42 = vsel %vm6834_vm3, %v3941_v18, %v8540_v7  ;;  %v8645_v1 = vsel %vm7120_vm6, %v6010_v23, %v4536_v49  ;;  %v3956_v13 = vsel %vm6834_vm3, %v3951_v34, %v3955_v50  ;;  %v5995_v18 = vld [vmem:[%s6794_s27 + $0x90] sm:$0xe] }
 0x122   : > { %v6363_v15 = vpop.f32.mrf.mxu0  ;;  %6578 = vmatmul.mubr.msk.bf16.vlgmr.msra.gmra.mxu0 %vm727_vm2, %v9910_v25  ;;  %v5932_v25 = vld [vmem:[%s6794_s27 + $0x9c] sm:$0xf]  ;;  %v8656_v43 = vsel %vm7120_vm6, %v4538_v48, %v4539_v12  ;;  %v3964_v24 = vor.u32 %v3963_v5, %v3960_v21  ;;  %v3977_v7 = vshll.u32 %v8620_v39, 16  ;;  %v8662_v32 = vcombine.low %v3922_v27, %v3932_v46 }
 0x123   : > { %v8622_v19 = vpop.f32.mrf.mxu1  ;;  %6581 = vmatprep.mubr.msk.bf16.mxu0 %vm727_vm2, %v9912_v44  ;;  %v3985_v23 = vshll.u32 %v5932_v25, 16  ;;  %v3974_v34 = vor.u32 %v3973_v17, %v8633_v40  ;;  %v4543_v12 = vrot.slane %v8567_v30, 5  ;;  %v3991_v48 = vshll.u32 %v8648_v38, 16 }
 0x124   : > { %v1548_v58 = vpop.f32.mrf.mxu0  ;;  %v3995_v21 = vshrl.u32 %v8648_v38, 16  ;;  %v8672_v44 = vcombine.low %v3946_v42, %v3956_v13  ;;  %v3979_v17 = vrot.slane %v3977_v7, 5  ;;  %v6011_v30 = vrot.slane %v5995_v18, 9 }
 0x125   : > { %v6327_v51 = vpop.f32.mrf.mxu1  ;;  %6542 = vmatmul.mubr.msk.bf16.vlgmr.msra.gmra.mxu1 %vm727_vm2, %v8264_v16  ;;  %v3982_v16 = vshrl.u32 %v5932_v25, 16  ;;  %v8676_v25 = vrot.slane %v3964_v24, 4  ;;  %v9913_v42 = vcombine.low %v8353_v11, %v8357_v20  ;;  %v8688_v24 = vld [vmem:[%s6794_s27 + $0xac] sm:$0xf]  ;;  %v4545_v18 = vrot.slane %v4543_v12, 4 }
 0x126   : > { %v1120_v6 = vadd.f32 %v6327_v51, %v8163_v61  ;;  %v6364_v49 = vpop.f32.mrf.mxu0  ;;  %6545 = vmatprep.mubr.msk.bf16.mxu1 %vm727_vm2, %v8338_v2  ;;  %v4546_v51 = vrot.slane %v8620_v39, 5  ;;  %v9914_v39 = vcombine.low %v8396_v54, %v8409_v52  ;;  %v8710_v52 = vsel %vm7120_vm6, %v6011_v30, %v4543_v12 }
 0x127   : > { %v1111_v50 = vpop.f32.mrf.mxu1  ;;  %v3984_v13 = vrot.slane %v3982_v16, 4  ;;  %v8700_v16 = vld [vmem:[%s6794_s27 + $0xa4] sm:$0x1]  ;;  %v3970_v54 = vsel %vm6834_vm3, %v8676_v25, %v8633_v40  ;;  %v4550_v40 = vrot.slane %v8648_v38, 5 }
 0x128   : > { %v8669_v61 = vadd.f32 %v6363_v15, %v1120_v6  ;;  %v1112_v5 = vadd.f32 %v1111_v50, %v8190_v35  ;;  %v1551_v2 = vpop.f32.mrf.mxu0  ;;  %v3987_v6 = vrot.slane %v3985_v23, 5  ;;  %v8694_v50 = vrot.slane %v3991_v48, 5 }
 0x129   : > { %v6328_v46 = vpop.f32.mrf.mxu1  ;;  %v4006_v23 = vshrl.u32 %v5935_v62, 16  ;;  %v8725_v30 = vsel %vm7120_vm6, %v4545_v18, %v4546_v51 }
 0x12a   : > { %v8680_v36 = vadd.f32 %v1548_v58, %v1112_v5  ;;  %v1123_v35 = vadd.f32 %v6328_v46, %v8202_v3  ;;  %v6367_v15 = vpop.f32.mrf.mxu0  ;;  %6582 = vmatmul.mubr.msk.bf16.gmra.mxu0 %vm727_vm2, %v9913_v42  ;;  %v3975_v58 = vrot.slane %v3974_v34, 4  ;;  %v3997_v3 = vrot.slane %v3995_v21, 4 }
 0x12b   : > { %v1114_v7 = vpop.f32.mrf.mxu1  ;;  %6585 = vmatprep.mubr.msk.bf16.mxu0 %vm727_vm2, %v9914_v39  ;;  %v4009_v46 = vshll.u32 %v5935_v62, 16  ;;  %v9915_v62 = vld [vmem:[#allocation6_spill] sm:$0xff]  ;;  %v4008_v38 = vrot.slane %v4006_v23, 4 }
 0x12c   : > { %v8696_v5 = vadd.f32 %v6364_v49, %v1123_v35  ;;  %v1115_v11 = vadd.f32 %v1114_v7, %v8251_v57  ;;  %v1564_v20 = vpop.f32.mrf.mxu0  ;;  %v4015_v57 = vshll.u32 %v8688_v24, 16  ;;  %v4019_v49 = vshrl.u32 %v8688_v24, 16  ;;  %v5996_v35 = vld [vmem:[%s6794_s27 + $0x9c] sm:$0xe] }
 0x12d   : > { %v6331_v42 = vpop.f32.mrf.mxu1  ;;  %6546 = vmatmul.mubr.msk.bf16.gmra.mxu1 %vm727_vm2, %v8442_v55  ;;  %v3988_v55 = vor.u32 %v3987_v6, %v3984_v13  ;;  %v3980_v12 = vsel %vm6834_vm3, %v3975_v58, %v3979_v17  ;;  %v4001_v7 = vshll.u32 %v8700_v16, 16  ;;  %v4011_v6 = vrot.slane %v4009_v46, 5 }
 0x12e   : > { %v8714_v34 = vadd.f32 %v1551_v2, %v1115_v11  ;;  %v1136_v48 = vadd.f32 %v6331_v42, %v9915_v62  ;;  %v6368_v21 = vpop.f32.mrf.mxu0  ;;  %6549 = vmatprep.mubr.msk.bf16.mxu1 %vm727_vm2, %v8444_v26  ;;  %v3998_v2 = vor.u32 %v3997_v3, %v8694_v50  ;;  %v9916_v11 = vld [vmem:[#allocation9_spill] sm:$0xff]  ;;  %v6012_v62 = vrot.slane %v5996_v35, 9 }
 0x12f   : > { %v1127_v25 = vpop.f32.mrf.mxu1  ;;  %v4553_v17 = vrot.slane %v8700_v16, 5  ;;  %v8733_v58 = vrot.slane %v4015_v57, 5  ;;  %v4021_v51 = vrot.slane %v4019_v49, 4  ;;  %v8742_v23 = vrot.slane %v3988_v55, 4  ;;  %v5997_v16 = vld [vmem:[%s6794_s27 + $0xa8] sm:$0xe] }
 0x130   : > { %v8729_v39 = vadd.f32 %v6367_v15, %v1136_v48  ;;  %v1128_v26 = vadd.f32 %v1127_v25, %v9916_v11  ;;  %v1567_v13 = vpop.f32.mrf.mxu0  ;;  %v4552_v46 = vrot.slane %v4550_v40, 4  ;;  %v8745_v48 = vld [vmem:[%s6794_s27 + $0xb0] sm:$0x1]  ;;  %v8756_v56 = vrot.slane %v3998_v2, 4  ;;  %v9918_v55 = vld [vmem:[#allocation2_spill] sm:$0xff] }
 0x131   : > { %v6332_v42 = vpop.f32.mrf.mxu1  ;;  %v4012_v11 = vor.u32 %v4011_v6, %v4008_v38  ;;  %v4022_v2 = vor.u32 %v4021_v51, %v8733_v58  ;;  %v9920_v38 = vld [vmem:[#allocation13_spill] sm:$0xff] }
 0x132   : > { %v8735_v18 = vadd.f32 %v1564_v20, %v1128_v26  ;;  %v1139_v3 = vadd.f32 %v6332_v42, %v8336_v0  ;;  %v6371_v15 = vpop.f32.mrf.mxu0  ;;  %6586 = vmatmul.mubr.msk.bf16.gmra.mxu0 %vm727_vm2, %v6026_v8  ;;  %v9917_v20 = vcombine.low %v8477_v31, %v8508_v4  ;;  %v8752_v0 = vcombine.low %v3970_v54, %v3980_v12  ;;  %v5938_v31 = vld [vmem:[%s6794_s27 + $0xb4] sm:$0xf] }
 0x133   : > { %v1130_v57 = vpop.f32.mrf.mxu1  ;;  %v8758_v8 = vrot.slane %v4001_v7, 5  ;;  %v4557_v26 = vrot.slane %v8688_v24, 5  ;;  %v9919_v54 = vld [vmem:[#allocation16_spill] sm:$0xff]  ;;  %v8769_v12 = vsel %vm7120_vm6, %v6012_v62, %v4550_v40  ;;  %v6013_v7 = vrot.slane %v5997_v16, 9  ;;  %v8792_v16 = vld [vmem:[%s6794_s27 + $0xb8] sm:$0xf] }
 0x134   : > { %6589 = vmatprep.mubr.msk.bf16.mxu0 %vm727_vm2, %v9917_v20  ;;  %v8760_v49 = vadd.f32 %v6368_v21, %v1139_v3  ;;  %v1131_v35 = vadd.f32 %v1130_v57, %v9918_v55  ;;  %v1580_v25 = vpop.f32.mrf.mxu0  ;;  %v4025_v21 = vshll.u32 %v8745_v48, 16  ;;  %v3994_v40 = vsel %vm6834_vm3, %v8742_v23, %v8694_v50  ;;  %v9921_v50 = vld [vmem:[#allocation15_spill] sm:$0xff] }
 0x135   : > { %v6335_v4 = vpop.f32.mrf.mxu1  ;;  %6550 = vmatmul.mubr.msk.bf16.gmra.mxu1 %vm727_vm2, %v9919_v54  ;;  %v8784_v62 = vsel %vm7120_vm6, %v4552_v46, %v4553_v17  ;;  %v4560_v3 = vrot.slane %v8745_v48, 5  ;;  %v4033_v57 = vshll.u32 %v5938_v31, 16  ;;  %v4013_v17 = vrot.slane %v4012_v11, 4 }
 0x136   : > { %v8773_v42 = vadd.f32 %v1567_v13, %v1131_v35  ;;  %v1152_v6 = vadd.f32 %v6335_v4, %v9920_v38  ;;  %v6372_v24 = vpop.f32.mrf.mxu0  ;;  %6553 = vmatprep.mubr.msk.bf16.mxu1 %vm727_vm2, %v8613_v37  ;;  %v4004_v13 = vsel %vm6834_vm3, %v8756_v56, %v8758_v8  ;;  %v4030_v37 = vshrl.u32 %v5938_v31, 16  ;;  %v5941_v35 = vld [vmem:[%s6794_s27 + $0xc0] sm:$0xf] }
 0x137   : > { %v1143_v51 = vpop.f32.mrf.mxu1  ;;  %v4559_v46 = vrot.slane %v4557_v26, 4  ;;  %v4023_v8 = vrot.slane %v4022_v2, 4  ;;  %v4027_v48 = vrot.slane %v4025_v21, 5  ;;  %v8802_v54 = vsel %vm7120_vm6, %v6013_v7, %v4557_v26  ;;  %v8817_v21 = vld [vmem:[%s6794_s27 + $0xc4] sm:$0xf] }
 0x138   : > { %v8794_v20 = vadd.f32 %v6371_v15, %v1152_v6  ;;  %v1144_v23 = vadd.f32 %v1143_v51, %v9921_v50  ;;  %v1583_v55 = vpop.f32.mrf.mxu0  ;;  %v9922_v15 = vld [vmem:[#allocation18_spill] sm:$0xff]  ;;  %v9923_v11 = vcombine.low %v8552_v59, %v8563_v28  ;;  %v8812_v51 = vld [vmem:[%s6794_s27 + $0xbc] sm:$0x1]  ;;  %v4039_v50 = vshll.u32 %v8792_v16, 16 }
 0x139   : > { %v6336_v4 = vpop.f32.mrf.mxu1  ;;  %v4043_v2 = vshrl.u32 %v8792_v16, 16  ;;  %v4032_v7 = vrot.slane %v4030_v37, 4  ;;  %v4054_v59 = vshrl.u32 %v5941_v35, 16  ;;  %v4057_v28 = vshll.u32 %v5941_v35, 16  ;;  %v5998_v37 = vld [vmem:[%s6794_s27 + $0xb4] sm:$0xe] }
 0x13a   : > { %v8804_v31 = vadd.f32 %v1580_v25, %v1144_v23  ;;  %v1155_v38 = vadd.f32 %v6336_v4, %v9922_v15  ;;  %v6375_v6 = vpop.f32.mrf.mxu0  ;;  %6590 = vmatmul.mubr.msk.bf16.gmra.mxu0 %vm727_vm2, %v9923_v11  ;;  %v9924_v25 = vcombine.low %v8587_v47, %v8593_v41  ;;  %v4035_v23 = vrot.slane %v4033_v57, 5  ;;  %v9925_v15 = vld [vmem:[#allocation20_spill] sm:$0xff] }
 0x13b   : > { %v1146_v26 = vpop.f32.mrf.mxu1  ;;  %v4018_v9 = vsel %vm6834_vm3, %v4013_v17, %v8733_v58  ;;  %v8831_v27 = vsel %vm7120_vm6, %v4559_v46, %v4560_v3  ;;  %v4028_v41 = vsel %vm6834_vm3, %v4023_v8, %v4027_v48  ;;  %v4063_v57 = vshll.u32 %v8817_v21, 16 }
 0x13c   : > { %6593 = vmatprep.mubr.msk.bf16.mxu0 %vm727_vm2, %v9924_v25  ;;  %v8823_v4 = vadd.f32 %v6372_v24, %v1155_v38  ;;  %v1147_v11 = vadd.f32 %v1146_v26, %v9925_v15  ;;  %v1596_v56 = vpop.f32.mrf.mxu0  ;;  %v4049_v24 = vshll.u32 %v8812_v51, 16  ;;  %v4067_v35 = vshrl.u32 %v8817_v21, 16 }
 0x13d   : > { %v6339_v47 = vpop.f32.mrf.mxu1  ;;  %6554 = vmatmul.mubr.msk.bf16.gmra.mxu1 %vm727_vm2, %v8636_v60  ;;  %v8846_v17 = vrot.slane %v4039_v50, 5  ;;  %v4045_v60 = vrot.slane %v4043_v2, 4  ;;  %v4036_v8 = vor.u32 %v4035_v23, %v4032_v7  ;;  %v4564_v48 = vrot.slane %v8792_v16, 5 }
 0x13e   : > { %v8841_v38 = vadd.f32 %v1583_v55, %v1147_v11  ;;  %v1168_v58 = vadd.f32 %v6339_v47, %v8542_v53  ;;  %v6376_v3 = vpop.f32.mrf.mxu0  ;;  %6557 = vmatprep.mubr.msk.bf16.mxu1 %vm727_vm2, %v8662_v32  ;;  %v4056_v26 = vrot.slane %v4054_v59, 4  ;;  %v4059_v25 = vrot.slane %v4057_v28, 5 }
 0x13f   : > { %v1159_v46 = vpop.f32.mrf.mxu1  ;;  %v8852_v11 = vcombine.low %v3994_v40, %v4004_v13  ;;  %v6014_v47 = vrot.slane %v5998_v37, 9  ;;  %v8854_v50 = vcombine.low %v4018_v9, %v4028_v41  ;;  %v6033_v2 = vcombine.low %v8802_v54, %v8831_v27  ;;  %v5943_v27 = vld [vmem:[%s6794_s27 + $0xc8] sm:$0x1]  ;;  %v5944_v54 = vld [vmem:[%s6794_s27 + $0xcc] sm:$0xf] }
 0x140   : > { %v8849_v15 = vadd.f32 %v6375_v6, %v1168_v58  ;;  %v1160_v55 = vadd.f32 %v1159_v46, %v8555_v63  ;;  %v1599_v53 = vpop.f32.mrf.mxu0  ;;  %v8858_v7 = vrot.slane %v4063_v57, 5  ;;  %v4069_v16 = vrot.slane %v4067_v35, 4  ;;  %v8880_v41 = vld [vmem:[%s6794_s27 + $0xd0] sm:$0xf] }
 0x141   : > { %v6340_v32 = vpop.f32.mrf.mxu1  ;;  %v9927_v40 = vcombine.low %v8645_v1, %v8656_v43  ;;  %v8867_v9 = vrot.slane %v4049_v24, 5  ;;  %v4567_v13 = vrot.slane %v8812_v51, 5  ;;  %v4046_v28 = vor.u32 %v4045_v60, %v8846_v17 }
 0x142   : > { %v8860_v6 = vadd.f32 %v1596_v56, %v1160_v55  ;;  %v1171_v23 = vadd.f32 %v6340_v32, %v8578_v10  ;;  %v6379_v63 = vpop.f32.mrf.mxu0  ;;  %v9928_v56 = vcombine.low %v8710_v52, %v8725_v30  ;;  %v8876_v10 = vrot.slane %v4036_v8, 4  ;;  %v5999_v52 = vld [vmem:[%s6794_s27 + $0xc0] sm:$0xe] }
 0x143   : > { %6594 = vmatmul.mubr.msk.bf16.gmra.mxu0 %vm727_vm2, %v9927_v40  ;;  %v1162_v59 = vpop.f32.mrf.mxu1  ;;  %v4566_v1 = vrot.slane %v4564_v48, 4  ;;  %v4060_v43 = vor.u32 %v4059_v25, %v4056_v26  ;;  %v8887_v57 = vsel %vm7120_vm6, %v6014_v47, %v4564_v48  ;;  %v4571_v30 = vrot.slane %v8817_v21, 5 }
 0x144   : > { %9926 = vst [vmem:[#allocation6_spill] sm:$0xff] %v8860_v6  ;;  %6597 = vmatprep.mubr.msk.bf16.mxu0 %vm727_vm2, %v9928_v56  ;;  %v8882_v24 = vadd.f32 %v6376_v3, %v1171_v23  ;;  %v1163_v51 = vadd.f32 %v1162_v59, %v8597_v22  ;;  %v1612_v37 = vpop.f32.mrf.mxu0  ;;  %v4070_v58 = vor.u32 %v4069_v16, %v8858_v7  ;;  %v4073_v60 = vshll.u32 %v5943_v27, 16  ;;  %v9931_v22 = vld [vmem:[#allocation4_spill] sm:$0xff] }
 0x145   : > { %v6343_v35 = vpop.f32.mrf.mxu1  ;;  %6558 = vmatmul.mubr.msk.bf16.gmra.mxu1 %vm727_vm2, %v8672_v44  ;;  %v4078_v46 = vshrl.u32 %v5944_v54, 16  ;;  %v4081_v3 = vshll.u32 %v5944_v54, 16  ;;  %v4087_v48 = vshll.u32 %v8880_v41, 16  ;;  %v4091_v21 = vshrl.u32 %v8880_v41, 16 }
 0x146   : > { %9929 = vst [vmem:[#allocation9_spill] sm:$0xff] %v8882_v24  ;;  %v8894_v8 = vadd.f32 %v1599_v53, %v1163_v51  ;;  %v1184_v26 = vadd.f32 %v6343_v35, %v9931_v22  ;;  %v6380_v25 = vpop.f32.mrf.mxu0  ;;  %6561 = vmatprep.mubr.msk.bf16.mxu1 %vm727_vm2, %v8752_v0  ;;  %v4047_v47 = vrot.slane %v4046_v28, 4  ;;  %v4568_v44 = vsel %vm7120_vm6, %v4566_v1, %v4567_v13  ;;  %v9932_v53 = vld [vmem:[#allocation7_spill] sm:$0xff]  ;;  %v9933_v28 = vld [vmem:[#allocation5_spill] sm:$0xff] }
 0x147   : > { %v1175_v55 = vpop.f32.mrf.mxu1  ;;  %v4061_v32 = vrot.slane %v4060_v43, 4  ;;  %v6015_v16 = vrot.slane %v5999_v52, 9  ;;  %v4573_v59 = vrot.slane %v4571_v30, 4  ;;  %v4574_v56 = vrot.slane %v5943_v27, 5 }
 0x148   : > { %9930 = vst [vmem:[#allocation2_spill] sm:$0xff] %v8894_v8  ;;  %v8903_v23 = vadd.f32 %v6379_v63, %v1184_v26  ;;  %v1176_v40 = vadd.f32 %v1175_v55, %v9932_v53  ;;  %v1615_v54 = vpop.f32.mrf.mxu0  ;;  %v4071_v51 = vrot.slane %v4070_v58, 4  ;;  %v4075_v35 = vrot.slane %v4073_v60, 5  ;;  %v5946_v58 = vld [vmem:[%s6794_s27 + $0xd4] sm:$0x1]  ;;  %v9935_v60 = vld [vmem:[#allocation10_spill] sm:$0xff] }
 0x149   : > { %v6344_v0 = vpop.f32.mrf.mxu1  ;;  %v4080_v22 = vrot.slane %v4078_v46, 4  ;;  %v4083_v8 = vrot.slane %v4081_v3, 5  ;;  %v9934_v63 = vcombine.low %v8769_v12, %v8784_v62  ;;  %v8913_v1 = vrot.slane %v4087_v48, 5  ;;  %v6000_v48 = vld [vmem:[%s6794_s27 + $0xcc] sm:$0xe] }
 0x14a   : > { %v8906_v24 = vadd.f32 %v1612_v37, %v1176_v40  ;;  %v1187_v6 = vadd.f32 %v6344_v0, %v9933_v28  ;;  %v6383_v13 = vpop.f32.mrf.mxu0  ;;  %v4093_v27 = vrot.slane %v4091_v21, 4  ;;  %v4042_v37 = vsel %vm6834_vm3, %v8876_v10, %v8846_v17  ;;  %v9937_v40 = vld [vmem:[#allocation12_spill] sm:$0xff] }
 0x14b   : > { %6598 = vmatmul.mubr.msk.bf16.gmra.mxu0 %vm727_vm2, %v9934_v63  ;;  %v1178_v43 = vpop.f32.mrf.mxu1  ;;  %v4052_v52 = vsel %vm6834_vm3, %v4047_v47, %v8867_v9  ;;  %v4578_v12 = vrot.slane %v8880_v41, 5  ;;  %v4575_v26 = vsel %vm7120_vm6, %v4573_v59, %v4574_v56  ;;  %v6034_v9 = vcombine.low %v8887_v57, %v4568_v44 }
 0x14c   : > { %6601 = vmatprep.mubr.msk.bf16.mxu0 %vm727_vm2, %v6033_v2  ;;  %v8925_v62 = vadd.f32 %v6380_v25, %v1187_v6  ;;  %v1179_v46 = vadd.f32 %v1178_v43, %v9935_v60  ;;  %v1628_v3 = vpop.f32.mrf.mxu0  ;;  %v4572_v2 = vsel %vm7120_vm6, %v6015_v16, %v4571_v30  ;;  %v4066_v6 = vsel %vm6834_vm3, %v4061_v32, %v8858_v7  ;;  %v9936_v30 = vld [vmem:[#allocation11_spill] sm:$0xff] }
 0x14d   : > { %v6347_v17 = vpop.f32.mrf.mxu1  ;;  %6562 = vmatmul.mubr.msk.bf16.gmra.mxu1 %vm727_vm2, %v8852_v11  ;;  %v4076_v10 = vsel %vm6834_vm3, %v4071_v51, %v4075_v35  ;;  %v4084_v41 = vor.u32 %v4083_v8, %v4080_v22  ;;  %v4094_v11 = vor.u32 %v4093_v27, %v8913_v1  ;;  %v4097_v47 = vshll.u32 %v5946_v58, 16 }
 0x14e   : > { %v8941_v25 = vadd.f32 %v1615_v54, %v1179_v46  ;;  %v1200_v21 = vadd.f32 %v6347_v17, %v9936_v30  ;;  %v6384_v55 = vpop.f32.mrf.mxu0  ;;  %6565 = vmatprep.mubr.msk.bf16.mxu1 %vm727_vm2, %v8854_v50  ;;  %v6035_v44 = vcombine.low %v4572_v2, %v4575_v26  ;;  %v6016_v16 = vrot.slane %v6000_v48, 9  ;;  %v9938_v50 = vld [vmem:[#allocation3_spill] sm:$0xff]  ;;  %v9940_v48 = vld [vmem:[#allocation14_spill] sm:$0xff] }
 0x14f   : > { %v1191_v57 = vpop.f32.mrf.mxu1  ;;  %v4580_v53 = vrot.slane %v4578_v12, 4  ;;  %v4581_v7 = vrot.slane %v5946_v58, 5  ;;  %v5964_v56 = vcombine.low %v4042_v37, %v4052_v52  ;;  %v5965_v0 = vcombine.low %v4066_v6, %v4076_v10  ;;  %v9939_v58 = vld [vmem:[#allocation8_spill] sm:$0xff] }
 0x150   : > { %v8947_v32 = vadd.f32 %v6383_v13, %v1200_v21  ;;  %v1192_v8 = vadd.f32 %v1191_v57, %v9937_v40  ;;  %v1631_v54 = vpop.f32.mrf.mxu0  ;;  %v4085_v51 = vrot.slane %v4084_v41, 4  ;;  %v4095_v63 = vrot.slane %v4094_v11, 4  ;;  %v9941_v41 = vld [vmem:[#allocation17_spill] sm:$0xff] }
 0x151   : > { %v6348_v59 = vpop.f32.mrf.mxu1  ;;  %v4099_v27 = vrot.slane %v4097_v47, 5  ;;  %v4579_v13 = vsel %vm7120_vm6, %v6016_v16, %v4578_v12  ;;  %v4582_v37 = vsel %vm7120_vm6, %v4580_v53, %v4581_v7  ;;  %v9942_v47 = vld [vmem:[#allocation19_spill] sm:$0xff] }
 0x152   : > { %v8950_v35 = vadd.f32 %v1628_v3, %v1192_v8  ;;  %v1203_v22 = vadd.f32 %v6348_v59, %v9938_v50  ;;  %v6387_v28 = vpop.f32.mrf.mxu0  ;;  %v4090_v2 = vsel %vm6834_vm3, %v4085_v51, %v8913_v1  ;;  %v9944_v50 = vld [vmem:[#allocation22_spill] sm:$0xff] }
 0x153   : > { %6602 = vmatmul.mubr.msk.bf16.gmra.mxu0 %vm727_vm2, %v6034_v9  ;;  %v1194_v43 = vpop.f32.mrf.mxu1  ;;  %v4100_v45 = vsel %vm6834_vm3, %v4095_v63, %v4099_v27  ;;  %v6036_v9 = vcombine.low %v4579_v13, %v4582_v37 }
 0x154   : > { %6605 = vmatprep.mubr.msk.bf16.mxu0 %vm727_vm2, %v6035_v44  ;;  %v8959_v52 = vadd.f32 %v6384_v55, %v1203_v22  ;;  %v1195_v60 = vadd.f32 %v1194_v43, %v9939_v58  ;;  %v1644_v46 = vpop.f32.mrf.mxu0  ;;  %v5966_v11 = vcombine.low %v4090_v2, %v4100_v45 }
 0x155   : > { %v6351_v3 = vpop.f32.mrf.mxu1  ;;  %6566 = vmatmul.mubr.msk.bf16.gmra.mxu1 %vm727_vm2, %v5964_v56 }
 0x156   : > { %v8966_v26 = vadd.f32 %v1631_v54, %v1195_v60  ;;  %v1216_v17 = vadd.f32 %v6351_v3, %v9940_v48  ;;  %v6388_v12 = vpop.f32.mrf.mxu0  ;;  %6569 = vmatprep.mubr.msk.bf16.mxu1 %vm727_vm2, %v5965_v0 }
 0x157   : > { %v1207_v6 = vpop.f32.mrf.mxu1 }
 0x158   : > { %v8972_v10 = vadd.f32 %v6387_v28, %v1216_v17  ;;  %v1208_v30 = vadd.f32 %v1207_v6, %v9941_v41  ;;  %v1647_v21 = vpop.f32.mrf.mxu0 }
 0x159   : > { %v6352_v55 = vpop.f32.mrf.mxu1 }
 0x15a   : > { %v8975_v1 = vadd.f32 %v1644_v46, %v1208_v30  ;;  %v1219_v57 = vadd.f32 %v6352_v55, %v9942_v47  ;;  %v6391_v44 = vpop.f32.mrf.mxu0 }
 0x15b   : > { %6606 = vmatmul.mubr.msk.bf16.gmra.mxu0 %vm727_vm2, %v6036_v9  ;;  %v1210_v16 = vpop.f32.mrf.mxu1 }
 0x15c   : > { %v8979_v53 = vadd.f32 %v6388_v12, %v1219_v57  ;;  %v1211_v7 = vadd.f32 %v1210_v16, %v9943_v29  ;;  %v1660_v40 = vpop.f32.mrf.mxu0 }
 0x15d   : > { %v6355_v8 = vpop.f32.mrf.mxu1  ;;  %6570 = vmatmul.mubr.msk.bf16.gmra.mxu1 %vm727_vm2, %v5966_v11 }
 0x15e   : > { %v8983_v54 = vadd.f32 %v1647_v21, %v1211_v7  ;;  %v1232_v59 = vadd.f32 %v6355_v8, %v8569_v33  ;;  %v6392_v56 = vpop.f32.mrf.mxu0 }
 0x15f   : > { %v1223_v0 = vpop.f32.mrf.mxu1 }
 0x160   : > { %v8986_v51 = vadd.f32 %v6391_v44, %v1232_v59  ;;  %v1224_v22 = vadd.f32 %v1223_v0, %v9944_v50  ;;  %v1663_v28 = vpop.f32.mrf.mxu0 }
 0x161   : > { %v6356_v63 = vpop.f32.mrf.mxu1 }
 0x162   : > { %v8989_v27 = vadd.f32 %v1660_v40, %v1224_v22  ;;  %v1235_v43 = vadd.f32 %v6356_v63, %v8600_v14  ;;  %v6435_v13 = vpop.f32.mrf.mxu0 }
 0x163   : > { %v1226_v37 = vpop.f32.mrf.mxu1 }
 0x164   : > { %v8992_v58 = vadd.f32 %v6392_v56, %v1235_v43  ;;  %v1227_v60 = vadd.f32 %v1226_v37, %v8622_v19  ;;  %v2657_v46 = vpop.f32.mrf.mxu0 }
 0x165   : > { %v6399_v33 = vpop.f32.mrf.mxu1 }
 0x166   : > { %v8995_v3 = vadd.f32 %v1663_v28, %v1227_v60  ;;  %v2048_v2 = vadd.f32 %v6399_v33, %v8669_v61  ;;  %v6436_v48 = vpop.f32.mrf.mxu0 }
 0x167   : > { %v1919_v17 = vpop.f32.mrf.mxu1 }
 0x168   : > { %v8998_v12 = vadd.f32 %v6435_v13, %v2048_v2  ;;  %v2046_v45 = vadd.f32 %v1919_v17, %v8680_v36  ;;  %v2660_v9 = vpop.f32.mrf.mxu0 }
 0x169   : > { %v6400_v14 = vpop.f32.mrf.mxu1 }
 0x16a   : > { %v9001_v6 = vadd.f32 %v2657_v46, %v2046_v45  ;;  %v2049_v41 = vadd.f32 %v6400_v14, %v8696_v5  ;;  %v6439_v30 = vpop.f32.mrf.mxu0 }
 0x16b   : > { %v1922_v19 = vpop.f32.mrf.mxu1 }
 0x16c   : > { %v9004_v21 = vadd.f32 %v6436_v48, %v2049_v41  ;;  %v2047_v55 = vadd.f32 %v1922_v19, %v8714_v34  ;;  %v2673_v11 = vpop.f32.mrf.mxu0 }
 0x16d   : > { %v6403_v61 = vpop.f32.mrf.mxu1 }
 0x16e   : > { %v9007_v47 = vadd.f32 %v2660_v9, %v2047_v55  ;;  %v2052_v57 = vadd.f32 %v6403_v61, %v8729_v39  ;;  %v6440_v44 = vpop.f32.mrf.mxu0  ;;  %v9946_v61 = vld [vmem:[#allocation9_spill] sm:$0xff] }
 0x16f   : > { %v1935_v36 = vpop.f32.mrf.mxu1 }
 0x170   : > { %v9010_v16 = vadd.f32 %v6439_v30, %v2052_v57  ;;  %v2050_v29 = vadd.f32 %v1935_v36, %v8735_v18  ;;  %v2676_v7 = vpop.f32.mrf.mxu0  ;;  %v9945_v30 = vld [vmem:[#allocation6_spill] sm:$0xff] }
 0x171   : > { %v6404_v5 = vpop.f32.mrf.mxu1 }
 0x172   : > { %v9013_v40 = vadd.f32 %v2673_v11, %v2050_v29  ;;  %v2053_v8 = vadd.f32 %v6404_v5, %v8760_v49  ;;  %v6443_v59 = vpop.f32.mrf.mxu0  ;;  %v9947_v29 = vld [vmem:[#allocation2_spill] sm:$0xff] }
 0x173   : > { %v1938_v34 = vpop.f32.mrf.mxu1 }
 0x174   : > { %v9016_v56 = vadd.f32 %v6440_v44, %v2053_v8  ;;  %v2051_v0 = vadd.f32 %v1938_v34, %v8773_v42  ;;  %v2689_v50 = vpop.f32.mrf.mxu0 }
 0x175   : > { %v6407_v39 = vpop.f32.mrf.mxu1 }
 0x176   : > { %v9019_v22 = vadd.f32 %v2676_v7, %v2051_v0  ;;  %v2056_v28 = vadd.f32 %v6407_v39, %v8794_v20  ;;  %v6444_v63 = vpop.f32.mrf.mxu0 }
 0x177   : > { %v1951_v18 = vpop.f32.mrf.mxu1 }
 0x178   : > { %v9022_v43 = vadd.f32 %v6443_v59, %v2056_v28  ;;  %v2054_v13 = vadd.f32 %v1951_v18, %v8804_v31  ;;  %v2692_v37 = vpop.f32.mrf.mxu0 }
 0x179   : > { %v6408_v49 = vpop.f32.mrf.mxu1 }
 0x17a   : > { %v9025_v60 = vadd.f32 %v2689_v50, %v2054_v13  ;;  %v2057_v46 = vadd.f32 %v6408_v49, %v8823_v4  ;;  %v6447_v33 = vpop.f32.mrf.mxu0 }
 0x17b   : > { %v1954_v42 = vpop.f32.mrf.mxu1 }
 0x17c   : > { %v9028_v2 = vadd.f32 %v6444_v63, %v2057_v46  ;;  %v2055_v48 = vadd.f32 %v1954_v42, %v8841_v38  ;;  %v2705_v17 = vpop.f32.mrf.mxu0 }
 0x17d   : > { %v6411_v20 = vpop.f32.mrf.mxu1 }
 0x17e   : > { %v9031_v45 = vadd.f32 %v2692_v37, %v2055_v48  ;;  %v2060_v9 = vadd.f32 %v6411_v20, %v8849_v15  ;;  %v6448_v14 = vpop.f32.mrf.mxu0 }
 0x17f   : > { %v1967_v31 = vpop.f32.mrf.mxu1 }
 0x180   : > { %v9034_v41 = vadd.f32 %v6447_v33, %v2060_v9  ;;  %v2058_v19 = vadd.f32 %v1967_v31, %v9945_v30  ;;  %v2708_v55 = vpop.f32.mrf.mxu0 }
 0x181   : > { %v6412_v4 = vpop.f32.mrf.mxu1 }
 0x182   : > { %v9037_v11 = vadd.f32 %v2705_v17, %v2058_v19  ;;  %v2061_v57 = vadd.f32 %v6412_v4, %v9946_v61  ;;  %v6451_v44 = vpop.f32.mrf.mxu0 }
 0x183   : > { %v1970_v38 = vpop.f32.mrf.mxu1 }
 0x184   : > { %v9040_v36 = vadd.f32 %v6448_v14, %v2061_v57  ;;  %v2059_v7 = vadd.f32 %v1970_v38, %v9947_v29  ;;  %v2721_v5 = vpop.f32.mrf.mxu0 }
 0x185   : > { %v6415_v15 = vpop.f32.mrf.mxu1 }
 0x186   : > { %v9043_v8 = vadd.f32 %v2708_v55, %v2059_v7  ;;  %v2064_v59 = vadd.f32 %v6415_v15, %v8903_v23  ;;  %v6452_v34 = vpop.f32.mrf.mxu0 }
 0x187   : > { %v1983_v0 = vpop.f32.mrf.mxu1 }
 0x188   : > { %v9046_v50 = vadd.f32 %v6451_v44, %v2064_v59  ;;  %v2062_v39 = vadd.f32 %v1983_v0, %v8906_v24  ;;  %v2724_v28 = vpop.f32.mrf.mxu0 }
 0x189   : > { %v6416_v63 = vpop.f32.mrf.mxu1 }
 0x18a   : > { %v9049_v18 = vadd.f32 %v2721_v5, %v2062_v39  ;;  %v2065_v13 = vadd.f32 %v6416_v63, %v8925_v62  ;;  %v6455_v37 = vpop.f32.mrf.mxu0 }
 0x18b   : > { %v1986_v49 = vpop.f32.mrf.mxu1 }
 0x18c   : > { %v9052_v46 = vadd.f32 %v6452_v34, %v2065_v13  ;;  %v2063_v33 = vadd.f32 %v1986_v49, %v8941_v25  ;;  %v2737_v42 = vpop.f32.mrf.mxu0 }
 0x18d   : > { %v6419_v23 = vpop.f32.mrf.mxu1 }
 0x18e   : > { %v9055_v48 = vadd.f32 %v2724_v28, %v2063_v33  ;;  %v2068_v17 = vadd.f32 %v6419_v23, %v8947_v32  ;;  %v6456_v20 = vpop.f32.mrf.mxu0 }
 0x18f   : > { %v1999_v24 = vpop.f32.mrf.mxu1 }
 0x190   : > { %v9058_v9 = vadd.f32 %v6455_v37, %v2068_v17  ;;  %v2066_v14 = vadd.f32 %v1999_v24, %v8950_v35  ;;  %v2740_v31 = vpop.f32.mrf.mxu0 }
 0x191   : > { %v6420_v62 = vpop.f32.mrf.mxu1 }
 0x192   : > { %v9061_v30 = vadd.f32 %v2737_v42, %v2066_v14  ;;  %v2069_v19 = vadd.f32 %v6420_v62, %v8959_v52  ;;  %v6459_v55 = vpop.f32.mrf.mxu0 }
 0x193   : > { %v2002_v25 = vpop.f32.mrf.mxu1 }
 0x194   : > { %v9064_v4 = vadd.f32 %v6456_v20, %v2069_v19  ;;  %v2067_v61 = vadd.f32 %v2002_v25, %v8966_v26  ;;  %v2753_v57 = vpop.f32.mrf.mxu0 }
 0x195   : > { %v6423_v32 = vpop.f32.mrf.mxu1 }
 0x196   : > { %v9067_v44 = vadd.f32 %v2740_v31, %v2067_v61  ;;  %v2072_v38 = vadd.f32 %v6423_v32, %v8972_v10  ;;  %v6460_v29 = vpop.f32.mrf.mxu0 }
 0x197   : > { %v2015_v35 = vpop.f32.mrf.mxu1 }
 0x198   : > { %v9070_v7 = vadd.f32 %v6459_v55, %v2072_v38  ;;  %v2070_v5 = vadd.f32 %v2015_v35, %v8975_v1  ;;  %v2756_v15 = vpop.f32.mrf.mxu0 }
 0x199   : > { %v6424_v52 = vpop.f32.mrf.mxu1 }
 0x19a   : > { %v9073_v59 = vadd.f32 %v2753_v57, %v2070_v5  ;;  %v2073_v34 = vadd.f32 %v6424_v52, %v8979_v53  ;;  %v6463_v0 = vpop.f32.mrf.mxu0 }
 0x19b   : > { %v2018_v26 = vpop.f32.mrf.mxu1 }
 0x19c   : > { %v9076_v39 = vadd.f32 %v6460_v29, %v2073_v34  ;;  %v2071_v28 = vadd.f32 %v2018_v26, %v8983_v54  ;;  %v2769_v63 = vpop.f32.mrf.mxu0 }
 0x19d   : > { %v6427_v10 = vpop.f32.mrf.mxu1 }
 0x19e   : > { %v9079_v13 = vadd.f32 %v2756_v15, %v2071_v28  ;;  %v2076_v37 = vadd.f32 %v6427_v10, %v8986_v51  ;;  %v6464_v49 = vpop.f32.mrf.mxu0 }
 0x19f   : > { %v2031_v1 = vpop.f32.mrf.mxu1 }
 0x1a0   : > { %v9082_v33 = vadd.f32 %v6463_v0, %v2076_v37  ;;  %v2074_v42 = vadd.f32 %v2031_v1, %v8989_v27  ;;  %v2772_v23 = vpop.f32.mrf.mxu0 }
 0x1a1   : > { %v6428_v53 = vpop.f32.mrf.mxu1 }
 0x1a2   : > { %v9085_v17 = vadd.f32 %v2769_v63, %v2074_v42  ;;  %v2077_v20 = vadd.f32 %v6428_v53, %v8992_v58  ;;  %v6507_v24 = vpop.f32.mrf.mxu0 }
 0x1a3   : > { %v2034_v54 = vpop.f32.mrf.mxu1 }
 0x1a4   : > { %v9088_v14 = vadd.f32 %v6464_v49, %v2077_v20  ;;  %v2075_v31 = vadd.f32 %v2034_v54, %v8995_v3  ;;  %v3510_v62 = vpop.f32.mrf.mxu0 }
 0x1a5   : > { %v6471_v51 = vpop.f32.mrf.mxu1 }
 0x1a6   : > { %v9091_v19 = vadd.f32 %v2772_v23, %v2075_v31  ;;  %v3268_v55 = vadd.f32 %v6471_v51, %v8998_v12  ;;  %v6508_v25 = vpop.f32.mrf.mxu0 }
 0x1a7   : > { %v3139_v27 = vpop.f32.mrf.mxu1 }
 0x1a8   : > { %v9094_v61 = vadd.f32 %v6507_v24, %v3268_v55  ;;  %v3266_v57 = vadd.f32 %v3139_v27, %v9001_v6  ;;  %v9097_v32 = vpop.f32.mrf.mxu0 }
 0x1a9   : > { %v6472_v58 = vpop.f32.mrf.mxu1 }
 0x1aa   : > { %v9099_v38 = vadd.f32 %v3510_v62, %v3266_v57  ;;  %v3269_v29 = vadd.f32 %v6472_v58, %v9004_v21  ;;  %v6511_v3 = vpop.f32.mrf.mxu0 }
 0x1ab   : > { %v9102_v35 = vpop.f32.mrf.mxu1 }
 0x1ac   : > { %v9104_v5 = vadd.f32 %v6508_v25, %v3269_v29  ;;  %v9106_v15 = vpop.f32.mrf.mxu0 }
 0x1ad   : > { %v6475_v12 = vpop.f32.mrf.mxu1 }
 0x1ae   : > { %v3272_v52 = vadd.f32 %v6475_v12, %v9010_v16  ;;  %v6512_v34 = vpop.f32.mrf.mxu0 }
 0x1af   : > { %v9109_v0 = vpop.f32.mrf.mxu1 }
 0x1b0   : > { %v9111_v6 = vadd.f32 %v6511_v3, %v3272_v52  ;;  %v9113_v26 = vpop.f32.mrf.mxu0 }
 0x1b1   : > { %v6476_v28 = vpop.f32.mrf.mxu1 }
 0x1b2   : > { %v3273_v21 = vadd.f32 %v6476_v28, %v9016_v56  ;;  %v6515_v63 = vpop.f32.mrf.mxu0 }
 0x1b3   : > { %v9116_v10 = vpop.f32.mrf.mxu1 }
 0x1b4   : > { %v9118_v37 = vadd.f32 %v6512_v34, %v3273_v21  ;;  %v9120_v49 = vpop.f32.mrf.mxu0 }
 0x1b5   : > { %v6479_v1 = vpop.f32.mrf.mxu1 }
 0x1b6   : > { %v3276_v16 = vadd.f32 %v6479_v1, %v9022_v43  ;;  %v6516_v42 = vpop.f32.mrf.mxu0 }
 0x1b7   : > { %v9123_v23 = vpop.f32.mrf.mxu1 }
 0x1b8   : > { %v9125_v53 = vadd.f32 %v6515_v63, %v3276_v16  ;;  %v9127_v20 = vpop.f32.mrf.mxu0 }
 0x1b9   : > { %v6480_v24 = vpop.f32.mrf.mxu1 }
 0x1ba   : > { %9948 = vst [vmem:[#allocation16_spill] sm:$0xff] %v9125_v53  ;;  %v3277_v56 = vadd.f32 %v6480_v24, %v9028_v2  ;;  %v6519_v54 = vpop.f32.mrf.mxu0 }
 0x1bb   : > { %v9130_v31 = vpop.f32.mrf.mxu1 }
 0x1bc   : > { %v9132_v62 = vadd.f32 %v6516_v42, %v3277_v56  ;;  %v9134_v51 = vpop.f32.mrf.mxu0 }
 0x1bd   : > { %v6483_v55 = vpop.f32.mrf.mxu1 }
 0x1be   : > { %9949 = vst [vmem:[#allocation13_spill] sm:$0xff] %v9132_v62  ;;  %v3280_v43 = vadd.f32 %v6483_v55, %v9034_v41  ;;  %v6520_v25 = vpop.f32.mrf.mxu0 }
 0x1bf   : > { %v9137_v27 = vpop.f32.mrf.mxu1 }
 0x1c0   : > { %v9139_v57 = vadd.f32 %v6519_v54, %v3280_v43  ;;  %v9141_v58 = vpop.f32.mrf.mxu0 }
 0x1c1   : > { %v6484_v29 = vpop.f32.mrf.mxu1 }
 0x1c2   : > { %9950 = vst [vmem:[#allocation15_spill] sm:$0xff] %v9139_v57  ;;  %v3281_v2 = vadd.f32 %v6484_v29, %v9040_v36  ;;  %v6523_v3 = vpop.f32.mrf.mxu0 }
 0x1c3   : > { %v9144_v12 = vpop.f32.mrf.mxu1 }
 0x1c4   : > { %v9146_v52 = vadd.f32 %v6520_v25, %v3281_v2  ;;  %v9148_v34 = vpop.f32.mrf.mxu0 }
 0x1c5   : > { %v6487_v28 = vpop.f32.mrf.mxu1 }
 0x1c6   : > { %9951 = vst [vmem:[#allocation18_spill] sm:$0xff] %v9146_v52  ;;  %v3284_v41 = vadd.f32 %v6487_v28, %v9046_v50  ;;  %v6524_v21 = vpop.f32.mrf.mxu0 }
 0x1c7   : > { %v3203_v63 = vpop.f32.mrf.mxu1 }
 0x1c8   : > { %v9151_v1 = vadd.f32 %v6523_v3, %v3284_v41  ;;  %v9153_v16 = vpop.f32.mrf.mxu0 }
 0x1c9   : > { %v6488_v42 = vpop.f32.mrf.mxu1 }
 0x1ca   : > { %9952 = vst [vmem:[#allocation20_spill] sm:$0xff] %v9151_v1  ;;  %v3285_v24 = vadd.f32 %v6488_v42, %v9052_v46  ;;  %v6527_v36 = vpop.f32.mrf.mxu0 }
 0x1cb   : > { %v3206_v56 = vpop.f32.mrf.mxu1 }
 0x1cc   : > { %v9156_v54 = vadd.f32 %v6524_v21, %v3285_v24  ;;  %v9158_v55 = vpop.f32.mrf.mxu0 }
 0x1cd   : > { %v6491_v43 = vpop.f32.mrf.mxu1 }
 0x1ce   : > { %9953 = vst [vmem:[#allocation4_spill] sm:$0xff] %v9156_v54  ;;  %v3288_v25 = vadd.f32 %v6491_v43, %v9058_v9  ;;  %v6528_v29 = vpop.f32.mrf.mxu0 }
 0x1cf   : > { %v3219_v50 = vpop.f32.mrf.mxu1 }
 0x1d0   : > { %v9161_v2 = vadd.f32 %v6527_v36, %v3288_v25  ;;  %v9163_v3 = vpop.f32.mrf.mxu0 }
 0x1d1   : > { %v6492_v28 = vpop.f32.mrf.mxu1 }
 0x1d2   : > { %9954 = vst [vmem:[#allocation7_spill] sm:$0xff] %v9161_v2  ;;  %v3289_v41 = vadd.f32 %v6492_v28, %v9064_v4  ;;  %v6531_v1 = vpop.f32.mrf.mxu0 }
 0x1d3   : > { %v3222_v46 = vpop.f32.mrf.mxu1 }
 0x1d4   : > { %v9166_v42 = vadd.f32 %v6528_v29, %v3289_v41  ;;  %v9168_v21 = vpop.f32.mrf.mxu0 }
 0x1d5   : > { %v6495_v24 = vpop.f32.mrf.mxu1 }
 0x1d6   : > { %9955 = vst [vmem:[#allocation5_spill] sm:$0xff] %v9166_v42  ;;  %v3292_v54 = vadd.f32 %v6495_v24, %v9070_v7  ;;  %v6532_v52 = vpop.f32.mrf.mxu0 }
 0x1d7   : > { %v3235_v9 = vpop.f32.mrf.mxu1 }
 0x1d8   : > { %v9171_v43 = vadd.f32 %v6531_v1, %v3292_v54  ;;  %v9173_v36 = vpop.f32.mrf.mxu0 }
 0x1d9   : > { %v6496_v25 = vpop.f32.mrf.mxu1 }
 0x1da   : > { %9956 = vst [vmem:[#allocation10_spill] sm:$0xff] %v9171_v43  ;;  %v3293_v2 = vadd.f32 %v6496_v25, %v9076_v39  ;;  %v6535_v57 = vpop.f32.mrf.mxu0 }
 0x1db   : > { %v3238_v4 = vpop.f32.mrf.mxu1 }
 0x1dc   : > { %v9176_v28 = vadd.f32 %v6532_v52, %v3293_v2  ;;  %v9178_v29 = vpop.f32.mrf.mxu0  ;;  %v3267_v52 = vadd.f32 %v9102_v35, %v9007_v47 }
 0x1dd   : > { %v6499_v41 = vpop.f32.mrf.mxu1 }
 0x1de   : > { %v3296_v42 = vadd.f32 %v6499_v41, %v9082_v33  ;;  %v6536_v62 = vpop.f32.mrf.mxu0  ;;  %v3270_v33 = vadd.f32 %v9109_v0, %v9013_v40  ;;  %v3638_v35 = vadd.f32 %v9097_v32, %v3267_v52  ;;  %v3282_v0 = vadd.f32 %v3203_v63, %v9049_v18  ;;  %v9220_v18 = vld [vmem:[%s9784_s2] ss:$0 sm:$0xff] }
 0x1df   : > { %v3251_v7 = vpop.f32.mrf.mxu1 }
 0x1e0   : > { %v9181_v24 = vadd.f32 %v6535_v57, %v3296_v42  ;;  %v9183_v1 = vpop.f32.mrf.mxu0  ;;  %v3641_v40 = vadd.f32 %v9106_v15, %v3270_v33 }
 0x1e1   : > { %v6500_v54 = vpop.f32.mrf.mxu1 }
 0x1e2   : > { %9957 = vst [vmem:[#allocation11_spill] sm:$0xff] %v9181_v24  ;;  %v3297_v43 = vadd.f32 %v6500_v54, %v9088_v14  ;;  %v6579_v53 = vpop.f32.mrf.mxu0  ;;  %v3271_v24 = vadd.f32 %v9116_v10, %v9019_v22  ;;  %v3274_v14 = vadd.f32 %v9123_v23, %v9025_v60  ;;  %v3275_v54 = vadd.f32 %v9130_v31, %v9031_v45 }
 0x1e3   : > { %v3254_v39 = vpop.f32.mrf.mxu1  ;;  %v3279_v22 = vadd.f32 %v9144_v12, %v9043_v8  ;;  %v3283_v10 = vadd.f32 %v3206_v56, %v9055_v48  ;;  %v3286_v8 = vadd.f32 %v3219_v50, %v9061_v30 }
 0x1e4   : > { %v9188_v2 = vadd.f32 %v6536_v62, %v3297_v43  ;;  %v4730_v25 = vpop.f32.mrf.mxu0  ;;  %v9211_v15 = vadd.f32 %v9120_v49, %v3274_v14 }
 0x1e5   : > { %v6543_v41 = vpop.f32.mrf.mxu1  ;;  %v9233_v50 = vadd.f32 %v9141_v58, %v3279_v22 }
 0x1e6   : > { %v4377_v57 = vadd.f32 %v6543_v41, %v9094_v61  ;;  %v6580_v42 = vpop.f32.mrf.mxu0  ;;  %v3278_v61 = vadd.f32 %v9137_v27, %v9037_v11  ;;  %v9214_v11 = vadd.f32 %v9127_v20, %v3275_v54  ;;  %v3294_v20 = vadd.f32 %v3251_v7, %v9085_v17 }
 0x1e7   : > { %v4248_v47 = vpop.f32.mrf.mxu1  ;;  %v9245_v17 = vadd.f32 %v9158_v55, %v3286_v8  ;;  %v9269_v41 = vadd.f32 %v3254_v39, %v9091_v19 }
 0x1e8   : > { %v4375_v62 = vadd.f32 %v4248_v47, %v9099_v38  ;;  %v4733_v43 = vpop.f32.mrf.mxu0  ;;  %v4859_v45 = vadd.f32 %v6579_v53, %v4377_v57  ;;  %v3642_v38 = vadd.f32 %v9113_v26, %v3271_v24  ;;  %v3287_v53 = vadd.f32 %v3222_v46, %v9067_v44 }
 0x1e9   : > { %v6544_v60 = vpop.f32.mrf.mxu1  ;;  %v3291_v26 = vadd.f32 %v3238_v4, %v9079_v13  ;;  %v9226_v12 = vadd.f32 %v9134_v51, %v3278_v61  ;;  %v9236_v44 = vadd.f32 %v9148_v34, %v3282_v0  ;;  %v9261_v55 = vadd.f32 %v9178_v29, %v3294_v20 }
 0x1ea   : > { %v4857_v23 = vadd.f32 %v4730_v25, %v4375_v62  ;;  %v4378_v32 = vadd.f32 %v6544_v60, %v9104_v5  ;;  %v6583_v31 = vpop.f32.mrf.mxu0  ;;  %v3290_v5 = vadd.f32 %v3235_v9, %v9073_v59  ;;  %v9239_v59 = vadd.f32 %v9153_v16, %v3283_v10 }
 0x1eb   : > { %v4251_v48 = vpop.f32.mrf.mxu1  ;;  %v9242_v13 = vadd.f32 %v9220_v18, %v4859_v45  ;;  %v9252_v34 = vadd.f32 %v9163_v3, %v3287_v53  ;;  %v9258_v7 = vadd.f32 %v9173_v36, %v3291_v26  ;;  %v9958_v53 = vld [vmem:[#allocation16_spill] sm:$0xff] }
 0x1ec   : > { %v4860_v27 = vadd.f32 %v6580_v42, %v4378_v32  ;;  %v4746_v49 = vpop.f32.mrf.mxu0  ;;  %v9230_v30 = vadd.f32 %v9220_v18, %v4857_v23  ;;  %v4376_v63 = vadd.f32 %v4251_v48, %v3638_v35  ;;  %v9255_v16 = vadd.f32 %v9168_v21, %v3290_v5 }
 0x1ed   : > { %v6547_v56 = vpop.f32.mrf.mxu1  ;;  %v5001_v21 = vmul.f32 %v9242_v13, %v9242_v13 }
 0x1ee   : > { %v6584_v51 = vpop.f32.mrf.mxu0  ;;  %v9248_v46 = vadd.f32 %v9220_v18, %v4860_v27  ;;  %v4858_v9 = vadd.f32 %v4733_v43, %v4376_v63  ;;  %v4381_v58 = vadd.f32 %v6547_v56, %v9111_v6  ;;  %v4999_v25 = vmul.f32 %v9230_v30, %v9230_v30 }
 0x1ef   : > { %v4264_v4 = vpop.f32.mrf.mxu1  ;;  %v4928_v29 = vsel %vm727_vm2, %v9230_v30, 0.0  ;;  %v5034_v10 = vsel %vm727_vm2, %v5001_v21, 0.0 }
 0x1f0   : > { %v4379_v24 = vadd.f32 %v4264_v4, %v3641_v40  ;;  %v4749_v52 = vpop.f32.mrf.mxu0  ;;  %v9266_v6 = vadd.f32 %v9220_v18, %v4858_v9  ;;  %v4863_v33 = vadd.f32 %v6583_v31, %v4381_v58  ;;  %v5002_v14 = vmul.f32 %v9248_v46, %v9248_v46 }
 0x1f1   : > { %v6548_v3 = vpop.f32.mrf.mxu1  ;;  %v4931_v40 = vsel %vm727_vm2, %v9242_v13, 0.0  ;;  %v5031_v61 = vsel %vm727_vm2, %v4999_v25, 0.0  ;;  %v4933_v45 = vsel %vm727_vm2, %v9248_v46, 0.0 }
 0x1f2   : > { %v4861_v36 = vadd.f32 %v4746_v49, %v4379_v24  ;;  %v4382_v57 = vadd.f32 %v6548_v3, %v9118_v37  ;;  %v6587_v42 = vpop.f32.mrf.mxu0  ;;  %v4929_v54 = vsel %vm727_vm2, %v9266_v6, 0.0  ;;  %v5000_v19 = vmul.f32 %v9266_v6, %v9266_v6  ;;  %v9959_v3 = vld [vmem:[#allocation13_spill] sm:$0xff] }
 0x1f3   : > { %v4267_v39 = vpop.f32.mrf.mxu1  ;;  %v4930_v47 = vadd.f32 %v4929_v54, %v4928_v29  ;;  %v9290_v0 = vadd.f32 %v9220_v18, %v4863_v33  ;;  %v5036_v27 = vsel %vm727_vm2, %v5002_v14, 0.0 }
 0x1f4   : > { %v9283_v35 = vadd.f32 %v9220_v18, %v4861_v36  ;;  %v4864_v62 = vadd.f32 %v6584_v51, %v4382_v57  ;;  %v4380_v37 = vadd.f32 %v4267_v39, %v3642_v38  ;;  %v4762_v43 = vpop.f32.mrf.mxu0  ;;  %v5032_v22 = vsel %vm727_vm2, %v5000_v19, 0.0 }
 0x1f5   : > { %v6551_v60 = vpop.f32.mrf.mxu1  ;;  %v4932_v23 = vadd.f32 %v4931_v40, %v4930_v47  ;;  %v5033_v32 = vadd.f32 %v5032_v22, %v5031_v61  ;;  %v5005_v51 = vmul.f32 %v9290_v0, %v9290_v0 }
 0x1f6   : > { %v6588_v31 = vpop.f32.mrf.mxu0  ;;  %v5003_v38 = vmul.f32 %v9283_v35, %v9283_v35  ;;  %v9298_v8 = vadd.f32 %v9220_v18, %v4864_v62  ;;  %v4862_v48 = vadd.f32 %v4749_v52, %v4380_v37  ;;  %v4385_v5 = vadd.f32 %v6551_v60, %v9958_v53  ;;  %v9960_v53 = vld [vmem:[#allocation15_spill] sm:$0xff] }
 0x1f7   : > { %v4280_v26 = vpop.f32.mrf.mxu1  ;;  %v5035_v49 = vadd.f32 %v5034_v10, %v5033_v32  ;;  %v4934_v20 = vadd.f32 %v4933_v45, %v4932_v23  ;;  %v4935_v9 = vsel %vm727_vm2, %v9283_v35, 0.0  ;;  %v4939_v37 = vsel %vm727_vm2, %v9290_v0, 0.0 }
 0x1f8   : > { %v4383_v63 = vadd.f32 %v4280_v26, %v9211_v15  ;;  %v4765_v56 = vpop.f32.mrf.mxu0  ;;  %v9308_v58 = vadd.f32 %v9220_v18, %v4862_v48  ;;  %v4867_v4 = vadd.f32 %v6587_v42, %v4385_v5  ;;  %v5038_v15 = vsel %vm727_vm2, %v5003_v38, 0.0 }
 0x1f9   : > { %v6552_v24 = vpop.f32.mrf.mxu1  ;;  %v4936_v52 = vadd.f32 %v4935_v9, %v4934_v20  ;;  %v5037_v25 = vadd.f32 %v5036_v27, %v5035_v49  ;;  %v5006_v57 = vmul.f32 %v9298_v8, %v9298_v8  ;;  %v5042_v60 = vsel %vm727_vm2, %v5005_v51, 0.0 }
 0x1fa   : > { %v4865_v33 = vadd.f32 %v4762_v43, %v4383_v63  ;;  %v4386_v21 = vadd.f32 %v6552_v24, %v9959_v3  ;;  %v6591_v36 = vpop.f32.mrf.mxu0  ;;  %v4937_v29 = vsel %vm727_vm2, %v9308_v58, 0.0  ;;  %v5004_v14 = vmul.f32 %v9308_v58, %v9308_v58  ;;  %v9961_v3 = vld [vmem:[#allocation18_spill] sm:$0xff] }
 0x1fb   : > { %v4283_v54 = vpop.f32.mrf.mxu1  ;;  %v5039_v42 = vadd.f32 %v5038_v15, %v5037_v25  ;;  %v4938_v19 = vadd.f32 %v4937_v29, %v4936_v52  ;;  %v9325_v40 = vadd.f32 %v9220_v18, %v4867_v4  ;;  %v4941_v10 = vsel %vm727_vm2, %v9298_v8, 0.0 }
 0x1fc   : > { %v9319_v39 = vadd.f32 %v9220_v18, %v4865_v33  ;;  %v4868_v47 = vadd.f32 %v6588_v31, %v4386_v21  ;;  %v4778_v62 = vpop.f32.mrf.mxu0  ;;  %v5040_v43 = vsel %vm727_vm2, %v5004_v14, 0.0  ;;  %v4384_v61 = vadd.f32 %v4283_v54, %v9214_v11 }
 0x1fd   : > { %v6555_v22 = vpop.f32.mrf.mxu1  ;;  %v4940_v45 = vadd.f32 %v4939_v37, %v4938_v19  ;;  %v5041_v23 = vadd.f32 %v5040_v43, %v5039_v42  ;;  %v5044_v11 = vsel %vm727_vm2, %v5006_v57, 0.0  ;;  %v5009_v51 = vmul.f32 %v9325_v40, %v9325_v40 }
 0x1fe   : > { %v6592_v32 = vpop.f32.mrf.mxu0  ;;  %v5007_v31 = vmul.f32 %v9319_v39, %v9319_v39  ;;  %v9334_v38 = vadd.f32 %v9220_v18, %v4868_v47  ;;  %v4866_v48 = vadd.f32 %v4765_v56, %v4384_v61  ;;  %v4389_v5 = vadd.f32 %v6555_v22, %v9960_v53 }
 0x1ff   : > { %v4296_v26 = vpop.f32.mrf.mxu1  ;;  %v5043_v27 = vadd.f32 %v5042_v60, %v5041_v23  ;;  %v4942_v49 = vadd.f32 %v4941_v10, %v4940_v45  ;;  %v4943_v9 = vsel %vm727_vm2, %v9319_v39, 0.0  ;;  %v4947_v37 = vsel %vm727_vm2, %v9325_v40, 0.0 }
 0x200   : > { %v4387_v20 = vadd.f32 %v4296_v26, %v9226_v12  ;;  %v4781_v63 = vpop.f32.mrf.mxu0  ;;  %v9344_v4 = vadd.f32 %v9220_v18, %v4866_v48  ;;  %v4871_v56 = vadd.f32 %v6591_v36, %v4389_v5  ;;  %v5046_v12 = vsel %vm727_vm2, %v5007_v31, 0.0  ;;  %v9962_v26 = vld [vmem:[#allocation20_spill] sm:$0xff] }
 0x201   : > { %v6556_v24 = vpop.f32.mrf.mxu1  ;;  %v4944_v52 = vadd.f32 %v4943_v9, %v4942_v49  ;;  %v5045_v25 = vadd.f32 %v5044_v11, %v5043_v27  ;;  %v5010_v57 = vmul.f32 %v9334_v38, %v9334_v38  ;;  %v5050_v10 = vsel %vm727_vm2, %v5009_v51, 0.0 }
 0x202   : > { %v4869_v33 = vadd.f32 %v4778_v62, %v4387_v20  ;;  %v4390_v21 = vadd.f32 %v6556_v24, %v9961_v3  ;;  %v4945_v29 = vsel %vm727_vm2, %v9344_v4, 0.0  ;;  %v5008_v14 = vmul.f32 %v9344_v4, %v9344_v4 }
 0x203   : > { %v6595_v15 = vpop.f32.mrf.mxu0  ;;  %v4299_v54 = vpop.f32.mrf.mxu1  ;;  %v5047_v36 = vadd.f32 %v5046_v12, %v5045_v25  ;;  %v4946_v42 = vadd.f32 %v4945_v29, %v4944_v52  ;;  %v9361_v61 = vadd.f32 %v9220_v18, %v4871_v56  ;;  %v4949_v45 = vsel %vm727_vm2, %v9334_v38, 0.0  ;;  %v9963_v12 = vld [vmem:[#allocation4_spill] sm:$0xff] }
 0x204   : > { %v9355_v19 = vadd.f32 %v9220_v18, %v4869_v33  ;;  %v4872_v47 = vadd.f32 %v6592_v32, %v4390_v21  ;;  %v5048_v43 = vsel %vm727_vm2, %v5008_v14, 0.0  ;;  %v4388_v22 = vadd.f32 %v4299_v54, %v9233_v50 }
 0x205   : > { %v4794_v62 = vpop.f32.mrf.mxu0  ;;  %v6559_v60 = vpop.f32.mrf.mxu1  ;;  %v4948_v23 = vadd.f32 %v4947_v37, %v4946_v42  ;;  %v5049_v31 = vadd.f32 %v5048_v43, %v5047_v36  ;;  %v5052_v50 = vsel %vm727_vm2, %v5010_v57, 0.0  ;;  %v5013_v56 = vmul.f32 %v9361_v61, %v9361_v61 }
 0x206   : > { %v5011_v48 = vmul.f32 %v9355_v19, %v9355_v19  ;;  %v9370_v53 = vadd.f32 %v9220_v18, %v4872_v47  ;;  %v4870_v5 = vadd.f32 %v4781_v63, %v4388_v22  ;;  %v4393_v11 = vadd.f32 %v6559_v60, %v9962_v26 }
 0x207   : > { %v6596_v32 = vpop.f32.mrf.mxu0  ;;  %v4312_v27 = vpop.f32.mrf.mxu1  ;;  %v5051_v49 = vadd.f32 %v5050_v10, %v5049_v31  ;;  %v4950_v20 = vadd.f32 %v4949_v45, %v4948_v23  ;;  %v4951_v24 = vsel %vm727_vm2, %v9355_v19, 0.0  ;;  %v4955_v22 = vsel %vm727_vm2, %v9361_v61, 0.0 }
 0x208   : > { %v4391_v51 = vadd.f32 %v4312_v27, %v9236_v44  ;;  %v9380_v52 = vadd.f32 %v9220_v18, %v4870_v5  ;;  %v4875_v63 = vadd.f32 %v6595_v15, %v4393_v11  ;;  %v5054_v44 = vsel %vm727_vm2, %v5011_v48, 0.0 }
 0x209   : > { %v4797_v9 = vpop.f32.mrf.mxu0  ;;  %v6560_v25 = vpop.f32.mrf.mxu1  ;;  %v4952_v33 = vadd.f32 %v4951_v24, %v4950_v20  ;;  %v5053_v3 = vadd.f32 %v5052_v50, %v5051_v49  ;;  %v5014_v14 = vmul.f32 %v9370_v53, %v9370_v53  ;;  %v5058_v31 = vsel %vm727_vm2, %v5013_v56, 0.0  ;;  %v9964_v49 = vld [vmem:[#allocation7_spill] sm:$0xff] }
 0x20a   : > { %v4873_v21 = vadd.f32 %v4794_v62, %v4391_v51  ;;  %v4394_v57 = vadd.f32 %v6560_v25, %v9963_v12  ;;  %v4953_v54 = vsel %vm727_vm2, %v9380_v52, 0.0  ;;  %v5012_v36 = vmul.f32 %v9380_v52, %v9380_v52 }
 0x20b   : > { %v6599_v29 = vpop.f32.mrf.mxu0  ;;  %v4315_v42 = vpop.f32.mrf.mxu1  ;;  %v5055_v15 = vadd.f32 %v5054_v44, %v5053_v3  ;;  %v4954_v47 = vadd.f32 %v4953_v54, %v4952_v33  ;;  %v9397_v10 = vadd.f32 %v9220_v18, %v4875_v63  ;;  %v4957_v48 = vsel %vm727_vm2, %v9370_v53, 0.0 }
 0x20c   : > { %v9391_v37 = vadd.f32 %v9220_v18, %v4873_v21  ;;  %v4876_v62 = vadd.f32 %v6596_v32, %v4394_v57  ;;  %v5056_v60 = vsel %vm727_vm2, %v5012_v36, 0.0  ;;  %v4392_v45 = vadd.f32 %v4315_v42, %v9239_v59 }
 0x20d   : > { %v4810_v43 = vpop.f32.mrf.mxu0  ;;  %v6563_v23 = vpop.f32.mrf.mxu1  ;;  %v4956_v5 = vadd.f32 %v4955_v22, %v4954_v47  ;;  %v5057_v26 = vadd.f32 %v5056_v60, %v5055_v15  ;;  %v5060_v59 = vsel %vm727_vm2, %v5014_v14, 0.0  ;;  %v5017_v33 = vmul.f32 %v9397_v10, %v9397_v10  ;;  %v9965_v14 = vld [vmem:[#allocation5_spill] sm:$0xff] }
 0x20e   : > { %v5015_v11 = vmul.f32 %v9391_v37, %v9391_v37  ;;  %v9406_v27 = vadd.f32 %v9220_v18, %v4876_v62  ;;  %v4874_v50 = vadd.f32 %v4797_v9, %v4392_v45  ;;  %v4397_v20 = vadd.f32 %v6563_v23, %v9964_v49 }
 0x20f   : > { %v6600_v32 = vpop.f32.mrf.mxu0  ;;  %v4328_v51 = vpop.f32.mrf.mxu1  ;;  %v5059_v24 = vadd.f32 %v5058_v31, %v5057_v26  ;;  %v4958_v56 = vadd.f32 %v4957_v48, %v4956_v5  ;;  %v4959_v3 = vsel %vm727_vm2, %v9391_v37, 0.0  ;;  %v4963_v31 = vsel %vm727_vm2, %v9397_v10, 0.0 }
 0x210   : > { %v4395_v63 = vadd.f32 %v4328_v51, %v9245_v17  ;;  %v9416_v21 = vadd.f32 %v9220_v18, %v4874_v50  ;;  %v4879_v9 = vadd.f32 %v6599_v29, %v4397_v20  ;;  %v5062_v17 = vsel %vm727_vm2, %v5015_v11, 0.0 }
 0x211   : > { %v4813_v25 = vpop.f32.mrf.mxu0  ;;  %v6564_v12 = vpop.f32.mrf.mxu1  ;;  %v4960_v57 = vadd.f32 %v4959_v3, %v4958_v56  ;;  %v5061_v44 = vadd.f32 %v5060_v59, %v5059_v24  ;;  %v5018_v15 = vmul.f32 %v9406_v27, %v9406_v27  ;;  %v5066_v50 = vsel %vm727_vm2, %v5017_v33, 0.0 }
 0x212   : > { %v4877_v54 = vadd.f32 %v4810_v43, %v4395_v63  ;;  %v4398_v36 = vadd.f32 %v6564_v12, %v9965_v14  ;;  %v4961_v47 = vsel %vm727_vm2, %v9416_v21, 0.0  ;;  %v5016_v62 = vmul.f32 %v9416_v21, %v9416_v21  ;;  %v9966_v63 = vld [vmem:[#allocation10_spill] sm:$0xff] }
 0x213   : > { %v6603_v42 = vpop.f32.mrf.mxu0  ;;  %v4331_v22 = vpop.f32.mrf.mxu1  ;;  %v5063_v29 = vadd.f32 %v5062_v17, %v5061_v44  ;;  %v4962_v60 = vadd.f32 %v4961_v47, %v4960_v57  ;;  %v9433_v5 = vadd.f32 %v9220_v18, %v4879_v9  ;;  %v4965_v49 = vsel %vm727_vm2, %v9406_v27, 0.0 }
 0x214   : > { %v9427_v45 = vadd.f32 %v9220_v18, %v4877_v54  ;;  %v4880_v43 = vadd.f32 %v6600_v32, %v4398_v36  ;;  %v5064_v48 = vsel %vm727_vm2, %v5016_v62, 0.0  ;;  %v4396_v26 = vadd.f32 %v4331_v22, %v9252_v34 }
 0x215   : > { %v4826_v23 = vpop.f32.mrf.mxu0  ;;  %v6567_v11 = vpop.f32.mrf.mxu1  ;;  %v4964_v20 = vadd.f32 %v4963_v31, %v4962_v60  ;;  %v5065_v51 = vadd.f32 %v5064_v48, %v5063_v29  ;;  %v5068_v59 = vsel %vm727_vm2, %v5018_v15, 0.0  ;;  %v5021_v54 = vmul.f32 %v9433_v5, %v9433_v5 }
 0x216   : > { %v5019_v24 = vmul.f32 %v9427_v45, %v9427_v45  ;;  %v4878_v56 = vadd.f32 %v4813_v25, %v4396_v26  ;;  %v4401_v3 = vadd.f32 %v6567_v11, %v9966_v63  ;;  %v9444_v57 = vadd.f32 %v9220_v18, %v4880_v43 }
 0x217   : > { %v6604_v32 = vpop.f32.mrf.mxu0  ;;  %v4344_v9 = vpop.f32.mrf.mxu1  ;;  %v5067_v12 = vadd.f32 %v5066_v50, %v5065_v51  ;;  %v4966_v34 = vadd.f32 %v4965_v49, %v4964_v20  ;;  %v4967_v14 = vsel %vm727_vm2, %v9427_v45, 0.0 }
 0x218   : > { %v4399_v33 = vadd.f32 %v4344_v9, %v9255_v16  ;;  %v9452_v36 = vadd.f32 %v9220_v18, %v4878_v56  ;;  %v4883_v25 = vadd.f32 %v6603_v42, %v4401_v3  ;;  %v4971_v16 = vsel %vm727_vm2, %v9433_v5, 0.0 }
 0x219   : > { %v4829_v44 = vpop.f32.mrf.mxu0  ;;  %v6568_v17 = vpop.f32.mrf.mxu1  ;;  %v4968_v15 = vadd.f32 %v4967_v14, %v4966_v34  ;;  %v5069_v47 = vadd.f32 %v5068_v59, %v5067_v12  ;;  %v5070_v60 = vsel %vm727_vm2, %v5019_v24, 0.0  ;;  %v5022_v26 = vmul.f32 %v9444_v57, %v9444_v57 }
 0x21a   : > { %v4881_v62 = vadd.f32 %v4826_v23, %v4399_v33  ;;  %v4402_v22 = vadd.f32 %v6568_v17, %v9176_v28  ;;  %v4969_v43 = vsel %vm727_vm2, %v9452_v36, 0.0  ;;  %v5020_v31 = vmul.f32 %v9452_v36, %v9452_v36  ;;  %v9967_v33 = vld [vmem:[#allocation11_spill] sm:$0xff] }
 0x21b   : > { %v6607_v29 = vpop.f32.mrf.mxu0  ;;  %v4347_v48 = vpop.f32.mrf.mxu1  ;;  %v5071_v42 = vadd.f32 %v5070_v60, %v5069_v47  ;;  %v4970_v23 = vadd.f32 %v4969_v43, %v4968_v15  ;;  %v9469_v50 = vadd.f32 %v9220_v18, %v4883_v25  ;;  %v3666_v59 = vadd.f32 %v9183_v1, %v9269_v41 }
 0x21c   : > { %v9465_v28 = vadd.f32 %v9220_v18, %v4881_v62  ;;  %v5072_v11 = vsel %vm727_vm2, %v5020_v31, 0.0  ;;  %v4884_v49 = vadd.f32 %v6604_v32, %v4402_v22  ;;  %v4400_v20 = vadd.f32 %v4347_v48, %v9258_v7 }
 0x21d   : > { %v6571_v51 = vpop.f32.mrf.mxu1  ;;  %v5074_v24 = vsel %vm727_vm2, %v5021_v54, 0.0  ;;  %v4972_v56 = vadd.f32 %v4971_v16, %v4970_v23  ;;  %v5073_v63 = vadd.f32 %v5072_v11, %v5071_v42  ;;  %v4842_v3 = vpop.f32.mrf.mxu0  ;;  %v4973_v9 = vsel %vm727_vm2, %v9444_v57, 0.0 }
 0x21e   : > { %v5023_v12 = vmul.f32 %v9465_v28, %v9465_v28  ;;  %v4882_v34 = vadd.f32 %v4829_v44, %v4400_v20  ;;  %v4405_v32 = vadd.f32 %v6571_v51, %v9967_v33  ;;  %v5076_v7 = vsel %vm727_vm2, %v5022_v26, 0.0 }
 0x21f   : > { %v4360_v14 = vpop.f32.mrf.mxu1  ;;  %v5075_v25 = vadd.f32 %v5074_v24, %v5073_v63  ;;  %v4974_v17 = vadd.f32 %v4973_v9, %v4972_v56  ;;  %v5025_v41 = vmul.f32 %v9469_v50, %v9469_v50  ;;  %v4975_v54 = vsel %vm727_vm2, %v9465_v28, 0.0  ;;  %v6608_v43 = vpop.f32.mrf.mxu0 }
 0x220   : > { %v4403_v1 = vadd.f32 %v4360_v14, %v9261_v55  ;;  %v9487_v15 = vadd.f32 %v9220_v18, %v4884_v49  ;;  %v9490_v44 = vadd.f32 %v9220_v18, %v4882_v34  ;;  %v5078_v55 = vsel %vm727_vm2, %v5023_v12, 0.0 }
 0x221   : > { %v6572_v47 = vpop.f32.mrf.mxu1  ;;  %v4976_v62 = vadd.f32 %v4975_v54, %v4974_v17  ;;  %v5077_v22 = vadd.f32 %v5076_v7, %v5075_v25  ;;  %v4887_v42 = vadd.f32 %v6607_v29, %v4405_v32  ;;  %v4979_v23 = vsel %vm727_vm2, %v9469_v50, 0.0  ;;  %v4845_v9 = vpop.f32.mrf.mxu0 }
 0x222   : > { %v4885_v16 = vadd.f32 %v4842_v3, %v4403_v1  ;;  %v4406_v60 = vadd.f32 %v6572_v47, %v9188_v2  ;;  %v4977_v31 = vsel %vm727_vm2, %v9490_v44, 0.0  ;;  %v5024_v48 = vmul.f32 %v9490_v44, %v9490_v44 }
 0x223   : > { %v4363_v26 = vpop.f32.mrf.mxu1  ;;  %v5079_v11 = vadd.f32 %v5078_v55, %v5077_v22  ;;  %v4978_v49 = vadd.f32 %v4977_v31, %v4976_v62  ;;  %v5026_v2 = vmul.f32 %v9487_v15, %v9487_v15  ;;  %v5082_v63 = vsel %vm727_vm2, %v5025_v41, 0.0 }
 0x224   : > { %v9501_v20 = vadd.f32 %v9220_v18, %v4885_v16  ;;  %v5080_v51 = vsel %vm727_vm2, %v5024_v48, 0.0  ;;  %v4888_v24 = vadd.f32 %v6608_v43, %v4406_v60  ;;  %v4404_v56 = vadd.f32 %v4363_v26, %v3666_v59 }
 0x225   : > { %v4980_v3 = vadd.f32 %v4979_v23, %v4978_v49  ;;  %v5081_v29 = vadd.f32 %v5080_v51, %v5079_v11  ;;  %v4981_v12 = vsel %vm727_vm2, %v9487_v15, 0.0  ;;  %v9510_v34 = vadd.f32 %v9220_v18, %v4887_v42 }
 0x226   : > { %v5027_v33 = vmul.f32 %v9501_v20, %v9501_v20  ;;  %v4886_v32 = vadd.f32 %v4845_v9, %v4404_v56  ;;  %v5084_v25 = vsel %vm727_vm2, %v5026_v2, 0.0  ;;  %v4983_v59 = vsel %vm727_vm2, %v9501_v20, 0.0 }
 0x227   : > { %v5083_v14 = vadd.f32 %v5082_v63, %v5081_v29  ;;  %v4982_v7 = vadd.f32 %v4981_v12, %v4980_v3  ;;  %v9518_v17 = vadd.f32 %v9220_v18, %v4888_v24  ;;  %v5029_v47 = vmul.f32 %v9510_v34, %v9510_v34 }
 0x228   : > { %v9521_v1 = vadd.f32 %v9220_v18, %v4886_v32  ;;  %v5086_v62 = vsel %vm727_vm2, %v5027_v33, 0.0  ;;  %v4987_v55 = vsel %vm727_vm2, %v9510_v34, 0.0 }
 0x229   : > { %v4984_v41 = vadd.f32 %v4983_v59, %v4982_v7  ;;  %v5085_v54 = vadd.f32 %v5084_v25, %v5083_v14  ;;  %v5030_v18 = vmul.f32 %v9518_v17, %v9518_v17  ;;  %v5090_v26 = vsel %vm727_vm2, %v5029_v47, 0.0 }
 0x22a   : > { %v4985_v22 = vsel %vm727_vm2, %v9521_v1, 0.0  ;;  %v5028_v16 = vmul.f32 %v9521_v1, %v9521_v1  ;;  %v4989_v23 = vsel %vm727_vm2, %v9518_v17, 0.0 }
 0x22b   : > { %v5087_v60 = vadd.f32 %v5086_v62, %v5085_v54  ;;  %v4986_v43 = vadd.f32 %v4985_v22, %v4984_v41  ;;  %v5092_v2 = vsel %vm727_vm2, %v5030_v18, 0.0 }
 0x22c   : > { %v5088_v31 = vsel %vm727_vm2, %v5028_v16, 0.0 }
 0x22d   : > { %v4988_v48 = vadd.f32 %v4987_v55, %v4986_v43  ;;  %v5089_v42 = vadd.f32 %v5088_v31, %v5087_v60 }
 0x22f   : > { %v4990_v11 = vadd.f32 %v4989_v23, %v4988_v48  ;;  %v5091_v49 = vadd.f32 %v5090_v26, %v5089_v42 }
 0x231   : > { %v4991_v51 = vrot.slane %v4990_v11, 4  ;;  %v5093_v24 = vadd.f32 %v5092_v2, %v5091_v49 }
 0x233   : > { %v4992_v56 = vadd.f32 %v4991_v51, %v4990_v11  ;;  %v5094_v63 = vrot.slane %v5093_v24, 4 }
 0x235   : > { %v4993_v3 = vrot.slane %v4992_v56, 2  ;;  %v5095_v29 = vadd.f32 %v5094_v63, %v5093_v24 }
 0x237   : > { %v4994_v9 = vadd.f32 %v4993_v3, %v4992_v56  ;;  %v5096_v12 = vrot.slane %v5095_v29, 2 }
 0x239   : > { %v4995_v33 = vrot.slane %v4994_v9, 1  ;;  %v5097_v32 = vadd.f32 %v5096_v12, %v5095_v29 }
 0x23b   : > { %v4996_v14 = vadd.f32 %v4995_v33, %v4994_v9  ;;  %v5098_v7 = vrot.slane %v5097_v32, 1 }
 0x23d   : > { %v9539_v25 = vmul.f32 0.00390625, %v4996_v14  ;;  %v5099_v59 = vadd.f32 %v5098_v7, %v5097_v32 }
 0x23f   : > { %v5100_v41 = vmul.f32 0.00390625, %v5099_v59  ;;  %v5101_v54 = vmul.f32 %v9539_v25, %v9539_v25  ;;  %v5112_v62 = vsub.f32 %v9344_v4, %v9539_v25  ;;  %v5115_v22 = vsub.f32 %v9355_v19, %v9539_v25 }
 0x240   : > { %v5116_v16 = vsub.f32 %v9380_v52, %v9539_v25  ;;  %v5117_v60 = vsub.f32 %v9361_v61, %v9539_v25  ;;  %v5118_v43 = vsub.f32 %v9370_v53, %v9539_v25  ;;  %v5119_v55 = vsub.f32 %v9391_v37, %v9539_v25 }
 0x241   : > { %v5102_v47 = vsub.f32 %v5100_v41, %v5101_v54  ;;  %v5120_v18 = vsub.f32 %v9416_v21, %v9539_v25  ;;  %v5121_v4 = vsub.f32 %v9397_v10, %v9539_v25  ;;  %v5122_v19 = vsub.f32 %v9406_v27, %v9539_v25 }
 0x242   : > { %v5123_v52 = vsub.f32 %v9427_v45, %v9539_v25  ;;  %v5124_v61 = vsub.f32 %v9452_v36, %v9539_v25  ;;  %v5125_v53 = vsub.f32 %v9433_v5, %v9539_v25  ;;  %v5126_v37 = vsub.f32 %v9444_v57, %v9539_v25 }
 0x243   : > { %v5127_v21 = vsub.f32 %v9465_v28, %v9539_v25  ;;  %v5128_v10 = vsub.f32 %v9490_v44, %v9539_v25  ;;  %v5129_v27 = vsub.f32 %v9469_v50, %v9539_v25  ;;  %v5130_v45 = vsub.f32 %v9487_v15, %v9539_v25 }
 0x244   : > { %v5131_v36 = vsub.f32 %v9501_v20, %v9539_v25  ;;  %v5132_v5 = vsub.f32 %v9521_v1, %v9539_v25  ;;  %v5133_v57 = vsub.f32 %v9510_v34, %v9539_v25  ;;  %v5134_v28 = vsub.f32 %v9518_v17, %v9539_v25 }
 0x245   : > { %v5135_v31 = vadd.f32 1e-05, %v5102_v47  ;;  %v5103_v50 = vsub.f32 %v9230_v30, %v9539_v25  ;;  %v5104_v15 = vsub.f32 %v9266_v6, %v9539_v25  ;;  %v5105_v44 = vsub.f32 %v9242_v13, %v9539_v25 }
 0x246   : > { %v5106_v20 = vsub.f32 %v9248_v46, %v9539_v25  ;;  %v5107_v34 = vsub.f32 %v9283_v35, %v9539_v25  ;;  %v5108_v17 = vsub.f32 %v9308_v58, %v9539_v25  ;;  %v5109_v1 = vsub.f32 %v9290_v0, %v9539_v25 }
 0x247   : > { %6704 = vrsqrt.f32 %v5135_v31  ;;  %v5110_v30 = vsub.f32 %v9298_v8, %v9539_v25  ;;  %v5111_v6 = vsub.f32 %v9319_v39, %v9539_v25  ;;  %v5113_v13 = vsub.f32 %v9325_v40, %v9539_v25 }
 0x248   : > { %v5114_v46 = vsub.f32 %v9334_v38, %v9539_v25 }
 0x254   : > { %v6705_v48 = vpop.eup %6704 }
 0x255   : > { %v9607_v35 = vmul.f32 %v6705_v48, %v5103_v50  ;;  %v9609_v42 = vmul.f32 %v6705_v48, %v5104_v15  ;;  %v9611_v58 = vmul.f32 %v6705_v48, %v5105_v44  ;;  %v9613_v0 = vmul.f32 %v6705_v48, %v5106_v20 }
 0x256   : > { %v9615_v26 = vmul.f32 %v6705_v48, %v5107_v34  ;;  %v9617_v8 = vmul.f32 %v6705_v48, %v5108_v17  ;;  %v9619_v23 = vmul.f32 %v6705_v48, %v5109_v1  ;;  %v9621_v39 = vmul.f32 %v6705_v48, %v5110_v30 }
 0x257   : > { %v9623_v40 = vmul.f32 %v6705_v48, %v5111_v6  ;;  %v9625_v11 = vmul.f32 %v6705_v48, %v5112_v62  ;;  %v9627_v38 = vmul.f32 %v6705_v48, %v5113_v13  ;;  %v9629_v49 = vmul.f32 %v6705_v48, %v5114_v46 }
 0x258   : > { %v9631_v2 = vmul.f32 %v6705_v48, %v5115_v22  ;;  %v9633_v51 = vmul.f32 %v6705_v48, %v5116_v16  ;;  %v9635_v24 = vmul.f32 %v6705_v48, %v5117_v60  ;;  %v9637_v56 = vmul.f32 %v6705_v48, %v5118_v43 }
 0x259   : > { %v9639_v63 = vmul.f32 %v6705_v48, %v5119_v55  ;;  %v9641_v3 = vmul.f32 %v6705_v48, %v5120_v18  ;;  %v9643_v29 = vmul.f32 %v6705_v48, %v5121_v4  ;;  %v9645_v9 = vmul.f32 %v6705_v48, %v5122_v19 }
 0x25a   : > { %v9647_v12 = vmul.f32 %v6705_v48, %v5123_v52  ;;  %v9649_v33 = vmul.f32 %v6705_v48, %v5124_v61  ;;  %v9651_v32 = vmul.f32 %v6705_v48, %v5125_v53  ;;  %v9653_v14 = vmul.f32 %v6705_v48, %v5126_v37 }
 0x25b   : > { %v9655_v7 = vmul.f32 %v6705_v48, %v5127_v21  ;;  %v9657_v25 = vmul.f32 %v6705_v48, %v5128_v10  ;;  %v9659_v59 = vmul.f32 %v6705_v48, %v5129_v27  ;;  %v9661_v41 = vmul.f32 %v6705_v48, %v5130_v45 }
 0x25c   : > { %v9663_v54 = vmul.f32 %v6705_v48, %v5131_v36  ;;  %v9665_v47 = vmul.f32 %v6705_v48, %v5132_v5  ;;  %v9667_v62 = vmul.f32 %v6705_v48, %v5133_v57  ;;  %v9669_v22 = vmul.f32 %v6705_v48, %v5134_v28 }
 0x25d   : > { %v5169_v16 = vmax.f32 %v9607_v35, 0.0  ;;  %v5170_v60 = vmax.f32 %v9609_v42, 0.0  ;;  %v5171_v43 = vmax.f32 %v9611_v58, 0.0  ;;  %v5172_v55 = vmax.f32 %v9613_v0, 0.0 }
 0x25e   : > { %v5173_v18 = vmax.f32 %v9615_v26, 0.0  ;;  %v5174_v4 = vmax.f32 %v9617_v8, 0.0  ;;  %v5175_v19 = vmax.f32 %v9619_v23, 0.0  ;;  %v5176_v52 = vmax.f32 %v9621_v39, 0.0 }
 0x25f   : > { %v5177_v61 = vmax.f32 %v9623_v40, 0.0  ;;  %v5178_v53 = vmax.f32 %v9625_v11, 0.0  ;;  %v5179_v37 = vmax.f32 %v9627_v38, 0.0  ;;  %v5180_v21 = vmax.f32 %v9629_v49, 0.0 }
 0x260   : > { %v5181_v10 = vmax.f32 %v9631_v2, 0.0  ;;  %v5182_v27 = vmax.f32 %v9633_v51, 0.0  ;;  %v5183_v45 = vmax.f32 %v9635_v24, 0.0  ;;  %v5184_v36 = vmax.f32 %v9637_v56, 0.0 }
 0x261   : > { %v5185_v5 = vmax.f32 %v9639_v63, 0.0  ;;  %v5186_v57 = vmax.f32 %v9641_v3, 0.0  ;;  %v5187_v28 = vmax.f32 %v9643_v29, 0.0  ;;  %v5188_v31 = vmax.f32 %v9645_v9, 0.0 }
 0x262   : > { %v5189_v50 = vmax.f32 %v9647_v12, 0.0  ;;  %v5190_v15 = vmax.f32 %v9649_v33, 0.0  ;;  %v5191_v44 = vmax.f32 %v9651_v32, 0.0  ;;  %v5192_v20 = vmax.f32 %v9653_v14, 0.0 }
 0x263   : > { %v5193_v34 = vmax.f32 %v9655_v7, 0.0  ;;  %v5194_v17 = vmax.f32 %v9657_v25, 0.0  ;;  %v5195_v1 = vmax.f32 %v9659_v59, 0.0  ;;  %v5196_v48 = vmax.f32 %v9661_v41, 0.0 }
 0x264   : > { %v5197_v30 = vmax.f32 %v9663_v54, 0.0  ;;  %v5198_v6 = vmax.f32 %v9665_v47, 0.0  ;;  %v5199_v13 = vmax.f32 %v9667_v62, 0.0  ;;  %v5200_v46 = vmax.f32 %v9669_v22, 0.0 }
 0x265   : > { %v6091_v35 = vpack.c.bf16 %v5169_v16, %v5169_v16  ;;  %v6092_v42 = vpack.c.bf16 %v5170_v60, %v5170_v60  ;;  %v6093_v58 = vpack.c.bf16 %v5171_v43, %v5171_v43  ;;  %v6094_v0 = vpack.c.bf16 %v5172_v55, %v5172_v55 }
 0x266   : > { %v6095_v26 = vpack.c.bf16 %v5173_v18, %v5173_v18  ;;  %v6096_v8 = vpack.c.bf16 %v5174_v4, %v5174_v4  ;;  %v6097_v23 = vpack.c.bf16 %v5175_v19, %v5175_v19  ;;  %v6098_v39 = vpack.c.bf16 %v5176_v52, %v5176_v52 }
 0x267   : > { %v6099_v40 = vpack.c.bf16 %v5177_v61, %v5177_v61  ;;  %v6100_v11 = vpack.c.bf16 %v5178_v53, %v5178_v53  ;;  %v6101_v38 = vpack.c.bf16 %v5179_v37, %v5179_v37  ;;  %v6102_v49 = vpack.c.bf16 %v5180_v21, %v5180_v21  ;;  %5330 = vst.msk [vmem:[%s9703_s10] sm:$0xf] %vm5329_vm7, %v6091_v35 }
 0x268   : > { %5331 = vst.msk [vmem:[%s9703_s10 + $0x4] sm:$0xf] %vm5329_vm7, %v6092_v42  ;;  %5332 = vst.msk [vmem:[%s9703_s10 + $0x8] sm:$0xf] %vm5329_vm7, %v6093_v58  ;;  %v6103_v2 = vpack.c.bf16 %v5181_v10, %v5181_v10  ;;  %v6104_v51 = vpack.c.bf16 %v5182_v27, %v5182_v27  ;;  %v6105_v24 = vpack.c.bf16 %v5183_v45, %v5183_v45 }
 0x269   : > { %5333 = vst.msk [vmem:[%s9703_s10 + $0xc] sm:$0xf] %vm5329_vm7, %v6094_v0  ;;  %v6106_v56 = vpack.c.bf16 %v5184_v36, %v5184_v36  ;;  %5334 = vst.msk [vmem:[%s9703_s10 + $0x10] sm:$0xf] %vm5329_vm7, %v6095_v26  ;;  %v6107_v63 = vpack.c.bf16 %v5185_v5, %v5185_v5  ;;  %v6108_v3 = vpack.c.bf16 %v5186_v57, %v5186_v57 }
 0x26a   : > { %5335 = vst.msk [vmem:[%s9703_s10 + $0x14] sm:$0xf] %vm5329_vm7, %v6096_v8  ;;  %5336 = vst.msk [vmem:[%s9703_s10 + $0x18] sm:$0xf] %vm5329_vm7, %v6097_v23  ;;  %v6109_v29 = vpack.c.bf16 %v5187_v28, %v5187_v28  ;;  %v6110_v9 = vpack.c.bf16 %v5188_v31, %v5188_v31  ;;  %v6111_v12 = vpack.c.bf16 %v5189_v50, %v5189_v50 }
 0x26b   : > { %5337 = vst.msk [vmem:[%s9703_s10 + $0x1c] sm:$0xf] %vm5329_vm7, %v6098_v39  ;;  %5338 = vst.msk [vmem:[%s9703_s10 + $0x20] sm:$0xf] %vm5329_vm7, %v6099_v40  ;;  %v6112_v33 = vpack.c.bf16 %v5190_v15, %v5190_v15  ;;  %v6113_v32 = vpack.c.bf16 %v5191_v44, %v5191_v44  ;;  %v6114_v14 = vpack.c.bf16 %v5192_v20, %v5192_v20 }
 0x26c   : > { %5339 = vst.msk [vmem:[%s9703_s10 + $0x24] sm:$0xf] %vm5329_vm7, %v6100_v11  ;;  %5340 = vst.msk [vmem:[%s9703_s10 + $0x28] sm:$0xf] %vm5329_vm7, %v6101_v38  ;;  %v6115_v7 = vpack.c.bf16 %v5193_v34, %v5193_v34  ;;  %v6116_v25 = vpack.c.bf16 %v5194_v17, %v5194_v17  ;;  %v6117_v59 = vpack.c.bf16 %v5195_v1, %v5195_v1 }
 0x26d   : > { %5341 = vst.msk [vmem:[%s9703_s10 + $0x2c] sm:$0xf] %vm5329_vm7, %v6102_v49  ;;  %5342 = vst.msk [vmem:[%s9703_s10 + $0x30] sm:$0xf] %vm5329_vm7, %v6103_v2  ;;  %v6118_v41 = vpack.c.bf16 %v5196_v48, %v5196_v48  ;;  %v6119_v54 = vpack.c.bf16 %v5197_v30, %v5197_v30  ;;  %v6120_v47 = vpack.c.bf16 %v5198_v6, %v5198_v6 }
 0x26e   : > { %5343 = vst.msk [vmem:[%s9703_s10 + $0x34] sm:$0xf] %vm5329_vm7, %v6104_v51  ;;  %5344 = vst.msk [vmem:[%s9703_s10 + $0x38] sm:$0xf] %vm5329_vm7, %v6105_v24  ;;  %v6121_v62 = vpack.c.bf16 %v5199_v13, %v5199_v13  ;;  %v6122_v22 = vpack.c.bf16 %v5200_v46, %v5200_v46 }
 0x26f   : > { %5345 = vst.msk [vmem:[%s9703_s10 + $0x3c] sm:$0xf] %vm5329_vm7, %v6106_v56  ;;  %5346 = vst.msk [vmem:[%s9703_s10 + $0x40] sm:$0xf] %vm5329_vm7, %v6107_v63 }
 0x270   : > { %5347 = vst.msk [vmem:[%s9703_s10 + $0x44] sm:$0xf] %vm5329_vm7, %v6108_v3  ;;  %5348 = vst.msk [vmem:[%s9703_s10 + $0x48] sm:$0xf] %vm5329_vm7, %v6109_v29 }
 0x271   : > { %5349 = vst.msk [vmem:[%s9703_s10 + $0x4c] sm:$0xf] %vm5329_vm7, %v6110_v9  ;;  %5350 = vst.msk [vmem:[%s9703_s10 + $0x50] sm:$0xf] %vm5329_vm7, %v6111_v12 }
 0x272   : > { %5351 = vst.msk [vmem:[%s9703_s10 + $0x54] sm:$0xf] %vm5329_vm7, %v6112_v33  ;;  %5352 = vst.msk [vmem:[%s9703_s10 + $0x58] sm:$0xf] %vm5329_vm7, %v6113_v32 }
 0x273   : > { %5353 = vst.msk [vmem:[%s9703_s10 + $0x5c] sm:$0xf] %vm5329_vm7, %v6114_v14  ;;  %5354 = vst.msk [vmem:[%s9703_s10 + $0x60] sm:$0xf] %vm5329_vm7, %v6115_v7 }
 0x274   : > { %5355 = vst.msk [vmem:[%s9703_s10 + $0x64] sm:$0xf] %vm5329_vm7, %v6116_v25  ;;  %5356 = vst.msk [vmem:[%s9703_s10 + $0x68] sm:$0xf] %vm5329_vm7, %v6117_v59 }
 0x275   : > { %5357 = vst.msk [vmem:[%s9703_s10 + $0x6c] sm:$0xf] %vm5329_vm7, %v6118_v41  ;;  %5358 = vst.msk [vmem:[%s9703_s10 + $0x70] sm:$0xf] %vm5329_vm7, %v6119_v54 }
 0x276   : > { %5359 = vst.msk [vmem:[%s9703_s10 + $0x74] sm:$0xf] %vm5329_vm7, %v6120_v47  ;;  %5360 = vst.msk [vmem:[%s9703_s10 + $0x78] sm:$0xf] %vm5329_vm7, %v6121_v62 }
 0x277   : > { %5361 = vst.msk [vmem:[%s9703_s10 + $0x7c] sm:$0xf] %vm5329_vm7, %v6122_v22 }
 0x278 PF: > { %s13_s14 = sadd.s32 1, %s6732_s14   ;;  %s9968_s12 = smov %s6728_s13 }
 0x279   : > { %p10_p5 = scmp.ge.s32.totalorder %s13_s14, 4   ;;  %s9969_s13 = smov %s9971_s15 }
 0x27b   :  { %12 = sbr.rel (!%p10_p5) target bundleno = 2 (0x2), region = 78 }

</bundles_post_ra>
